<compile_context>
chip_gen: v5e
topology: v5e:2x2
jax: 0.10.0
libtpu: 0.0.40
codegen_flags: <defaults>
</compile_context>

<pallas_src>
import functools

import jax
import jax.numpy as jnp
import numpy as np
from jax.experimental import pallas as pl
from jax.experimental.pallas import tpu as pltpu

SAMPLE_SIZE = 100
NUM_CLASSES = 12
COND_K = 16            # one-hot contraction dim padded 12 -> 16
ALPHA = 0.2
EPS = 1e-5
K = 5                  # conv-transpose kernel size
STRIDE = 2
PAD = 2

# Fixed geometry of the module
H1, W1, C1 = 7, 7, 16        # reshape(16, 7, 7)
H2, W2, C2 = 14, 14, 32      # after conv1
H3, W3, C3 = 28, 28, 1       # after conv2
LANE1 = W1 * C1              # 112 used lanes of a conv1-input h-row (w*16 + c)
LANE1P = 128                 # padded to one full lane tile
FRONT_N = H1 * LANE1P        # 896 = padded Linear / BN1d feature width
LANE2 = W2 * C2              # 448 used lanes of conv1 output (x*32 + c)
LANE2P = 512                 # padded slab width (multiple of 128)
LANE3 = W3 * C3              # 28 used lanes of conv2 output
LANE3P = 128                 # padded slab width


# ---------------------------------------------------------------------------
# The single fused kernel
# ---------------------------------------------------------------------------

def _generator_kernel(onehot_ref, z_ref,
                      wc_ref, bc_ref, gc_ref, bec_ref,
                      wf_ref, bf_ref, gf_ref, bef_ref,
                      rw1_ref, g1t_ref, b1t_ref,
                      rw2_ref, gsum_ref, gbcast_ref,
                      out_ref,
                      acc1_ref,
                      *, alpha, b_true):
    b_pad = z_ref.shape[0]
    f32 = jnp.float32

    def leaky(v):
        return jnp.where(v >= 0.0, v, alpha * v)

    # Row mask: padded batch rows are excluded from BN stats and zeroed before
    # the convolutions (conv has no bias, so zero rows stay zero).
    row_ids = jax.lax.broadcasted_iota(jnp.int32, (b_pad, 1), 0)
    row_mask = (row_ids < b_true).astype(f32)
    inv_b = 1.0 / float(b_true)

    def bn_batch(y, gamma, beta):
        # one-pass training-mode batch norm (biased variance), true-batch count
        ym = y * row_mask
        s = jnp.sum(ym, axis=0, keepdims=True)
        ss = jnp.sum(ym * y, axis=0, keepdims=True)
        mean = s * inv_b
        var = jnp.maximum(ss * inv_b - mean * mean, 0.0)
        return (y - mean) * jax.lax.rsqrt(var + EPS) * gamma + beta

    # ---- condition branch: one_hot(labels) @ Wc  (bf16 MXU matmul) -----------
    c_lin = jnp.dot(onehot_ref[...], wc_ref[...],
                    preferred_element_type=f32) + bc_ref[...]
    c_act = leaky(bn_batch(c_lin, gc_ref[...], bec_ref[...]))

    # ---- noise branch: Linear (bf16 MXU, f32 accumulate) + BN1d + LeakyReLU --
    x_lin = jnp.dot(z_ref[...].astype(jnp.bfloat16), wf_ref[...],
                    preferred_element_type=f32) + bf_ref[...]
    x_act = leaky(bn_batch(x_lin, gf_ref[...], bef_ref[...]))

    # Features are pre-permuted so lane = h*128 + w*16 + c (16 pad lanes per h)
    h0 = (x_act + c_act) * row_mask                       # (b_pad, 896)

    # ---- relayout to conv1 LHS: rows = (h, batch), lanes = w*16+c (aligned) --
    x1 = jnp.concatenate(
        [h0[:, LANE1P * h:LANE1P * (h + 1)] for h in range(H1)],
        axis=0).astype(jnp.bfloat16)                      # (7*b_pad, 128)

    # ---- ConvT1 (16->32, k5 s2 p2 op1): width-unrolled matmul + row taps -----
    t1 = jnp.dot(x1, rw1_ref[...], preferred_element_type=f32)   # (7b, 5*512)
    for y in range(H2):                                   # output row y = 2r - 2 + kh
        slab = None
        for r in range(H1):
            kh = y + PAD - STRIDE * r
            if 0 <= kh < K:
                term = t1[r * b_pad:(r + 1) * b_pad,
                          kh * LANE2P:(kh + 1) * LANE2P]
                slab = term if slab is None else slab + term
        acc1_ref[y * b_pad:(y + 1) * b_pad, :] = slab     # rows=(y,b), lanes=x*32+c

    # ---- BatchNorm2d(32): per-channel stats via MXU group-sum ----------------
    y1 = acc1_ref[...]                                    # (14*b_pad, 512) f32
    n1 = float(b_true * H2 * W2)
    s1 = jnp.sum(y1, axis=0, keepdims=True)               # (1, 512)
    q1 = jnp.sum(y1 * y1, axis=0, keepdims=True)
    s_ch = jnp.dot(s1, gsum_ref[...], preferred_element_type=f32)   # (1, 32)
    q_ch = jnp.dot(q1, gsum_ref[...], preferred_element_type=f32)
    mean_ch = s_ch * (1.0 / n1)
    var_ch = jnp.maximum(q_ch * (1.0 / n1) - mean_ch * mean_ch, 0.0)
    rstd_ch = jax.lax.rsqrt(var_ch + EPS)
    mean_l = jnp.dot(mean_ch, gbcast_ref[...], preferred_element_type=f32)  # (1,512)
    rstd_l = jnp.dot(rstd_ch, gbcast_ref[...], preferred_element_type=f32)
    scale = rstd_l * g1t_ref[...]
    shift = b1t_ref[...] - mean_l * scale
    x2 = leaky(y1 * scale + shift).astype(jnp.bfloat16)   # (14*b_pad, 512)

    # ---- ConvT2 (32->1): width-unrolled matmul + row taps + stable sigmoid ---
    t2 = jnp.dot(x2, rw2_ref[...], preferred_element_type=f32)   # (14b, 5*128)
    for y in range(H3):
        slab = None
        for r in range(H2):
            kh = y + PAD - STRIDE * r
            if 0 <= kh < K:
                term = t2[r * b_pad:(r + 1) * b_pad,
                          kh * LANE3P:(kh + 1) * LANE3P]
                slab = term if slab is None else slab + term
        e = jnp.exp(-jnp.abs(slab))                       # overflow-safe sigmoid
        num = jnp.where(slab >= 0.0, 1.0, e)
        sig = num * pl.reciprocal(1.0 + e, approx=True)   # EUP reciprocal
        out_ref[y] = jnp.clip(sig, 0.0, 1.0)              # lane-dense (b_pad,128) store


# ---------------------------------------------------------------------------
# Wrapper
# ---------------------------------------------------------------------------

def generator_forward(pparams, labels, z, alpha=ALPHA):
    b_true = z.shape[0]
    b_pad = max(8, ((b_true + 7) // 8) * 8)     # sublane-aligned batch

    # pad batch (padded rows masked in-kernel before BN stats / conv)
    z_p = jnp.zeros((b_pad, SAMPLE_SIZE), jnp.float32).at[:b_true].set(
        z.astype(jnp.float32))
    oh = jax.nn.one_hot(labels.astype(jnp.int32), NUM_CLASSES, dtype=jnp.float32)
    onehot = jnp.zeros((b_pad, COND_K), jnp.float32).at[:b_true, :NUM_CLASSES] \
                .set(oh).astype(jnp.bfloat16)

    flops = (2 * b_pad * (COND_K + SAMPLE_SIZE) * FRONT_N
             + 2 * (H1 * b_pad) * LANE1P * (K * LANE2P)
             + 2 * (H2 * b_pad) * LANE2P * (K * LANE3P)
             + 4 * LANE2P * C2)
    bytes_accessed = (4 * b_pad * SAMPLE_SIZE + 2 * b_pad * COND_K
                      + 2 * COND_K * FRONT_N + 2 * SAMPLE_SIZE * FRONT_N
                      + 6 * 4 * FRONT_N
                      + 2 * LANE1P * K * LANE2P + 2 * LANE2P * K * LANE3P
                      + 4 * (2 * LANE2P + 2 * LANE2P * C2)
                      + 4 * H3 * b_pad * LANE3P)

    out = pl.pallas_call(
        functools.partial(_generator_kernel, alpha=alpha, b_true=b_true),
        out_shape=jax.ShapeDtypeStruct((H3, b_pad, LANE3P), jnp.float32),
        in_specs=[pl.BlockSpec(memory_space=pltpu.MemorySpace.VMEM)] * 16,
        out_specs=pl.BlockSpec(memory_space=pltpu.MemorySpace.VMEM),
        scratch_shapes=[pltpu.VMEM((H2 * b_pad, LANE2P), jnp.float32)],
        cost_estimate=pl.CostEstimate(flops=flops,
                                      transcendentals=b_pad * H3 * LANE3P,
                                      bytes_accessed=bytes_accessed),
    )(onehot, z_p,
      pparams["wc"], pparams["bc"], pparams["gc"], pparams["bec"],
      pparams["wf"], pparams["bf"], pparams["gf"], pparams["bef"],
      pparams["rw1"], pparams["g1t"], pparams["b1t"],
      pparams["rw2"], pparams["gsum"], pparams["gbcast"])

    # kernel layout (y, b_pad, x_pad) -> NCHW (B, 1, 28, 28)
    return (jnp.transpose(out, (1, 0, 2))[:b_true, :, :W3]
            .reshape(b_true, 1, H3, W3))


# ---------------------------------------------------------------------------
# One-time parameter preprocessing (layout plumbing, done outside jit)
# ---------------------------------------------------------------------------

def _front_dst():
    """dst[j] = padded kernel lane (h*128 + w*16 + c) of PyTorch feature j,
    where the 784-vector reshapes to (16,7,7), i.e. j = c*49 + h*7 + w."""
    j = np.arange(H1 * W1 * C1)
    c = j // (H1 * W1)
    h = (j // W1) % H1
    w = j % W1
    return h * LANE1P + w * C1 + c


def _width_unrolled(w, w_in, w_out, k_pad, slab_pad):
    """PyTorch ConvTranspose2d weight (Cin, Cout, K, K) -> padded matrix
    M[s*Cin+ci, kh*slab_pad + x*Cout + co] = w[ci, co, kh, x - 2*s + 2]
    (zero where the tap is out of range), zero-padded to (k_pad, K*slab_pad)
    so every kh slab and the contraction dim are 128-lane aligned."""
    w = np.asarray(w, np.float32)
    cin, cout = w.shape[0], w.shape[1]
    s = np.arange(w_in)[:, None]
    x = np.arange(w_out)[None, :]
    kw = x - STRIDE * s + PAD                       # (w_in, w_out)
    valid = ((kw >= 0) & (kw < K)).astype(np.float32)
    kw_c = np.clip(kw, 0, K - 1)
    r = w[:, :, :, kw_c] * valid[None, None, None]  # (cin, cout, K, w_in, w_out)
    r = np.transpose(r, (3, 0, 2, 4, 1))            # (w_in, cin, K, w_out, cout)
    base = r.reshape(w_in * cin, K, w_out * cout)
    mat = np.zeros((k_pad, K * slab_pad), np.float32)
    for kh in range(K):
        mat[:w_in * cin, kh * slab_pad:kh * slab_pad + w_out * cout] = base[:, kh, :]
    return mat


def preprocess_params(p):
    """One-time transformation of PyTorch-layout params into padded kernel
    layouts. (When loading a real checkpoint, feed the PyTorch tensors in.)"""
    dst = _front_dst()

    def front(w_t, bias, g, beta):
        # nn.Linear stores (out, in) and computes x @ W.T; scatter out-features
        # into the padded (h*128 + w*16 + c) lane layout, pad lanes = 0.
        w_t = np.asarray(w_t, np.float32)
        wk = np.zeros((w_t.shape[1], FRONT_N), np.float32)
        wk[:, dst] = w_t.T

        def vec(v):
            o = np.zeros((1, FRONT_N), np.float32)
            o[0, dst] = np.asarray(v, np.float32)
            return jnp.asarray(o)

        return wk, vec(bias), vec(g), vec(beta)

    wc, bc, gc, bec = front(p["cond_w"], p["cond_b"], p["cond_bn_g"], p["cond_bn_b"])
    wf, bf, gf, bef = front(p["fc_w"], p["fc_b"], p["fc_bn_g"], p["fc_bn_b"])

    wc_p = np.zeros((COND_K, FRONT_N), np.float32)   # pad one-hot K 12 -> 16
    wc_p[:NUM_CLASSES] = wc

    gsum = np.zeros((LANE2P, C2), np.float32)        # lane -> channel group sum
    lanes = np.arange(LANE2)
    gsum[lanes, lanes % C2] = 1.0

    g1t = np.zeros((1, LANE2P), np.float32)
    b1t = np.zeros((1, LANE2P), np.float32)
    g1t[0, :LANE2] = np.tile(np.asarray(p["bn1_g"], np.float32), W2)
    b1t[0, :LANE2] = np.tile(np.asarray(p["bn1_b"], np.float32), W2)

    return {
        "wc": jnp.asarray(wc_p, jnp.bfloat16),
        "bc": bc, "gc": gc, "bec": bec,
        "wf": jnp.asarray(wf, jnp.bfloat16),
        "bf": bf, "gf": gf, "bef": bef,
        "rw1": jnp.asarray(_width_unrolled(p["conv1_w"], W1, W2, LANE1P, LANE2P),
                           jnp.bfloat16),
        "rw2": jnp.asarray(_width_unrolled(p["conv2_w"], W2, W3, LANE2P, LANE3P),
                           jnp.bfloat16),
        "g1t": jnp.asarray(g1t), "b1t": jnp.asarray(b1t),
        "gsum": jnp.asarray(gsum),           # (512, 32)
        "gbcast": jnp.asarray(gsum.T),       # (32, 512)
    }


def init_params(key):
    """Random params in PyTorch layouts (Linear: (out,in); ConvT: (Cin,Cout,K,K))."""
    ks = jax.random.split(key, 12)
    n = lambda k, shape, s=0.05: s * jax.random.normal(k, shape, jnp.float32)
    return {
        "cond_w": n(ks[0], (784, NUM_CLASSES)),
        "cond_b": n(ks[1], (784,)),
        "cond_bn_g": 1.0 + 0.1 * jax.random.normal(ks[2], (784,), jnp.float32),
        "cond_bn_b": n(ks[3], (784,)),
        "fc_w": n(ks[4], (784, SAMPLE_SIZE)),
        "fc_b": n(ks[5], (784,)),
        "fc_bn_g": 1.0 + 0.1 * jax.random.normal(ks[6], (784,), jnp.float32),
        "fc_bn_b": n(ks[7], (784,)),
        "conv1_w": n(ks[8], (C1, C2, K, K)),
        "bn1_g": 1.0 + 0.1 * jax.random.normal(ks[9], (C2,), jnp.float32),
        "bn1_b": n(ks[10], (C2,)),
        "conv2_w": n(ks[11], (C2, C3, K, K)),
    }


if __name__ == "__main__":
    key = jax.random.PRNGKey(0)
    k_labels, k_z, k_params = jax.random.split(key, 3)

    B = 4
    labels = jax.random.randint(k_labels, (B,), 0, NUM_CLASSES)
    # The PyTorch forward draws z = torch.randn(B, sample_size) internally;
    # here z is an explicit deterministic input for reproducibility.
    z = jax.random.normal(k_z, (B, SAMPLE_SIZE), dtype=jnp.float32)

    params = init_params(k_params)
    pparams = preprocess_params(params)      # one-time layout transformation

    out = jax.jit(generator_forward)(pparams, labels, z)
    out = jax.block_until_ready(out)

    assert out.shape == (B, 1, 28, 28), out.shape
    assert bool(jnp.all(jnp.isfinite(out)))
    assert bool(jnp.all((out >= 0.0) & (out <= 1.0)))   # sigmoid output range
    print("KERNEL_OK")
</pallas_src>

<mosaic_0001>
module attributes {stable_mosaic.version = 11 : i64} {
  func.func @_generator_kernel(%arg0: memref<8x16xbf16, #tpu.memory_space<vmem>>, %arg1: memref<8x100xf32, #tpu.memory_space<vmem>>, %arg2: memref<16x896xbf16, #tpu.memory_space<vmem>>, %arg3: memref<1x896xf32, #tpu.memory_space<vmem>>, %arg4: memref<1x896xf32, #tpu.memory_space<vmem>>, %arg5: memref<1x896xf32, #tpu.memory_space<vmem>>, %arg6: memref<100x896xbf16, #tpu.memory_space<vmem>>, %arg7: memref<1x896xf32, #tpu.memory_space<vmem>>, %arg8: memref<1x896xf32, #tpu.memory_space<vmem>>, %arg9: memref<1x896xf32, #tpu.memory_space<vmem>>, %arg10: memref<128x2560xbf16, #tpu.memory_space<vmem>>, %arg11: memref<1x512xf32, #tpu.memory_space<vmem>>, %arg12: memref<1x512xf32, #tpu.memory_space<vmem>>, %arg13: memref<512x640xbf16, #tpu.memory_space<vmem>>, %arg14: memref<512x32xf32, #tpu.memory_space<vmem>>, %arg15: memref<32x512xf32, #tpu.memory_space<vmem>>, %arg16: memref<28x8x128xf32, #tpu.memory_space<vmem>>, %arg17: memref<112x512xf32, #tpu.memory_space<vmem>>) attributes {dimension_semantics = [], scalar_prefetch = 0 : i64, scratch_operands = 1 : i64, tpu.core_type = #tpu.core_type<tc>} {
    %0 = tpu.iota {dimensions = array<i32: 0>} : vector<8x1xi32>
    %c4_i32 = arith.constant 4 : i32
    %1 = vector.broadcast %c4_i32 : i32 to vector<8x1xi32>
    %2 = arith.cmpi slt, %0, %1 : vector<8x1xi32>
    %3 = arith.extui %2 : vector<8x1xi1> to vector<8x1xi32>
    %4 = arith.sitofp %3 : vector<8x1xi32> to vector<8x1xf32>
    %c0 = arith.constant 0 : index
    %c0_0 = arith.constant 0 : index
    %5 = vector.load %arg0[%c0, %c0_0] : memref<8x16xbf16, #tpu.memory_space<vmem>>, vector<8x16xbf16>
    %c0_1 = arith.constant 0 : index
    %c0_2 = arith.constant 0 : index
    %6 = vector.load %arg2[%c0_1, %c0_2] : memref<16x896xbf16, #tpu.memory_space<vmem>>, vector<16x896xbf16>
    %cst = arith.constant dense<0.000000e+00> : vector<8x896xf32>
    %7 = tpu.matmul %5, %6, %cst {dimension_numbers = #tpu.dot_dimension_numbers<[1], [0], [0], [1], [0, 0, 1, 1], [], []>} : vector<8x16xbf16>, vector<16x896xbf16>, vector<8x896xf32> -> vector<8x896xf32>
    %c0_3 = arith.constant 0 : index
    %c0_4 = arith.constant 0 : index
    %8 = vector.load %arg3[%c0_3, %c0_4] : memref<1x896xf32, #tpu.memory_space<vmem>>, vector<1x896xf32>
    %9 = vector.broadcast %8 : vector<1x896xf32> to vector<8x896xf32>
    %10 = arith.addf %7, %9 : vector<8x896xf32>
    %c0_5 = arith.constant 0 : index
    %c0_6 = arith.constant 0 : index
    %11 = vector.load %arg4[%c0_5, %c0_6] : memref<1x896xf32, #tpu.memory_space<vmem>>, vector<1x896xf32>
    %c0_7 = arith.constant 0 : index
    %c0_8 = arith.constant 0 : index
    %12 = vector.load %arg5[%c0_7, %c0_8] : memref<1x896xf32, #tpu.memory_space<vmem>>, vector<1x896xf32>
    %13 = vector.broadcast %4 : vector<8x1xf32> to vector<8x896xf32>
    %14 = arith.mulf %10, %13 : vector<8x896xf32>
    %cst_9 = arith.constant dense<0.000000e+00> : vector<896xf32>
    %15 = vector.multi_reduction <add>, %14, %cst_9 [0] : vector<8x896xf32> to vector<896xf32>
    %16 = vector.shape_cast %15 : vector<896xf32> to vector<1x896xf32>
    %17 = arith.mulf %14, %10 : vector<8x896xf32>
    %cst_10 = arith.constant dense<0.000000e+00> : vector<896xf32>
    %18 = vector.multi_reduction <add>, %17, %cst_10 [0] : vector<8x896xf32> to vector<896xf32>
    %19 = vector.shape_cast %18 : vector<896xf32> to vector<1x896xf32>
    %cst_11 = arith.constant 2.500000e-01 : f32
    %20 = vector.broadcast %cst_11 : f32 to vector<1x896xf32>
    %21 = arith.mulf %16, %20 : vector<1x896xf32>
    %cst_12 = arith.constant 2.500000e-01 : f32
    %22 = vector.broadcast %cst_12 : f32 to vector<1x896xf32>
    %23 = arith.mulf %19, %22 : vector<1x896xf32>
    %24 = arith.mulf %21, %21 : vector<1x896xf32>
    %25 = arith.subf %23, %24 : vector<1x896xf32>
    %cst_13 = arith.constant 0.000000e+00 : f32
    %26 = vector.broadcast %cst_13 : f32 to vector<1x896xf32>
    %27 = arith.maximumf %25, %26 : vector<1x896xf32>
    %28 = vector.broadcast %21 : vector<1x896xf32> to vector<8x896xf32>
    %29 = arith.subf %10, %28 : vector<8x896xf32>
    %cst_14 = arith.constant 9.99999974E-6 : f32
    %30 = vector.broadcast %cst_14 : f32 to vector<1x896xf32>
    %31 = arith.addf %27, %30 : vector<1x896xf32>
    %32 = math.rsqrt %31 : vector<1x896xf32>
    %33 = vector.broadcast %32 : vector<1x896xf32> to vector<8x896xf32>
    %34 = arith.mulf %29, %33 : vector<8x896xf32>
    %35 = vector.broadcast %11 : vector<1x896xf32> to vector<8x896xf32>
    %36 = arith.mulf %34, %35 : vector<8x896xf32>
    %37 = vector.broadcast %12 : vector<1x896xf32> to vector<8x896xf32>
    %38 = arith.addf %36, %37 : vector<8x896xf32>
    %cst_15 = arith.constant 0.000000e+00 : f32
    %39 = vector.broadcast %cst_15 : f32 to vector<8x896xf32>
    %40 = arith.cmpf oge, %38, %39 : vector<8x896xf32>
    %cst_16 = arith.constant 2.000000e-01 : f32
    %41 = vector.broadcast %cst_16 : f32 to vector<8x896xf32>
    %42 = arith.mulf %41, %38 : vector<8x896xf32>
    %43 = arith.select %40, %38, %42 : vector<8x896xi1>, vector<8x896xf32>
    %c0_17 = arith.constant 0 : index
    %c0_18 = arith.constant 0 : index
    %44 = vector.load %arg1[%c0_17, %c0_18] : memref<8x100xf32, #tpu.memory_space<vmem>>, vector<8x100xf32>
    %45 = arith.truncf %44 : vector<8x100xf32> to vector<8x100xbf16>
    %c0_19 = arith.constant 0 : index
    %c0_20 = arith.constant 0 : index
    %46 = vector.load %arg6[%c0_19, %c0_20] : memref<100x896xbf16, #tpu.memory_space<vmem>>, vector<100x896xbf16>
    %cst_21 = arith.constant dense<0.000000e+00> : vector<8x896xf32>
    %47 = tpu.matmul %45, %46, %cst_21 {dimension_numbers = #tpu.dot_dimension_numbers<[1], [0], [0], [1], [0, 0, 1, 1], [], []>} : vector<8x100xbf16>, vector<100x896xbf16>, vector<8x896xf32> -> vector<8x896xf32>
    %c0_22 = arith.constant 0 : index
    %c0_23 = arith.constant 0 : index
    %48 = vector.load %arg7[%c0_22, %c0_23] : memref<1x896xf32, #tpu.memory_space<vmem>>, vector<1x896xf32>
    %49 = vector.broadcast %48 : vector<1x896xf32> to vector<8x896xf32>
    %50 = arith.addf %47, %49 : vector<8x896xf32>
    %c0_24 = arith.constant 0 : index
    %c0_25 = arith.constant 0 : index
    %51 = vector.load %arg8[%c0_24, %c0_25] : memref<1x896xf32, #tpu.memory_space<vmem>>, vector<1x896xf32>
    %c0_26 = arith.constant 0 : index
    %c0_27 = arith.constant 0 : index
    %52 = vector.load %arg9[%c0_26, %c0_27] : memref<1x896xf32, #tpu.memory_space<vmem>>, vector<1x896xf32>
    %53 = vector.broadcast %4 : vector<8x1xf32> to vector<8x896xf32>
    %54 = arith.mulf %50, %53 : vector<8x896xf32>
    %cst_28 = arith.constant dense<0.000000e+00> : vector<896xf32>
    %55 = vector.multi_reduction <add>, %54, %cst_28 [0] : vector<8x896xf32> to vector<896xf32>
    %56 = vector.shape_cast %55 : vector<896xf32> to vector<1x896xf32>
    %57 = arith.mulf %54, %50 : vector<8x896xf32>
    %cst_29 = arith.constant dense<0.000000e+00> : vector<896xf32>
    %58 = vector.multi_reduction <add>, %57, %cst_29 [0] : vector<8x896xf32> to vector<896xf32>
    %59 = vector.shape_cast %58 : vector<896xf32> to vector<1x896xf32>
    %cst_30 = arith.constant 2.500000e-01 : f32
    %60 = vector.broadcast %cst_30 : f32 to vector<1x896xf32>
    %61 = arith.mulf %56, %60 : vector<1x896xf32>
    %cst_31 = arith.constant 2.500000e-01 : f32
    %62 = vector.broadcast %cst_31 : f32 to vector<1x896xf32>
    %63 = arith.mulf %59, %62 : vector<1x896xf32>
    %64 = arith.mulf %61, %61 : vector<1x896xf32>
    %65 = arith.subf %63, %64 : vector<1x896xf32>
    %cst_32 = arith.constant 0.000000e+00 : f32
    %66 = vector.broadcast %cst_32 : f32 to vector<1x896xf32>
    %67 = arith.maximumf %65, %66 : vector<1x896xf32>
    %68 = vector.broadcast %61 : vector<1x896xf32> to vector<8x896xf32>
    %69 = arith.subf %50, %68 : vector<8x896xf32>
    %cst_33 = arith.constant 9.99999974E-6 : f32
    %70 = vector.broadcast %cst_33 : f32 to vector<1x896xf32>
    %71 = arith.addf %67, %70 : vector<1x896xf32>
    %72 = math.rsqrt %71 : vector<1x896xf32>
    %73 = vector.broadcast %72 : vector<1x896xf32> to vector<8x896xf32>
    %74 = arith.mulf %69, %73 : vector<8x896xf32>
    %75 = vector.broadcast %51 : vector<1x896xf32> to vector<8x896xf32>
    %76 = arith.mulf %74, %75 : vector<8x896xf32>
    %77 = vector.broadcast %52 : vector<1x896xf32> to vector<8x896xf32>
    %78 = arith.addf %76, %77 : vector<8x896xf32>
    %cst_34 = arith.constant 0.000000e+00 : f32
    %79 = vector.broadcast %cst_34 : f32 to vector<8x896xf32>
    %80 = arith.cmpf oge, %78, %79 : vector<8x896xf32>
    %cst_35 = arith.constant 2.000000e-01 : f32
    %81 = vector.broadcast %cst_35 : f32 to vector<8x896xf32>
    %82 = arith.mulf %81, %78 : vector<8x896xf32>
    %83 = arith.select %80, %78, %82 : vector<8x896xi1>, vector<8x896xf32>
    %84 = arith.addf %83, %43 : vector<8x896xf32>
    %85 = vector.broadcast %4 : vector<8x1xf32> to vector<8x896xf32>
    %86 = arith.mulf %84, %85 : vector<8x896xf32>
    %87 = vector.extract_strided_slice %86 {offsets = [0, 0], sizes = [8, 128], strides = [1, 1]} : vector<8x896xf32> to vector<8x128xf32>
    %88 = vector.extract_strided_slice %86 {offsets = [0, 128], sizes = [8, 128], strides = [1, 1]} : vector<8x896xf32> to vector<8x128xf32>
    %89 = vector.extract_strided_slice %86 {offsets = [0, 256], sizes = [8, 128], strides = [1, 1]} : vector<8x896xf32> to vector<8x128xf32>
    %90 = vector.extract_strided_slice %86 {offsets = [0, 384], sizes = [8, 128], strides = [1, 1]} : vector<8x896xf32> to vector<8x128xf32>
    %91 = vector.extract_strided_slice %86 {offsets = [0, 512], sizes = [8, 128], strides = [1, 1]} : vector<8x896xf32> to vector<8x128xf32>
    %92 = vector.extract_strided_slice %86 {offsets = [0, 640], sizes = [8, 128], strides = [1, 1]} : vector<8x896xf32> to vector<8x128xf32>
    %93 = vector.extract_strided_slice %86 {offsets = [0, 768], sizes = [8, 128], strides = [1, 1]} : vector<8x896xf32> to vector<8x128xf32>
    %94 = tpu.concatenate %87, %88, %89, %90, %91, %92, %93 in 0 : vector<8x128xf32>, vector<8x128xf32>, vector<8x128xf32>, vector<8x128xf32>, vector<8x128xf32>, vector<8x128xf32>, vector<8x128xf32> -> vector<56x128xf32>
    %95 = arith.truncf %94 : vector<56x128xf32> to vector<56x128xbf16>
    %c0_36 = arith.constant 0 : index
    %c0_37 = arith.constant 0 : index
    %96 = vector.load %arg10[%c0_36, %c0_37] : memref<128x2560xbf16, #tpu.memory_space<vmem>>, vector<128x2560xbf16>
    %cst_38 = arith.constant dense<0.000000e+00> : vector<56x2560xf32>
    %97 = tpu.matmul %95, %96, %cst_38 {dimension_numbers = #tpu.dot_dimension_numbers<[1], [0], [0], [1], [0, 0, 1, 1], [], []>} : vector<56x128xbf16>, vector<128x2560xbf16>, vector<56x2560xf32> -> vector<56x2560xf32>
    %98 = vector.extract_strided_slice %97 {offsets = [0, 1024], sizes = [8, 512], strides = [1, 1]} : vector<56x2560xf32> to vector<8x512xf32>
    %99 = vector.extract_strided_slice %97 {offsets = [8, 0], sizes = [8, 512], strides = [1, 1]} : vector<56x2560xf32> to vector<8x512xf32>
    %100 = arith.addf %98, %99 : vector<8x512xf32>
    %c0_39 = arith.constant 0 : index
    %c0_40 = arith.constant 0 : index
    %101 = vector.load %arg17[%c0_39, %c0_40] : memref<112x512xf32, #tpu.memory_space<vmem>>, vector<8x512xf32>
    tpu.vector_store %arg17[%c0_39, %c0_40], %100 {strides = array<i32>} : memref<112x512xf32, #tpu.memory_space<vmem>>, vector<8x512xf32>,
    %102 = vector.extract_strided_slice %97 {offsets = [0, 1536], sizes = [8, 512], strides = [1, 1]} : vector<56x2560xf32> to vector<8x512xf32>
    %103 = vector.extract_strided_slice %97 {offsets = [8, 512], sizes = [8, 512], strides = [1, 1]} : vector<56x2560xf32> to vector<8x512xf32>
    %104 = arith.addf %102, %103 : vector<8x512xf32>
    %c8 = arith.constant 8 : index
    %c0_41 = arith.constant 0 : index
    %105 = vector.load %arg17[%c8, %c0_41] : memref<112x512xf32, #tpu.memory_space<vmem>>, vector<8x512xf32>
    tpu.vector_store %arg17[%c8, %c0_41], %104 {strides = array<i32>} : memref<112x512xf32, #tpu.memory_space<vmem>>, vector<8x512xf32>,
    %106 = vector.extract_strided_slice %97 {offsets = [0, 2048], sizes = [8, 512], strides = [1, 1]} : vector<56x2560xf32> to vector<8x512xf32>
    %107 = vector.extract_strided_slice %97 {offsets = [8, 1024], sizes = [8, 512], strides = [1, 1]} : vector<56x2560xf32> to vector<8x512xf32>
    %108 = arith.addf %106, %107 : vector<8x512xf32>
    %109 = vector.extract_strided_slice %97 {offsets = [16, 0], sizes = [8, 512], strides = [1, 1]} : vector<56x2560xf32> to vector<8x512xf32>
    %110 = arith.addf %108, %109 : vector<8x512xf32>
    %c16 = arith.constant 16 : index
    %c0_42 = arith.constant 0 : index
    %111 = vector.load %arg17[%c16, %c0_42] : memref<112x512xf32, #tpu.memory_space<vmem>>, vector<8x512xf32>
    tpu.vector_store %arg17[%c16, %c0_42], %110 {strides = array<i32>} : memref<112x512xf32, #tpu.memory_space<vmem>>, vector<8x512xf32>,
    %112 = vector.extract_strided_slice %97 {offsets = [8, 1536], sizes = [8, 512], strides = [1, 1]} : vector<56x2560xf32> to vector<8x512xf32>
    %113 = vector.extract_strided_slice %97 {offsets = [16, 512], sizes = [8, 512], strides = [1, 1]} : vector<56x2560xf32> to vector<8x512xf32>
    %114 = arith.addf %112, %113 : vector<8x512xf32>
    %c24 = arith.constant 24 : index
    %c0_43 = arith.constant 0 : index
    %115 = vector.load %arg17[%c24, %c0_43] : memref<112x512xf32, #tpu.memory_space<vmem>>, vector<8x512xf32>
    tpu.vector_store %arg17[%c24, %c0_43], %114 {strides = array<i32>} : memref<112x512xf32, #tpu.memory_space<vmem>>, vector<8x512xf32>,
    %116 = vector.extract_strided_slice %97 {offsets = [8, 2048], sizes = [8, 512], strides = [1, 1]} : vector<56x2560xf32> to vector<8x512xf32>
    %117 = vector.extract_strided_slice %97 {offsets = [16, 1024], sizes = [8, 512], strides = [1, 1]} : vector<56x2560xf32> to vector<8x512xf32>
    %118 = arith.addf %116, %117 : vector<8x512xf32>
    %119 = vector.extract_strided_slice %97 {offsets = [24, 0], sizes = [8, 512], strides = [1, 1]} : vector<56x2560xf32> to vector<8x512xf32>
    %120 = arith.addf %118, %119 : vector<8x512xf32>
    %c32 = arith.constant 32 : index
    %c0_44 = arith.constant 0 : index
    %121 = vector.load %arg17[%c32, %c0_44] : memref<112x512xf32, #tpu.memory_space<vmem>>, vector<8x512xf32>
    tpu.vector_store %arg17[%c32, %c0_44], %120 {strides = array<i32>} : memref<112x512xf32, #tpu.memory_space<vmem>>, vector<8x512xf32>,
    %122 = vector.extract_strided_slice %97 {offsets = [16, 1536], sizes = [8, 512], strides = [1, 1]} : vector<56x2560xf32> to vector<8x512xf32>
    %123 = vector.extract_strided_slice %97 {offsets = [24, 512], sizes = [8, 512], strides = [1, 1]} : vector<56x2560xf32> to vector<8x512xf32>
    %124 = arith.addf %122, %123 : vector<8x512xf32>
    %c40 = arith.constant 40 : index
    %c0_45 = arith.constant 0 : index
    %125 = vector.load %arg17[%c40, %c0_45] : memref<112x512xf32, #tpu.memory_space<vmem>>, vector<8x512xf32>
    tpu.vector_store %arg17[%c40, %c0_45], %124 {strides = array<i32>} : memref<112x512xf32, #tpu.memory_space<vmem>>, vector<8x512xf32>,
    %126 = vector.extract_strided_slice %97 {offsets = [16, 2048], sizes = [8, 512], strides = [1, 1]} : vector<56x2560xf32> to vector<8x512xf32>
    %127 = vector.extract_strided_slice %97 {offsets = [24, 1024], sizes = [8, 512], strides = [1, 1]} : vector<56x2560xf32> to vector<8x512xf32>
    %128 = arith.addf %126, %127 : vector<8x512xf32>
    %129 = vector.extract_strided_slice %97 {offsets = [32, 0], sizes = [8, 512], strides = [1, 1]} : vector<56x2560xf32> to vector<8x512xf32>
    %130 = arith.addf %128, %129 : vector<8x512xf32>
    %c48 = arith.constant 48 : index
    %c0_46 = arith.constant 0 : index
    %131 = vector.load %arg17[%c48, %c0_46] : memref<112x512xf32, #tpu.memory_space<vmem>>, vector<8x512xf32>
    tpu.vector_store %arg17[%c48, %c0_46], %130 {strides = array<i32>} : memref<112x512xf32, #tpu.memory_space<vmem>>, vector<8x512xf32>,
    %132 = vector.extract_strided_slice %97 {offsets = [24, 1536], sizes = [8, 512], strides = [1, 1]} : vector<56x2560xf32> to vector<8x512xf32>
    %133 = vector.extract_strided_slice %97 {offsets = [32, 512], sizes = [8, 512], strides = [1, 1]} : vector<56x2560xf32> to vector<8x512xf32>
    %134 = arith.addf %132, %133 : vector<8x512xf32>
    %c56 = arith.constant 56 : index
    %c0_47 = arith.constant 0 : index
    %135 = vector.load %arg17[%c56, %c0_47] : memref<112x512xf32, #tpu.memory_space<vmem>>, vector<8x512xf32>
    tpu.vector_store %arg17[%c56, %c0_47], %134 {strides = array<i32>} : memref<112x512xf32, #tpu.memory_space<vmem>>, vector<8x512xf32>,
    %136 = vector.extract_strided_slice %97 {offsets = [24, 2048], sizes = [8, 512], strides = [1, 1]} : vector<56x2560xf32> to vector<8x512xf32>
    %137 = vector.extract_strided_slice %97 {offsets = [32, 1024], sizes = [8, 512], strides = [1, 1]} : vector<56x2560xf32> to vector<8x512xf32>
    %138 = arith.addf %136, %137 : vector<8x512xf32>
    %139 = vector.extract_strided_slice %97 {offsets = [40, 0], sizes = [8, 512], strides = [1, 1]} : vector<56x2560xf32> to vector<8x512xf32>
    %140 = arith.addf %138, %139 : vector<8x512xf32>
    %c64 = arith.constant 64 : index
    %c0_48 = arith.constant 0 : index
    %141 = vector.load %arg17[%c64, %c0_48] : memref<112x512xf32, #tpu.memory_space<vmem>>, vector<8x512xf32>
    tpu.vector_store %arg17[%c64, %c0_48], %140 {strides = array<i32>} : memref<112x512xf32, #tpu.memory_space<vmem>>, vector<8x512xf32>,
    %142 = vector.extract_strided_slice %97 {offsets = [32, 1536], sizes = [8, 512], strides = [1, 1]} : vector<56x2560xf32> to vector<8x512xf32>
    %143 = vector.extract_strided_slice %97 {offsets = [40, 512], sizes = [8, 512], strides = [1, 1]} : vector<56x2560xf32> to vector<8x512xf32>
    %144 = arith.addf %142, %143 : vector<8x512xf32>
    %c72 = arith.constant 72 : index
    %c0_49 = arith.constant 0 : index
    %145 = vector.load %arg17[%c72, %c0_49] : memref<112x512xf32, #tpu.memory_space<vmem>>, vector<8x512xf32>
    tpu.vector_store %arg17[%c72, %c0_49], %144 {strides = array<i32>} : memref<112x512xf32, #tpu.memory_space<vmem>>, vector<8x512xf32>,
    %146 = vector.extract_strided_slice %97 {offsets = [32, 2048], sizes = [8, 512], strides = [1, 1]} : vector<56x2560xf32> to vector<8x512xf32>
    %147 = vector.extract_strided_slice %97 {offsets = [40, 1024], sizes = [8, 512], strides = [1, 1]} : vector<56x2560xf32> to vector<8x512xf32>
    %148 = arith.addf %146, %147 : vector<8x512xf32>
    %149 = vector.extract_strided_slice %97 {offsets = [48, 0], sizes = [8, 512], strides = [1, 1]} : vector<56x2560xf32> to vector<8x512xf32>
    %150 = arith.addf %148, %149 : vector<8x512xf32>
    %c80 = arith.constant 80 : index
    %c0_50 = arith.constant 0 : index
    %151 = vector.load %arg17[%c80, %c0_50] : memref<112x512xf32, #tpu.memory_space<vmem>>, vector<8x512xf32>
    tpu.vector_store %arg17[%c80, %c0_50], %150 {strides = array<i32>} : memref<112x512xf32, #tpu.memory_space<vmem>>, vector<8x512xf32>,
    %152 = vector.extract_strided_slice %97 {offsets = [40, 1536], sizes = [8, 512], strides = [1, 1]} : vector<56x2560xf32> to vector<8x512xf32>
    %153 = vector.extract_strided_slice %97 {offsets = [48, 512], sizes = [8, 512], strides = [1, 1]} : vector<56x2560xf32> to vector<8x512xf32>
    %154 = arith.addf %152, %153 : vector<8x512xf32>
    %c88 = arith.constant 88 : index
    %c0_51 = arith.constant 0 : index
    %155 = vector.load %arg17[%c88, %c0_51] : memref<112x512xf32, #tpu.memory_space<vmem>>, vector<8x512xf32>
    tpu.vector_store %arg17[%c88, %c0_51], %154 {strides = array<i32>} : memref<112x512xf32, #tpu.memory_space<vmem>>, vector<8x512xf32>,
    %156 = vector.extract_strided_slice %97 {offsets = [40, 2048], sizes = [8, 512], strides = [1, 1]} : vector<56x2560xf32> to vector<8x512xf32>
    %157 = vector.extract_strided_slice %97 {offsets = [48, 1024], sizes = [8, 512], strides = [1, 1]} : vector<56x2560xf32> to vector<8x512xf32>
    %158 = arith.addf %156, %157 : vector<8x512xf32>
    %c96 = arith.constant 96 : index
    %c0_52 = arith.constant 0 : index
    %159 = vector.load %arg17[%c96, %c0_52] : memref<112x512xf32, #tpu.memory_space<vmem>>, vector<8x512xf32>
    tpu.vector_store %arg17[%c96, %c0_52], %158 {strides = array<i32>} : memref<112x512xf32, #tpu.memory_space<vmem>>, vector<8x512xf32>,
    %160 = vector.extract_strided_slice %97 {offsets = [48, 1536], sizes = [8, 512], strides = [1, 1]} : vector<56x2560xf32> to vector<8x512xf32>
    %c104 = arith.constant 104 : index
    %c0_53 = arith.constant 0 : index
    %161 = vector.load %arg17[%c104, %c0_53] : memref<112x512xf32, #tpu.memory_space<vmem>>, vector<8x512xf32>
    tpu.vector_store %arg17[%c104, %c0_53], %160 {strides = array<i32>} : memref<112x512xf32, #tpu.memory_space<vmem>>, vector<8x512xf32>,
    %c0_54 = arith.constant 0 : index
    %c0_55 = arith.constant 0 : index
    %162 = vector.load %arg17[%c0_54, %c0_55] : memref<112x512xf32, #tpu.memory_space<vmem>>, vector<112x512xf32>
    %cst_56 = arith.constant dense<0.000000e+00> : vector<512xf32>
    %163 = vector.multi_reduction <add>, %162, %cst_56 [0] : vector<112x512xf32> to vector<512xf32>
    %164 = vector.shape_cast %163 : vector<512xf32> to vector<1x512xf32>
    %165 = arith.mulf %162, %162 : vector<112x512xf32>
    %cst_57 = arith.constant dense<0.000000e+00> : vector<512xf32>
    %166 = vector.multi_reduction <add>, %165, %cst_57 [0] : vector<112x512xf32> to vector<512xf32>
    %167 = vector.shape_cast %166 : vector<512xf32> to vector<1x512xf32>
    %c0_58 = arith.constant 0 : index
    %c0_59 = arith.constant 0 : index
    %168 = vector.load %arg14[%c0_58, %c0_59] : memref<512x32xf32, #tpu.memory_space<vmem>>, vector<512x32xf32>
    %cst_60 = arith.constant dense<0.000000e+00> : vector<1x32xf32>
    %169 = tpu.matmul %164, %168, %cst_60 {dimension_numbers = #tpu.dot_dimension_numbers<[1], [0], [0], [1], [0, 0, 1, 1], [], []>} : vector<1x512xf32>, vector<512x32xf32>, vector<1x32xf32> -> vector<1x32xf32>
    %c0_61 = arith.constant 0 : index
    %c0_62 = arith.constant 0 : index
    %170 = vector.load %arg14[%c0_61, %c0_62] : memref<512x32xf32, #tpu.memory_space<vmem>>, vector<512x32xf32>
    %cst_63 = arith.constant dense<0.000000e+00> : vector<1x32xf32>
    %171 = tpu.matmul %167, %170, %cst_63 {dimension_numbers = #tpu.dot_dimension_numbers<[1], [0], [0], [1], [0, 0, 1, 1], [], []>} : vector<1x512xf32>, vector<512x32xf32>, vector<1x32xf32> -> vector<1x32xf32>
    %cst_64 = arith.constant 0.00127551018 : f32
    %172 = vector.broadcast %cst_64 : f32 to vector<1x32xf32>
    %173 = arith.mulf %169, %172 : vector<1x32xf32>
    %cst_65 = arith.constant 0.00127551018 : f32
    %174 = vector.broadcast %cst_65 : f32 to vector<1x32xf32>
    %175 = arith.mulf %171, %174 : vector<1x32xf32>
    %176 = arith.mulf %173, %173 : vector<1x32xf32>
    %177 = arith.subf %175, %176 : vector<1x32xf32>
    %cst_66 = arith.constant 0.000000e+00 : f32
    %178 = vector.broadcast %cst_66 : f32 to vector<1x32xf32>
    %179 = arith.maximumf %177, %178 : vector<1x32xf32>
    %cst_67 = arith.constant 9.99999974E-6 : f32
    %180 = vector.broadcast %cst_67 : f32 to vector<1x32xf32>
    %181 = arith.addf %179, %180 : vector<1x32xf32>
    %182 = math.rsqrt %181 : vector<1x32xf32>
    %c0_68 = arith.constant 0 : index
    %c0_69 = arith.constant 0 : index
    %183 = vector.load %arg15[%c0_68, %c0_69] : memref<32x512xf32, #tpu.memory_space<vmem>>, vector<32x512xf32>
    %cst_70 = arith.constant dense<0.000000e+00> : vector<1x512xf32>
    %184 = tpu.matmul %173, %183, %cst_70 {dimension_numbers = #tpu.dot_dimension_numbers<[1], [0], [0], [1], [0, 0, 1, 1], [], []>} : vector<1x32xf32>, vector<32x512xf32>, vector<1x512xf32> -> vector<1x512xf32>
    %c0_71 = arith.constant 0 : index
    %c0_72 = arith.constant 0 : index
    %185 = vector.load %arg15[%c0_71, %c0_72] : memref<32x512xf32, #tpu.memory_space<vmem>>, vector<32x512xf32>
    %cst_73 = arith.constant dense<0.000000e+00> : vector<1x512xf32>
    %186 = tpu.matmul %182, %185, %cst_73 {dimension_numbers = #tpu.dot_dimension_numbers<[1], [0], [0], [1], [0, 0, 1, 1], [], []>} : vector<1x32xf32>, vector<32x512xf32>, vector<1x512xf32> -> vector<1x512xf32>
    %c0_74 = arith.constant 0 : index
    %c0_75 = arith.constant 0 : index
    %187 = vector.load %arg11[%c0_74, %c0_75] : memref<1x512xf32, #tpu.memory_space<vmem>>, vector<1x512xf32>
    %188 = arith.mulf %186, %187 : vector<1x512xf32>
    %c0_76 = arith.constant 0 : index
    %c0_77 = arith.constant 0 : index
    %189 = vector.load %arg12[%c0_76, %c0_77] : memref<1x512xf32, #tpu.memory_space<vmem>>, vector<1x512xf32>
    %190 = arith.mulf %184, %188 : vector<1x512xf32>
    %191 = arith.subf %189, %190 : vector<1x512xf32>
    %192 = vector.broadcast %188 : vector<1x512xf32> to vector<112x512xf32>
    %193 = arith.mulf %162, %192 : vector<112x512xf32>
    %194 = vector.broadcast %191 : vector<1x512xf32> to vector<112x512xf32>
    %195 = arith.addf %193, %194 : vector<112x512xf32>
    %cst_78 = arith.constant 0.000000e+00 : f32
    %196 = vector.broadcast %cst_78 : f32 to vector<112x512xf32>
    %197 = arith.cmpf oge, %195, %196 : vector<112x512xf32>
    %cst_79 = arith.constant 2.000000e-01 : f32
    %198 = vector.broadcast %cst_79 : f32 to vector<112x512xf32>
    %199 = arith.mulf %198, %195 : vector<112x512xf32>
    %200 = arith.select %197, %195, %199 : vector<112x512xi1>, vector<112x512xf32>
    %201 = arith.truncf %200 : vector<112x512xf32> to vector<112x512xbf16>
    %c0_80 = arith.constant 0 : index
    %c0_81 = arith.constant 0 : index
    %202 = vector.load %arg13[%c0_80, %c0_81] : memref<512x640xbf16, #tpu.memory_space<vmem>>, vector<512x640xbf16>
    %cst_82 = arith.constant dense<0.000000e+00> : vector<112x640xf32>
    %203 = tpu.matmul %201, %202, %cst_82 {dimension_numbers = #tpu.dot_dimension_numbers<[1], [0], [0], [1], [0, 0, 1, 1], [], []>} : vector<112x512xbf16>, vector<512x640xbf16>, vector<112x640xf32> -> vector<112x640xf32>
    %204 = vector.extract_strided_slice %203 {offsets = [0, 256], sizes = [8, 128], strides = [1, 1]} : vector<112x640xf32> to vector<8x128xf32>
    %205 = vector.extract_strided_slice %203 {offsets = [8, 0], sizes = [8, 128], strides = [1, 1]} : vector<112x640xf32> to vector<8x128xf32>
    %206 = arith.addf %204, %205 : vector<8x128xf32>
    %207 = math.absf %206 : vector<8x128xf32>
    %cst_83 = arith.constant 0.000000e+00 : f32
    %208 = vector.broadcast %cst_83 : f32 to vector<8x128xf32>
    %209 = arith.subf %208, %207 : vector<8x128xf32>
    %210 = math.exp %209 : vector<8x128xf32>
    %cst_84 = arith.constant 0.000000e+00 : f32
    %211 = vector.broadcast %cst_84 : f32 to vector<8x128xf32>
    %212 = arith.cmpf oge, %206, %211 : vector<8x128xf32>
    %cst_85 = arith.constant 1.000000e+00 : f32
    %213 = vector.broadcast %cst_85 : f32 to vector<8x128xf32>
    %214 = arith.select %212, %213, %210 : vector<8x128xi1>, vector<8x128xf32>
    %cst_86 = arith.constant 1.000000e+00 : f32
    %215 = vector.broadcast %cst_86 : f32 to vector<8x128xf32>
    %216 = arith.addf %215, %210 : vector<8x128xf32>
    %217 = tpu.reciprocal %216 {approx = true} : vector<8x128xf32> -> vector<8x128xf32>
    %218 = arith.mulf %214, %217 : vector<8x128xf32>
    %cst_87 = arith.constant 0.000000e+00 : f32
    %cst_88 = arith.constant 1.000000e+00 : f32
    %219 = vector.broadcast %cst_87 : f32 to vector<8x128xf32>
    %220 = arith.maximumf %219, %218 : vector<8x128xf32>
    %221 = vector.broadcast %cst_88 : f32 to vector<8x128xf32>
    %222 = arith.minimumf %221, %220 : vector<8x128xf32>
    %c0_89 = arith.constant 0 : index
    %c0_90 = arith.constant 0 : index
    %c0_91 = arith.constant 0 : index
    %223 = vector.load %arg16[%c0_89, %c0_90, %c0_91] : memref<28x8x128xf32, #tpu.memory_space<vmem>>, vector<1x8x128xf32>
    %224 = vector.shape_cast %223 : vector<1x8x128xf32> to vector<8x128xf32>
    %225 = vector.shape_cast %222 : vector<8x128xf32> to vector<1x8x128xf32>
    tpu.vector_store %arg16[%c0_89, %c0_90, %c0_91], %225 {strides = array<i32>} : memref<28x8x128xf32, #tpu.memory_space<vmem>>, vector<1x8x128xf32>,
    %226 = vector.extract_strided_slice %203 {offsets = [0, 384], sizes = [8, 128], strides = [1, 1]} : vector<112x640xf32> to vector<8x128xf32>
    %227 = vector.extract_strided_slice %203 {offsets = [8, 128], sizes = [8, 128], strides = [1, 1]} : vector<112x640xf32> to vector<8x128xf32>
    %228 = arith.addf %226, %227 : vector<8x128xf32>
    %229 = math.absf %228 : vector<8x128xf32>
    %cst_92 = arith.constant 0.000000e+00 : f32
    %230 = vector.broadcast %cst_92 : f32 to vector<8x128xf32>
    %231 = arith.subf %230, %229 : vector<8x128xf32>
    %232 = math.exp %231 : vector<8x128xf32>
    %cst_93 = arith.constant 0.000000e+00 : f32
    %233 = vector.broadcast %cst_93 : f32 to vector<8x128xf32>
    %234 = arith.cmpf oge, %228, %233 : vector<8x128xf32>
    %cst_94 = arith.constant 1.000000e+00 : f32
    %235 = vector.broadcast %cst_94 : f32 to vector<8x128xf32>
    %236 = arith.select %234, %235, %232 : vector<8x128xi1>, vector<8x128xf32>
    %cst_95 = arith.constant 1.000000e+00 : f32
    %237 = vector.broadcast %cst_95 : f32 to vector<8x128xf32>
    %238 = arith.addf %237, %232 : vector<8x128xf32>
    %239 = tpu.reciprocal %238 {approx = true} : vector<8x128xf32> -> vector<8x128xf32>
    %240 = arith.mulf %236, %239 : vector<8x128xf32>
    %cst_96 = arith.constant 0.000000e+00 : f32
    %cst_97 = arith.constant 1.000000e+00 : f32
    %241 = vector.broadcast %cst_96 : f32 to vector<8x128xf32>
    %242 = arith.maximumf %241, %240 : vector<8x128xf32>
    %243 = vector.broadcast %cst_97 : f32 to vector<8x128xf32>
    %244 = arith.minimumf %243, %242 : vector<8x128xf32>
    %c1 = arith.constant 1 : index
    %c0_98 = arith.constant 0 : index
    %c0_99 = arith.constant 0 : index
    %245 = vector.load %arg16[%c1, %c0_98, %c0_99] : memref<28x8x128xf32, #tpu.memory_space<vmem>>, vector<1x8x128xf32>
    %246 = vector.shape_cast %245 : vector<1x8x128xf32> to vector<8x128xf32>
    %247 = vector.shape_cast %244 : vector<8x128xf32> to vector<1x8x128xf32>
    tpu.vector_store %arg16[%c1, %c0_98, %c0_99], %247 {strides = array<i32>} : memref<28x8x128xf32, #tpu.memory_space<vmem>>, vector<1x8x128xf32>,
    %248 = vector.extract_strided_slice %203 {offsets = [0, 512], sizes = [8, 128], strides = [1, 1]} : vector<112x640xf32> to vector<8x128xf32>
    %249 = vector.extract_strided_slice %203 {offsets = [8, 256], sizes = [8, 128], strides = [1, 1]} : vector<112x640xf32> to vector<8x128xf32>
    %250 = arith.addf %248, %249 : vector<8x128xf32>
    %251 = vector.extract_strided_slice %203 {offsets = [16, 0], sizes = [8, 128], strides = [1, 1]} : vector<112x640xf32> to vector<8x128xf32>
    %252 = arith.addf %250, %251 : vector<8x128xf32>
    %253 = math.absf %252 : vector<8x128xf32>
    %cst_100 = arith.constant 0.000000e+00 : f32
    %254 = vector.broadcast %cst_100 : f32 to vector<8x128xf32>
    %255 = arith.subf %254, %253 : vector<8x128xf32>
    %256 = math.exp %255 : vector<8x128xf32>
    %cst_101 = arith.constant 0.000000e+00 : f32
    %257 = vector.broadcast %cst_101 : f32 to vector<8x128xf32>
    %258 = arith.cmpf oge, %252, %257 : vector<8x128xf32>
    %cst_102 = arith.constant 1.000000e+00 : f32
    %259 = vector.broadcast %cst_102 : f32 to vector<8x128xf32>
    %260 = arith.select %258, %259, %256 : vector<8x128xi1>, vector<8x128xf32>
    %cst_103 = arith.constant 1.000000e+00 : f32
    %261 = vector.broadcast %cst_103 : f32 to vector<8x128xf32>
    %262 = arith.addf %261, %256 : vector<8x128xf32>
    %263 = tpu.reciprocal %262 {approx = true} : vector<8x128xf32> -> vector<8x128xf32>
    %264 = arith.mulf %260, %263 : vector<8x128xf32>
    %cst_104 = arith.constant 0.000000e+00 : f32
    %cst_105 = arith.constant 1.000000e+00 : f32
    %265 = vector.broadcast %cst_104 : f32 to vector<8x128xf32>
    %266 = arith.maximumf %265, %264 : vector<8x128xf32>
    %267 = vector.broadcast %cst_105 : f32 to vector<8x128xf32>
    %268 = arith.minimumf %267, %266 : vector<8x128xf32>
    %c2 = arith.constant 2 : index
    %c0_106 = arith.constant 0 : index
    %c0_107 = arith.constant 0 : index
    %269 = vector.load %arg16[%c2, %c0_106, %c0_107] : memref<28x8x128xf32, #tpu.memory_space<vmem>>, vector<1x8x128xf32>
    %270 = vector.shape_cast %269 : vector<1x8x128xf32> to vector<8x128xf32>
    %271 = vector.shape_cast %268 : vector<8x128xf32> to vector<1x8x128xf32>
    tpu.vector_store %arg16[%c2, %c0_106, %c0_107], %271 {strides = array<i32>} : memref<28x8x128xf32, #tpu.memory_space<vmem>>, vector<1x8x128xf32>,
    %272 = vector.extract_strided_slice %203 {offsets = [8, 384], sizes = [8, 128], strides = [1, 1]} : vector<112x640xf32> to vector<8x128xf32>
    %273 = vector.extract_strided_slice %203 {offsets = [16, 128], sizes = [8, 128], strides = [1, 1]} : vector<112x640xf32> to vector<8x128xf32>
    %274 = arith.addf %272, %273 : vector<8x128xf32>
    %275 = math.absf %274 : vector<8x128xf32>
    %cst_108 = arith.constant 0.000000e+00 : f32
    %276 = vector.broadcast %cst_108 : f32 to vector<8x128xf32>
    %277 = arith.subf %276, %275 : vector<8x128xf32>
    %278 = math.exp %277 : vector<8x128xf32>
    %cst_109 = arith.constant 0.000000e+00 : f32
    %279 = vector.broadcast %cst_109 : f32 to vector<8x128xf32>
    %280 = arith.cmpf oge, %274, %279 : vector<8x128xf32>
    %cst_110 = arith.constant 1.000000e+00 : f32
    %281 = vector.broadcast %cst_110 : f32 to vector<8x128xf32>
    %282 = arith.select %280, %281, %278 : vector<8x128xi1>, vector<8x128xf32>
    %cst_111 = arith.constant 1.000000e+00 : f32
    %283 = vector.broadcast %cst_111 : f32 to vector<8x128xf32>
    %284 = arith.addf %283, %278 : vector<8x128xf32>
    %285 = tpu.reciprocal %284 {approx = true} : vector<8x128xf32> -> vector<8x128xf32>
    %286 = arith.mulf %282, %285 : vector<8x128xf32>
    %cst_112 = arith.constant 0.000000e+00 : f32
    %cst_113 = arith.constant 1.000000e+00 : f32
    %287 = vector.broadcast %cst_112 : f32 to vector<8x128xf32>
    %288 = arith.maximumf %287, %286 : vector<8x128xf32>
    %289 = vector.broadcast %cst_113 : f32 to vector<8x128xf32>
    %290 = arith.minimumf %289, %288 : vector<8x128xf32>
    %c3 = arith.constant 3 : index
    %c0_114 = arith.constant 0 : index
    %c0_115 = arith.constant 0 : index
    %291 = vector.load %arg16[%c3, %c0_114, %c0_115] : memref<28x8x128xf32, #tpu.memory_space<vmem>>, vector<1x8x128xf32>
    %292 = vector.shape_cast %291 : vector<1x8x128xf32> to vector<8x128xf32>
    %293 = vector.shape_cast %290 : vector<8x128xf32> to vector<1x8x128xf32>
    tpu.vector_store %arg16[%c3, %c0_114, %c0_115], %293 {strides = array<i32>} : memref<28x8x128xf32, #tpu.memory_space<vmem>>, vector<1x8x128xf32>,
    %294 = vector.extract_strided_slice %203 {offsets = [8, 512], sizes = [8, 128], strides = [1, 1]} : vector<112x640xf32> to vector<8x128xf32>
    %295 = vector.extract_strided_slice %203 {offsets = [16, 256], sizes = [8, 128], strides = [1, 1]} : vector<112x640xf32> to vector<8x128xf32>
    %296 = arith.addf %294, %295 : vector<8x128xf32>
    %297 = vector.extract_strided_slice %203 {offsets = [24, 0], sizes = [8, 128], strides = [1, 1]} : vector<112x640xf32> to vector<8x128xf32>
    %298 = arith.addf %296, %297 : vector<8x128xf32>
    %299 = math.absf %298 : vector<8x128xf32>
    %cst_116 = arith.constant 0.000000e+00 : f32
    %300 = vector.broadcast %cst_116 : f32 to vector<8x128xf32>
    %301 = arith.subf %300, %299 : vector<8x128xf32>
    %302 = math.exp %301 : vector<8x128xf32>
    %cst_117 = arith.constant 0.000000e+00 : f32
    %303 = vector.broadcast %cst_117 : f32 to vector<8x128xf32>
    %304 = arith.cmpf oge, %298, %303 : vector<8x128xf32>
    %cst_118 = arith.constant 1.000000e+00 : f32
    %305 = vector.broadcast %cst_118 : f32 to vector<8x128xf32>
    %306 = arith.select %304, %305, %302 : vector<8x128xi1>, vector<8x128xf32>
    %cst_119 = arith.constant 1.000000e+00 : f32
    %307 = vector.broadcast %cst_119 : f32 to vector<8x128xf32>
    %308 = arith.addf %307, %302 : vector<8x128xf32>
    %309 = tpu.reciprocal %308 {approx = true} : vector<8x128xf32> -> vector<8x128xf32>
    %310 = arith.mulf %306, %309 : vector<8x128xf32>
    %cst_120 = arith.constant 0.000000e+00 : f32
    %cst_121 = arith.constant 1.000000e+00 : f32
    %311 = vector.broadcast %cst_120 : f32 to vector<8x128xf32>
    %312 = arith.maximumf %311, %310 : vector<8x128xf32>
    %313 = vector.broadcast %cst_121 : f32 to vector<8x128xf32>
    %314 = arith.minimumf %313, %312 : vector<8x128xf32>
    %c4 = arith.constant 4 : index
    %c0_122 = arith.constant 0 : index
    %c0_123 = arith.constant 0 : index
    %315 = vector.load %arg16[%c4, %c0_122, %c0_123] : memref<28x8x128xf32, #tpu.memory_space<vmem>>, vector<1x8x128xf32>
    %316 = vector.shape_cast %315 : vector<1x8x128xf32> to vector<8x128xf32>
    %317 = vector.shape_cast %314 : vector<8x128xf32> to vector<1x8x128xf32>
    tpu.vector_store %arg16[%c4, %c0_122, %c0_123], %317 {strides = array<i32>} : memref<28x8x128xf32, #tpu.memory_space<vmem>>, vector<1x8x128xf32>,
    %318 = vector.extract_strided_slice %203 {offsets = [16, 384], sizes = [8, 128], strides = [1, 1]} : vector<112x640xf32> to vector<8x128xf32>
    %319 = vector.extract_strided_slice %203 {offsets = [24, 128], sizes = [8, 128], strides = [1, 1]} : vector<112x640xf32> to vector<8x128xf32>
    %320 = arith.addf %318, %319 : vector<8x128xf32>
    %321 = math.absf %320 : vector<8x128xf32>
    %cst_124 = arith.constant 0.000000e+00 : f32
    %322 = vector.broadcast %cst_124 : f32 to vector<8x128xf32>
    %323 = arith.subf %322, %321 : vector<8x128xf32>
    %324 = math.exp %323 : vector<8x128xf32>
    %cst_125 = arith.constant 0.000000e+00 : f32
    %325 = vector.broadcast %cst_125 : f32 to vector<8x128xf32>
    %326 = arith.cmpf oge, %320, %325 : vector<8x128xf32>
    %cst_126 = arith.constant 1.000000e+00 : f32
    %327 = vector.broadcast %cst_126 : f32 to vector<8x128xf32>
    %328 = arith.select %326, %327, %324 : vector<8x128xi1>, vector<8x128xf32>
    %cst_127 = arith.constant 1.000000e+00 : f32
    %329 = vector.broadcast %cst_127 : f32 to vector<8x128xf32>
    %330 = arith.addf %329, %324 : vector<8x128xf32>
    %331 = tpu.reciprocal %330 {approx = true} : vector<8x128xf32> -> vector<8x128xf32>
    %332 = arith.mulf %328, %331 : vector<8x128xf32>
    %cst_128 = arith.constant 0.000000e+00 : f32
    %cst_129 = arith.constant 1.000000e+00 : f32
    %333 = vector.broadcast %cst_128 : f32 to vector<8x128xf32>
    %334 = arith.maximumf %333, %332 : vector<8x128xf32>
    %335 = vector.broadcast %cst_129 : f32 to vector<8x128xf32>
    %336 = arith.minimumf %335, %334 : vector<8x128xf32>
    %c5 = arith.constant 5 : index
    %c0_130 = arith.constant 0 : index
    %c0_131 = arith.constant 0 : index
    %337 = vector.load %arg16[%c5, %c0_130, %c0_131] : memref<28x8x128xf32, #tpu.memory_space<vmem>>, vector<1x8x128xf32>
    %338 = vector.shape_cast %337 : vector<1x8x128xf32> to vector<8x128xf32>
    %339 = vector.shape_cast %336 : vector<8x128xf32> to vector<1x8x128xf32>
    tpu.vector_store %arg16[%c5, %c0_130, %c0_131], %339 {strides = array<i32>} : memref<28x8x128xf32, #tpu.memory_space<vmem>>, vector<1x8x128xf32>,
    %340 = vector.extract_strided_slice %203 {offsets = [16, 512], sizes = [8, 128], strides = [1, 1]} : vector<112x640xf32> to vector<8x128xf32>
    %341 = vector.extract_strided_slice %203 {offsets = [24, 256], sizes = [8, 128], strides = [1, 1]} : vector<112x640xf32> to vector<8x128xf32>
    %342 = arith.addf %340, %341 : vector<8x128xf32>
    %343 = vector.extract_strided_slice %203 {offsets = [32, 0], sizes = [8, 128], strides = [1, 1]} : vector<112x640xf32> to vector<8x128xf32>
    %344 = arith.addf %342, %343 : vector<8x128xf32>
    %345 = math.absf %344 : vector<8x128xf32>
    %cst_132 = arith.constant 0.000000e+00 : f32
    %346 = vector.broadcast %cst_132 : f32 to vector<8x128xf32>
    %347 = arith.subf %346, %345 : vector<8x128xf32>
    %348 = math.exp %347 : vector<8x128xf32>
    %cst_133 = arith.constant 0.000000e+00 : f32
    %349 = vector.broadcast %cst_133 : f32 to vector<8x128xf32>
    %350 = arith.cmpf oge, %344, %349 : vector<8x128xf32>
    %cst_134 = arith.constant 1.000000e+00 : f32
    %351 = vector.broadcast %cst_134 : f32 to vector<8x128xf32>
    %352 = arith.select %350, %351, %348 : vector<8x128xi1>, vector<8x128xf32>
    %cst_135 = arith.constant 1.000000e+00 : f32
    %353 = vector.broadcast %cst_135 : f32 to vector<8x128xf32>
    %354 = arith.addf %353, %348 : vector<8x128xf32>
    %355 = tpu.reciprocal %354 {approx = true} : vector<8x128xf32> -> vector<8x128xf32>
    %356 = arith.mulf %352, %355 : vector<8x128xf32>
    %cst_136 = arith.constant 0.000000e+00 : f32
    %cst_137 = arith.constant 1.000000e+00 : f32
    %357 = vector.broadcast %cst_136 : f32 to vector<8x128xf32>
    %358 = arith.maximumf %357, %356 : vector<8x128xf32>
    %359 = vector.broadcast %cst_137 : f32 to vector<8x128xf32>
    %360 = arith.minimumf %359, %358 : vector<8x128xf32>
    %c6 = arith.constant 6 : index
    %c0_138 = arith.constant 0 : index
    %c0_139 = arith.constant 0 : index
    %361 = vector.load %arg16[%c6, %c0_138, %c0_139] : memref<28x8x128xf32, #tpu.memory_space<vmem>>, vector<1x8x128xf32>
    %362 = vector.shape_cast %361 : vector<1x8x128xf32> to vector<8x128xf32>
    %363 = vector.shape_cast %360 : vector<8x128xf32> to vector<1x8x128xf32>
    tpu.vector_store %arg16[%c6, %c0_138, %c0_139], %363 {strides = array<i32>} : memref<28x8x128xf32, #tpu.memory_space<vmem>>, vector<1x8x128xf32>,
    %364 = vector.extract_strided_slice %203 {offsets = [24, 384], sizes = [8, 128], strides = [1, 1]} : vector<112x640xf32> to vector<8x128xf32>
    %365 = vector.extract_strided_slice %203 {offsets = [32, 128], sizes = [8, 128], strides = [1, 1]} : vector<112x640xf32> to vector<8x128xf32>
    %366 = arith.addf %364, %365 : vector<8x128xf32>
    %367 = math.absf %366 : vector<8x128xf32>
    %cst_140 = arith.constant 0.000000e+00 : f32
    %368 = vector.broadcast %cst_140 : f32 to vector<8x128xf32>
    %369 = arith.subf %368, %367 : vector<8x128xf32>
    %370 = math.exp %369 : vector<8x128xf32>
    %cst_141 = arith.constant 0.000000e+00 : f32
    %371 = vector.broadcast %cst_141 : f32 to vector<8x128xf32>
    %372 = arith.cmpf oge, %366, %371 : vector<8x128xf32>
    %cst_142 = arith.constant 1.000000e+00 : f32
    %373 = vector.broadcast %cst_142 : f32 to vector<8x128xf32>
    %374 = arith.select %372, %373, %370 : vector<8x128xi1>, vector<8x128xf32>
    %cst_143 = arith.constant 1.000000e+00 : f32
    %375 = vector.broadcast %cst_143 : f32 to vector<8x128xf32>
    %376 = arith.addf %375, %370 : vector<8x128xf32>
    %377 = tpu.reciprocal %376 {approx = true} : vector<8x128xf32> -> vector<8x128xf32>
    %378 = arith.mulf %374, %377 : vector<8x128xf32>
    %cst_144 = arith.constant 0.000000e+00 : f32
    %cst_145 = arith.constant 1.000000e+00 : f32
    %379 = vector.broadcast %cst_144 : f32 to vector<8x128xf32>
    %380 = arith.maximumf %379, %378 : vector<8x128xf32>
    %381 = vector.broadcast %cst_145 : f32 to vector<8x128xf32>
    %382 = arith.minimumf %381, %380 : vector<8x128xf32>
    %c7 = arith.constant 7 : index
    %c0_146 = arith.constant 0 : index
    %c0_147 = arith.constant 0 : index
    %383 = vector.load %arg16[%c7, %c0_146, %c0_147] : memref<28x8x128xf32, #tpu.memory_space<vmem>>, vector<1x8x128xf32>
    %384 = vector.shape_cast %383 : vector<1x8x128xf32> to vector<8x128xf32>
    %385 = vector.shape_cast %382 : vector<8x128xf32> to vector<1x8x128xf32>
    tpu.vector_store %arg16[%c7, %c0_146, %c0_147], %385 {strides = array<i32>} : memref<28x8x128xf32, #tpu.memory_space<vmem>>, vector<1x8x128xf32>,
    %386 = vector.extract_strided_slice %203 {offsets = [24, 512], sizes = [8, 128], strides = [1, 1]} : vector<112x640xf32> to vector<8x128xf32>
    %387 = vector.extract_strided_slice %203 {offsets = [32, 256], sizes = [8, 128], strides = [1, 1]} : vector<112x640xf32> to vector<8x128xf32>
    %388 = arith.addf %386, %387 : vector<8x128xf32>
    %389 = vector.extract_strided_slice %203 {offsets = [40, 0], sizes = [8, 128], strides = [1, 1]} : vector<112x640xf32> to vector<8x128xf32>
    %390 = arith.addf %388, %389 : vector<8x128xf32>
    %391 = math.absf %390 : vector<8x128xf32>
    %cst_148 = arith.constant 0.000000e+00 : f32
    %392 = vector.broadcast %cst_148 : f32 to vector<8x128xf32>
    %393 = arith.subf %392, %391 : vector<8x128xf32>
    %394 = math.exp %393 : vector<8x128xf32>
    %cst_149 = arith.constant 0.000000e+00 : f32
    %395 = vector.broadcast %cst_149 : f32 to vector<8x128xf32>
    %396 = arith.cmpf oge, %390, %395 : vector<8x128xf32>
    %cst_150 = arith.constant 1.000000e+00 : f32
    %397 = vector.broadcast %cst_150 : f32 to vector<8x128xf32>
    %398 = arith.select %396, %397, %394 : vector<8x128xi1>, vector<8x128xf32>
    %cst_151 = arith.constant 1.000000e+00 : f32
    %399 = vector.broadcast %cst_151 : f32 to vector<8x128xf32>
    %400 = arith.addf %399, %394 : vector<8x128xf32>
    %401 = tpu.reciprocal %400 {approx = true} : vector<8x128xf32> -> vector<8x128xf32>
    %402 = arith.mulf %398, %401 : vector<8x128xf32>
    %cst_152 = arith.constant 0.000000e+00 : f32
    %cst_153 = arith.constant 1.000000e+00 : f32
    %403 = vector.broadcast %cst_152 : f32 to vector<8x128xf32>
    %404 = arith.maximumf %403, %402 : vector<8x128xf32>
    %405 = vector.broadcast %cst_153 : f32 to vector<8x128xf32>
    %406 = arith.minimumf %405, %404 : vector<8x128xf32>
    %c8_154 = arith.constant 8 : index
    %c0_155 = arith.constant 0 : index
    %c0_156 = arith.constant 0 : index
    %407 = vector.load %arg16[%c8_154, %c0_155, %c0_156] : memref<28x8x128xf32, #tpu.memory_space<vmem>>, vector<1x8x128xf32>
    %408 = vector.shape_cast %407 : vector<1x8x128xf32> to vector<8x128xf32>
    %409 = vector.shape_cast %406 : vector<8x128xf32> to vector<1x8x128xf32>
    tpu.vector_store %arg16[%c8_154, %c0_155, %c0_156], %409 {strides = array<i32>} : memref<28x8x128xf32, #tpu.memory_space<vmem>>, vector<1x8x128xf32>,
    %410 = vector.extract_strided_slice %203 {offsets = [32, 384], sizes = [8, 128], strides = [1, 1]} : vector<112x640xf32> to vector<8x128xf32>
    %411 = vector.extract_strided_slice %203 {offsets = [40, 128], sizes = [8, 128], strides = [1, 1]} : vector<112x640xf32> to vector<8x128xf32>
    %412 = arith.addf %410, %411 : vector<8x128xf32>
    %413 = math.absf %412 : vector<8x128xf32>
    %cst_157 = arith.constant 0.000000e+00 : f32
    %414 = vector.broadcast %cst_157 : f32 to vector<8x128xf32>
    %415 = arith.subf %414, %413 : vector<8x128xf32>
    %416 = math.exp %415 : vector<8x128xf32>
    %cst_158 = arith.constant 0.000000e+00 : f32
    %417 = vector.broadcast %cst_158 : f32 to vector<8x128xf32>
    %418 = arith.cmpf oge, %412, %417 : vector<8x128xf32>
    %cst_159 = arith.constant 1.000000e+00 : f32
    %419 = vector.broadcast %cst_159 : f32 to vector<8x128xf32>
    %420 = arith.select %418, %419, %416 : vector<8x128xi1>, vector<8x128xf32>
    %cst_160 = arith.constant 1.000000e+00 : f32
    %421 = vector.broadcast %cst_160 : f32 to vector<8x128xf32>
    %422 = arith.addf %421, %416 : vector<8x128xf32>
    %423 = tpu.reciprocal %422 {approx = true} : vector<8x128xf32> -> vector<8x128xf32>
    %424 = arith.mulf %420, %423 : vector<8x128xf32>
    %cst_161 = arith.constant 0.000000e+00 : f32
    %cst_162 = arith.constant 1.000000e+00 : f32
    %425 = vector.broadcast %cst_161 : f32 to vector<8x128xf32>
    %426 = arith.maximumf %425, %424 : vector<8x128xf32>
    %427 = vector.broadcast %cst_162 : f32 to vector<8x128xf32>
    %428 = arith.minimumf %427, %426 : vector<8x128xf32>
    %c9 = arith.constant 9 : index
    %c0_163 = arith.constant 0 : index
    %c0_164 = arith.constant 0 : index
    %429 = vector.load %arg16[%c9, %c0_163, %c0_164] : memref<28x8x128xf32, #tpu.memory_space<vmem>>, vector<1x8x128xf32>
    %430 = vector.shape_cast %429 : vector<1x8x128xf32> to vector<8x128xf32>
    %431 = vector.shape_cast %428 : vector<8x128xf32> to vector<1x8x128xf32>
    tpu.vector_store %arg16[%c9, %c0_163, %c0_164], %431 {strides = array<i32>} : memref<28x8x128xf32, #tpu.memory_space<vmem>>, vector<1x8x128xf32>,
    %432 = vector.extract_strided_slice %203 {offsets = [32, 512], sizes = [8, 128], strides = [1, 1]} : vector<112x640xf32> to vector<8x128xf32>
    %433 = vector.extract_strided_slice %203 {offsets = [40, 256], sizes = [8, 128], strides = [1, 1]} : vector<112x640xf32> to vector<8x128xf32>
    %434 = arith.addf %432, %433 : vector<8x128xf32>
    %435 = vector.extract_strided_slice %203 {offsets = [48, 0], sizes = [8, 128], strides = [1, 1]} : vector<112x640xf32> to vector<8x128xf32>
    %436 = arith.addf %434, %435 : vector<8x128xf32>
    %437 = math.absf %436 : vector<8x128xf32>
    %cst_165 = arith.constant 0.000000e+00 : f32
    %438 = vector.broadcast %cst_165 : f32 to vector<8x128xf32>
    %439 = arith.subf %438, %437 : vector<8x128xf32>
    %440 = math.exp %439 : vector<8x128xf32>
    %cst_166 = arith.constant 0.000000e+00 : f32
    %441 = vector.broadcast %cst_166 : f32 to vector<8x128xf32>
    %442 = arith.cmpf oge, %436, %441 : vector<8x128xf32>
    %cst_167 = arith.constant 1.000000e+00 : f32
    %443 = vector.broadcast %cst_167 : f32 to vector<8x128xf32>
    %444 = arith.select %442, %443, %440 : vector<8x128xi1>, vector<8x128xf32>
    %cst_168 = arith.constant 1.000000e+00 : f32
    %445 = vector.broadcast %cst_168 : f32 to vector<8x128xf32>
    %446 = arith.addf %445, %440 : vector<8x128xf32>
    %447 = tpu.reciprocal %446 {approx = true} : vector<8x128xf32> -> vector<8x128xf32>
    %448 = arith.mulf %444, %447 : vector<8x128xf32>
    %cst_169 = arith.constant 0.000000e+00 : f32
    %cst_170 = arith.constant 1.000000e+00 : f32
    %449 = vector.broadcast %cst_169 : f32 to vector<8x128xf32>
    %450 = arith.maximumf %449, %448 : vector<8x128xf32>
    %451 = vector.broadcast %cst_170 : f32 to vector<8x128xf32>
    %452 = arith.minimumf %451, %450 : vector<8x128xf32>
    %c10 = arith.constant 10 : index
    %c0_171 = arith.constant 0 : index
    %c0_172 = arith.constant 0 : index
    %453 = vector.load %arg16[%c10, %c0_171, %c0_172] : memref<28x8x128xf32, #tpu.memory_space<vmem>>, vector<1x8x128xf32>
    %454 = vector.shape_cast %453 : vector<1x8x128xf32> to vector<8x128xf32>
    %455 = vector.shape_cast %452 : vector<8x128xf32> to vector<1x8x128xf32>
    tpu.vector_store %arg16[%c10, %c0_171, %c0_172], %455 {strides = array<i32>} : memref<28x8x128xf32, #tpu.memory_space<vmem>>, vector<1x8x128xf32>,
    %456 = vector.extract_strided_slice %203 {offsets = [40, 384], sizes = [8, 128], strides = [1, 1]} : vector<112x640xf32> to vector<8x128xf32>
    %457 = vector.extract_strided_slice %203 {offsets = [48, 128], sizes = [8, 128], strides = [1, 1]} : vector<112x640xf32> to vector<8x128xf32>
    %458 = arith.addf %456, %457 : vector<8x128xf32>
    %459 = math.absf %458 : vector<8x128xf32>
    %cst_173 = arith.constant 0.000000e+00 : f32
    %460 = vector.broadcast %cst_173 : f32 to vector<8x128xf32>
    %461 = arith.subf %460, %459 : vector<8x128xf32>
    %462 = math.exp %461 : vector<8x128xf32>
    %cst_174 = arith.constant 0.000000e+00 : f32
    %463 = vector.broadcast %cst_174 : f32 to vector<8x128xf32>
    %464 = arith.cmpf oge, %458, %463 : vector<8x128xf32>
    %cst_175 = arith.constant 1.000000e+00 : f32
    %465 = vector.broadcast %cst_175 : f32 to vector<8x128xf32>
    %466 = arith.select %464, %465, %462 : vector<8x128xi1>, vector<8x128xf32>
    %cst_176 = arith.constant 1.000000e+00 : f32
    %467 = vector.broadcast %cst_176 : f32 to vector<8x128xf32>
    %468 = arith.addf %467, %462 : vector<8x128xf32>
    %469 = tpu.reciprocal %468 {approx = true} : vector<8x128xf32> -> vector<8x128xf32>
    %470 = arith.mulf %466, %469 : vector<8x128xf32>
    %cst_177 = arith.constant 0.000000e+00 : f32
    %cst_178 = arith.constant 1.000000e+00 : f32
    %471 = vector.broadcast %cst_177 : f32 to vector<8x128xf32>
    %472 = arith.maximumf %471, %470 : vector<8x128xf32>
    %473 = vector.broadcast %cst_178 : f32 to vector<8x128xf32>
    %474 = arith.minimumf %473, %472 : vector<8x128xf32>
    %c11 = arith.constant 11 : index
    %c0_179 = arith.constant 0 : index
    %c0_180 = arith.constant 0 : index
    %475 = vector.load %arg16[%c11, %c0_179, %c0_180] : memref<28x8x128xf32, #tpu.memory_space<vmem>>, vector<1x8x128xf32>
    %476 = vector.shape_cast %475 : vector<1x8x128xf32> to vector<8x128xf32>
    %477 = vector.shape_cast %474 : vector<8x128xf32> to vector<1x8x128xf32>
    tpu.vector_store %arg16[%c11, %c0_179, %c0_180], %477 {strides = array<i32>} : memref<28x8x128xf32, #tpu.memory_space<vmem>>, vector<1x8x128xf32>,
    %478 = vector.extract_strided_slice %203 {offsets = [40, 512], sizes = [8, 128], strides = [1, 1]} : vector<112x640xf32> to vector<8x128xf32>
    %479 = vector.extract_strided_slice %203 {offsets = [48, 256], sizes = [8, 128], strides = [1, 1]} : vector<112x640xf32> to vector<8x128xf32>
    %480 = arith.addf %478, %479 : vector<8x128xf32>
    %481 = vector.extract_strided_slice %203 {offsets = [56, 0], sizes = [8, 128], strides = [1, 1]} : vector<112x640xf32> to vector<8x128xf32>
    %482 = arith.addf %480, %481 : vector<8x128xf32>
    %483 = math.absf %482 : vector<8x128xf32>
    %cst_181 = arith.constant 0.000000e+00 : f32
    %484 = vector.broadcast %cst_181 : f32 to vector<8x128xf32>
    %485 = arith.subf %484, %483 : vector<8x128xf32>
    %486 = math.exp %485 : vector<8x128xf32>
    %cst_182 = arith.constant 0.000000e+00 : f32
    %487 = vector.broadcast %cst_182 : f32 to vector<8x128xf32>
    %488 = arith.cmpf oge, %482, %487 : vector<8x128xf32>
    %cst_183 = arith.constant 1.000000e+00 : f32
    %489 = vector.broadcast %cst_183 : f32 to vector<8x128xf32>
    %490 = arith.select %488, %489, %486 : vector<8x128xi1>, vector<8x128xf32>
    %cst_184 = arith.constant 1.000000e+00 : f32
    %491 = vector.broadcast %cst_184 : f32 to vector<8x128xf32>
    %492 = arith.addf %491, %486 : vector<8x128xf32>
    %493 = tpu.reciprocal %492 {approx = true} : vector<8x128xf32> -> vector<8x128xf32>
    %494 = arith.mulf %490, %493 : vector<8x128xf32>
    %cst_185 = arith.constant 0.000000e+00 : f32
    %cst_186 = arith.constant 1.000000e+00 : f32
    %495 = vector.broadcast %cst_185 : f32 to vector<8x128xf32>
    %496 = arith.maximumf %495, %494 : vector<8x128xf32>
    %497 = vector.broadcast %cst_186 : f32 to vector<8x128xf32>
    %498 = arith.minimumf %497, %496 : vector<8x128xf32>
    %c12 = arith.constant 12 : index
    %c0_187 = arith.constant 0 : index
    %c0_188 = arith.constant 0 : index
    %499 = vector.load %arg16[%c12, %c0_187, %c0_188] : memref<28x8x128xf32, #tpu.memory_space<vmem>>, vector<1x8x128xf32>
    %500 = vector.shape_cast %499 : vector<1x8x128xf32> to vector<8x128xf32>
    %501 = vector.shape_cast %498 : vector<8x128xf32> to vector<1x8x128xf32>
    tpu.vector_store %arg16[%c12, %c0_187, %c0_188], %501 {strides = array<i32>} : memref<28x8x128xf32, #tpu.memory_space<vmem>>, vector<1x8x128xf32>,
    %502 = vector.extract_strided_slice %203 {offsets = [48, 384], sizes = [8, 128], strides = [1, 1]} : vector<112x640xf32> to vector<8x128xf32>
    %503 = vector.extract_strided_slice %203 {offsets = [56, 128], sizes = [8, 128], strides = [1, 1]} : vector<112x640xf32> to vector<8x128xf32>
    %504 = arith.addf %502, %503 : vector<8x128xf32>
    %505 = math.absf %504 : vector<8x128xf32>
    %cst_189 = arith.constant 0.000000e+00 : f32
    %506 = vector.broadcast %cst_189 : f32 to vector<8x128xf32>
    %507 = arith.subf %506, %505 : vector<8x128xf32>
    %508 = math.exp %507 : vector<8x128xf32>
    %cst_190 = arith.constant 0.000000e+00 : f32
    %509 = vector.broadcast %cst_190 : f32 to vector<8x128xf32>
    %510 = arith.cmpf oge, %504, %509 : vector<8x128xf32>
    %cst_191 = arith.constant 1.000000e+00 : f32
    %511 = vector.broadcast %cst_191 : f32 to vector<8x128xf32>
    %512 = arith.select %510, %511, %508 : vector<8x128xi1>, vector<8x128xf32>
    %cst_192 = arith.constant 1.000000e+00 : f32
    %513 = vector.broadcast %cst_192 : f32 to vector<8x128xf32>
    %514 = arith.addf %513, %508 : vector<8x128xf32>
    %515 = tpu.reciprocal %514 {approx = true} : vector<8x128xf32> -> vector<8x128xf32>
    %516 = arith.mulf %512, %515 : vector<8x128xf32>
    %cst_193 = arith.constant 0.000000e+00 : f32
    %cst_194 = arith.constant 1.000000e+00 : f32
    %517 = vector.broadcast %cst_193 : f32 to vector<8x128xf32>
    %518 = arith.maximumf %517, %516 : vector<8x128xf32>
    %519 = vector.broadcast %cst_194 : f32 to vector<8x128xf32>
    %520 = arith.minimumf %519, %518 : vector<8x128xf32>
    %c13 = arith.constant 13 : index
    %c0_195 = arith.constant 0 : index
    %c0_196 = arith.constant 0 : index
    %521 = vector.load %arg16[%c13, %c0_195, %c0_196] : memref<28x8x128xf32, #tpu.memory_space<vmem>>, vector<1x8x128xf32>
    %522 = vector.shape_cast %521 : vector<1x8x128xf32> to vector<8x128xf32>
    %523 = vector.shape_cast %520 : vector<8x128xf32> to vector<1x8x128xf32>
    tpu.vector_store %arg16[%c13, %c0_195, %c0_196], %523 {strides = array<i32>} : memref<28x8x128xf32, #tpu.memory_space<vmem>>, vector<1x8x128xf32>,
    %524 = vector.extract_strided_slice %203 {offsets = [48, 512], sizes = [8, 128], strides = [1, 1]} : vector<112x640xf32> to vector<8x128xf32>
    %525 = vector.extract_strided_slice %203 {offsets = [56, 256], sizes = [8, 128], strides = [1, 1]} : vector<112x640xf32> to vector<8x128xf32>
    %526 = arith.addf %524, %525 : vector<8x128xf32>
    %527 = vector.extract_strided_slice %203 {offsets = [64, 0], sizes = [8, 128], strides = [1, 1]} : vector<112x640xf32> to vector<8x128xf32>
    %528 = arith.addf %526, %527 : vector<8x128xf32>
    %529 = math.absf %528 : vector<8x128xf32>
    %cst_197 = arith.constant 0.000000e+00 : f32
    %530 = vector.broadcast %cst_197 : f32 to vector<8x128xf32>
    %531 = arith.subf %530, %529 : vector<8x128xf32>
    %532 = math.exp %531 : vector<8x128xf32>
    %cst_198 = arith.constant 0.000000e+00 : f32
    %533 = vector.broadcast %cst_198 : f32 to vector<8x128xf32>
    %534 = arith.cmpf oge, %528, %533 : vector<8x128xf32>
    %cst_199 = arith.constant 1.000000e+00 : f32
    %535 = vector.broadcast %cst_199 : f32 to vector<8x128xf32>
    %536 = arith.select %534, %535, %532 : vector<8x128xi1>, vector<8x128xf32>
    %cst_200 = arith.constant 1.000000e+00 : f32
    %537 = vector.broadcast %cst_200 : f32 to vector<8x128xf32>
    %538 = arith.addf %537, %532 : vector<8x128xf32>
    %539 = tpu.reciprocal %538 {approx = true} : vector<8x128xf32> -> vector<8x128xf32>
    %540 = arith.mulf %536, %539 : vector<8x128xf32>
    %cst_201 = arith.constant 0.000000e+00 : f32
    %cst_202 = arith.constant 1.000000e+00 : f32
    %541 = vector.broadcast %cst_201 : f32 to vector<8x128xf32>
    %542 = arith.maximumf %541, %540 : vector<8x128xf32>
    %543 = vector.broadcast %cst_202 : f32 to vector<8x128xf32>
    %544 = arith.minimumf %543, %542 : vector<8x128xf32>
    %c14 = arith.constant 14 : index
    %c0_203 = arith.constant 0 : index
    %c0_204 = arith.constant 0 : index
    %545 = vector.load %arg16[%c14, %c0_203, %c0_204] : memref<28x8x128xf32, #tpu.memory_space<vmem>>, vector<1x8x128xf32>
    %546 = vector.shape_cast %545 : vector<1x8x128xf32> to vector<8x128xf32>
    %547 = vector.shape_cast %544 : vector<8x128xf32> to vector<1x8x128xf32>
    tpu.vector_store %arg16[%c14, %c0_203, %c0_204], %547 {strides = array<i32>} : memref<28x8x128xf32, #tpu.memory_space<vmem>>, vector<1x8x128xf32>,
    %548 = vector.extract_strided_slice %203 {offsets = [56, 384], sizes = [8, 128], strides = [1, 1]} : vector<112x640xf32> to vector<8x128xf32>
    %549 = vector.extract_strided_slice %203 {offsets = [64, 128], sizes = [8, 128], strides = [1, 1]} : vector<112x640xf32> to vector<8x128xf32>
    %550 = arith.addf %548, %549 : vector<8x128xf32>
    %551 = math.absf %550 : vector<8x128xf32>
    %cst_205 = arith.constant 0.000000e+00 : f32
    %552 = vector.broadcast %cst_205 : f32 to vector<8x128xf32>
    %553 = arith.subf %552, %551 : vector<8x128xf32>
    %554 = math.exp %553 : vector<8x128xf32>
    %cst_206 = arith.constant 0.000000e+00 : f32
    %555 = vector.broadcast %cst_206 : f32 to vector<8x128xf32>
    %556 = arith.cmpf oge, %550, %555 : vector<8x128xf32>
    %cst_207 = arith.constant 1.000000e+00 : f32
    %557 = vector.broadcast %cst_207 : f32 to vector<8x128xf32>
    %558 = arith.select %556, %557, %554 : vector<8x128xi1>, vector<8x128xf32>
    %cst_208 = arith.constant 1.000000e+00 : f32
    %559 = vector.broadcast %cst_208 : f32 to vector<8x128xf32>
    %560 = arith.addf %559, %554 : vector<8x128xf32>
    %561 = tpu.reciprocal %560 {approx = true} : vector<8x128xf32> -> vector<8x128xf32>
    %562 = arith.mulf %558, %561 : vector<8x128xf32>
    %cst_209 = arith.constant 0.000000e+00 : f32
    %cst_210 = arith.constant 1.000000e+00 : f32
    %563 = vector.broadcast %cst_209 : f32 to vector<8x128xf32>
    %564 = arith.maximumf %563, %562 : vector<8x128xf32>
    %565 = vector.broadcast %cst_210 : f32 to vector<8x128xf32>
    %566 = arith.minimumf %565, %564 : vector<8x128xf32>
    %c15 = arith.constant 15 : index
    %c0_211 = arith.constant 0 : index
    %c0_212 = arith.constant 0 : index
    %567 = vector.load %arg16[%c15, %c0_211, %c0_212] : memref<28x8x128xf32, #tpu.memory_space<vmem>>, vector<1x8x128xf32>
    %568 = vector.shape_cast %567 : vector<1x8x128xf32> to vector<8x128xf32>
    %569 = vector.shape_cast %566 : vector<8x128xf32> to vector<1x8x128xf32>
    tpu.vector_store %arg16[%c15, %c0_211, %c0_212], %569 {strides = array<i32>} : memref<28x8x128xf32, #tpu.memory_space<vmem>>, vector<1x8x128xf32>,
    %570 = vector.extract_strided_slice %203 {offsets = [56, 512], sizes = [8, 128], strides = [1, 1]} : vector<112x640xf32> to vector<8x128xf32>
    %571 = vector.extract_strided_slice %203 {offsets = [64, 256], sizes = [8, 128], strides = [1, 1]} : vector<112x640xf32> to vector<8x128xf32>
    %572 = arith.addf %570, %571 : vector<8x128xf32>
    %573 = vector.extract_strided_slice %203 {offsets = [72, 0], sizes = [8, 128], strides = [1, 1]} : vector<112x640xf32> to vector<8x128xf32>
    %574 = arith.addf %572, %573 : vector<8x128xf32>
    %575 = math.absf %574 : vector<8x128xf32>
    %cst_213 = arith.constant 0.000000e+00 : f32
    %576 = vector.broadcast %cst_213 : f32 to vector<8x128xf32>
    %577 = arith.subf %576, %575 : vector<8x128xf32>
    %578 = math.exp %577 : vector<8x128xf32>
    %cst_214 = arith.constant 0.000000e+00 : f32
    %579 = vector.broadcast %cst_214 : f32 to vector<8x128xf32>
    %580 = arith.cmpf oge, %574, %579 : vector<8x128xf32>
    %cst_215 = arith.constant 1.000000e+00 : f32
    %581 = vector.broadcast %cst_215 : f32 to vector<8x128xf32>
    %582 = arith.select %580, %581, %578 : vector<8x128xi1>, vector<8x128xf32>
    %cst_216 = arith.constant 1.000000e+00 : f32
    %583 = vector.broadcast %cst_216 : f32 to vector<8x128xf32>
    %584 = arith.addf %583, %578 : vector<8x128xf32>
    %585 = tpu.reciprocal %584 {approx = true} : vector<8x128xf32> -> vector<8x128xf32>
    %586 = arith.mulf %582, %585 : vector<8x128xf32>
    %cst_217 = arith.constant 0.000000e+00 : f32
    %cst_218 = arith.constant 1.000000e+00 : f32
    %587 = vector.broadcast %cst_217 : f32 to vector<8x128xf32>
    %588 = arith.maximumf %587, %586 : vector<8x128xf32>
    %589 = vector.broadcast %cst_218 : f32 to vector<8x128xf32>
    %590 = arith.minimumf %589, %588 : vector<8x128xf32>
    %c16_219 = arith.constant 16 : index
    %c0_220 = arith.constant 0 : index
    %c0_221 = arith.constant 0 : index
    %591 = vector.load %arg16[%c16_219, %c0_220, %c0_221] : memref<28x8x128xf32, #tpu.memory_space<vmem>>, vector<1x8x128xf32>
    %592 = vector.shape_cast %591 : vector<1x8x128xf32> to vector<8x128xf32>
    %593 = vector.shape_cast %590 : vector<8x128xf32> to vector<1x8x128xf32>
    tpu.vector_store %arg16[%c16_219, %c0_220, %c0_221], %593 {strides = array<i32>} : memref<28x8x128xf32, #tpu.memory_space<vmem>>, vector<1x8x128xf32>,
    %594 = vector.extract_strided_slice %203 {offsets = [64, 384], sizes = [8, 128], strides = [1, 1]} : vector<112x640xf32> to vector<8x128xf32>
    %595 = vector.extract_strided_slice %203 {offsets = [72, 128], sizes = [8, 128], strides = [1, 1]} : vector<112x640xf32> to vector<8x128xf32>
    %596 = arith.addf %594, %595 : vector<8x128xf32>
    %597 = math.absf %596 : vector<8x128xf32>
    %cst_222 = arith.constant 0.000000e+00 : f32
    %598 = vector.broadcast %cst_222 : f32 to vector<8x128xf32>
    %599 = arith.subf %598, %597 : vector<8x128xf32>
    %600 = math.exp %599 : vector<8x128xf32>
    %cst_223 = arith.constant 0.000000e+00 : f32
    %601 = vector.broadcast %cst_223 : f32 to vector<8x128xf32>
    %602 = arith.cmpf oge, %596, %601 : vector<8x128xf32>
    %cst_224 = arith.constant 1.000000e+00 : f32
    %603 = vector.broadcast %cst_224 : f32 to vector<8x128xf32>
    %604 = arith.select %602, %603, %600 : vector<8x128xi1>, vector<8x128xf32>
    %cst_225 = arith.constant 1.000000e+00 : f32
    %605 = vector.broadcast %cst_225 : f32 to vector<8x128xf32>
    %606 = arith.addf %605, %600 : vector<8x128xf32>
    %607 = tpu.reciprocal %606 {approx = true} : vector<8x128xf32> -> vector<8x128xf32>
    %608 = arith.mulf %604, %607 : vector<8x128xf32>
    %cst_226 = arith.constant 0.000000e+00 : f32
    %cst_227 = arith.constant 1.000000e+00 : f32
    %609 = vector.broadcast %cst_226 : f32 to vector<8x128xf32>
    %610 = arith.maximumf %609, %608 : vector<8x128xf32>
    %611 = vector.broadcast %cst_227 : f32 to vector<8x128xf32>
    %612 = arith.minimumf %611, %610 : vector<8x128xf32>
    %c17 = arith.constant 17 : index
    %c0_228 = arith.constant 0 : index
    %c0_229 = arith.constant 0 : index
    %613 = vector.load %arg16[%c17, %c0_228, %c0_229] : memref<28x8x128xf32, #tpu.memory_space<vmem>>, vector<1x8x128xf32>
    %614 = vector.shape_cast %613 : vector<1x8x128xf32> to vector<8x128xf32>
    %615 = vector.shape_cast %612 : vector<8x128xf32> to vector<1x8x128xf32>
    tpu.vector_store %arg16[%c17, %c0_228, %c0_229], %615 {strides = array<i32>} : memref<28x8x128xf32, #tpu.memory_space<vmem>>, vector<1x8x128xf32>,
    %616 = vector.extract_strided_slice %203 {offsets = [64, 512], sizes = [8, 128], strides = [1, 1]} : vector<112x640xf32> to vector<8x128xf32>
    %617 = vector.extract_strided_slice %203 {offsets = [72, 256], sizes = [8, 128], strides = [1, 1]} : vector<112x640xf32> to vector<8x128xf32>
    %618 = arith.addf %616, %617 : vector<8x128xf32>
    %619 = vector.extract_strided_slice %203 {offsets = [80, 0], sizes = [8, 128], strides = [1, 1]} : vector<112x640xf32> to vector<8x128xf32>
    %620 = arith.addf %618, %619 : vector<8x128xf32>
    %621 = math.absf %620 : vector<8x128xf32>
    %cst_230 = arith.constant 0.000000e+00 : f32
    %622 = vector.broadcast %cst_230 : f32 to vector<8x128xf32>
    %623 = arith.subf %622, %621 : vector<8x128xf32>
    %624 = math.exp %623 : vector<8x128xf32>
    %cst_231 = arith.constant 0.000000e+00 : f32
    %625 = vector.broadcast %cst_231 : f32 to vector<8x128xf32>
    %626 = arith.cmpf oge, %620, %625 : vector<8x128xf32>
    %cst_232 = arith.constant 1.000000e+00 : f32
    %627 = vector.broadcast %cst_232 : f32 to vector<8x128xf32>
    %628 = arith.select %626, %627, %624 : vector<8x128xi1>, vector<8x128xf32>
    %cst_233 = arith.constant 1.000000e+00 : f32
    %629 = vector.broadcast %cst_233 : f32 to vector<8x128xf32>
    %630 = arith.addf %629, %624 : vector<8x128xf32>
    %631 = tpu.reciprocal %630 {approx = true} : vector<8x128xf32> -> vector<8x128xf32>
    %632 = arith.mulf %628, %631 : vector<8x128xf32>
    %cst_234 = arith.constant 0.000000e+00 : f32
    %cst_235 = arith.constant 1.000000e+00 : f32
    %633 = vector.broadcast %cst_234 : f32 to vector<8x128xf32>
    %634 = arith.maximumf %633, %632 : vector<8x128xf32>
    %635 = vector.broadcast %cst_235 : f32 to vector<8x128xf32>
    %636 = arith.minimumf %635, %634 : vector<8x128xf32>
    %c18 = arith.constant 18 : index
    %c0_236 = arith.constant 0 : index
    %c0_237 = arith.constant 0 : index
    %637 = vector.load %arg16[%c18, %c0_236, %c0_237] : memref<28x8x128xf32, #tpu.memory_space<vmem>>, vector<1x8x128xf32>
    %638 = vector.shape_cast %637 : vector<1x8x128xf32> to vector<8x128xf32>
    %639 = vector.shape_cast %636 : vector<8x128xf32> to vector<1x8x128xf32>
    tpu.vector_store %arg16[%c18, %c0_236, %c0_237], %639 {strides = array<i32>} : memref<28x8x128xf32, #tpu.memory_space<vmem>>, vector<1x8x128xf32>,
    %640 = vector.extract_strided_slice %203 {offsets = [72, 384], sizes = [8, 128], strides = [1, 1]} : vector<112x640xf32> to vector<8x128xf32>
    %641 = vector.extract_strided_slice %203 {offsets = [80, 128], sizes = [8, 128], strides = [1, 1]} : vector<112x640xf32> to vector<8x128xf32>
    %642 = arith.addf %640, %641 : vector<8x128xf32>
    %643 = math.absf %642 : vector<8x128xf32>
    %cst_238 = arith.constant 0.000000e+00 : f32
    %644 = vector.broadcast %cst_238 : f32 to vector<8x128xf32>
    %645 = arith.subf %644, %643 : vector<8x128xf32>
    %646 = math.exp %645 : vector<8x128xf32>
    %cst_239 = arith.constant 0.000000e+00 : f32
    %647 = vector.broadcast %cst_239 : f32 to vector<8x128xf32>
    %648 = arith.cmpf oge, %642, %647 : vector<8x128xf32>
    %cst_240 = arith.constant 1.000000e+00 : f32
    %649 = vector.broadcast %cst_240 : f32 to vector<8x128xf32>
    %650 = arith.select %648, %649, %646 : vector<8x128xi1>, vector<8x128xf32>
    %cst_241 = arith.constant 1.000000e+00 : f32
    %651 = vector.broadcast %cst_241 : f32 to vector<8x128xf32>
    %652 = arith.addf %651, %646 : vector<8x128xf32>
    %653 = tpu.reciprocal %652 {approx = true} : vector<8x128xf32> -> vector<8x128xf32>
    %654 = arith.mulf %650, %653 : vector<8x128xf32>
    %cst_242 = arith.constant 0.000000e+00 : f32
    %cst_243 = arith.constant 1.000000e+00 : f32
    %655 = vector.broadcast %cst_242 : f32 to vector<8x128xf32>
    %656 = arith.maximumf %655, %654 : vector<8x128xf32>
    %657 = vector.broadcast %cst_243 : f32 to vector<8x128xf32>
    %658 = arith.minimumf %657, %656 : vector<8x128xf32>
    %c19 = arith.constant 19 : index
    %c0_244 = arith.constant 0 : index
    %c0_245 = arith.constant 0 : index
    %659 = vector.load %arg16[%c19, %c0_244, %c0_245] : memref<28x8x128xf32, #tpu.memory_space<vmem>>, vector<1x8x128xf32>
    %660 = vector.shape_cast %659 : vector<1x8x128xf32> to vector<8x128xf32>
    %661 = vector.shape_cast %658 : vector<8x128xf32> to vector<1x8x128xf32>
    tpu.vector_store %arg16[%c19, %c0_244, %c0_245], %661 {strides = array<i32>} : memref<28x8x128xf32, #tpu.memory_space<vmem>>, vector<1x8x128xf32>,
    %662 = vector.extract_strided_slice %203 {offsets = [72, 512], sizes = [8, 128], strides = [1, 1]} : vector<112x640xf32> to vector<8x128xf32>
    %663 = vector.extract_strided_slice %203 {offsets = [80, 256], sizes = [8, 128], strides = [1, 1]} : vector<112x640xf32> to vector<8x128xf32>
    %664 = arith.addf %662, %663 : vector<8x128xf32>
    %665 = vector.extract_strided_slice %203 {offsets = [88, 0], sizes = [8, 128], strides = [1, 1]} : vector<112x640xf32> to vector<8x128xf32>
    %666 = arith.addf %664, %665 : vector<8x128xf32>
    %667 = math.absf %666 : vector<8x128xf32>
    %cst_246 = arith.constant 0.000000e+00 : f32
    %668 = vector.broadcast %cst_246 : f32 to vector<8x128xf32>
    %669 = arith.subf %668, %667 : vector<8x128xf32>
    %670 = math.exp %669 : vector<8x128xf32>
    %cst_247 = arith.constant 0.000000e+00 : f32
    %671 = vector.broadcast %cst_247 : f32 to vector<8x128xf32>
    %672 = arith.cmpf oge, %666, %671 : vector<8x128xf32>
    %cst_248 = arith.constant 1.000000e+00 : f32
    %673 = vector.broadcast %cst_248 : f32 to vector<8x128xf32>
    %674 = arith.select %672, %673, %670 : vector<8x128xi1>, vector<8x128xf32>
    %cst_249 = arith.constant 1.000000e+00 : f32
    %675 = vector.broadcast %cst_249 : f32 to vector<8x128xf32>
    %676 = arith.addf %675, %670 : vector<8x128xf32>
    %677 = tpu.reciprocal %676 {approx = true} : vector<8x128xf32> -> vector<8x128xf32>
    %678 = arith.mulf %674, %677 : vector<8x128xf32>
    %cst_250 = arith.constant 0.000000e+00 : f32
    %cst_251 = arith.constant 1.000000e+00 : f32
    %679 = vector.broadcast %cst_250 : f32 to vector<8x128xf32>
    %680 = arith.maximumf %679, %678 : vector<8x128xf32>
    %681 = vector.broadcast %cst_251 : f32 to vector<8x128xf32>
    %682 = arith.minimumf %681, %680 : vector<8x128xf32>
    %c20 = arith.constant 20 : index
    %c0_252 = arith.constant 0 : index
    %c0_253 = arith.constant 0 : index
    %683 = vector.load %arg16[%c20, %c0_252, %c0_253] : memref<28x8x128xf32, #tpu.memory_space<vmem>>, vector<1x8x128xf32>
    %684 = vector.shape_cast %683 : vector<1x8x128xf32> to vector<8x128xf32>
    %685 = vector.shape_cast %682 : vector<8x128xf32> to vector<1x8x128xf32>
    tpu.vector_store %arg16[%c20, %c0_252, %c0_253], %685 {strides = array<i32>} : memref<28x8x128xf32, #tpu.memory_space<vmem>>, vector<1x8x128xf32>,
    %686 = vector.extract_strided_slice %203 {offsets = [80, 384], sizes = [8, 128], strides = [1, 1]} : vector<112x640xf32> to vector<8x128xf32>
    %687 = vector.extract_strided_slice %203 {offsets = [88, 128], sizes = [8, 128], strides = [1, 1]} : vector<112x640xf32> to vector<8x128xf32>
    %688 = arith.addf %686, %687 : vector<8x128xf32>
    %689 = math.absf %688 : vector<8x128xf32>
    %cst_254 = arith.constant 0.000000e+00 : f32
    %690 = vector.broadcast %cst_254 : f32 to vector<8x128xf32>
    %691 = arith.subf %690, %689 : vector<8x128xf32>
    %692 = math.exp %691 : vector<8x128xf32>
    %cst_255 = arith.constant 0.000000e+00 : f32
    %693 = vector.broadcast %cst_255 : f32 to vector<8x128xf32>
    %694 = arith.cmpf oge, %688, %693 : vector<8x128xf32>
    %cst_256 = arith.constant 1.000000e+00 : f32
    %695 = vector.broadcast %cst_256 : f32 to vector<8x128xf32>
    %696 = arith.select %694, %695, %692 : vector<8x128xi1>, vector<8x128xf32>
    %cst_257 = arith.constant 1.000000e+00 : f32
    %697 = vector.broadcast %cst_257 : f32 to vector<8x128xf32>
    %698 = arith.addf %697, %692 : vector<8x128xf32>
    %699 = tpu.reciprocal %698 {approx = true} : vector<8x128xf32> -> vector<8x128xf32>
    %700 = arith.mulf %696, %699 : vector<8x128xf32>
    %cst_258 = arith.constant 0.000000e+00 : f32
    %cst_259 = arith.constant 1.000000e+00 : f32
    %701 = vector.broadcast %cst_258 : f32 to vector<8x128xf32>
    %702 = arith.maximumf %701, %700 : vector<8x128xf32>
    %703 = vector.broadcast %cst_259 : f32 to vector<8x128xf32>
    %704 = arith.minimumf %703, %702 : vector<8x128xf32>
    %c21 = arith.constant 21 : index
    %c0_260 = arith.constant 0 : index
    %c0_261 = arith.constant 0 : index
    %705 = vector.load %arg16[%c21, %c0_260, %c0_261] : memref<28x8x128xf32, #tpu.memory_space<vmem>>, vector<1x8x128xf32>
    %706 = vector.shape_cast %705 : vector<1x8x128xf32> to vector<8x128xf32>
    %707 = vector.shape_cast %704 : vector<8x128xf32> to vector<1x8x128xf32>
    tpu.vector_store %arg16[%c21, %c0_260, %c0_261], %707 {strides = array<i32>} : memref<28x8x128xf32, #tpu.memory_space<vmem>>, vector<1x8x128xf32>,
    %708 = vector.extract_strided_slice %203 {offsets = [80, 512], sizes = [8, 128], strides = [1, 1]} : vector<112x640xf32> to vector<8x128xf32>
    %709 = vector.extract_strided_slice %203 {offsets = [88, 256], sizes = [8, 128], strides = [1, 1]} : vector<112x640xf32> to vector<8x128xf32>
    %710 = arith.addf %708, %709 : vector<8x128xf32>
    %711 = vector.extract_strided_slice %203 {offsets = [96, 0], sizes = [8, 128], strides = [1, 1]} : vector<112x640xf32> to vector<8x128xf32>
    %712 = arith.addf %710, %711 : vector<8x128xf32>
    %713 = math.absf %712 : vector<8x128xf32>
    %cst_262 = arith.constant 0.000000e+00 : f32
    %714 = vector.broadcast %cst_262 : f32 to vector<8x128xf32>
    %715 = arith.subf %714, %713 : vector<8x128xf32>
    %716 = math.exp %715 : vector<8x128xf32>
    %cst_263 = arith.constant 0.000000e+00 : f32
    %717 = vector.broadcast %cst_263 : f32 to vector<8x128xf32>
    %718 = arith.cmpf oge, %712, %717 : vector<8x128xf32>
    %cst_264 = arith.constant 1.000000e+00 : f32
    %719 = vector.broadcast %cst_264 : f32 to vector<8x128xf32>
    %720 = arith.select %718, %719, %716 : vector<8x128xi1>, vector<8x128xf32>
    %cst_265 = arith.constant 1.000000e+00 : f32
    %721 = vector.broadcast %cst_265 : f32 to vector<8x128xf32>
    %722 = arith.addf %721, %716 : vector<8x128xf32>
    %723 = tpu.reciprocal %722 {approx = true} : vector<8x128xf32> -> vector<8x128xf32>
    %724 = arith.mulf %720, %723 : vector<8x128xf32>
    %cst_266 = arith.constant 0.000000e+00 : f32
    %cst_267 = arith.constant 1.000000e+00 : f32
    %725 = vector.broadcast %cst_266 : f32 to vector<8x128xf32>
    %726 = arith.maximumf %725, %724 : vector<8x128xf32>
    %727 = vector.broadcast %cst_267 : f32 to vector<8x128xf32>
    %728 = arith.minimumf %727, %726 : vector<8x128xf32>
    %c22 = arith.constant 22 : index
    %c0_268 = arith.constant 0 : index
    %c0_269 = arith.constant 0 : index
    %729 = vector.load %arg16[%c22, %c0_268, %c0_269] : memref<28x8x128xf32, #tpu.memory_space<vmem>>, vector<1x8x128xf32>
    %730 = vector.shape_cast %729 : vector<1x8x128xf32> to vector<8x128xf32>
    %731 = vector.shape_cast %728 : vector<8x128xf32> to vector<1x8x128xf32>
    tpu.vector_store %arg16[%c22, %c0_268, %c0_269], %731 {strides = array<i32>} : memref<28x8x128xf32, #tpu.memory_space<vmem>>, vector<1x8x128xf32>,
    %732 = vector.extract_strided_slice %203 {offsets = [88, 384], sizes = [8, 128], strides = [1, 1]} : vector<112x640xf32> to vector<8x128xf32>
    %733 = vector.extract_strided_slice %203 {offsets = [96, 128], sizes = [8, 128], strides = [1, 1]} : vector<112x640xf32> to vector<8x128xf32>
    %734 = arith.addf %732, %733 : vector<8x128xf32>
    %735 = math.absf %734 : vector<8x128xf32>
    %cst_270 = arith.constant 0.000000e+00 : f32
    %736 = vector.broadcast %cst_270 : f32 to vector<8x128xf32>
    %737 = arith.subf %736, %735 : vector<8x128xf32>
    %738 = math.exp %737 : vector<8x128xf32>
    %cst_271 = arith.constant 0.000000e+00 : f32
    %739 = vector.broadcast %cst_271 : f32 to vector<8x128xf32>
    %740 = arith.cmpf oge, %734, %739 : vector<8x128xf32>
    %cst_272 = arith.constant 1.000000e+00 : f32
    %741 = vector.broadcast %cst_272 : f32 to vector<8x128xf32>
    %742 = arith.select %740, %741, %738 : vector<8x128xi1>, vector<8x128xf32>
    %cst_273 = arith.constant 1.000000e+00 : f32
    %743 = vector.broadcast %cst_273 : f32 to vector<8x128xf32>
    %744 = arith.addf %743, %738 : vector<8x128xf32>
    %745 = tpu.reciprocal %744 {approx = true} : vector<8x128xf32> -> vector<8x128xf32>
    %746 = arith.mulf %742, %745 : vector<8x128xf32>
    %cst_274 = arith.constant 0.000000e+00 : f32
    %cst_275 = arith.constant 1.000000e+00 : f32
    %747 = vector.broadcast %cst_274 : f32 to vector<8x128xf32>
    %748 = arith.maximumf %747, %746 : vector<8x128xf32>
    %749 = vector.broadcast %cst_275 : f32 to vector<8x128xf32>
    %750 = arith.minimumf %749, %748 : vector<8x128xf32>
    %c23 = arith.constant 23 : index
    %c0_276 = arith.constant 0 : index
    %c0_277 = arith.constant 0 : index
    %751 = vector.load %arg16[%c23, %c0_276, %c0_277] : memref<28x8x128xf32, #tpu.memory_space<vmem>>, vector<1x8x128xf32>
    %752 = vector.shape_cast %751 : vector<1x8x128xf32> to vector<8x128xf32>
    %753 = vector.shape_cast %750 : vector<8x128xf32> to vector<1x8x128xf32>
    tpu.vector_store %arg16[%c23, %c0_276, %c0_277], %753 {strides = array<i32>} : memref<28x8x128xf32, #tpu.memory_space<vmem>>, vector<1x8x128xf32>,
    %754 = vector.extract_strided_slice %203 {offsets = [88, 512], sizes = [8, 128], strides = [1, 1]} : vector<112x640xf32> to vector<8x128xf32>
    %755 = vector.extract_strided_slice %203 {offsets = [96, 256], sizes = [8, 128], strides = [1, 1]} : vector<112x640xf32> to vector<8x128xf32>
    %756 = arith.addf %754, %755 : vector<8x128xf32>
    %757 = vector.extract_strided_slice %203 {offsets = [104, 0], sizes = [8, 128], strides = [1, 1]} : vector<112x640xf32> to vector<8x128xf32>
    %758 = arith.addf %756, %757 : vector<8x128xf32>
    %759 = math.absf %758 : vector<8x128xf32>
    %cst_278 = arith.constant 0.000000e+00 : f32
    %760 = vector.broadcast %cst_278 : f32 to vector<8x128xf32>
    %761 = arith.subf %760, %759 : vector<8x128xf32>
    %762 = math.exp %761 : vector<8x128xf32>
    %cst_279 = arith.constant 0.000000e+00 : f32
    %763 = vector.broadcast %cst_279 : f32 to vector<8x128xf32>
    %764 = arith.cmpf oge, %758, %763 : vector<8x128xf32>
    %cst_280 = arith.constant 1.000000e+00 : f32
    %765 = vector.broadcast %cst_280 : f32 to vector<8x128xf32>
    %766 = arith.select %764, %765, %762 : vector<8x128xi1>, vector<8x128xf32>
    %cst_281 = arith.constant 1.000000e+00 : f32
    %767 = vector.broadcast %cst_281 : f32 to vector<8x128xf32>
    %768 = arith.addf %767, %762 : vector<8x128xf32>
    %769 = tpu.reciprocal %768 {approx = true} : vector<8x128xf32> -> vector<8x128xf32>
    %770 = arith.mulf %766, %769 : vector<8x128xf32>
    %cst_282 = arith.constant 0.000000e+00 : f32
    %cst_283 = arith.constant 1.000000e+00 : f32
    %771 = vector.broadcast %cst_282 : f32 to vector<8x128xf32>
    %772 = arith.maximumf %771, %770 : vector<8x128xf32>
    %773 = vector.broadcast %cst_283 : f32 to vector<8x128xf32>
    %774 = arith.minimumf %773, %772 : vector<8x128xf32>
    %c24_284 = arith.constant 24 : index
    %c0_285 = arith.constant 0 : index
    %c0_286 = arith.constant 0 : index
    %775 = vector.load %arg16[%c24_284, %c0_285, %c0_286] : memref<28x8x128xf32, #tpu.memory_space<vmem>>, vector<1x8x128xf32>
    %776 = vector.shape_cast %775 : vector<1x8x128xf32> to vector<8x128xf32>
    %777 = vector.shape_cast %774 : vector<8x128xf32> to vector<1x8x128xf32>
    tpu.vector_store %arg16[%c24_284, %c0_285, %c0_286], %777 {strides = array<i32>} : memref<28x8x128xf32, #tpu.memory_space<vmem>>, vector<1x8x128xf32>,
    %778 = vector.extract_strided_slice %203 {offsets = [96, 384], sizes = [8, 128], strides = [1, 1]} : vector<112x640xf32> to vector<8x128xf32>
    %779 = vector.extract_strided_slice %203 {offsets = [104, 128], sizes = [8, 128], strides = [1, 1]} : vector<112x640xf32> to vector<8x128xf32>
    %780 = arith.addf %778, %779 : vector<8x128xf32>
    %781 = math.absf %780 : vector<8x128xf32>
    %cst_287 = arith.constant 0.000000e+00 : f32
    %782 = vector.broadcast %cst_287 : f32 to vector<8x128xf32>
    %783 = arith.subf %782, %781 : vector<8x128xf32>
    %784 = math.exp %783 : vector<8x128xf32>
    %cst_288 = arith.constant 0.000000e+00 : f32
    %785 = vector.broadcast %cst_288 : f32 to vector<8x128xf32>
    %786 = arith.cmpf oge, %780, %785 : vector<8x128xf32>
    %cst_289 = arith.constant 1.000000e+00 : f32
    %787 = vector.broadcast %cst_289 : f32 to vector<8x128xf32>
    %788 = arith.select %786, %787, %784 : vector<8x128xi1>, vector<8x128xf32>
    %cst_290 = arith.constant 1.000000e+00 : f32
    %789 = vector.broadcast %cst_290 : f32 to vector<8x128xf32>
    %790 = arith.addf %789, %784 : vector<8x128xf32>
    %791 = tpu.reciprocal %790 {approx = true} : vector<8x128xf32> -> vector<8x128xf32>
    %792 = arith.mulf %788, %791 : vector<8x128xf32>
    %cst_291 = arith.constant 0.000000e+00 : f32
    %cst_292 = arith.constant 1.000000e+00 : f32
    %793 = vector.broadcast %cst_291 : f32 to vector<8x128xf32>
    %794 = arith.maximumf %793, %792 : vector<8x128xf32>
    %795 = vector.broadcast %cst_292 : f32 to vector<8x128xf32>
    %796 = arith.minimumf %795, %794 : vector<8x128xf32>
    %c25 = arith.constant 25 : index
    %c0_293 = arith.constant 0 : index
    %c0_294 = arith.constant 0 : index
    %797 = vector.load %arg16[%c25, %c0_293, %c0_294] : memref<28x8x128xf32, #tpu.memory_space<vmem>>, vector<1x8x128xf32>
    %798 = vector.shape_cast %797 : vector<1x8x128xf32> to vector<8x128xf32>
    %799 = vector.shape_cast %796 : vector<8x128xf32> to vector<1x8x128xf32>
    tpu.vector_store %arg16[%c25, %c0_293, %c0_294], %799 {strides = array<i32>} : memref<28x8x128xf32, #tpu.memory_space<vmem>>, vector<1x8x128xf32>,
    %800 = vector.extract_strided_slice %203 {offsets = [96, 512], sizes = [8, 128], strides = [1, 1]} : vector<112x640xf32> to vector<8x128xf32>
    %801 = vector.extract_strided_slice %203 {offsets = [104, 256], sizes = [8, 128], strides = [1, 1]} : vector<112x640xf32> to vector<8x128xf32>
    %802 = arith.addf %800, %801 : vector<8x128xf32>
    %803 = math.absf %802 : vector<8x128xf32>
    %cst_295 = arith.constant 0.000000e+00 : f32
    %804 = vector.broadcast %cst_295 : f32 to vector<8x128xf32>
    %805 = arith.subf %804, %803 : vector<8x128xf32>
    %806 = math.exp %805 : vector<8x128xf32>
    %cst_296 = arith.constant 0.000000e+00 : f32
    %807 = vector.broadcast %cst_296 : f32 to vector<8x128xf32>
    %808 = arith.cmpf oge, %802, %807 : vector<8x128xf32>
    %cst_297 = arith.constant 1.000000e+00 : f32
    %809 = vector.broadcast %cst_297 : f32 to vector<8x128xf32>
    %810 = arith.select %808, %809, %806 : vector<8x128xi1>, vector<8x128xf32>
    %cst_298 = arith.constant 1.000000e+00 : f32
    %811 = vector.broadcast %cst_298 : f32 to vector<8x128xf32>
    %812 = arith.addf %811, %806 : vector<8x128xf32>
    %813 = tpu.reciprocal %812 {approx = true} : vector<8x128xf32> -> vector<8x128xf32>
    %814 = arith.mulf %810, %813 : vector<8x128xf32>
    %cst_299 = arith.constant 0.000000e+00 : f32
    %cst_300 = arith.constant 1.000000e+00 : f32
    %815 = vector.broadcast %cst_299 : f32 to vector<8x128xf32>
    %816 = arith.maximumf %815, %814 : vector<8x128xf32>
    %817 = vector.broadcast %cst_300 : f32 to vector<8x128xf32>
    %818 = arith.minimumf %817, %816 : vector<8x128xf32>
    %c26 = arith.constant 26 : index
    %c0_301 = arith.constant 0 : index
    %c0_302 = arith.constant 0 : index
    %819 = vector.load %arg16[%c26, %c0_301, %c0_302] : memref<28x8x128xf32, #tpu.memory_space<vmem>>, vector<1x8x128xf32>
    %820 = vector.shape_cast %819 : vector<1x8x128xf32> to vector<8x128xf32>
    %821 = vector.shape_cast %818 : vector<8x128xf32> to vector<1x8x128xf32>
    tpu.vector_store %arg16[%c26, %c0_301, %c0_302], %821 {strides = array<i32>} : memref<28x8x128xf32, #tpu.memory_space<vmem>>, vector<1x8x128xf32>,
    %822 = vector.extract_strided_slice %203 {offsets = [104, 384], sizes = [8, 128], strides = [1, 1]} : vector<112x640xf32> to vector<8x128xf32>
    %823 = math.absf %822 : vector<8x128xf32>
    %cst_303 = arith.constant 0.000000e+00 : f32
    %824 = vector.broadcast %cst_303 : f32 to vector<8x128xf32>
    %825 = arith.subf %824, %823 : vector<8x128xf32>
    %826 = math.exp %825 : vector<8x128xf32>
    %cst_304 = arith.constant 0.000000e+00 : f32
    %827 = vector.broadcast %cst_304 : f32 to vector<8x128xf32>
    %828 = arith.cmpf oge, %822, %827 : vector<8x128xf32>
    %cst_305 = arith.constant 1.000000e+00 : f32
    %829 = vector.broadcast %cst_305 : f32 to vector<8x128xf32>
    %830 = arith.select %828, %829, %826 : vector<8x128xi1>, vector<8x128xf32>
    %cst_306 = arith.constant 1.000000e+00 : f32
    %831 = vector.broadcast %cst_306 : f32 to vector<8x128xf32>
    %832 = arith.addf %831, %826 : vector<8x128xf32>
    %833 = tpu.reciprocal %832 {approx = true} : vector<8x128xf32> -> vector<8x128xf32>
    %834 = arith.mulf %830, %833 : vector<8x128xf32>
    %cst_307 = arith.constant 0.000000e+00 : f32
    %cst_308 = arith.constant 1.000000e+00 : f32
    %835 = vector.broadcast %cst_307 : f32 to vector<8x128xf32>
    %836 = arith.maximumf %835, %834 : vector<8x128xf32>
    %837 = vector.broadcast %cst_308 : f32 to vector<8x128xf32>
    %838 = arith.minimumf %837, %836 : vector<8x128xf32>
    %c27 = arith.constant 27 : index
    %c0_309 = arith.constant 0 : index
    %c0_310 = arith.constant 0 : index
    %839 = vector.load %arg16[%c27, %c0_309, %c0_310] : memref<28x8x128xf32, #tpu.memory_space<vmem>>, vector<1x8x128xf32>
    %840 = vector.shape_cast %839 : vector<1x8x128xf32> to vector<8x128xf32>
    %841 = vector.shape_cast %838 : vector<8x128xf32> to vector<1x8x128xf32>
    tpu.vector_store %arg16[%c27, %c0_309, %c0_310], %841 {strides = array<i32>} : memref<28x8x128xf32, #tpu.memory_space<vmem>>, vector<1x8x128xf32>,
    return
  }
}

</mosaic_0001>

<bundles_post_ra>
// kernel: generator_forward.1
= control target key start
LH: loop header
LB: loop body
LE: loop exit
PB: predicated region body
PF: predicated region fallthrough
CT: control target
= control target key end

     0   :  { %s11325_s0 = inlined_call_operand.vmem [shape: bf16[8,16], index: 0, kind: input, shape index: {}]   ;;  %s11326_s1 = inlined_call_operand.vmem [shape: f32[8,100], index: 1, kind: input, shape index: {}]   ;;  %s11327_s2 = inlined_call_operand.vmem [shape: bf16[16,896], index: 2, kind: input, shape index: {}]   ;;  %s11328_s3 = inlined_call_operand.vmem [shape: f32[1,896], index: 3, kind: input, shape index: {}]   ;;  %s11329_s4 = inlined_call_operand.vmem [shape: f32[1,896], index: 4, kind: input, shape index: {}]   ;;  %s11330_s5 = inlined_call_operand.vmem [shape: f32[1,896], index: 5, kind: input, shape index: {}]   ;;  %s11331_s6 = inlined_call_operand.vmem [shape: bf16[100,896], index: 6, kind: input, shape index: {}]   ;;  %s11332_s7 = inlined_call_operand.vmem [shape: f32[1,896], index: 7, kind: input, shape index: {}]   ;;  %s11333_s8 = inlined_call_operand.vmem [shape: f32[1,896], index: 8, kind: input, shape index: {}]   ;;  %s11334_s9 = inlined_call_operand.vmem [shape: f32[1,896], index: 9, kind: input, shape index: {}]   ;;  %s11335_s10 = inlined_call_operand.hbm [shape: bf16[128,2560], index: 10, kind: input, shape index: {}]   ;;  %s11336_s11 = inlined_call_operand.vmem [shape: f32[1,512], index: 11, kind: input, shape index: {}]   ;;  %s11337_s12 = inlined_call_operand.vmem [shape: f32[1,512], index: 12, kind: input, shape index: {}]   ;;  %s11338_s13 = inlined_call_operand.hbm [shape: bf16[512,640], index: 13, kind: input, shape index: {}]   ;;  %s11339_s14 = inlined_call_operand.vmem [shape: f32[512,32], index: 14, kind: input, shape index: {}]   ;;  %s11340_s15 = inlined_call_operand.vmem [shape: f32[32,512], index: 15, kind: input, shape index: {}]   ;;  %s11341_s16 = inlined_call_operand.vmem [shape: f32[28,8,128], index: 16, kind: output, shape index: {}]  }
   0x1   :  { %11441 = sst [smem:[#allocation130_spill]] %s11325_s0 }
   0x2   :  { %21 = vsyncpa [#allocation4], 0  ;;  %s47_s23 = sshll.u32 %s11335_s10, 4  ;;  %s48_s23 = int_to_ptr.hbm [resolvable:$true] %s47_s23 }
   0x3   :  { %22 = vsyncpa [#allocation6], 0  ;;  %s8341_s24 = smov [#allocation3]   ;;  %s64_s28 = sshll.u32 %s11338_s13, 4  ;;  %s65_s28 = int_to_ptr.hbm [resolvable:$true] %s64_s28 }
   0x4   :  { %s49_s25 = sshll.u32 %s8341_s24, 4  ;;  %s8342_s29 = smov 1280   ;;  %s50_s25 = int_to_ptr.vmem [resolvable:$true] %s49_s25 }
   0x5   :  { %s8343_s30 = smov 80   ;;  %s8344_s0 = smov [#allocation5]  }
   0x6   :  { %55 = dma.hbm_to_vmem [thread:$0]  %s48_s23, 20480, %s50_s25, [#allocation4], %s8342_s29, %s8342_s29, %s8343_s30  }
   0x7   :  { %s66_s17 = sshll.u32 %s8344_s0, 4  ;;  %s8345_s18 = smov 320   ;;  %s67_s17 = int_to_ptr.vmem [resolvable:$true] %s66_s17 }
   0x8   :  { %s8346_s19 = smov 20  }
   0x9   :  { %72 = dma.hbm_to_vmem [thread:$0]  %s65_s28, 20480, %s67_s17, [#allocation6], %s8345_s18, %s8345_s18, %s8346_s19  }
   0xa   :  { %8337 = dma.done.wait [#allocation4], 20480  }
   0xb   :  { %8338 = vsyncadd [#allocation4], 4294946816 }
   0xc   :  { %8339 = dma.done.wait [#allocation6], 20480  }
   0xd   :  { %8340 = vsyncadd [#allocation6], 4294946816  ;;  %vm152_vm0 = vcmask 130048   ;;  %v6248_v0 = vld [vmem:[%s11327_s2] sm:$0xf]  ;;  %s11442_s20 = sld [smem:[#allocation130_spill]] }
   0xe   :  { %v7774_v1 = vld [vmem:[%s11327_s2 + $0x18] sm:$0xf0]  ;;  %v7771_v2 = vld [vmem:[%s11327_s2 + $0x4] sm:$0xf]  ;;  %v6250_v4 = vld [vmem:[%s11327_s2 + $0x1c] sm:$0xf0] }
   0xf   :  { %v6249_v3 = vor.u32 %v7774_v1, %v6248_v0  ;;  %v6256_v5 = vld [vmem:[%s11327_s2 + $0x8] sm:$0xf]  ;;  %v7775_v6 = vld [vmem:[%s11327_s2 + $0x20] sm:$0xf0]  ;;  %v6253_v7 = vor.u32 %v7771_v2, %v6250_v4  ;;  %v7772_v9 = vld [vmem:[%s11327_s2 + $0xc] sm:$0xf] }
  0x10   :  { %v6257_v8 = vor.u32 %v7775_v6, %v6256_v5  ;;  %v6258_v10 = vld [vmem:[%s11327_s2 + $0x24] sm:$0xf0]  ;;  %v6264_v13 = vld [vmem:[%s11327_s2 + $0x10] sm:$0xf]  ;;  %v7776_v14 = vld [vmem:[%s11327_s2 + $0x28] sm:$0xf0] }
  0x11   :  { %163 = vmatpush.bf16.msra.mxu0 %v6249_v3  ;;  %v6261_v12 = vor.u32 %v7772_v9, %v6258_v10  ;;  %v7773_v15 = vld [vmem:[%s11327_s2 + $0x14] sm:$0xf]  ;;  %176 = vmatpush.bf16.msra.mxu1 %v6253_v7  ;;  %v6265_v16 = vor.u32 %v7776_v14, %v6264_v13  ;;  %v6266_v17 = vld [vmem:[%s11327_s2 + $0x2c] sm:$0xf0]  ;;  %v589_v19 = vld [vmem:[%s11331_s6 + $0x158] sm:$0x33] }
  0x12   :  { %189 = vmatpush.bf16.msra.mxu2 %v6257_v8  ;;  %v588_v18 = vld [vmem:[%s11331_s6 + $0x150] sm:$0x33]  ;;  %v6269_v20 = vor.u32 %v7773_v15, %v6266_v17  ;;  %v746_v23 = vunpack.c.l.b16 %v589_v19  ;;  %v6272_v24 = vld [vmem:[%s11327_s2 + $0x18] sm:$0xf]  ;;  %vm846_vm1 = vcmask 1041408   ;;  %v747_v28 = vunpack.c.h.b16 %v589_v19 }
  0x13   :  { %v8466_v11 = vld [vmem:[%s11442_s20] sm:$0xf]  ;;  %202 = vmatpush.bf16.msra.mxu3 %v6261_v12  ;;  %v744_v21 = vunpack.c.l.b16 %v588_v18  ;;  %v745_v22 = vunpack.c.h.b16 %v588_v18  ;;  %v7777_v25 = vld [vmem:[%s11327_s2 + $0x30] sm:$0xf0]  ;;  %v6423_v27 = vld [vmem:[%s11331_s6 + $0x118] sm:$0xf] }
  0x14   :  { %6274 = vmatmul.msk.bf16.vlgmr.msra.gmra.mxu0 %vm152_vm0, %v8466_v11  ;;  %v6273_v26 = vor.u32 %v7777_v25, %v6272_v24  ;;  %6275 = vmatmul.msk.bf16.vlgmr.msra.gmra.mxu1 %vm152_vm0, %v8466_v11  ;;  %v795_v31 = vpack.c.b16 %v746_v23, %v746_v23  ;;  %v7816_v32 = vld [vmem:[%s11331_s6 + $0x130] sm:$0xf0]  ;;  %v7813_v33 = vld [vmem:[%s11331_s6 + $0x11c] sm:$0xf]  ;;  %v6425_v34 = vld [vmem:[%s11331_s6 + $0x134] sm:$0xf0]  ;;  %v796_v40 = vpack.c.b16 %v747_v28, %v747_v28 }
  0x15   :  { %6276 = vmatmul.msk.bf16.vlgmr.msra.gmra.mxu2 %vm152_vm0, %v8466_v11  ;;  %v793_v29 = vpack.c.b16 %v744_v21, %v744_v21  ;;  %v794_v30 = vpack.c.b16 %v745_v22, %v745_v22  ;;  %215 = vmatpush.bf16.msrb.mxu0 %v6265_v16  ;;  %v6431_v35 = vld [vmem:[%s11331_s6 + $0x120] sm:$0xf]  ;;  %v7817_v36 = vld [vmem:[%s11331_s6 + $0x138] sm:$0xf0]  ;;  %v6424_v42 = vor.u32 %v7816_v32, %v6423_v27  ;;  %v7814_v45 = vld [vmem:[%s11331_s6 + $0x124] sm:$0xf] }
  0x16   :  { %6277 = vmatmul.msk.bf16.vlgmr.msra.gmra.mxu3 %vm152_vm0, %v8466_v11  ;;  %228 = vmatpush.bf16.msrb.mxu1 %v6269_v20  ;;  %v854_v39 = vsel %vm846_vm1, %v795_v31, 0  ;;  %v6395_v41 = vld [vmem:[%s11331_s6 + $0xe0] sm:$0xf]  ;;  %v6428_v43 = vor.u32 %v7813_v33, %v6425_v34  ;;  %v7809_v44 = vld [vmem:[%s11331_s6 + $0xf8] sm:$0xf0]  ;;  %v6432_v47 = vor.u32 %v7817_v36, %v6431_v35  ;;  %v857_v48 = vsel %vm846_vm1, %v796_v40, 0 }
  0x17   :  { %v848_v37 = vsel %vm846_vm1, %v793_v29, 0  ;;  %v851_v38 = vsel %vm846_vm1, %v794_v30, 0  ;;  %241 = vmatpush.bf16.msrb.mxu2 %v6273_v26  ;;  %v6433_v46 = vld [vmem:[%s11331_s6 + $0x13c] sm:$0xf0]  ;;  %v7806_v49 = vld [vmem:[%s11331_s6 + $0xe4] sm:$0xf]  ;;  %v6396_v56 = vor.u32 %v7809_v44, %v6395_v41 }
  0x18   :  { %869 = vmatpush.bf16.msrb.mxu3 %v848_v37  ;;  %v6397_v50 = vld [vmem:[%s11331_s6 + $0xfc] sm:$0xf0]  ;;  %v6403_v51 = vld [vmem:[%s11331_s6 + $0xe8] sm:$0xf]  ;;  %v7810_v52 = vld [vmem:[%s11331_s6 + $0x100] sm:$0xf0]  ;;  %v6436_v53 = vor.u32 %v7814_v45, %v6433_v46 }
  0x19   :  { %882 = vmatpush.bf16.msra.mxu0 %v851_v38  ;;  %v7807_v54 = vld [vmem:[%s11331_s6 + $0xec] sm:$0xf]  ;;  %v6405_v55 = vld [vmem:[%s11331_s6 + $0x104] sm:$0xf0]  ;;  %v6400_v57 = vor.u32 %v7806_v49, %v6397_v50  ;;  %v6404_v59 = vor.u32 %v7810_v52, %v6403_v51  ;;  %v7802_v60 = vld [vmem:[%s11331_s6 + $0xc0] sm:$0xf0] }
  0x1a   :  { %895 = vmatpush.bf16.msra.mxu1 %v854_v39  ;;  %v6367_v58 = vld [vmem:[%s11331_s6 + $0xa8] sm:$0xf]  ;;  %v7799_v61 = vld [vmem:[%s11331_s6 + $0xac] sm:$0xf]  ;;  %v6375_v63 = vld [vmem:[%s11331_s6 + $0xb0] sm:$0xf]  ;;  %v6408_v1 = vor.u32 %v7807_v54, %v6405_v55 }
  0x1b   :  { %908 = vmatpush.bf16.msra.mxu2 %v857_v48  ;;  %v6369_v62 = vld [vmem:[%s11331_s6 + $0xc4] sm:$0xf0]  ;;  %v7803_v0 = vld [vmem:[%s11331_s6 + $0xc8] sm:$0xf0]  ;;  %v6368_v2 = vor.u32 %v7802_v60, %v6367_v58  ;;  %v6339_v4 = vld [vmem:[%s11331_s6 + $0x70] sm:$0xf] }
  0x1c   :  { %870 = vmatpush.bf16.msrb.mxu3 %v6424_v42  ;;  %v6372_v3 = vor.u32 %v7799_v61, %v6369_v62  ;;  %v7800_v5 = vld [vmem:[%s11331_s6 + $0xb4] sm:$0xf]  ;;  %v6377_v6 = vld [vmem:[%s11331_s6 + $0xcc] sm:$0xf0]  ;;  %v6376_v7 = vor.u32 %v7803_v0, %v6375_v63  ;;  %v7795_v8 = vld [vmem:[%s11331_s6 + $0x88] sm:$0xf0] }
  0x1d   :  { %883 = vmatpush.bf16.msra.mxu0 %v6428_v43  ;;  %v7792_v9 = vld [vmem:[%s11331_s6 + $0x74] sm:$0xf]  ;;  %v6341_v10 = vld [vmem:[%s11331_s6 + $0x8c] sm:$0xf0]  ;;  %v6347_v12 = vld [vmem:[%s11331_s6 + $0x78] sm:$0xf]  ;;  %v6380_v14 = vor.u32 %v7800_v5, %v6377_v6  ;;  %v6340_v17 = vor.u32 %v7795_v8, %v6339_v4 }
  0x1e   :  { %896 = vmatpush.bf16.msra.mxu1 %v6432_v47  ;;  %v7796_v13 = vld [vmem:[%s11331_s6 + $0x90] sm:$0xf0]  ;;  %v6311_v15 = vld [vmem:[%s11331_s6 + $0x38] sm:$0xf]  ;;  %v7793_v16 = vld [vmem:[%s11331_s6 + $0x7c] sm:$0xf]  ;;  %v6344_v18 = vor.u32 %v7792_v9, %v6341_v10 }
  0x1f   :  { %909 = vmatpush.bf16.msra.mxu2 %v6436_v53  ;;  %v6349_v19 = vld [vmem:[%s11331_s6 + $0x94] sm:$0xf0]  ;;  %v590_v20 = vld [vmem:[%s11331_s6 + $0x160] sm:$0x33]  ;;  %v591_v21 = vld [vmem:[%s11331_s6 + $0x168] sm:$0x3]  ;;  %v6348_v22 = vor.u32 %v7796_v13, %v6347_v12 }
  0x20   :  { %871 = vmatpush.bf16.msrb.mxu3 %v6396_v56  ;;  %v7788_v23 = vld [vmem:[%s11331_s6 + $0x50] sm:$0xf0]  ;;  %v7785_v24 = vld [vmem:[%s11331_s6 + $0x3c] sm:$0xf]  ;;  %v6313_v25 = vld [vmem:[%s11331_s6 + $0x54] sm:$0xf0]  ;;  %v748_v28 = vunpack.c.l.b16 %v590_v20  ;;  %v6352_v29 = vor.u32 %v7793_v16, %v6349_v19  ;;  %v749_v30 = vunpack.c.h.b16 %v590_v20  ;;  %v750_v31 = vunpack.c.l.b16 %v591_v21 }
  0x21   :  { %884 = vmatpush.bf16.msra.mxu0 %v6400_v57  ;;  %v6319_v26 = vld [vmem:[%s11331_s6 + $0x40] sm:$0xf]  ;;  %v7789_v27 = vld [vmem:[%s11331_s6 + $0x58] sm:$0xf0]  ;;  %v6312_v32 = vor.u32 %v7788_v23, %v6311_v15  ;;  %v6316_v33 = vor.u32 %v7785_v24, %v6313_v25  ;;  %v7786_v34 = vld [vmem:[%s11331_s6 + $0x44] sm:$0xf] }
  0x22   :  { %897 = vmatpush.bf16.msra.mxu1 %v6404_v59  ;;  %v6321_v35 = vld [vmem:[%s11331_s6 + $0x5c] sm:$0xf0]  ;;  %v6320_v36 = vor.u32 %v7789_v27, %v6319_v26  ;;  %v7781_v37 = vld [vmem:[%s11331_s6 + $0x18] sm:$0xf0]  ;;  %v7778_v38 = vld [vmem:[%s11331_s6 + $0x4] sm:$0xf]  ;;  %v797_v42 = vpack.c.b16 %v748_v28, %v748_v28  ;;  %v798_v44 = vpack.c.b16 %v749_v30, %v749_v30  ;;  %v799_v45 = vpack.c.b16 %v750_v31, %v750_v31 }
  0x23   :  { %910 = vmatpush.bf16.msra.mxu2 %v6408_v1  ;;  %v6285_v39 = vld [vmem:[%s11331_s6 + $0x1c] sm:$0xf0]  ;;  %v6291_v40 = vld [vmem:[%s11331_s6 + $0x8] sm:$0xf]  ;;  %v7782_v41 = vld [vmem:[%s11331_s6 + $0x20] sm:$0xf0]  ;;  %v6324_v43 = vor.u32 %v7786_v34, %v6321_v35 }
  0x24   :  { %872 = vmatpush.bf16.msrb.mxu3 %v6368_v2  ;;  %6278 = vmatmul.msk.bf16.vlgmr.msrb.gmra.mxu0 %vm152_vm0, %v8466_v11  ;;  %v6288_v47 = vor.u32 %v7778_v38, %v6285_v39  ;;  %v538_v48 = vld [vmem:[%s11326_s1] sm:$0xff]  ;;  %v7779_v49 = vld [vmem:[%s11331_s6 + $0xc] sm:$0xf]  ;;  %v6293_v50 = vld [vmem:[%s11331_s6 + $0x24] sm:$0xf0]  ;;  %v6292_v51 = vor.u32 %v7782_v41, %v6291_v40  ;;  %v860_v54 = vsel %vm846_vm1, %v797_v42, 0 }
  0x25   :  { %885 = vmatpush.bf16.msra.mxu0 %v6372_v3  ;;  %6279 = vmatmul.msk.bf16.vlgmr.msrb.gmra.mxu1 %vm152_vm0, %v8466_v11  ;;  %v6439_v52 = vld [vmem:[%s11331_s6 + $0x128] sm:$0xf]  ;;  %v7818_v53 = vld [vmem:[%s11331_s6 + $0x140] sm:$0xf0]  ;;  %v7815_v55 = vld [vmem:[%s11331_s6 + $0x12c] sm:$0xf]  ;;  %v8678_v59 = vpack.c.bf16 %v538_v48, %v538_v48  ;;  %v6296_v60 = vor.u32 %v7779_v49, %v6293_v50 }
  0x26   :  { %898 = vmatpush.bf16.msra.mxu1 %v6376_v7  ;;  %6280 = vmatmul.msk.bf16.vlgmr.msrb.gmra.mxu2 %vm152_vm0, %v8466_v11  ;;  %v6283_v11 = vld [vmem:[%s11331_s6] sm:$0xf]  ;;  %v6441_v56 = vld [vmem:[%s11331_s6 + $0x144] sm:$0xf0]  ;;  %v863_v57 = vsel %vm846_vm1, %v798_v44, 0  ;;  %v866_v58 = vsel %vm846_vm1, %v799_v45, 0  ;;  %v6440_v63 = vor.u32 %v7818_v53, %v6439_v52 }
  0x27   :  { %911 = vmatpush.bf16.msra.mxu2 %v6380_v14  ;;  %v6284_v46 = vor.u32 %v7781_v37, %v6283_v11  ;;  %v6447_v61 = vld [vmem:[%s11331_s6 + $0x130] sm:$0xf]  ;;  %v7819_v62 = vld [vmem:[%s11331_s6 + $0x148] sm:$0xf0]  ;;  %vm842_vm2 = vcmask 818176   ;;  %v6444_v0 = vor.u32 %v7815_v55, %v6441_v56  ;;  %v8793_v49 = vld [vmem:[%s11328_s3] sm:$0xff] }
  0x28   :  { %873 = vmatpush.bf16.msrb.mxu3 %v6340_v17  ;;  %v6448_v1 = vor.u32 %v7819_v62, %v6447_v61  ;;  %v6411_v2 = vld [vmem:[%s11331_s6 + $0xf0] sm:$0xf]  ;;  %v7811_v3 = vld [vmem:[%s11331_s6 + $0x108] sm:$0xf0]  ;;  %v7808_v4 = vld [vmem:[%s11331_s6 + $0xf4] sm:$0xf] }
  0x29   :  { %886 = vmatpush.bf16.msra.mxu0 %v6344_v18  ;;  %v6413_v5 = vld [vmem:[%s11331_s6 + $0x10c] sm:$0xf0]  ;;  %v6419_v6 = vld [vmem:[%s11331_s6 + $0xf8] sm:$0xf]  ;;  %v7812_v7 = vld [vmem:[%s11331_s6 + $0x110] sm:$0xf0]  ;;  %v6412_v8 = vor.u32 %v7811_v3, %v6411_v2 }
  0x2a   :  { %899 = vmatpush.bf16.msra.mxu1 %v6348_v22  ;;  %v6416_v9 = vor.u32 %v7808_v4, %v6413_v5  ;;  %v6420_v10 = vor.u32 %v7812_v7, %v6419_v6  ;;  %v6383_v12 = vld [vmem:[%s11331_s6 + $0xb8] sm:$0xf]  ;;  %v7804_v13 = vld [vmem:[%s11331_s6 + $0xd0] sm:$0xf0]  ;;  %v7801_v14 = vld [vmem:[%s11331_s6 + $0xbc] sm:$0xf] }
  0x2b   :  { %912 = vmatpush.bf16.msra.mxu2 %v6352_v29  ;;  %v6385_v15 = vld [vmem:[%s11331_s6 + $0xd4] sm:$0xf0]  ;;  %v6391_v16 = vld [vmem:[%s11331_s6 + $0xc0] sm:$0xf]  ;;  %v7805_v17 = vld [vmem:[%s11331_s6 + $0xd8] sm:$0xf0]  ;;  %v6384_v18 = vor.u32 %v7804_v13, %v6383_v12 }
  0x2c   :  { %874 = vmatpush.bf16.msrb.mxu3 %v6312_v32  ;;  %v6388_v19 = vor.u32 %v7801_v14, %v6385_v15  ;;  %v6392_v20 = vor.u32 %v7805_v17, %v6391_v16  ;;  %v6355_v21 = vld [vmem:[%s11331_s6 + $0x80] sm:$0xf]  ;;  %v7797_v22 = vld [vmem:[%s11331_s6 + $0x98] sm:$0xf0]  ;;  %v7794_v23 = vld [vmem:[%s11331_s6 + $0x84] sm:$0xf] }
  0x2d   :  { %887 = vmatpush.bf16.msra.mxu0 %v6316_v33  ;;  %v6357_v24 = vld [vmem:[%s11331_s6 + $0x9c] sm:$0xf0]  ;;  %v6363_v25 = vld [vmem:[%s11331_s6 + $0x88] sm:$0xf]  ;;  %v7798_v26 = vld [vmem:[%s11331_s6 + $0xa0] sm:$0xf0]  ;;  %v6356_v27 = vor.u32 %v7797_v22, %v6355_v21 }
  0x2e   :  { %900 = vmatpush.bf16.msra.mxu1 %v6320_v36  ;;  %v6360_v28 = vor.u32 %v7794_v23, %v6357_v24  ;;  %v6364_v29 = vor.u32 %v7798_v26, %v6363_v25  ;;  %v6327_v30 = vld [vmem:[%s11331_s6 + $0x48] sm:$0xf]  ;;  %v7790_v31 = vld [vmem:[%s11331_s6 + $0x60] sm:$0xf0]  ;;  %v7787_v32 = vld [vmem:[%s11331_s6 + $0x4c] sm:$0xf] }
  0x2f   :  { %913 = vmatpush.bf16.msra.mxu2 %v6324_v43  ;;  %v6329_v33 = vld [vmem:[%s11331_s6 + $0x64] sm:$0xf0]  ;;  %v6335_v11 = vld [vmem:[%s11331_s6 + $0x50] sm:$0xf]  ;;  %v7791_v34 = vld [vmem:[%s11331_s6 + $0x68] sm:$0xf0]  ;;  %v6328_v35 = vor.u32 %v7790_v31, %v6327_v30 }
  0x30   :  { %875 = vmatpush.bf16.msrb.mxu3 %v6284_v46  ;;  %v6332_v36 = vor.u32 %v7787_v32, %v6329_v33  ;;  %v6336_v37 = vor.u32 %v7791_v34, %v6335_v11  ;;  %v6299_v38 = vld [vmem:[%s11331_s6 + $0x10] sm:$0xf]  ;;  %v7783_v39 = vld [vmem:[%s11331_s6 + $0x28] sm:$0xf0]  ;;  %v7780_v40 = vld [vmem:[%s11331_s6 + $0x14] sm:$0xf] }
  0x31   :  { %888 = vmatpush.bf16.msra.mxu0 %v6288_v47  ;;  %v6301_v41 = vld [vmem:[%s11331_s6 + $0x2c] sm:$0xf0]  ;;  %v6307_v42 = vld [vmem:[%s11331_s6 + $0x18] sm:$0xf]  ;;  %v7784_v43 = vld [vmem:[%s11331_s6 + $0x30] sm:$0xf0]  ;;  %v6300_v44 = vor.u32 %v7783_v39, %v6299_v38  ;;  %v86_v47 = vlaneseq }
  0x32   :  { %901 = vmatpush.bf16.msra.mxu1 %v6292_v51  ;;  %v6304_v45 = vor.u32 %v7780_v40, %v6301_v41  ;;  %v6308_v46 = vor.u32 %v7784_v43, %v6307_v42  ;;  %v102_v50 = vperm.slane %v8793_v49, 0  ;;  %v103_v51 = vperm.slane %v8793_v49, 1 }
  0x33   :  { %6449 = vmatmul.msk.bf16.vlgmr.msrb.gmra.mxu3 %vm842_vm2, %v8678_v59  ;;  %914 = vmatpush.bf16.msra.mxu2 %v6296_v60  ;;  %v87_v48 = vshrl.u32 %v86_v47, 7  ;;  %v8347_v52 = vmov 0.0   ;;  %v104_v60 = vperm.slane %v8793_v49, 2  ;;  %v106_v43 = vperm.slane %v8793_v49, 4 }
  0x34   :  { %921 = vmatpush.bf16.msra.mxu3 %v860_v54  ;;  %6450 = vmatmul.msk.bf16.vlgmr.msra.gmra.mxu0 %vm842_vm2, %v8678_v59 }
  0x35   :  { %934 = vmatpush.bf16.msrb.mxu0 %v863_v57  ;;  %6451 = vmatmul.msk.bf16.vlgmr.msra.gmra.mxu1 %vm842_vm2, %v8678_v59  ;;  %vm88_vm3 = vcmp.lt.s32.totalorder %v87_v48, 4 }
  0x36   :  { %947 = vmatpush.bf16.msrb.mxu1 %v866_v58  ;;  %6452 = vmatmul.msk.bf16.vlgmr.msra.gmra.mxu2 %vm842_vm2, %v8678_v59  ;;  %v8797_v53 = vsel %vm88_vm3, 1.0, %v8347_v52 }
  0x38   :  { %922 = vmatpush.bf16.msra.mxu3 %v6440_v63  ;;  %v105_v63 = vperm.slane %v8793_v49, 3 }
  0x39   :  { %935 = vmatpush.bf16.msrb.mxu0 %v6444_v0 }
  0x3a   :  { %948 = vmatpush.bf16.msrb.mxu1 %v6448_v1 }
  0x3c   :  { %923 = vmatpush.bf16.msra.mxu3 %v6412_v8 }
  0x3d   :  { %936 = vmatpush.bf16.msrb.mxu0 %v6416_v9 }
  0x3e   :  { %949 = vmatpush.bf16.msrb.mxu1 %v6420_v10 }
  0x40   :  { %924 = vmatpush.bf16.msra.mxu3 %v6384_v18 }
  0x41   :  { %937 = vmatpush.bf16.msrb.mxu0 %v6388_v19 }
  0x42   :  { %950 = vmatpush.bf16.msrb.mxu1 %v6392_v20 }
  0x44   :  { %925 = vmatpush.bf16.msra.mxu3 %v6356_v27 }
  0x45   :  { %938 = vmatpush.bf16.msrb.mxu0 %v6360_v28 }
  0x46   :  { %951 = vmatpush.bf16.msrb.mxu1 %v6364_v29 }
  0x48   :  { %926 = vmatpush.bf16.msra.mxu3 %v6328_v35 }
  0x49   :  { %939 = vmatpush.bf16.msrb.mxu0 %v6332_v36 }
  0x4a   :  { %952 = vmatpush.bf16.msrb.mxu1 %v6336_v37 }
  0x4c   :  { %927 = vmatpush.bf16.msra.mxu3 %v6300_v44 }
  0x4d   :  { %940 = vmatpush.bf16.msrb.mxu0 %v6304_v45 }
  0x4e   :  { %953 = vmatpush.bf16.msrb.mxu1 %v6308_v46 }
  0x4f   :  { %6453 = vmatmul.msk.bf16.vlgmr.msra.gmra.mxu3 %vm842_vm2, %v8678_v59 }
  0x50   :  { %6454 = vmatmul.msk.bf16.vlgmr.msrb.gmra.mxu0 %vm842_vm2, %v8678_v59 }
  0x51   :  { %6455 = vmatmul.msk.bf16.vlgmr.msrb.gmra.mxu1 %vm842_vm2, %v8678_v59 }
  0x91   :  { %v165_v54 = vpop.f32.mrf.mxu0  ;;  %v178_v56 = vpop.f32.mrf.mxu1 }
  0x92   :  { %v8799_v55 = vadd.f32 %v165_v54, %v102_v50  ;;  %v8801_v57 = vadd.f32 %v178_v56, %v103_v51 }
  0x94   :  { %v249_v58 = vmul.f32 %v8797_v53, %v8799_v55  ;;  %v250_v59 = vmul.f32 %v8797_v53, %v8801_v57 }
  0x96   :  { %v256_v61 = vrot.slane %v249_v58, 4  ;;  %v298_v62 = vmul.f32 %v249_v58, %v8799_v55  ;;  %v262_v0 = vrot.slane %v250_v59, 4  ;;  %v299_v1 = vmul.f32 %v250_v59, %v8801_v57 }
  0x98   :  { %v257_v2 = vadd.f32 %v256_v61, %v249_v58  ;;  %v305_v3 = vrot.slane %v298_v62, 4  ;;  %v191_v4 = vpop.f32.mrf.mxu2  ;;  %v263_v5 = vadd.f32 %v262_v0, %v250_v59  ;;  %v311_v6 = vrot.slane %v299_v1, 4 }
  0x99   :  { %v8811_v7 = vadd.f32 %v191_v4, %v104_v60  ;;  %v204_v8 = vpop.f32.mrf.mxu3  ;;  %v167_v9 = vpop.f32.mrf.mxu0 }
  0x9a   :  { %v258_v10 = vrot.slane %v257_v2, 2  ;;  %v306_v12 = vadd.f32 %v305_v3, %v298_v62  ;;  %v8813_v13 = vadd.f32 %v204_v8, %v105_v63  ;;  %v180_v14 = vpop.f32.mrf.mxu1  ;;  %v264_v15 = vrot.slane %v263_v5, 2 }
  0x9b   :  { %v312_v16 = vadd.f32 %v311_v6, %v299_v1  ;;  %v251_v17 = vmul.f32 %v8797_v53, %v8811_v7 }
  0x9c   :  { %v259_v18 = vadd.f32 %v258_v10, %v257_v2  ;;  %v307_v19 = vrot.slane %v306_v12, 2  ;;  %v252_v20 = vmul.f32 %v8797_v53, %v8813_v13  ;;  %v265_v21 = vadd.f32 %v264_v15, %v263_v5 }
  0x9d   :  { %v313_v22 = vrot.slane %v312_v16, 2  ;;  %v268_v23 = vrot.slane %v251_v17, 4  ;;  %v300_v24 = vmul.f32 %v251_v17, %v8811_v7  ;;  %v107_v2 = vperm.slane %v8793_v49, 5 }
  0x9e   :  { %v260_v25 = vrot.slane %v259_v18, 1  ;;  %v308_v26 = vadd.f32 %v307_v19, %v306_v12  ;;  %v274_v27 = vrot.slane %v252_v20, 4  ;;  %v266_v28 = vrot.slane %v265_v21, 1 }
  0x9f   :  { %v314_v29 = vadd.f32 %v313_v22, %v312_v16  ;;  %v269_v30 = vadd.f32 %v268_v23, %v251_v17  ;;  %v317_v31 = vrot.slane %v300_v24, 4  ;;  %v301_v62 = vmul.f32 %v252_v20, %v8813_v13 }
  0xa0   :  { %v261_v32 = vadd.f32 %v260_v25, %v259_v18  ;;  %v309_v33 = vrot.slane %v308_v26, 1  ;;  %v275_v11 = vadd.f32 %v274_v27, %v252_v20  ;;  %v193_v34 = vpop.f32.mrf.mxu2  ;;  %v267_v35 = vadd.f32 %v266_v28, %v265_v21 }
  0xa1   :  { %v315_v36 = vrot.slane %v314_v29, 1  ;;  %v270_v37 = vrot.slane %v269_v30, 2  ;;  %v318_v38 = vadd.f32 %v317_v31, %v300_v24  ;;  %v206_v39 = vpop.f32.mrf.mxu3  ;;  %v217_v44 = vpop.f32.mrf.mxu0  ;;  %v323_v9 = vrot.slane %v301_v62, 4 }
  0xa2   :  { %v310_v40 = vadd.f32 %v309_v33, %v308_v26  ;;  %v8820_v41 = vmul.f32 0.25, %v261_v32  ;;  %v276_v42 = vrot.slane %v275_v11, 2  ;;  %v8823_v46 = vmul.f32 0.25, %v267_v35  ;;  %v230_v50 = vpop.f32.mrf.mxu1 }
  0xa3   :  { %v316_v45 = vadd.f32 %v315_v36, %v314_v29  ;;  %v271_v47 = vadd.f32 %v270_v37, %v269_v30  ;;  %v319_v48 = vrot.slane %v318_v38, 2  ;;  %v8830_v1 = vadd.f32 %v217_v44, %v106_v43 }
  0xa4   :  { %v354_v51 = vmul.f32 0.25, %v310_v40  ;;  %v361_v52 = vmul.f32 %v8820_v41, %v8820_v41  ;;  %v362_v56 = vmul.f32 %v8823_v46, %v8823_v46  ;;  %v277_v61 = vadd.f32 %v276_v42, %v275_v11 }
  0xa5   :  { %v355_v54 = vmul.f32 0.25, %v316_v45  ;;  %v272_v58 = vrot.slane %v271_v47, 1  ;;  %v320_v60 = vadd.f32 %v319_v48, %v318_v38  ;;  %v253_v10 = vmul.f32 %v8797_v53, %v8830_v1 }
  0xa6   :  { %v368_v59 = vsub.f32 %v354_v51, %v361_v52  ;;  %v278_v5 = vrot.slane %v277_v61, 1  ;;  %v324_v20 = vadd.f32 %v323_v9, %v301_v62  ;;  %v8843_v21 = vadd.f32 %v230_v50, %v107_v2 }
  0xa7   :  { %v369_v63 = vsub.f32 %v355_v54, %v362_v56  ;;  %v273_v0 = vadd.f32 %v272_v58, %v271_v47  ;;  %v321_v4 = vrot.slane %v320_v60, 1  ;;  %v108_v24 = vperm.slane %v8793_v49, 6 }
  0xa8   :  { %v375_v3 = vmax.f32 %v368_v59, 0.0  ;;  %v279_v16 = vadd.f32 %v278_v5, %v277_v61  ;;  %v325_v25 = vrot.slane %v324_v20, 2  ;;  %v280_v26 = vrot.slane %v253_v10, 4 }
  0xa9   :  { %v376_v6 = vmax.f32 %v369_v63, 0.0  ;;  %v8833_v8 = vmul.f32 0.25, %v273_v0  ;;  %v243_v12 = vpop.f32.mrf.mxu2  ;;  %v322_v15 = vadd.f32 %v321_v4, %v320_v60  ;;  %v219_v17 = vpop.f32.mrf.mxu0  ;;  %v302_v28 = vmul.f32 %v253_v10, %v8830_v1 }
  0xaa   :  { %v8837_v14 = vadd.f32 1e-05, %v375_v3  ;;  %v232_v22 = vpop.f32.mrf.mxu1  ;;  %v326_v29 = vadd.f32 %v325_v25, %v324_v20  ;;  %v8849_v30 = vmul.f32 0.25, %v279_v16  ;;  %v281_v31 = vadd.f32 %v280_v26, %v253_v10 }
  0xab   :  { %v8839_v18 = vadd.f32 1e-05, %v376_v6  ;;  %v363_v19 = vmul.f32 %v8833_v8, %v8833_v8  ;;  %v356_v23 = vmul.f32 0.25, %v322_v15  ;;  %v254_v32 = vmul.f32 %v8797_v53, %v8843_v21 }
  0xac   :  { %8147 = vrsqrt.f32 %v8837_v14  ;;  %v329_v11 = vrot.slane %v302_v28, 4  ;;  %v8853_v34 = vadd.f32 %v243_v12, %v108_v24  ;;  %v327_v35 = vrot.slane %v326_v29, 1 }
  0xad   :  { %8149 = vrsqrt.f32 %v8839_v18  ;;  %v370_v27 = vsub.f32 %v356_v23, %v363_v19  ;;  %v282_v49 = vrot.slane %v281_v31, 2  ;;  %v286_v40 = vrot.slane %v254_v32, 4 }
  0xae   :  { %v330_v39 = vadd.f32 %v329_v11, %v302_v28  ;;  %v303_v42 = vmul.f32 %v254_v32, %v8843_v21  ;;  %v328_v47 = vadd.f32 %v327_v35, %v326_v29  ;;  %v364_v48 = vmul.f32 %v8849_v30, %v8849_v30 }
  0xaf   :  { %v377_v33 = vmax.f32 %v370_v27, 0.0  ;;  %v283_v50 = vadd.f32 %v282_v49, %v281_v31  ;;  %v8873_v52 = vmul.f32 %v8797_v53, %v8853_v34  ;;  %v287_v62 = vadd.f32 %v286_v40, %v254_v32  ;;  %v8899_v40 = vld [vmem:[%s11329_s4] sm:$0xff] }
  0xb0   :  { %v357_v58 = vmul.f32 0.25, %v328_v47  ;;  %v331_v60 = vrot.slane %v330_v39, 2  ;;  %v335_v63 = vrot.slane %v303_v42, 4  ;;  %vm402_vm5 = vweird.f32 %v8837_v14 }
  0xb1   :  { %v245_v36 = vpop.f32.mrf.mxu2  ;;  %v8857_v38 = vadd.f32 1e-05, %v377_v33  ;;  %v8860_v43 = vpop.f32.mrf.mxu0  ;;  %v284_v59 = vrot.slane %v283_v50, 1  ;;  %v288_v5 = vrot.slane %v287_v62, 2  ;;  %v292_v9 = vrot.slane %v8873_v52, 4 }
  0xb2   :  { %v8855_v37 = vpop.eup %8147  ;;  %v8875_v54 = vpop.f32.mrf.mxu1  ;;  %v371_v2 = vsub.f32 %v357_v58, %v364_v48  ;;  %v332_v4 = vadd.f32 %v331_v60, %v330_v39  ;;  %v336_v6 = vadd.f32 %v335_v63, %v303_v42  ;;  %v8913_v58 = vld [vmem:[%s11330_s5] sm:$0xff]  ;;  %vm412_vm6 = vweird.f32 %v8839_v18 }
  0xb3   :  { %v8862_v44 = vpop.eup %8149  ;;  %v397_v45 = vmul.f32 %v8855_v37, %v8837_v14  ;;  %8151 = vrsqrt.f32 %v8857_v38  ;;  %v285_v3 = vadd.f32 %v284_v59, %v283_v50  ;;  %v289_v24 = vadd.f32 %v288_v5, %v287_v62  ;;  %v8905_v50 = vld [vmem:[%s11332_s7] sm:$0xff] }
  0xb4   :  { %v407_v51 = vmul.f32 %v8862_v44, %v8839_v18  ;;  %v378_v12 = vmax.f32 %v371_v2, 0.0  ;;  %v333_v15 = vrot.slane %v332_v4, 1  ;;  %v337_v25 = vrot.slane %v336_v6, 2 }
  0xb5   :  { %v398_v56 = vmul.f32 %v8855_v37, %v397_v45  ;;  %v8882_v16 = vmul.f32 0.25, %v285_v3  ;;  %v293_v31 = vadd.f32 %v292_v9, %v8873_v52  ;;  %v290_v49 = vrot.slane %v289_v24, 1 }
  0xb6   :  { %v408_v61 = vmul.f32 %v8862_v44, %v407_v51  ;;  %v8879_v0 = vpop.f32.mrf.mxu3  ;;  %v8888_v23 = vadd.f32 1e-05, %v378_v12  ;;  %v334_v26 = vadd.f32 %v333_v15, %v332_v4  ;;  %v338_v36 = vadd.f32 %v337_v25, %v336_v6 }
  0xb7   :  { %v399_v10 = vmul.f32 0.5, %v398_v56  ;;  %v365_v27 = vmul.f32 %v8882_v16, %v8882_v16  ;;  %vm403_vm4 = vweird.f32 %v8855_v37  ;;  %v291_v45 = vadd.f32 %v290_v49, %v289_v24 }
  0xb8   :  { %v409_v19 = vmul.f32 0.5, %v408_v61  ;;  %8153 = vrsqrt.f32 %v8888_v23  ;;  %v358_v32 = vmul.f32 0.25, %v334_v26  ;;  %v339_v47 = vrot.slane %v338_v36, 1  ;;  %vm8920_vm8 = vmor %vm402_vm5, %vm403_vm4 }
  0xb9   :  { %v8884_v17 = vpop.eup %8151  ;;  %v892_v20 = vpop.f32.mrf.mxu0  ;;  %v400_v29 = vsub.f32 1.5, %v399_v10  ;;  %v294_v48 = vrot.slane %v293_v31, 2  ;;  %vm413_vm7 = vweird.f32 %v8862_v44  ;;  %v474_v14 = vperm.slane %v8899_v40, 0 }
  0xba   :  { %v417_v22 = vmul.f32 %v8884_v17, %v8857_v38  ;;  %v905_v28 = vpop.f32.mrf.mxu1  ;;  %v410_v11 = vsub.f32 1.5, %v409_v19  ;;  %v372_v39 = vsub.f32 %v358_v32, %v365_v27  ;;  %v340_v62 = vadd.f32 %v339_v47, %v338_v36  ;;  %v8928_v3 = vpop.f32.mrf.mxu2  ;;  %vm414_vm9 = vmor %vm412_vm6, %vm413_vm7 }
  0xbb   :  { %v401_v42 = vmul.f32 %v8855_v37, %v400_v29  ;;  %v8925_v63 = vmul.f32 0.25, %v291_v45  ;;  %v595_v2 = vperm.slane %v8905_v50, 1  ;;  %v295_v6 = vadd.f32 %v294_v48, %v293_v31 }
  0xbc   :  { %v418_v35 = vmul.f32 %v8884_v17, %v417_v22  ;;  %v379_v51 = vmax.f32 %v372_v39, 0.0  ;;  %v411_v59 = vmul.f32 %v8862_v44, %v410_v11  ;;  %v304_v9 = vmul.f32 %v8873_v52, %v8853_v34 }
  0xbd   :  { %v405_v4 = vsel %vm8920_vm8, %v8855_v37, %v401_v42  ;;  %v382_v10 = vsub.f32 %v8799_v55, %v8820_v41  ;;  %v496_v12 = vperm.slane %v8913_v58, 0  ;;  %v475_v15 = vperm.slane %v8899_v40, 1 }
  0xbe   :  { %v879_v33 = vpop.f32.mrf.mxu3  ;;  %v8908_v56 = vpop.eup %8153  ;;  %v419_v60 = vmul.f32 0.5, %v418_v35  ;;  %v8943_v19 = vadd.f32 1e-05, %v379_v51  ;;  %v383_v37 = vsub.f32 %v8801_v57, %v8823_v46  ;;  %v415_v20 = vsel %vm414_vm9, %v8862_v44, %v411_v59 }
  0xbf   :  { %v427_v5 = vmul.f32 %v8908_v56, %v8888_v23  ;;  %v497_v22 = vperm.slane %v8913_v58, 1  ;;  %v466_v24 = vmul.f32 %v405_v4, %v382_v10  ;;  %v476_v55 = vperm.slane %v8899_v40, 2 }
  0xc0   :  { %v420_v52 = vsub.f32 1.5, %v419_v60  ;;  %v359_v41 = vmul.f32 0.25, %v340_v62  ;;  %v366_v18 = vmul.f32 %v8925_v63, %v8925_v63  ;;  %v296_v26 = vrot.slane %v295_v6, 1 }
  0xc1   :  { %v428_v25 = vmul.f32 %v8908_v56, %v427_v5  ;;  %v341_v27 = vrot.slane %v304_v9, 4  ;;  %v8954_v28 = vadd.f32 %v8860_v43, %v595_v2  ;;  %v467_v57 = vmul.f32 %v415_v20, %v383_v37 }
  0xc2   :  { %vm423_vm10 = vweird.f32 %v8884_v17  ;;  %8155 = vrsqrt.f32 %v8943_v19  ;;  %v596_v46 = vperm.slane %v8905_v50, 2  ;;  %v421_v44 = vmul.f32 %v8884_v17, %v420_v52  ;;  %v918_v35 = vpop.f32.mrf.mxu2 }
  0xc3   :  { %v297_v29 = vadd.f32 %v296_v26, %v295_v6  ;;  %v342_v31 = vadd.f32 %v341_v27, %v304_v9  ;;  %v962_v32 = vmul.f32 %v8797_v53, %v8954_v28  ;;  %v384_v33 = vsub.f32 %v8811_v7, %v8833_v8 }
  0xc4   :  { %vm422_vm11 = vweird.f32 %v8857_v38  ;;  %v498_v43 = vperm.slane %v8913_v58, 2  ;;  %v373_v11 = vsub.f32 %v359_v41, %v366_v18  ;;  %v488_v49 = vmul.f32 %v474_v14, %v466_v24 }
  0xc5   :  { %v429_v36 = vmul.f32 0.5, %v428_v25  ;;  %v343_v39 = vrot.slane %v342_v31, 2  ;;  %v974_v42 = vrot.slane %v962_v32, 4  ;;  %v489_v45 = vmul.f32 %v475_v15, %v467_v57  ;;  %vm8968_vm12 = vmor %vm422_vm11, %vm423_vm10 }
  0xc6   :  { %v385_v7 = vsub.f32 %v8813_v13, %v8849_v30  ;;  %v477_v8 = vperm.slane %v8899_v40, 3  ;;  %v8976_v38 = vadd.f32 %v8875_v54, %v596_v46  ;;  %v425_v48 = vsel %vm8968_vm12, %v8884_v17, %v421_v44 }
  0xc7   :  { %v499_v51 = vperm.slane %v8913_v58, 3  ;;  %v344_v59 = vadd.f32 %v343_v39, %v342_v31  ;;  %v8982_v60 = vmul.f32 0.25, %v297_v29  ;;  %vm432_vm13 = vweird.f32 %v8888_v23 }
  0xc8   :  { %v8984_v61 = vpop.eup %8155  ;;  %v386_v13 = vsub.f32 %v8830_v1, %v8882_v16  ;;  %v478_v30 = vperm.slane %v8899_v40, 4  ;;  %v380_v54 = vmax.f32 %v373_v11, 0.0  ;;  %v510_v14 = vadd.f32 %v496_v12, %v488_v49 }
  0xc9   :  { %v430_v62 = vsub.f32 1.5, %v429_v36  ;;  %v345_v2 = vrot.slane %v344_v59, 1  ;;  %v975_v4 = vadd.f32 %v974_v42, %v962_v32  ;;  %v511_v17 = vadd.f32 %v497_v22, %v489_v45 }
  0xca   :  { %v468_v5 = vmul.f32 %v425_v48, %v384_v33  ;;  %v1011_v6 = vmul.f32 %v962_v32, %v8954_v28  ;;  %v963_v9 = vmul.f32 %v8797_v53, %v8976_v38  ;;  %v437_v10 = vmul.f32 %v8984_v61, %v8943_v19 }
  0xcb   :  { %v346_v15 = vadd.f32 %v345_v2, %v344_v59  ;;  %v367_v37 = vmul.f32 %v8982_v60, %v8982_v60  ;;  %v976_v20 = vrot.slane %v975_v4, 2  ;;  %v8997_v52 = vadd.f32 1e-05, %v380_v54 }
  0xcc   :  { %v1023_v12 = vrot.slane %v1011_v6, 4  ;;  %v980_v24 = vrot.slane %v963_v9, 4  ;;  %v1012_v22 = vmul.f32 %v963_v9, %v8976_v38  ;;  %v431_v41 = vmul.f32 %v8908_v56, %v430_v62 }
  0xcd   :  { %vm433_vm14 = vweird.f32 %v8908_v56  ;;  %v360_v18 = vmul.f32 0.25, %v346_v15  ;;  %v977_v25 = vadd.f32 %v976_v20, %v975_v4  ;;  %v9002_v26 = vpop.f32.mrf.mxu0  ;;  %vm517_vm15 = vcmp.ge.f32.partialorder %v510_v14, 0.0  ;;  %v6940_v15 = vld [vmem:[#allocation3 + $0x410] sm:$0xf0] }
  0xce   :  { %v9004_v27 = vpop.f32.mrf.mxu1  ;;  %v524_v57 = vmul.f32 0.2, %v510_v14  ;;  %v490_v46 = vmul.f32 %v476_v55, %v468_v5  ;;  %v1024_v44 = vadd.f32 %v1023_v12, %v1011_v6  ;;  %v438_v29 = vmul.f32 %v8984_v61, %v437_v10  ;;  %vm9009_vm0 = vmor %vm432_vm13, %vm433_vm14 }
  0xcf   :  { %v374_v31 = vsub.f32 %v360_v18, %v367_v37  ;;  %v978_v32 = vrot.slane %v977_v25, 1  ;;  %v981_v33 = vadd.f32 %v980_v24, %v963_v9  ;;  %8157 = vrsqrt.f32 %v8997_v52 }
  0xd0   :  { %v1025_v35 = vrot.slane %v1024_v44, 2  ;;  %v1029_v49 = vrot.slane %v1012_v22, 4  ;;  %v594_v36 = vperm.slane %v8905_v50, 0  ;;  %v435_v55 = vsel %vm9009_vm0, %v8908_v56, %v431_v41 }
  0xd1   :  { %v381_v39 = vmax.f32 %v374_v31, 0.0  ;;  %v979_v42 = vadd.f32 %v978_v32, %v977_v25  ;;  %v982_v45 = vrot.slane %v981_v33, 2  ;;  %vm518_vm2 = vcmp.ge.f32.partialorder %v511_v17, 0.0 }
  0xd2   :  { %v525_v47 = vmul.f32 0.2, %v511_v17  ;;  %v1026_v23 = vadd.f32 %v1025_v35, %v1024_v44  ;;  %v1030_v48 = vadd.f32 %v1029_v49, %v1012_v22  ;;  %v512_v59 = vadd.f32 %v498_v43, %v490_v46 }
  0xd3   :  { %v439_v54 = vmul.f32 0.5, %v438_v29  ;;  %v9020_v62 = vmul.f32 0.25, %v979_v42  ;;  %v983_v2 = vadd.f32 %v982_v45, %v981_v33  ;;  %v469_v4 = vmul.f32 %v435_v55, %v385_v7 }
  0xd4   :  { %v1027_v5 = vrot.slane %v1026_v23, 1  ;;  %v1031_v6 = vrot.slane %v1030_v48, 2  ;;  %v9023_v9 = vadd.f32 %v8879_v0, %v594_v36  ;;  %v9026_v56 = vsel %vm517_vm15, %v510_v14, %v524_v57 }
  0xd5   :  { %v500_v10 = vperm.slane %v8913_v58, 4  ;;  %v9030_v37 = vadd.f32 1e-05, %v381_v39  ;;  %v944_v43 = vpop.f32.mrf.mxu0  ;;  %v9032_v12 = vpop.eup %8157  ;;  %v9035_v7 = vsel %vm518_vm2, %v511_v17, %v525_v47  ;;  %v1074_v0 = vmul.f32 %v9020_v62, %v9020_v62 }
  0xd6   :  { %v957_v20 = vpop.f32.mrf.mxu1  ;;  %v1028_v24 = vadd.f32 %v1027_v5, %v1026_v23  ;;  %v984_v22 = vrot.slane %v983_v2, 1  ;;  %vm519_vm3 = vcmp.ge.f32.partialorder %v512_v59, 0.0  ;;  %v440_v14 = vsub.f32 1.5, %v439_v54 }
  0xd7   :  { %v1032_v41 = vadd.f32 %v1031_v6, %v1030_v48  ;;  %v597_v18 = vperm.slane %v8905_v50, 3  ;;  %v491_v25 = vmul.f32 %v477_v8, %v469_v4  ;;  %v961_v44 = vmul.f32 %v8797_v53, %v9023_v9 }
  0xd8   :  { %v1067_v57 = vmul.f32 0.25, %v1028_v24  ;;  %v985_v46 = vadd.f32 %v984_v22, %v983_v2  ;;  %v526_v17 = vmul.f32 0.2, %v512_v59  ;;  %v447_v29 = vmul.f32 %v9032_v12, %v8997_v52 }
  0xd9   :  { %8159 = vrsqrt.f32 %v9030_v37  ;;  %v1033_v31 = vrot.slane %v1032_v41, 1  ;;  %v968_v11 = vrot.slane %v961_v44, 4  ;;  %v1010_v35 = vmul.f32 %v961_v44, %v9023_v9 }
  0xda   :  { %v1081_v32 = vsub.f32 %v1067_v57, %v1074_v0  ;;  %v9047_v33 = vmul.f32 0.25, %v985_v46  ;;  %v441_v8 = vmul.f32 %v8984_v61, %v440_v14  ;;  %vm443_vm4 = vweird.f32 %v8984_v61  ;;  %v9081_v0 = vpop.f32.mrf.mxu3 }
  0xdb   :  { %v1034_v49 = vadd.f32 %v1033_v31, %v1032_v41  ;;  %v9053_v36 = vadd.f32 %v8928_v3, %v597_v18  ;;  %v513_v55 = vadd.f32 %v499_v51, %v491_v25  ;;  %vm442_vm5 = vweird.f32 %v8943_v19 }
  0xdc   :  { %v1088_v39 = vmax.f32 %v1081_v32, 0.0  ;;  %v1075_v42 = vmul.f32 %v9047_v33, %v9047_v33  ;;  %v9061_v45 = vsel %vm519_vm3, %v512_v59, %v526_v17  ;;  %v969_v48 = vadd.f32 %v968_v11, %v961_v44  ;;  %vm9064_vm6 = vmor %vm442_vm5, %vm443_vm4  ;;  %v9094_v17 = vld [vmem:[%s11333_s8] sm:$0xff] }
  0xdd   :  { %v1068_v23 = vmul.f32 0.25, %v1034_v49  ;;  %v448_v3 = vmul.f32 %v9032_v12, %v447_v29  ;;  %v1017_v19 = vrot.slane %v1010_v35, 4  ;;  %v964_v2 = vmul.f32 %v8797_v53, %v9053_v36 }
  0xde   :  { %v9069_v51 = vadd.f32 1e-05, %v1088_v39  ;;  %v445_v59 = vsel %vm9064_vm6, %v8984_v61, %v441_v8  ;;  %v970_v43 = vrot.slane %v969_v48, 2  ;;  %vm520_vm7 = vcmp.ge.f32.partialorder %v513_v55, 0.0 }
  0xdf   :  { %v9073_v4 = vpop.eup %8159  ;;  %v1082_v6 = vsub.f32 %v1068_v23, %v1075_v42  ;;  %v1018_v20 = vadd.f32 %v1017_v19, %v1010_v35  ;;  %v599_v24 = vperm.slane %v8905_v50, 5  ;;  %v527_v22 = vmul.f32 0.2, %v513_v55  ;;  %v9113_v23 = vld [vmem:[%s11334_s9] sm:$0xff] }
  0xe0   :  { %8161 = vrsqrt.f32 %v9069_v51  ;;  %v971_v41 = vadd.f32 %v970_v43, %v969_v48  ;;  %v986_v18 = vrot.slane %v964_v2, 4  ;;  %v470_v61 = vmul.f32 %v445_v59, %v386_v13 }
  0xe1   :  { %v1089_v14 = vmax.f32 %v1082_v6, 0.0  ;;  %v9086_v25 = vmul.f32 0.5, %v448_v3  ;;  %v1019_v57 = vrot.slane %v1018_v20, 2  ;;  %v1013_v46 = vmul.f32 %v964_v2, %v9053_v36 }
  0xe2   :  { %v457_v44 = vmul.f32 %v9073_v4, %v9030_v37  ;;  %v972_v31 = vrot.slane %v971_v41, 1  ;;  %v987_v32 = vadd.f32 %v986_v18, %v964_v2  ;;  %v9100_v11 = vadd.f32 %v9002_v26, %v599_v24 }
  0xe3   :  { %v9096_v29 = vadd.f32 1e-05, %v1089_v14  ;;  %v1020_v16 = vadd.f32 %v1019_v57, %v1018_v20  ;;  %v1035_v13 = vrot.slane %v1013_v46, 4  ;;  %v9103_v35 = vsel %vm520_vm7, %v513_v55, %v527_v22  ;;  %v931_v20 = vpop.f32.mrf.mxu3 }
  0xe4   :  { %v973_v8 = vadd.f32 %v972_v31, %v971_v41  ;;  %v988_v49 = vrot.slane %v987_v32, 2  ;;  %v9108_v42 = vmul.f32 %v478_v30, %v470_v61  ;;  %v1187_v26 = vperm.slane %v9094_v17, 1 }
  0xe5   :  { %8163 = vrsqrt.f32 %v9096_v29  ;;  %v1021_v48 = vrot.slane %v1020_v16, 1  ;;  %v1036_v54 = vadd.f32 %v1035_v13, %v1013_v46  ;;  %v450_v55 = vsub.f32 1.5, %v9086_v25 }
  0xe6   :  { %v8162_v39 = vpop.eup %8161  ;;  %v458_v3 = vmul.f32 %v9073_v4, %v457_v44  ;;  %v9119_v2 = vmul.f32 0.25, %v973_v8  ;;  %v989_v30 = vadd.f32 %v988_v49, %v987_v32  ;;  %v966_v43 = vmul.f32 %v8797_v53, %v9100_v11 }
  0xe7   :  { %v1119_v19 = vmul.f32 %v8162_v39, %v9069_v51  ;;  %v1022_v59 = vadd.f32 %v1021_v48, %v1020_v16  ;;  %v1037_v6 = vrot.slane %v1036_v54, 2  ;;  %v1095_v24 = vsub.f32 %v8954_v28, %v9020_v62 }
  0xe8   :  { %v1209_v14 = vperm.slane %v9113_v23, 1  ;;  %v1073_v41 = vmul.f32 %v9119_v2, %v9119_v2  ;;  %v1188_v18 = vperm.slane %v9094_v17, 2  ;;  %v990_v57 = vrot.slane %v989_v30, 1 }
  0xe9   :  { %v1120_v22 = vmul.f32 %v8162_v39, %v1119_v19  ;;  %v1066_v61 = vmul.f32 0.25, %v1022_v59  ;;  %v1038_v46 = vadd.f32 %v1037_v6, %v1036_v54  ;;  %v1096_v32 = vsub.f32 %v8976_v38, %v9047_v33 }
  0xea   :  { %v1210_v16 = vperm.slane %v9113_v23, 2  ;;  %v998_v13 = vrot.slane %v966_v43, 4  ;;  %v9132_v28 = vmul.f32 0.5, %v458_v3  ;;  %v991_v49 = vadd.f32 %v990_v57, %v989_v30 }
  0xeb   :  { %v8164_v44 = vpop.eup %8163  ;;  %v1121_v31 = vmul.f32 0.5, %v1120_v22  ;;  %v1080_v8 = vsub.f32 %v1066_v61, %v1073_v41  ;;  %vm1125_vm8 = vweird.f32 %v8162_v39  ;;  %v1039_v19 = vrot.slane %v1038_v46, 1  ;;  %v7018_v61 = vld [vmem:[#allocation3 + $0x460] sm:$0xf] }
  0xec   :  { %v1129_v62 = vmul.f32 %v8164_v44, %v9096_v29  ;;  %v1015_v59 = vmul.f32 %v966_v43, %v9100_v11  ;;  %vm1124_vm9 = vweird.f32 %v9069_v51  ;;  %v9137_v20 = vmul.f32 0.25, %v991_v49 }
  0xed   :  { %v1122_v48 = vsub.f32 1.5, %v1121_v31  ;;  %v1087_v6 = vmax.f32 %v1080_v8, 0.0  ;;  %v1040_v33 = vadd.f32 %v1039_v19, %v1038_v46  ;;  %v999_v22 = vadd.f32 %v998_v13, %v966_v43  ;;  %vm1126_vm10 = vmor %vm1124_vm9, %vm1125_vm8  ;;  %v7970_v8 = vld [vmem:[#allocation3 + $0x4ac] sm:$0xf0] }
  0xee   :  { %v1130_v54 = vmul.f32 %v8164_v44, %v1129_v62  ;;  %v600_v3 = vperm.slane %v8905_v50, 6  ;;  %vm1134_vm11 = vweird.f32 %v9096_v29  ;;  %v1076_v41 = vmul.f32 %v9137_v20, %v9137_v20 }
  0xef   :  { %v1123_v38 = vmul.f32 %v8162_v39, %v1122_v48  ;;  %v9141_v30 = vadd.f32 1e-05, %v1087_v6  ;;  %v1069_v57 = vmul.f32 0.25, %v1040_v33  ;;  %v1000_v31 = vrot.slane %v999_v22, 2  ;;  %v7020_v6 = vld [vmem:[#allocation3 + $0x4b0] sm:$0xf0] }
  0xf0   :  { %v1131_v47 = vmul.f32 0.5, %v1130_v54  ;;  %v1047_v62 = vrot.slane %v1015_v59, 4  ;;  %vm1135_vm12 = vweird.f32 %v8164_v44  ;;  %v9147_v19 = vadd.f32 %v9004_v27, %v600_v3  ;;  %v7960_v54 = vld [vmem:[#allocation3 + $0x464] sm:$0xf] }
  0xf1   :  { %v1127_v51 = vsel %vm1126_vm10, %v8162_v39, %v1123_v38  ;;  %8165 = vrsqrt.f32 %v9141_v30  ;;  %v1083_v43 = vsub.f32 %v1069_v57, %v1076_v41  ;;  %v1001_v13 = vadd.f32 %v1000_v31, %v999_v22  ;;  %vm1136_vm13 = vmor %vm1134_vm11, %vm1135_vm12 }
  0xf2   :  { %v1179_v49 = vmul.f32 %v1127_v51, %v1095_v24  ;;  %v1132_v46 = vsub.f32 1.5, %v1131_v47  ;;  %v1048_v48 = vadd.f32 %v1047_v62, %v1015_v59  ;;  %v460_v1 = vsub.f32 1.5, %v9132_v28 }
  0xf3   :  { %v7019_v33 = vor.u32 %v7970_v8, %v7018_v61  ;;  %v1090_v47 = vmax.f32 %v1083_v43, 0.0  ;;  %v1002_v24 = vrot.slane %v1001_v13, 1  ;;  %v967_v59 = vmul.f32 %v8797_v53, %v9147_v19 }
  0xf4   :  { %v1201_v39 = vmul.f32 %v1187_v26, %v1179_v49  ;;  %v1133_v38 = vmul.f32 %v8164_v44, %v1132_v46  ;;  %v1049_v41 = vrot.slane %v1048_v48, 2  ;;  %v598_v3 = vperm.slane %v8905_v50, 4 }
  0xf5   :  { %2228 = vmatpush.bf16.msrb.mxu2 %v7019_v33  ;;  %v7023_v51 = vor.u32 %v7960_v54, %v7020_v6  ;;  %v9157_v31 = vadd.f32 1e-05, %v1090_v47  ;;  %v1003_v26 = vadd.f32 %v1002_v24, %v1001_v13  ;;  %v1186_v8 = vperm.slane %v9094_v17, 0 }
  0xf6   :  { %v1223_v27 = vadd.f32 %v1209_v14, %v1201_v39  ;;  %v1137_v22 = vsel %vm1136_vm13, %v8164_v44, %v1133_v38  ;;  %v1050_v61 = vadd.f32 %v1049_v41, %v1048_v48  ;;  %v1004_v49 = vrot.slane %v967_v59, 4  ;;  %v7026_v39 = vld [vmem:[#allocation3 + $0x468] sm:$0xf]  ;;  %v7971_v38 = vld [vmem:[#allocation3 + $0x4b4] sm:$0xf0] }
  0xf7   :  { %v1180_v57 = vmul.f32 %v1137_v22, %v1096_v32  ;;  %v8166_v62 = vpop.eup %8165  ;;  %2255 = vmatpush.bf16.msrb.mxu3 %v7023_v51  ;;  %v1208_v50 = vperm.slane %v9113_v23, 0  ;;  %8167 = vrsqrt.f32 %v9157_v31  ;;  %v9165_v43 = vmul.f32 0.25, %v1003_v26  ;;  %v7961_v41 = vld [vmem:[#allocation3 + $0x46c] sm:$0xf] }
  0xf8   :  { %vm1230_vm14 = vcmp.ge.f32.partialorder %v1223_v27, 0.0  ;;  %v1237_v29 = vmul.f32 0.2, %v1223_v27  ;;  %v1109_v44 = vmul.f32 %v8166_v62, %v9141_v30  ;;  %v1051_v46 = vrot.slane %v1050_v61, 1 }
  0xf9   :  { %v1202_v14 = vmul.f32 %v1188_v18, %v1180_v57  ;;  %v9168_v13 = vadd.f32 %v9081_v0, %v598_v3  ;;  %v1094_v18 = vsub.f32 %v9023_v9, %v9119_v2  ;;  %v1189_v33 = vperm.slane %v9094_v17, 3 }
  0xfa   :  { %v1244_v32 = vsel %vm1230_vm14, %v1223_v27, %v1237_v29  ;;  %v1110_v6 = vmul.f32 %v8166_v62, %v1109_v44  ;;  %v1052_v47 = vadd.f32 %v1051_v46, %v1050_v61  ;;  %v1078_v24 = vmul.f32 %v9165_v43, %v9165_v43  ;;  %v7028_v27 = vld [vmem:[#allocation3 + $0x4b8] sm:$0xf0] }
  0xfb   :  { %v9171_v48 = vadd.f32 %v1244_v32, %v9035_v7  ;;  %v1224_v54 = vadd.f32 %v1210_v16, %v1202_v14  ;;  %v1005_v0 = vadd.f32 %v1004_v49, %v967_v59  ;;  %vm1115_vm0 = vweird.f32 %v8166_v62 }
  0xfc   :  { %v1111_v22 = vmul.f32 0.5, %v1110_v6  ;;  %v1071_v16 = vmul.f32 0.25, %v1052_v47  ;;  %v1016_v9 = vmul.f32 %v967_v59, %v9147_v19  ;;  %v965_v2 = vmul.f32 %v8797_v53, %v9168_v13  ;;  %v7950_v47 = vld [vmem:[#allocation3 + $0x40c] sm:$0xf0] }
  0xfd   :  { %vm1231_vm15 = vcmp.ge.f32.partialorder %v1224_v54, 0.0  ;;  %v1238_v7 = vmul.f32 0.2, %v1224_v54  ;;  %v1006_v3 = vrot.slane %v1005_v0, 2  ;;  %v9183_v51 = vpop.eup %8167  ;;  %v7027_v61 = vor.u32 %v7971_v38, %v7026_v39 }
  0xfe   :  { %v1112_v26 = vsub.f32 1.5, %v1111_v22  ;;  %v7031_v29 = vor.u32 %v7961_v41, %v7028_v27  ;;  %vm1114_vm2 = vweird.f32 %v9141_v30  ;;  %v1139_v14 = vmul.f32 %v9183_v51, %v9157_v31  ;;  %v6938_v30 = vld [vmem:[#allocation3 + $0x3c0] sm:$0xf] }
  0xff   :  { %v1245_v57 = vsel %vm1231_vm15, %v1224_v54, %v1238_v7  ;;  %v1085_v44 = vsub.f32 %v1071_v16, %v1078_v24  ;;  %v1007_v59 = vadd.f32 %v1006_v3, %v1005_v0  ;;  %v1053_v46 = vrot.slane %v1016_v9, 4  ;;  %2282 = vmatpush.bf16.msra.mxu0 %v7027_v61  ;;  %vm1116_vm3 = vmor %vm1114_vm2, %vm1115_vm0 }
 0x100   :  { %v9186_v49 = vadd.f32 %v1245_v57, %v9061_v45  ;;  %v1113_v32 = vmul.f32 %v8166_v62, %v1112_v26  ;;  %v992_v6 = vrot.slane %v965_v2, 4  ;;  %2309 = vmatpush.bf16.msra.mxu1 %v7031_v29  ;;  %v1140_v54 = vmul.f32 %v9183_v51, %v1139_v14  ;;  %v7940_v14 = vld [vmem:[#allocation3 + $0x3c4] sm:$0xf] }
 0x101   :  { %v1211_v39 = vperm.slane %v9113_v23, 3  ;;  %v1092_v45 = vmax.f32 %v1085_v44, 0.0  ;;  %v1014_v38 = vmul.f32 %v965_v2, %v9168_v13  ;;  %v1008_v27 = vrot.slane %v1007_v59, 1 }
 0x102   :  { %v1117_v41 = vsel %vm1116_vm3, %v8166_v62, %v1113_v32  ;;  %v1054_v24 = vadd.f32 %v1053_v46, %v1016_v9  ;;  %v993_v7 = vadd.f32 %v992_v6, %v965_v2  ;;  %v1141_v22 = vmul.f32 0.5, %v1140_v54  ;;  %v6946_v32 = vld [vmem:[#allocation3 + $0x3c8] sm:$0xf]  ;;  %v7951_v6 = vld [vmem:[#allocation3 + $0x414] sm:$0xf0] }
 0x103   :  { %v1178_v0 = vmul.f32 %v1117_v41, %v1094_v18  ;;  %v9195_v16 = vadd.f32 1e-05, %v1092_v45  ;;  %v1041_v3 = vrot.slane %v1014_v38, 4  ;;  %v1009_v57 = vadd.f32 %v1008_v27, %v1007_v59  ;;  %v7941_v54 = vld [vmem:[#allocation3 + $0x3cc] sm:$0xf] }
 0x104   :  { %v1055_v26 = vrot.slane %v1054_v24, 2  ;;  %v994_v61 = vrot.slane %v993_v7, 2  ;;  %v6939_v29 = vor.u32 %v7950_v47, %v6938_v30  ;;  %v1142_v5 = vsub.f32 1.5, %v1141_v22  ;;  %v6948_v45 = vld [vmem:[#allocation3 + $0x418] sm:$0xf0] }
 0x105   :  { %v1200_v44 = vmul.f32 %v1186_v8, %v1178_v0  ;;  %vm1145_vm4 = vweird.f32 %v9183_v51  ;;  %8169 = vrsqrt.f32 %v9195_v16  ;;  %v9201_v18 = vmul.f32 0.25, %v1009_v57  ;;  %v7930_v41 = vld [vmem:[#allocation3 + $0x36c] sm:$0xf0]  ;;  %v7920_v57 = vld [vmem:[#allocation3 + $0x324] sm:$0xf] }
 0x106   :  { %v1056_v62 = vadd.f32 %v1055_v26, %v1054_v24  ;;  %v995_v9 = vadd.f32 %v994_v61, %v993_v7  ;;  %v1042_v2 = vadd.f32 %v1041_v3, %v1014_v38  ;;  %2229 = vmatpush.bf16.msrb.mxu2 %v6939_v29  ;;  %v1143_v46 = vmul.f32 %v9183_v51, %v1142_v5  ;;  %v6858_v5 = vld [vmem:[#allocation3 + $0x320] sm:$0xf]  ;;  %v6860_v26 = vld [vmem:[#allocation3 + $0x370] sm:$0xf0] }
 0x107   :  { %v1222_v59 = vadd.f32 %v1208_v50, %v1200_v44  ;;  %vm1144_vm5 = vweird.f32 %v9157_v31  ;;  %v6943_v8 = vor.u32 %v7940_v14, %v6940_v15  ;;  %v9210_v30 = vadd.f32 %v500_v10, %v9108_v42  ;;  %v6866_v44 = vld [vmem:[#allocation3 + $0x328] sm:$0xf] }
 0x108   :  { %v1097_v38 = vsub.f32 %v9053_v36, %v9137_v20  ;;  %vm1146_vm6 = vmor %vm1144_vm5, %vm1145_vm4  ;;  %v1057_v50 = vrot.slane %v1056_v62, 1  ;;  %v996_v47 = vrot.slane %v995_v9, 1  ;;  %v1079_v27 = vmul.f32 %v9201_v18, %v9201_v18 }
 0x109   :  { %vm1229_vm7 = vcmp.ge.f32.partialorder %v1222_v59, 0.0  ;;  %v1236_v15 = vmul.f32 0.2, %v1222_v59  ;;  %v1147_v31 = vsel %vm1146_vm6, %v9183_v51, %v1143_v46  ;;  %2256 = vmatpush.bf16.msrb.mxu3 %v6943_v8  ;;  %v1043_v7 = vrot.slane %v1042_v2, 2  ;;  %v7921_v46 = vld [vmem:[#allocation3 + $0x32c] sm:$0xf] }
 0x10a   :  { %v1181_v10 = vmul.f32 %v1147_v31, %v1097_v38  ;;  %v1058_v42 = vadd.f32 %v1057_v50, %v1056_v62  ;;  %v997_v24 = vadd.f32 %v996_v47, %v995_v9  ;;  %v6947_v0 = vor.u32 %v7951_v6, %v6946_v32  ;;  %v7931_v62 = vld [vmem:[#allocation3 + $0x374] sm:$0xf0]  ;;  %v6778_v8 = vld [vmem:[#allocation3 + $0x280] sm:$0xf]  ;;  %v6780_v38 = vld [vmem:[#allocation3 + $0x2d0] sm:$0xf0] }
 0x10b   :  { %v9219_v36 = vpop.eup %8169  ;;  %v1243_v20 = vsel %vm1229_vm7, %v1222_v59, %v1236_v15  ;;  %v6951_v22 = vor.u32 %v7941_v54, %v6948_v45  ;;  %v6859_v3 = vor.u32 %v7930_v41, %v6858_v5  ;;  %v1258_v61 = vmul.f32 %v8797_v53, %v9171_v48  ;;  %v6868_v48 = vld [vmem:[#allocation3 + $0x378] sm:$0xf0]  ;;  %v7910_v45 = vld [vmem:[#allocation3 + $0x2cc] sm:$0xf0]  ;;  %v6786_v41 = vld [vmem:[#allocation3 + $0x288] sm:$0xf] }
 0x10c   :  { %v1250_v51 = vadd.f32 %v1243_v20, %v9026_v56  ;;  %v1203_v29 = vmul.f32 %v1189_v33, %v1181_v10  ;;  %v1159_v14 = vmul.f32 %v9219_v36, %v9195_v16  ;;  %vm462_vm8 = vweird.f32 %v9030_v37  ;;  %2283 = vmatpush.bf16.msra.mxu0 %v6947_v0  ;;  %v7911_v15 = vld [vmem:[#allocation3 + $0x2d4] sm:$0xf0]  ;;  %v6788_v20 = vld [vmem:[#allocation3 + $0x2d8] sm:$0xf0]  ;;  %v6698_v0 = vld [vmem:[#allocation3 + $0x1e0] sm:$0xf] }
 0x10d   :  { %v1072_v9 = vmul.f32 0.25, %v1058_v42  ;;  %v1044_v32 = vadd.f32 %v1043_v7, %v1042_v2  ;;  %v9229_v59 = vmul.f32 0.25, %v997_v24  ;;  %2310 = vmatpush.bf16.msra.mxu1 %v6951_v22  ;;  %vm452_vm9 = vweird.f32 %v8997_v52  ;;  %2230 = vmatpush.bf16.msrb.mxu2 %v6859_v3  ;;  %v7900_v2 = vld [vmem:[#allocation3 + $0x284] sm:$0xf]  ;;  %v7901_v42 = vld [vmem:[#allocation3 + $0x28c] sm:$0xf] }
 0x10e   :  { %v1257_v56 = vmul.f32 %v8797_v53, %v1250_v51  ;;  %v1225_v33 = vadd.f32 %v1211_v39, %v1203_v29  ;;  %v1160_v6 = vmul.f32 %v9219_v36, %v1159_v14  ;;  %v6863_v54 = vor.u32 %v7920_v57, %v6860_v26  ;;  %v7890_v26 = vld [vmem:[#allocation3 + $0x22c] sm:$0xf0]  ;;  %v6546_v51 = vld [vmem:[#allocation3 + $0xa8] sm:$0xf] }
 0x10f   :  { %v9239_v50 = vmul.f32 %v9073_v4, %v460_v1  ;;  %vm463_vm10 = vweird.f32 %v9073_v4  ;;  %v1086_v47 = vsub.f32 %v1072_v9, %v1079_v27  ;;  %v1045_v5 = vrot.slane %v1044_v32, 1  ;;  %v6700_v9 = vld [vmem:[#allocation3 + $0x230] sm:$0xf0] }
 0x110   :  { %v9242_v31 = vpack.c.bf16 %v1258_v61, %v1257_v56  ;;  %vm1232_vm11 = vcmp.ge.f32.partialorder %v1225_v33, 0.0  ;;  %v1239_v39 = vmul.f32 0.2, %v1225_v33  ;;  %v1161_v10 = vmul.f32 0.5, %v1160_v6  ;;  %2257 = vmatpush.bf16.msrb.mxu3 %v6863_v54  ;;  %v7880_v61 = vld [vmem:[#allocation3 + $0x1e4] sm:$0xf]  ;;  %vm9250_vm12 = vmor %vm462_vm8, %vm463_vm10 }
 0x111   :  { %v1093_v24 = vmax.f32 %v1086_v47, 0.0  ;;  %v1046_v7 = vadd.f32 %v1045_v5, %v1044_v32  ;;  %v1077_v28 = vmul.f32 %v9229_v59, %v9229_v59  ;;  %v6867_v1 = vor.u32 %v7931_v62, %v6866_v44  ;;  %v6618_v6 = vld [vmem:[#allocation3 + $0x140] sm:$0xf]  ;;  %v7870_v54 = vld [vmem:[#allocation3 + $0x18c] sm:$0xf0] }
 0x112   :  { %v1246_v22 = vsel %vm1232_vm11, %v1225_v33, %v1239_v39  ;;  %v1162_v27 = vsub.f32 1.5, %v1161_v10  ;;  %v6871_v3 = vor.u32 %v7921_v46, %v6868_v48  ;;  %v6779_v57 = vor.u32 %v7910_v45, %v6778_v8  ;;  %v6706_v48 = vld [vmem:[#allocation3 + $0x1e8] sm:$0xf]  ;;  %v7891_v8 = vld [vmem:[#allocation3 + $0x234] sm:$0xf0] }
 0x113   :  { %v1253_v29 = vadd.f32 %v1246_v22, %v9103_v35  ;;  %v9255_v14 = vadd.f32 1e-05, %v1093_v24  ;;  %v1070_v44 = vmul.f32 0.25, %v1046_v7  ;;  %2284 = vmatpush.bf16.msra.mxu0 %v6867_v1  ;;  %v6783_v62 = vor.u32 %v7900_v2, %v6780_v38  ;;  %v7881_v35 = vld [vmem:[#allocation3 + $0x1ec] sm:$0xf] }
 0x114   :  { %v9260_v32 = vmul.f32 %v9032_v12, %v450_v55  ;;  %vm453_vm13 = vweird.f32 %v9032_v12  ;;  %2311 = vmatpush.bf16.msra.mxu1 %v6871_v3  ;;  %2231 = vmatpush.bf16.msrb.mxu2 %v6779_v57  ;;  %v6787_v37 = vor.u32 %v7911_v15, %v6786_v41  ;;  %v6791_v46 = vor.u32 %v7901_v42, %v6788_v20  ;;  %v6708_v55 = vld [vmem:[#allocation3 + $0x238] sm:$0xf0]  ;;  %v7860_v47 = vld [vmem:[#allocation3 + $0x144] sm:$0xf]  ;;  %v6626_v10 = vld [vmem:[#allocation3 + $0x148] sm:$0xf] }
 0x115   :  { %v1259_v56 = vmul.f32 %v8797_v53, %v9186_v49  ;;  %v1260_v33 = vmul.f32 %v8797_v53, %v1253_v29  ;;  %8171 = vrsqrt.f32 %v9255_v14  ;;  %v1084_v25 = vsub.f32 %v1070_v44, %v1077_v28  ;;  %2258 = vmatpush.bf16.msrb.mxu3 %v6783_v62  ;;  %v6620_v49 = vld [vmem:[#allocation3 + $0x190] sm:$0xf0]  ;;  %v7871_v24 = vld [vmem:[#allocation3 + $0x194] sm:$0xf0]  ;;  %v7861_v7 = vld [vmem:[#allocation3 + $0x14c] sm:$0xf] }
 0x116   :  { %v465_v45 = vsel %vm9250_vm12, %v9073_v4, %v9239_v50  ;;  %vm1165_vm14 = vweird.f32 %v9219_v36  ;;  %v6699_v2 = vor.u32 %v7890_v26, %v6698_v0  ;;  %v6703_v38 = vor.u32 %v7880_v61, %v6700_v9  ;;  %v6628_v28 = vld [vmem:[#allocation3 + $0x198] sm:$0xf0]  ;;  %vm9281_vm15 = vmor %vm452_vm9, %vm453_vm13  ;;  %v7850_v0 = vld [vmem:[#allocation3 + $0xec] sm:$0xf0] }
 0x117   :  { %v9272_v5 = vpack.c.bf16 %v1260_v33, %v1259_v56  ;;  %v1163_v41 = vmul.f32 %v9219_v36, %v1162_v27  ;;  %v1091_v15 = vmax.f32 %v1084_v25, 0.0  ;;  %2285 = vmatpush.bf16.msra.mxu0 %v6787_v37  ;;  %v6707_v39 = vor.u32 %v7891_v8, %v6706_v48  ;;  %v7840_v57 = vld [vmem:[#allocation3 + $0xa4] sm:$0xf]  ;;  %v6540_v26 = vld [vmem:[#allocation3 + $0xf0] sm:$0xf0] }
 0x118   :  { %v388_v42 = vsub.f32 %v8853_v34, %v8982_v60  ;;  %2312 = vmatpush.bf16.msra.mxu1 %v6791_v46  ;;  %2232 = vmatpush.bf16.msrb.mxu2 %v6699_v2  ;;  %v6711_v4 = vor.u32 %v7881_v35, %v6708_v55  ;;  %v6619_v50 = vor.u32 %v7870_v54, %v6618_v6  ;;  %vm1164_vm0 = vweird.f32 %v9195_v16  ;;  %v6538_v60 = vld [vmem:[#allocation3 + $0xa0] sm:$0xf]  ;;  %v7851_v9 = vld [vmem:[#allocation3 + $0xf4] sm:$0xf0]  ;;  %v6548_v37 = vld [vmem:[#allocation3 + $0xf8] sm:$0xf0] }
 0x119   :  { %v9286_v20 = vadd.f32 1e-05, %v1091_v15  ;;  %2259 = vmatpush.bf16.msrb.mxu3 %v6703_v38  ;;  %v6623_v34 = vor.u32 %v7860_v47, %v6620_v49  ;;  %v9289_v22 = vmul.f32 0.2, %v9210_v30  ;;  %v387_v27 = vsub.f32 %v8843_v21, %v8925_v63  ;;  %vm9299_vm2 = vmor %vm1164_vm0, %vm1165_vm14  ;;  %v6458_v48 = vld [vmem:[#allocation3] sm:$0xf] }
 0x11a   :  { %v455_v52 = vsel %vm9281_vm15, %v9032_v12, %v9260_v32  ;;  %v472_v3 = vmul.f32 %v465_v45, %v388_v42  ;;  %v1167_v21 = vsel %vm9299_vm2, %v9219_v36, %v1163_v41  ;;  %v1191_v63 = vperm.slane %v9094_v17, 5  ;;  %v7841_v32 = vld [vmem:[#allocation3 + $0xac] sm:$0xf]  ;;  %v7830_v8 = vld [vmem:[#allocation3 + $0x4c] sm:$0xf0] }
 0x11b   :  { %v9303_v61 = vpop.eup %8171  ;;  %8173 = vrsqrt.f32 %v9286_v20  ;;  %2286 = vmatpush.bf16.msra.mxu0 %v6707_v39  ;;  %v6627_v12 = vor.u32 %v7871_v24, %v6626_v10  ;;  %v6631_v44 = vor.u32 %v7861_v7, %v6628_v28  ;;  %v6539_v62 = vor.u32 %v7850_v0, %v6538_v60  ;;  %v7820_v35 = vld [vmem:[#allocation3 + $0x4] sm:$0xf]  ;;  %v6460_v25 = vld [vmem:[#allocation3 + $0x50] sm:$0xf0]  ;;  %v7034_v55 = vld [vmem:[#allocation3 + $0x470] sm:$0xf] }
 0x11c   :  { %v1169_v29 = vmul.f32 %v9303_v61, %v9255_v14  ;;  %2313 = vmatpush.bf16.msra.mxu1 %v6711_v4  ;;  %2233 = vmatpush.bf16.msrb.mxu2 %v6619_v50  ;;  %v1099_v36 = vsub.f32 %v9100_v11, %v9165_v43  ;;  %v6543_v46 = vor.u32 %v7840_v57, %v6540_v26  ;;  %v7972_v6 = vld [vmem:[#allocation3 + $0x4bc] sm:$0xf0]  ;;  %v11457_v54 = vperm.slane %v8899_v40, 6  ;;  %v6466_v11 = vld [vmem:[#allocation3 + $0x8] sm:$0xf] }
 0x11d   :  { %2260 = vmatpush.bf16.msrb.mxu3 %v6623_v34  ;;  %v471_v56 = vmul.f32 %v455_v52, %v387_v27  ;;  %vm1174_vm3 = vweird.f32 %v9255_v14  ;;  %v6547_v38 = vor.u32 %v7851_v9, %v6546_v51  ;;  %v7962_v43 = vld [vmem:[#allocation3 + $0x474] sm:$0xf]  ;;  %v7036_v47 = vld [vmem:[#allocation3 + $0x4c0] sm:$0xf0]  ;;  %vm1175_vm4 = vweird.f32 %v9303_v61  ;;  %v7831_v39 = vld [vmem:[#allocation3 + $0x54] sm:$0xf0] }
 0x11e   :  { %v1170_v33 = vmul.f32 %v9303_v61, %v1169_v29  ;;  %v494_v45 = vmul.f32 %v11457_v54, %v472_v3  ;;  %v1183_v2 = vmul.f32 %v1167_v21, %v1099_v36  ;;  %v6551_v41 = vor.u32 %v7841_v32, %v6548_v37  ;;  %v7821_v10 = vld [vmem:[#allocation3 + $0xc] sm:$0xf]  ;;  %v6468_v50 = vld [vmem:[#allocation3 + $0x58] sm:$0xf0]  ;;  %v6954_v7 = vld [vmem:[#allocation3 + $0x3d0] sm:$0xf] }
 0x11f   :  { %2287 = vmatpush.bf16.msra.mxu0 %v6627_v12  ;;  %v6459_v15 = vor.u32 %v7830_v8, %v6458_v48  ;;  %v6463_v4 = vor.u32 %v7820_v35, %v6460_v25  ;;  %v7035_v24 = vor.u32 %v7972_v6, %v7034_v55  ;;  %v7952_v28 = vld [vmem:[#allocation3 + $0x41c] sm:$0xf0]  ;;  %v11458_v1 = vperm.slane %v8899_v40, 5  ;;  %v7042_v52 = vld [vmem:[#allocation3 + $0x478] sm:$0xf]  ;;  %vm9334_vm5 = vmor %vm1174_vm3, %vm1175_vm4 }
 0x120   :  { %v1171_v49 = vmul.f32 0.5, %v1170_v33  ;;  %2314 = vmatpush.bf16.msra.mxu1 %v6631_v44  ;;  %2234 = vmatpush.bf16.msrb.mxu2 %v6539_v62  ;;  %v7039_v27 = vor.u32 %v7962_v43, %v7036_v47  ;;  %v7973_v3 = vld [vmem:[#allocation3 + $0x4c4] sm:$0xf0]  ;;  %v11459_v16 = vperm.slane %v8913_v58, 6  ;;  %v1205_v26 = vmul.f32 %v1191_v63, %v1183_v2  ;;  %v7942_v51 = vld [vmem:[#allocation3 + $0x3d4] sm:$0xf] }
 0x121   :  { %v9319_v42 = vpop.eup %8173  ;;  %2261 = vmatpush.bf16.msrb.mxu3 %v6543_v46  ;;  %v493_v34 = vmul.f32 %v11458_v1, %v471_v56  ;;  %v1213_v21 = vperm.slane %v9113_v23, 5  ;;  %v6467_v12 = vor.u32 %v7831_v39, %v6466_v11  ;;  %v6956_v29 = vld [vmem:[#allocation3 + $0x420] sm:$0xf0]  ;;  %v1192_v62 = vperm.slane %v9094_v17, 6  ;;  %v9341_v32 = vld [vmem:[#allocation3 + $0x330] sm:$0xf] }
 0x122   :  { %v1172_v60 = vsub.f32 1.5, %v1171_v49  ;;  %v1149_v0 = vmul.f32 %v9319_v42, %v9286_v20  ;;  %v9327_v57 = vadd.f32 %v11459_v16, %v494_v45  ;;  %v6471_v9 = vor.u32 %v7821_v10, %v6468_v50  ;;  %v7932_v46 = vld [vmem:[#allocation3 + $0x37c] sm:$0xf0]  ;;  %v7963_v48 = vld [vmem:[#allocation3 + $0x47c] sm:$0xf] }
 0x123   :  { %2288 = vmatpush.bf16.msra.mxu0 %v6547_v38  ;;  %v1100_v14 = vsub.f32 %v9147_v19, %v9201_v18  ;;  %v6955_v37 = vor.u32 %v7952_v28, %v6954_v7  ;;  %v7043_v36 = vor.u32 %v7973_v3, %v7042_v52  ;;  %v7044_v8 = vld [vmem:[#allocation3 + $0x4c8] sm:$0xf0]  ;;  %v11462_v35 = vperm.slane %v8913_v58, 5  ;;  %v6962_v6 = vld [vmem:[#allocation3 + $0x3d8] sm:$0xf] }
 0x124   :  { %v1173_v44 = vmul.f32 %v9303_v61, %v1172_v60  ;;  %v1150_v63 = vmul.f32 %v9319_v42, %v1149_v0  ;;  %2315 = vmatpush.bf16.msra.mxu1 %v6551_v41  ;;  %2235 = vmatpush.bf16.msrb.mxu2 %v6459_v15  ;;  %v6959_v55 = vor.u32 %v7942_v51, %v6956_v29  ;;  %v7953_v19 = vld [vmem:[#allocation3 + $0x424] sm:$0xf0]  ;;  %vm523_vm6 = vcmp.ge.f32.partialorder %v9327_v57, 0.0  ;;  %v7922_v58 = vld [vmem:[#allocation3 + $0x334] sm:$0xf] }
 0x125   :  { %2262 = vmatpush.bf16.msrb.mxu3 %v6463_v4  ;;  %v9347_v56 = vadd.f32 %v11462_v35, %v493_v34  ;;  %v9353_v18 = vadd.f32 %v1213_v21, %v1205_v26  ;;  %v1214_v45 = vperm.slane %v9113_v23, 6  ;;  %v6876_v2 = vld [vmem:[#allocation3 + $0x380] sm:$0xf0]  ;;  %v530_v38 = vmul.f32 0.2, %v9327_v57 }
 0x126   :  { %v1177_v33 = vsel %vm9334_vm5, %v9303_v61, %v1173_v44  ;;  %v1151_v25 = vmul.f32 0.5, %v1150_v63  ;;  %vm1155_vm7 = vweird.f32 %v9319_v42  ;;  %v7047_v11 = vor.u32 %v7963_v48, %v7044_v8  ;;  %v6794_v43 = vld [vmem:[#allocation3 + $0x290] sm:$0xf]  ;;  %v7912_v15 = vld [vmem:[#allocation3 + $0x2dc] sm:$0xf0] }
 0x127   :  { %v1184_v54 = vmul.f32 %v1177_v33, %v1100_v14  ;;  %2289 = vmatpush.bf16.msra.mxu0 %v6467_v12  ;;  %2236 = vmatmul.bf16.vlgmr.msrb.gmra.mxu2 %v9242_v31  ;;  %vm521_vm8 = vcmp.ge.f32.partialorder %v9210_v30, 0.0  ;;  %v6875_v49 = vor.u32 %v7932_v46, %v9341_v32  ;;  %v6963_v41 = vor.u32 %v7953_v19, %v6962_v6  ;;  %v7943_v39 = vld [vmem:[#allocation3 + $0x3dc] sm:$0xf]  ;;  %v6964_v10 = vld [vmem:[#allocation3 + $0x428] sm:$0xf0] }
 0x128   :  { %2336 = vmatpush.bf16.msra.mxu2 %v7035_v24  ;;  %v1152_v61 = vsub.f32 1.5, %v1151_v25  ;;  %2316 = vmatpush.bf16.msra.mxu1 %v6471_v9  ;;  %vm1154_vm9 = vweird.f32 %v9286_v20  ;;  %v1190_v50 = vperm.slane %v9094_v17, 4  ;;  %v6879_v24 = vor.u32 %v7922_v58, %v6876_v2  ;;  %v6882_v7 = vld [vmem:[#allocation3 + $0x338] sm:$0xf]  ;;  %v7933_v28 = vld [vmem:[#allocation3 + $0x384] sm:$0xf0] }
 0x129   :  { %2363 = vmatpush.bf16.msra.mxu3 %v7039_v27  ;;  %v1206_v47 = vmul.f32 %v1192_v62, %v1184_v54  ;;  %vm1234_vm10 = vcmp.ge.f32.partialorder %v9353_v18, 0.0  ;;  %v1098_v34 = vsub.f32 %v9168_v13, %v9229_v59  ;;  %vm1156_vm11 = vmor %vm1154_vm9, %vm1155_vm7  ;;  %v1212_v60 = vperm.slane %v9113_v23, 4  ;;  %v7902_v17 = vld [vmem:[#allocation3 + $0x294] sm:$0xf]  ;;  %v6796_v20 = vld [vmem:[#allocation3 + $0x2e0] sm:$0xf0] }
 0x12a   :  { %2263 = vmatmul.bf16.vlgmr.msrb.gmra.mxu3 %v9242_v31  ;;  %v1153_v4 = vmul.f32 %v9319_v42, %v1152_v61  ;;  %2290 = vmatmul.bf16.vlgmr.msra.gmra.mxu0 %v9242_v31  ;;  %v1241_v0 = vmul.f32 0.2, %v9353_v18  ;;  %v6795_v52 = vor.u32 %v7912_v15, %v6794_v43  ;;  %v6967_v3 = vor.u32 %v7943_v39, %v6964_v10  ;;  %v6714_v16 = vld [vmem:[#allocation3 + $0x1f0] sm:$0xf]  ;;  %v7923_v26 = vld [vmem:[#allocation3 + $0x33c] sm:$0xf] }
 0x12b   :  { %2390 = vmatpush.bf16.msrb.mxu0 %v7043_v36  ;;  %v1228_v1 = vadd.f32 %v1214_v45, %v1206_v47  ;;  %2317 = vmatmul.bf16.vlgmr.msra.gmra.mxu1 %v9242_v31  ;;  %v6883_v21 = vor.u32 %v7933_v28, %v6882_v7  ;;  %v6884_v23 = vld [vmem:[#allocation3 + $0x388] sm:$0xf0]  ;;  %v6799_v40 = vor.u32 %v7902_v17, %v6796_v20  ;;  %v7892_v12 = vld [vmem:[#allocation3 + $0x23c] sm:$0xf0]  ;;  %v6802_v51 = vld [vmem:[#allocation3 + $0x298] sm:$0xf] }
 0x12c   :  { %2337 = vmatpush.bf16.msra.mxu2 %v6955_v37  ;;  %v1157_v27 = vsel %vm1156_vm11, %v9319_v42, %v1153_v4  ;;  %2417 = vmatpush.bf16.msrb.mxu1 %v7047_v11  ;;  %v7913_v29 = vld [vmem:[#allocation3 + $0x2e4] sm:$0xf0]  ;;  %v529_v44 = vmul.f32 0.2, %v9347_v56  ;;  %v537_v42 = vsel %vm523_vm6, %v9327_v57, %v530_v38  ;;  %v7882_v9 = vld [vmem:[#allocation3 + $0x1f4] sm:$0xf]  ;;  %v1248_v14 = vsel %vm1234_vm10, %v9353_v18, %v1241_v0 }
 0x12d   :  { %2364 = vmatpush.bf16.msra.mxu3 %v6959_v55  ;;  %vm1235_vm12 = vcmp.ge.f32.partialorder %v1228_v1, 0.0  ;;  %v1242_v13 = vmul.f32 0.2, %v1228_v1  ;;  %v1182_v59 = vmul.f32 %v1157_v27, %v1098_v34  ;;  %v6716_v32 = vld [vmem:[#allocation3 + $0x240] sm:$0xf0]  ;;  %vm522_vm13 = vcmp.ge.f32.partialorder %v9347_v56, 0.0 }
 0x12e   :  { %v6887_v36 = vor.u32 %v7923_v26, %v6884_v23  ;;  %v6634_v46 = vld [vmem:[#allocation3 + $0x150] sm:$0xf]  ;;  %v6715_v8 = vor.u32 %v7892_v12, %v6714_v16  ;;  %v6803_v57 = vor.u32 %v7913_v29, %v6802_v51  ;;  %v7872_v35 = vld [vmem:[#allocation3 + $0x19c] sm:$0xf0]  ;;  %v7903_v33 = vld [vmem:[#allocation3 + $0x29c] sm:$0xf]  ;;  %v6719_v55 = vor.u32 %v7882_v9, %v6716_v32 }
 0x12f   :  { %2391 = vmatpush.bf16.msrb.mxu0 %v6963_v41  ;;  %v1249_v62 = vsel %vm1235_vm12, %v1228_v1, %v1242_v13  ;;  %v1204_v63 = vmul.f32 %v1190_v50, %v1182_v59  ;;  %v6804_v25 = vld [vmem:[#allocation3 + $0x2e8] sm:$0xf0]  ;;  %v7862_v6 = vld [vmem:[#allocation3 + $0x154] sm:$0xf]  ;;  %v6722_v19 = vld [vmem:[#allocation3 + $0x1f8] sm:$0xf]  ;;  %v536_v18 = vsel %vm522_vm13, %v9347_v56, %v529_v44  ;;  %v535_v2 = vsel %vm521_vm8, %v9210_v30, %v9289_v22 }
 0x130   :  { %2338 = vmatpush.bf16.msra.mxu2 %v6875_v49  ;;  %v9383_v37 = vadd.f32 %v1249_v62, %v537_v42  ;;  %2418 = vmatpush.bf16.msrb.mxu1 %v6967_v3  ;;  %v7893_v54 = vld [vmem:[#allocation3 + $0x244] sm:$0xf0]  ;;  %v6636_v58 = vld [vmem:[#allocation3 + $0x1a0] sm:$0xf0]  ;;  %v1255_v38 = vadd.f32 %v1248_v14, %v536_v18  ;;  %v6807_v61 = vor.u32 %v7903_v33, %v6804_v25  ;;  %v7883_v30 = vld [vmem:[#allocation3 + $0x1fc] sm:$0xf] }
 0x131   :  { %2365 = vmatpush.bf16.msra.mxu3 %v6879_v24  ;;  %v1226_v48 = vadd.f32 %v1212_v60, %v1204_v63  ;;  %v6635_v43 = vor.u32 %v7872_v35, %v6634_v46  ;;  %v6723_v47 = vor.u32 %v7893_v54, %v6722_v19  ;;  %v6639_v41 = vor.u32 %v7862_v6, %v6636_v58  ;;  %v6724_v22 = vld [vmem:[#allocation3 + $0x248] sm:$0xf0]  ;;  %v6554_v4 = vld [vmem:[#allocation3 + $0xb0] sm:$0xf]  ;;  %v7852_v50 = vld [vmem:[#allocation3 + $0xfc] sm:$0xf0] }
 0x132   :  { %v1262_v56 = vmul.f32 %v8797_v53, %v1255_v38  ;;  %v6727_v10 = vor.u32 %v7883_v30, %v6724_v22  ;;  %v7842_v24 = vld [vmem:[#allocation3 + $0xb4] sm:$0xf]  ;;  %v6555_v7 = vor.u32 %v7852_v50, %v6554_v4  ;;  %v6556_v28 = vld [vmem:[#allocation3 + $0x100] sm:$0xf0]  ;;  %v6642_v1 = vld [vmem:[#allocation3 + $0x158] sm:$0xf]  ;;  %v1263_v58 = vmul.f32 %v8797_v53, %v9383_v37 }
 0x133   :  { %2392 = vmatpush.bf16.msrb.mxu0 %v6883_v21  ;;  %vm1233_vm14 = vcmp.ge.f32.partialorder %v1226_v48, 0.0  ;;  %v1240_v45 = vmul.f32 0.2, %v1226_v48  ;;  %v7873_v34 = vld [vmem:[#allocation3 + $0x1a4] sm:$0xf0]  ;;  %v6559_v60 = vor.u32 %v7842_v24, %v6556_v28  ;;  %vm3424_vm15 = vcmask 261120  }
 0x134   :  { %2339 = vmatpush.bf16.msra.mxu2 %v6795_v52  ;;  %2419 = vmatpush.bf16.msrb.mxu1 %v6887_v36  ;;  %v6643_v17 = vor.u32 %v7873_v34, %v6642_v1  ;;  %v7863_v20 = vld [vmem:[#allocation3 + $0x15c] sm:$0xf]  ;;  %v6644_v0 = vld [vmem:[#allocation3 + $0x1a8] sm:$0xf0]  ;;  %v6474_v27 = vld [vmem:[#allocation3 + $0x10] sm:$0xf] }
 0x135   :  { %2366 = vmatpush.bf16.msra.mxu3 %v6799_v40  ;;  %v1247_v11 = vsel %vm1233_vm14, %v1226_v48, %v1240_v45  ;;  %v6647_v52 = vor.u32 %v7863_v20, %v6644_v0  ;;  %v7832_v3 = vld [vmem:[#allocation3 + $0x5c] sm:$0xf0]  ;;  %v7822_v16 = vld [vmem:[#allocation3 + $0x14] sm:$0xf]  ;;  %v6476_v26 = vld [vmem:[#allocation3 + $0x60] sm:$0xf0] }
 0x136   :  { %v1254_v49 = vadd.f32 %v1247_v11, %v535_v2  ;;  %v6475_v13 = vor.u32 %v7832_v3, %v6474_v27  ;;  %v6479_v59 = vor.u32 %v7822_v16, %v6476_v26  ;;  %v6562_v21 = vld [vmem:[#allocation3 + $0xb8] sm:$0xf]  ;;  %v7853_v23 = vld [vmem:[#allocation3 + $0x104] sm:$0xf0]  ;;  %v7843_v40 = vld [vmem:[#allocation3 + $0xbc] sm:$0xf]  ;;  %v9406_v2 = vpack.c.bf16 %v1263_v58, %v1263_v58 }
 0x137   :  { %2393 = vmatpush.bf16.msrb.mxu0 %v6803_v57  ;;  %2240 = vmatmul.bf16.gmra.mxu2 %v9272_v5  ;;  %v6563_v12 = vor.u32 %v7853_v23, %v6562_v21  ;;  %v6564_v51 = vld [vmem:[#allocation3 + $0x108] sm:$0xf0]  ;;  %v6482_v29 = vld [vmem:[#allocation3 + $0x18] sm:$0xf]  ;;  %v7833_v44 = vld [vmem:[#allocation3 + $0x64] sm:$0xf0] }
 0x138   :  { %2340 = vmatpush.bf16.msra.mxu2 %v6715_v8  ;;  %v1261_v15 = vmul.f32 %v8797_v53, %v1254_v49  ;;  %2420 = vmatpush.bf16.msrb.mxu1 %v6807_v61  ;;  %v6567_v42 = vor.u32 %v7843_v40, %v6564_v51  ;;  %v7823_v62 = vld [vmem:[#allocation3 + $0x1c] sm:$0xf]  ;;  %v6484_v63 = vld [vmem:[#allocation3 + $0x68] sm:$0xf0]  ;;  %v6483_v9 = vor.u32 %v7833_v44, %v6482_v29  ;;  %v7050_v14 = vld [vmem:[#allocation3 + $0x480] sm:$0xf] }
 0x139   :  { %2367 = vmatpush.bf16.msra.mxu3 %v6719_v55  ;;  %v6487_v32 = vor.u32 %v7823_v62, %v6484_v63  ;;  %v7974_v36 = vld [vmem:[#allocation3 + $0x4cc] sm:$0xf0]  ;;  %v7964_v46 = vld [vmem:[#allocation3 + $0x484] sm:$0xf]  ;;  %v7052_v8 = vld [vmem:[#allocation3 + $0x4d0] sm:$0xf0] }
 0x13a   :  { %2267 = vmatmul.bf16.gmra.mxu3 %v9272_v5  ;;  %v9396_v39 = vpack.c.bf16 %v1262_v56, %v1261_v15  ;;  %2294 = vmatmul.bf16.gmra.mxu0 %v9272_v5  ;;  %v7051_v48 = vor.u32 %v7974_v36, %v7050_v14  ;;  %v6970_v57 = vld [vmem:[#allocation3 + $0x3e0] sm:$0xf]  ;;  %v7954_v35 = vld [vmem:[#allocation3 + $0x42c] sm:$0xf0]  ;;  %v7055_v33 = vor.u32 %v7964_v46, %v7052_v8  ;;  %v7944_v25 = vld [vmem:[#allocation3 + $0x3e4] sm:$0xf] }
 0x13b   :  { %2394 = vmatpush.bf16.msrb.mxu0 %v6723_v47  ;;  %2321 = vmatmul.bf16.gmra.mxu1 %v9272_v5  ;;  %v6972_v55 = vld [vmem:[#allocation3 + $0x430] sm:$0xf0]  ;;  %v7058_v6 = vld [vmem:[#allocation3 + $0x488] sm:$0xf]  ;;  %v6971_v19 = vor.u32 %v7954_v35, %v6970_v57  ;;  %v7975_v54 = vld [vmem:[#allocation3 + $0x4d4] sm:$0xf0] }
 0x13c   :  { %2341 = vmatpush.bf16.msra.mxu2 %v6635_v43  ;;  %2421 = vmatpush.bf16.msrb.mxu1 %v6727_v10  ;;  %v6975_v18 = vor.u32 %v7944_v25, %v6972_v55  ;;  %v7059_v45 = vor.u32 %v7975_v54, %v7058_v6  ;;  %v6890_v38 = vld [vmem:[#allocation3 + $0x340] sm:$0xf]  ;;  %v7934_v61 = vld [vmem:[#allocation3 + $0x38c] sm:$0xf0]  ;;  %v7924_v11 = vld [vmem:[#allocation3 + $0x344] sm:$0xf] }
 0x13d   :  { %2368 = vmatpush.bf16.msra.mxu3 %v6639_v41  ;;  %v6891_v43 = vor.u32 %v7934_v61, %v6890_v38  ;;  %v6892_v47 = vld [vmem:[#allocation3 + $0x390] sm:$0xf0]  ;;  %v7965_v49 = vld [vmem:[#allocation3 + $0x48c] sm:$0xf]  ;;  %v7060_v53 = vld [vmem:[#allocation3 + $0x4d8] sm:$0xf0] }
 0x13e   :  { %v6895_v37 = vor.u32 %v7924_v11, %v6892_v47  ;;  %v7063_v41 = vor.u32 %v7965_v49, %v7060_v53  ;;  %v6978_v56 = vld [vmem:[#allocation3 + $0x3e8] sm:$0xf]  ;;  %v7955_v15 = vld [vmem:[#allocation3 + $0x434] sm:$0xf0]  ;;  %v6810_v30 = vld [vmem:[#allocation3 + $0x2a0] sm:$0xf] }
 0x13f   :  { %2395 = vmatpush.bf16.msrb.mxu0 %v6643_v17  ;;  %v6979_v22 = vor.u32 %v7955_v15, %v6978_v56  ;;  %v7914_v10 = vld [vmem:[#allocation3 + $0x2ec] sm:$0xf0]  ;;  %v7904_v4 = vld [vmem:[#allocation3 + $0x2a4] sm:$0xf]  ;;  %v6812_v50 = vld [vmem:[#allocation3 + $0x2f0] sm:$0xf0] }
 0x140   :  { %2342 = vmatpush.bf16.msra.mxu2 %v6555_v7  ;;  %2422 = vmatpush.bf16.msrb.mxu1 %v6647_v52  ;;  %v6811_v24 = vor.u32 %v7914_v10, %v6810_v30  ;;  %v6815_v7 = vor.u32 %v7904_v4, %v6812_v50  ;;  %v7945_v28 = vld [vmem:[#allocation3 + $0x3ec] sm:$0xf]  ;;  %v6980_v1 = vld [vmem:[#allocation3 + $0x438] sm:$0xf0]  ;;  %v6898_v34 = vld [vmem:[#allocation3 + $0x348] sm:$0xf] }
 0x141   :  { %2369 = vmatpush.bf16.msra.mxu3 %v6559_v60  ;;  %v6983_v60 = vor.u32 %v7945_v28, %v6980_v1  ;;  %v7935_v17 = vld [vmem:[#allocation3 + $0x394] sm:$0xf0]  ;;  %v6730_v0 = vld [vmem:[#allocation3 + $0x200] sm:$0xf]  ;;  %v7894_v27 = vld [vmem:[#allocation3 + $0x24c] sm:$0xf0] }
 0x142   :  { %v6899_v20 = vor.u32 %v7935_v17, %v6898_v34  ;;  %v7884_v52 = vld [vmem:[#allocation3 + $0x204] sm:$0xf]  ;;  %v6731_v3 = vor.u32 %v7894_v27, %v6730_v0  ;;  %v6732_v16 = vld [vmem:[#allocation3 + $0x250] sm:$0xf0]  ;;  %v7925_v26 = vld [vmem:[#allocation3 + $0x34c] sm:$0xf] }
 0x143   :  { %2396 = vmatpush.bf16.msrb.mxu0 %v6563_v12  ;;  %v6818_v23 = vld [vmem:[#allocation3 + $0x2a8] sm:$0xf]  ;;  %v7915_v40 = vld [vmem:[#allocation3 + $0x2f4] sm:$0xf0]  ;;  %v6650_v12 = vld [vmem:[#allocation3 + $0x160] sm:$0xf] }
 0x144   :  { %2343 = vmatpush.bf16.msra.mxu2 %v6475_v13  ;;  %2423 = vmatpush.bf16.msrb.mxu1 %v6567_v42  ;;  %v6900_v13 = vld [vmem:[#allocation3 + $0x398] sm:$0xf0]  ;;  %v6819_v51 = vor.u32 %v7915_v40, %v6818_v23  ;;  %v7874_v29 = vld [vmem:[#allocation3 + $0x1ac] sm:$0xf0]  ;;  %v7864_v44 = vld [vmem:[#allocation3 + $0x164] sm:$0xf] }
 0x145   :  { %2370 = vmatpush.bf16.msra.mxu3 %v6479_v59  ;;  %v6735_v59 = vor.u32 %v7884_v52, %v6732_v16  ;;  %v6903_v21 = vor.u32 %v7925_v26, %v6900_v13  ;;  %v6652_v42 = vld [vmem:[#allocation3 + $0x1b0] sm:$0xf0]  ;;  %v6651_v62 = vor.u32 %v7874_v29, %v6650_v12  ;;  %v6738_v14 = vld [vmem:[#allocation3 + $0x208] sm:$0xf]  ;;  %v7895_v46 = vld [vmem:[#allocation3 + $0x254] sm:$0xf0] }
 0x146   :  { %v6655_v63 = vor.u32 %v7864_v44, %v6652_v42  ;;  %v7885_v8 = vld [vmem:[#allocation3 + $0x20c] sm:$0xf]  ;;  %v6740_v57 = vld [vmem:[#allocation3 + $0x258] sm:$0xf0]  ;;  %v7854_v25 = vld [vmem:[#allocation3 + $0x10c] sm:$0xf0] }
 0x147   :  { %2245 = vmatmul.bf16.gmra.mxu2 %v9396_v39  ;;  %2397 = vmatpush.bf16.msrb.mxu0 %v6483_v9  ;;  %v7905_v9 = vld [vmem:[#allocation3 + $0x2ac] sm:$0xf]  ;;  %v6743_v35 = vor.u32 %v7885_v8, %v6740_v57  ;;  %v7844_v55 = vld [vmem:[#allocation3 + $0xc4] sm:$0xf]  ;;  %v6658_v54 = vld [vmem:[#allocation3 + $0x168] sm:$0xf] }
 0x148   :  { %2424 = vmatpush.bf16.msrb.mxu1 %v6487_v32  ;;  %2444 = vmatpush.bf16.msrb.mxu2 %v7051_v48  ;;  %v6820_v32 = vld [vmem:[#allocation3 + $0x2f8] sm:$0xf0]  ;;  %v6739_v48 = vor.u32 %v7895_v46, %v6738_v14  ;;  %v7865_v38 = vld [vmem:[#allocation3 + $0x16c] sm:$0xf]  ;;  %v6490_v11 = vld [vmem:[#allocation3 + $0x20] sm:$0xf] }
 0x149   :  { %2472 = vmatpush.bf16.msrb.mxu3 %v7055_v33  ;;  %v6823_v36 = vor.u32 %v7905_v9, %v6820_v32  ;;  %v6570_v33 = vld [vmem:[#allocation3 + $0xc0] sm:$0xf]  ;;  %v6660_v61 = vld [vmem:[#allocation3 + $0x1b8] sm:$0xf0]  ;;  %v7834_v47 = vld [vmem:[#allocation3 + $0x6c] sm:$0xf0] }
 0x14a   :  { %2272 = vmatmul.bf16.gmra.mxu3 %v9396_v39  ;;  %2299 = vmatmul.bf16.gmra.mxu0 %v9396_v39  ;;  %v6571_v6 = vor.u32 %v7854_v25, %v6570_v33  ;;  %v7824_v49 = vld [vmem:[#allocation3 + $0x24] sm:$0xf]  ;;  %v6492_v53 = vld [vmem:[#allocation3 + $0x70] sm:$0xf0]  ;;  %v6578_v56 = vld [vmem:[#allocation3 + $0xc8] sm:$0xf] }
 0x14b   :  { %2326 = vmatmul.bf16.gmra.mxu1 %v9396_v39  ;;  %2500 = vmatpush.bf16.msra.mxu0 %v7059_v45  ;;  %v7855_v15 = vld [vmem:[#allocation3 + $0x114] sm:$0xf0]  ;;  %v7845_v30 = vld [vmem:[#allocation3 + $0xcc] sm:$0xf]  ;;  %v6580_v10 = vld [vmem:[#allocation3 + $0x118] sm:$0xf0] }
 0x14c   :  { %2445 = vmatpush.bf16.msrb.mxu2 %v6971_v19  ;;  %2528 = vmatpush.bf16.msra.mxu1 %v7063_v41  ;;  %v6572_v19 = vld [vmem:[#allocation3 + $0x110] sm:$0xf0]  ;;  %v6495_v41 = vor.u32 %v7824_v49, %v6492_v53  ;;  %v6583_v4 = vor.u32 %v7845_v30, %v6580_v10  ;;  %v6498_v50 = vld [vmem:[#allocation3 + $0x28] sm:$0xf]  ;;  %v6500_v1 = vld [vmem:[#allocation3 + $0x78] sm:$0xf0] }
 0x14d   :  { %2473 = vmatpush.bf16.msrb.mxu3 %v6975_v18  ;;  %v7875_v18 = vld [vmem:[#allocation3 + $0x1b4] sm:$0xf0]  ;;  %v6575_v45 = vor.u32 %v7844_v55, %v6572_v19  ;;  %v7976_v17 = vld [vmem:[#allocation3 + $0x4dc] sm:$0xf0]  ;;  %v7068_v27 = vld [vmem:[#allocation3 + $0x4e0] sm:$0xf0] }
 0x14e   :  { %v6659_v58 = vor.u32 %v7875_v18, %v6658_v54  ;;  %v7956_v16 = vld [vmem:[#allocation3 + $0x43c] sm:$0xf0]  ;;  %v7946_v26 = vld [vmem:[#allocation3 + $0x3f4] sm:$0xf]  ;;  %v7074_v23 = vld [vmem:[#allocation3 + $0x498] sm:$0xf] }
 0x14f   :  { %2501 = vmatpush.bf16.msra.mxu0 %v6979_v22  ;;  %v6579_v22 = vor.u32 %v7855_v15, %v6578_v56  ;;  %v7977_v40 = vld [vmem:[#allocation3 + $0x4e4] sm:$0xf0]  ;;  %v7936_v29 = vld [vmem:[#allocation3 + $0x39c] sm:$0xf0]  ;;  %v7926_v44 = vld [vmem:[#allocation3 + $0x354] sm:$0xf] }
 0x150   :  { %2446 = vmatpush.bf16.msrb.mxu2 %v6891_v43  ;;  %2529 = vmatpush.bf16.msra.mxu1 %v6983_v60  ;;  %v6663_v43 = vor.u32 %v7865_v38, %v6660_v61  ;;  %v7066_v60 = vld [vmem:[#allocation3 + $0x490] sm:$0xf]  ;;  %v7075_v12 = vor.u32 %v7977_v40, %v7074_v23  ;;  %v7076_v9 = vld [vmem:[#allocation3 + $0x4e8] sm:$0xf0]  ;;  %v7957_v46 = vld [vmem:[#allocation3 + $0x444] sm:$0xf0] }
 0x151   :  { %2474 = vmatpush.bf16.msrb.mxu3 %v6895_v37  ;;  %v6491_v37 = vor.u32 %v7834_v47, %v6490_v11  ;;  %v7067_v0 = vor.u32 %v7976_v17, %v7066_v60  ;;  %v7916_v57 = vld [vmem:[#allocation3 + $0x2fc] sm:$0xf0]  ;;  %v6828_v33 = vld [vmem:[#allocation3 + $0x300] sm:$0xf0]  ;;  %v6996_v19 = vld [vmem:[#allocation3 + $0x448] sm:$0xf0] }
 0x152   :  { %v7937_v38 = vld [vmem:[#allocation3 + $0x3a4] sm:$0xf0]  ;;  %v6746_v47 = vld [vmem:[#allocation3 + $0x210] sm:$0xf]  ;;  %v7896_v49 = vld [vmem:[#allocation3 + $0x25c] sm:$0xf0] }
 0x153   :  { %2502 = vmatpush.bf16.msra.mxu0 %v6899_v20  ;;  %v7966_v20 = vld [vmem:[#allocation3 + $0x494] sm:$0xf]  ;;  %v7927_v56 = vld [vmem:[#allocation3 + $0x35c] sm:$0xf]  ;;  %v6916_v15 = vld [vmem:[#allocation3 + $0x3a8] sm:$0xf0] }
 0x154   :  { %2447 = vmatpush.bf16.msrb.mxu2 %v6811_v24  ;;  %2530 = vmatpush.bf16.msra.mxu1 %v6903_v21  ;;  %v7835_v24 = vld [vmem:[#allocation3 + $0x74] sm:$0xf0]  ;;  %v7071_v52 = vor.u32 %v7966_v20, %v7068_v27  ;;  %v7886_v53 = vld [vmem:[#allocation3 + $0x214] sm:$0xf]  ;;  %v6668_v60 = vld [vmem:[#allocation3 + $0x1c0] sm:$0xf0] }
 0x155   :  { %2475 = vmatpush.bf16.msrb.mxu3 %v6815_v7  ;;  %v7825_v7 = vld [vmem:[#allocation3 + $0x2c] sm:$0xf]  ;;  %v6499_v28 = vor.u32 %v7835_v24, %v6498_v50  ;;  %v6834_v50 = vld [vmem:[#allocation3 + $0x2b8] sm:$0xf]  ;;  %v7917_v24 = vld [vmem:[#allocation3 + $0x304] sm:$0xf0] }
 0x156   :  { %v6503_v34 = vor.u32 %v7825_v7, %v6500_v1  ;;  %v6666_v7 = vld [vmem:[#allocation3 + $0x170] sm:$0xf]  ;;  %v7876_v1 = vld [vmem:[#allocation3 + $0x1bc] sm:$0xf0]  ;;  %v7907_v27 = vld [vmem:[#allocation3 + $0x2bc] sm:$0xf] }
 0x157   :  { %2250 = vmatmul.bf16.gmra.mxu2 %v9406_v2  ;;  %2503 = vmatpush.bf16.msra.mxu0 %v6819_v51  ;;  %v6906_v51 = vld [vmem:[#allocation3 + $0x350] sm:$0xf]  ;;  %v6667_v20 = vor.u32 %v7876_v1, %v6666_v7  ;;  %v7887_v40 = vld [vmem:[#allocation3 + $0x21c] sm:$0xf]  ;;  %v7082_v1 = vld [vmem:[#allocation3 + $0x4a0] sm:$0xf] }
 0x158   :  { %2448 = vmatpush.bf16.msrb.mxu2 %v6731_v3  ;;  %2531 = vmatpush.bf16.msra.mxu1 %v6823_v36  ;;  %v6986_v3 = vld [vmem:[#allocation3 + $0x3f0] sm:$0xf]  ;;  %v6907_v42 = vor.u32 %v7936_v29, %v6906_v51  ;;  %v6994_v36 = vld [vmem:[#allocation3 + $0x3f8] sm:$0xf]  ;;  %vm3619_vm4 = vcmask 1042434   ;;  %vm3617_vm5 = vcmask 1040384  }
 0x159   :  { %2476 = vmatpush.bf16.msrb.mxu3 %v6735_v59  ;;  %v6987_v13 = vor.u32 %v7956_v16, %v6986_v3  ;;  %v6988_v59 = vld [vmem:[#allocation3 + $0x440] sm:$0xf0]  ;;  %v6995_v8 = vor.u32 %v7957_v46, %v6994_v36  ;;  %v6674_v36 = vld [vmem:[#allocation3 + $0x178] sm:$0xf]  ;;  %v7877_v46 = vld [vmem:[#allocation3 + $0x1c4] sm:$0xf0] }
 0x15a   :  { %2277 = vmatmul.bf16.gmra.mxu3 %v9406_v2  ;;  %2304 = vmatmul.bf16.gmra.mxu0 %v9406_v2  ;;  %v6991_v21 = vor.u32 %v7946_v26, %v6988_v59  ;;  %v6754_v59 = vld [vmem:[#allocation3 + $0x218] sm:$0xf] }
 0x15b   :  { %2331 = vmatmul.bf16.gmra.mxu1 %v9406_v2  ;;  %2504 = vmatpush.bf16.msra.mxu0 %v6739_v48  ;;  %v6826_v48 = vld [vmem:[#allocation3 + $0x2b0] sm:$0xf] }
 0x15c   :  { %2449 = vmatpush.bf16.msrb.mxu2 %v6651_v62  ;;  %2532 = vmatpush.bf16.msra.mxu1 %v6743_v35  ;;  %v6908_v62 = vld [vmem:[#allocation3 + $0x3a0] sm:$0xf0]  ;;  %v7906_v35 = vld [vmem:[#allocation3 + $0x2b4] sm:$0xf]  ;;  %v6827_v25 = vor.u32 %v7916_v57, %v6826_v48  ;;  %v7867_v48 = vld [vmem:[#allocation3 + $0x17c] sm:$0xf] }
 0x15d   :  { %2477 = vmatpush.bf16.msrb.mxu3 %v6655_v63  ;;  %v7967_v63 = vld [vmem:[#allocation3 + $0x49c] sm:$0xf]  ;;  %v6911_v32 = vor.u32 %v7926_v44, %v6908_v62  ;;  %v6831_v55 = vor.u32 %v7906_v35, %v6828_v33  ;;  %v7856_v62 = vld [vmem:[#allocation3 + $0x11c] sm:$0xf0]  ;;  %v6676_v57 = vld [vmem:[#allocation3 + $0x1c8] sm:$0xf0] }
 0x15e   :  { %v7079_v14 = vor.u32 %v7967_v63, %v7076_v9  ;;  %v7846_v63 = vld [vmem:[#allocation3 + $0xd4] sm:$0xf]  ;;  %v6679_v33 = vor.u32 %v7867_v48, %v6676_v57  ;;  %v7938_v57 = vld [vmem:[#allocation3 + $0x3ac] sm:$0xf0] }
 0x15f   :  { %2505 = vmatpush.bf16.msra.mxu0 %v6659_v58  ;;  %v6914_v58 = vld [vmem:[#allocation3 + $0x358] sm:$0xf] }
 0x160   :  { %2450 = vmatpush.bf16.msrb.mxu2 %v6571_v6  ;;  %2533 = vmatpush.bf16.msra.mxu1 %v6663_v43  ;;  %v7947_v6 = vld [vmem:[#allocation3 + $0x3fc] sm:$0xf]  ;;  %v6915_v61 = vor.u32 %v7937_v38, %v6914_v58  ;;  %v7857_v58 = vld [vmem:[#allocation3 + $0x124] sm:$0xf0] }
 0x161   :  { %2478 = vmatpush.bf16.msrb.mxu3 %v6575_v45  ;;  %v6999_v54 = vor.u32 %v7947_v6, %v6996_v19  ;;  %v7836_v6 = vld [vmem:[#allocation3 + $0x7c] sm:$0xf0]  ;;  %v7826_v19 = vld [vmem:[#allocation3 + $0x34] sm:$0xf] }
 0x163   :  { %2506 = vmatpush.bf16.msra.mxu0 %v6579_v22  ;;  %v6919_v22 = vor.u32 %v7927_v56, %v6916_v15  ;;  %v7827_v56 = vld [vmem:[#allocation3 + $0x3c] sm:$0xf] }
 0x164   :  { %2451 = vmatpush.bf16.msrb.mxu2 %v6491_v37  ;;  %2534 = vmatpush.bf16.msra.mxu1 %v6583_v4  ;;  %v6747_v37 = vor.u32 %v7896_v49, %v6746_v47  ;;  %v6596_v47 = vld [vmem:[#allocation3 + $0x128] sm:$0xf0] }
 0x165   :  { %2479 = vmatpush.bf16.msrb.mxu3 %v6495_v41  ;;  %v6748_v41 = vld [vmem:[#allocation3 + $0x260] sm:$0xf0] }
 0x166   :  { %v6751_v30 = vor.u32 %v7886_v53, %v6748_v41  ;;  %v7837_v41 = vld [vmem:[#allocation3 + $0x84] sm:$0xf0] }
 0x167   :  { %2344 = vmatmul.bf16.vlgmr.msra.gmra.mxu2 %v9242_v31  ;;  %2507 = vmatpush.bf16.msra.mxu0 %v6499_v28  ;;  %v6835_v28 = vor.u32 %v7917_v24, %v6834_v50 }
 0x168   :  { %2535 = vmatpush.bf16.msra.mxu1 %v6503_v34  ;;  %2556 = vmatpush.bf16.msra.mxu2 %v7067_v0  ;;  %v7866_v34 = vld [vmem:[#allocation3 + $0x174] sm:$0xf] }
 0x169   :  { %v6671_v0 = vor.u32 %v7866_v34, %v6668_v60  ;;  %v7978_v34 = vld [vmem:[#allocation3 + $0x4ec] sm:$0xf0]  ;;  %v7968_v60 = vld [vmem:[#allocation3 + $0x4a4] sm:$0xf] }
 0x16a   :  { %2371 = vmatmul.bf16.vlgmr.msra.gmra.mxu3 %v9242_v31  ;;  %2398 = vmatmul.bf16.vlgmr.msrb.gmra.mxu0 %v9242_v31 }
 0x16b   :  { %2425 = vmatmul.bf16.vlgmr.msrb.gmra.mxu1 %v9242_v31  ;;  %2584 = vmatpush.bf16.msra.mxu3 %v7071_v52  ;;  %v6836_v52 = vld [vmem:[#allocation3 + $0x308] sm:$0xf0] }
 0x16c   :  { %2557 = vmatpush.bf16.msra.mxu2 %v6987_v13  ;;  %2612 = vmatpush.bf16.msrb.mxu0 %v7075_v12  ;;  %v6839_v16 = vor.u32 %v7907_v27, %v6836_v52  ;;  %v6756_v12 = vld [vmem:[#allocation3 + $0x268] sm:$0xf0] }
 0x16d   :  { %2640 = vmatpush.bf16.msrb.mxu1 %v7079_v14  ;;  %v6759_v29 = vor.u32 %v7887_v40, %v6756_v12  ;;  %v7004_v12 = vld [vmem:[#allocation3 + $0x450] sm:$0xf0] }
 0x16f   :  { %2585 = vmatpush.bf16.msra.mxu3 %v6991_v21  ;;  %v7897_v21 = vld [vmem:[#allocation3 + $0x264] sm:$0xf0] }
 0x170   :  { %2558 = vmatpush.bf16.msra.mxu2 %v6907_v42  ;;  %2613 = vmatpush.bf16.msrb.mxu0 %v6995_v8  ;;  %v6755_v23 = vor.u32 %v7897_v21, %v6754_v59  ;;  %v6586_v42 = vld [vmem:[#allocation3 + $0xd0] sm:$0xf]  ;;  %v6675_v8 = vor.u32 %v7877_v46, %v6674_v36  ;;  %v7002_v59 = vld [vmem:[#allocation3 + $0x400] sm:$0xf] }
 0x171   :  { %2641 = vmatpush.bf16.msrb.mxu1 %v6999_v54  ;;  %v6587_v9 = vor.u32 %v7856_v62, %v6586_v42  ;;  %v7958_v21 = vld [vmem:[#allocation3 + $0x44c] sm:$0xf0] }
 0x172   :  { %v7003_v40 = vor.u32 %v7958_v21, %v7002_v59  ;;  %v6930_v59 = vld [vmem:[#allocation3 + $0x368] sm:$0xf]  ;;  %v7939_v21 = vld [vmem:[#allocation3 + $0x3b4] sm:$0xf0] }
 0x173   :  { %2586 = vmatpush.bf16.msra.mxu3 %v6911_v32  ;;  %v6588_v32 = vld [vmem:[#allocation3 + $0x120] sm:$0xf0] }
 0x174   :  { %2559 = vmatpush.bf16.msra.mxu2 %v6827_v25  ;;  %2614 = vmatpush.bf16.msrb.mxu0 %v6915_v61  ;;  %v6591_v14 = vor.u32 %v7846_v63, %v6588_v32  ;;  %v7090_v32 = vld [vmem:[#allocation3 + $0x4a8] sm:$0xf] }
 0x175   :  { %2642 = vmatpush.bf16.msrb.mxu1 %v6919_v22 }
 0x177   :  { %2348 = vmatmul.bf16.gmra.mxu2 %v9272_v5  ;;  %2587 = vmatpush.bf16.msra.mxu3 %v6831_v55  ;;  %v6506_v55 = vld [vmem:[#allocation3 + $0x30] sm:$0xf] }
 0x178   :  { %2560 = vmatpush.bf16.msra.mxu2 %v6747_v37  ;;  %2615 = vmatpush.bf16.msrb.mxu0 %v6835_v28  ;;  %v6507_v54 = vor.u32 %v7836_v6, %v6506_v55  ;;  %v6514_v37 = vld [vmem:[#allocation3 + $0x38] sm:$0xf]  ;;  %v6924_v6 = vld [vmem:[#allocation3 + $0x3b0] sm:$0xf0] }
 0x179   :  { %2643 = vmatpush.bf16.msrb.mxu1 %v6839_v16  ;;  %v6515_v15 = vor.u32 %v7837_v41, %v6514_v37  ;;  %v7918_v37 = vld [vmem:[#allocation3 + $0x30c] sm:$0xf0]  ;;  %v7908_v41 = vld [vmem:[#allocation3 + $0x2c4] sm:$0xf] }
 0x17a   :  { %2375 = vmatmul.bf16.gmra.mxu3 %v9272_v5  ;;  %2402 = vmatmul.bf16.gmra.mxu0 %v9272_v5 }
 0x17b   :  { %2429 = vmatmul.bf16.gmra.mxu1 %v9272_v5  ;;  %2588 = vmatpush.bf16.msra.mxu3 %v6751_v30  ;;  %v6516_v30 = vld [vmem:[#allocation3 + $0x88] sm:$0xf0] }
 0x17c   :  { %2561 = vmatpush.bf16.msra.mxu2 %v6667_v20  ;;  %2616 = vmatpush.bf16.msrb.mxu0 %v6755_v23  ;;  %v6519_v50 = vor.u32 %v7827_v56, %v6516_v30  ;;  %v7083_v20 = vor.u32 %v7978_v34, %v7082_v1  ;;  %v7948_v23 = vld [vmem:[#allocation3 + $0x404] sm:$0xf]  ;;  %v6844_v56 = vld [vmem:[#allocation3 + $0x310] sm:$0xf0]  ;;  %v7949_v1 = vld [vmem:[#allocation3 + $0x40c] sm:$0xf] }
 0x17d   :  { %2644 = vmatpush.bf16.msrb.mxu1 %v6759_v29  ;;  %v7007_v42 = vor.u32 %v7948_v23, %v7004_v12  ;;  %v7012_v34 = vld [vmem:[#allocation3 + $0x458] sm:$0xf0]  ;;  %v6931_v23 = vor.u32 %v7939_v21, %v6930_v59 }
 0x17e   :  { %v6772_v59 = vld [vmem:[#allocation3 + $0x278] sm:$0xf0] }
 0x17f   :  { %2589 = vmatpush.bf16.msra.mxu3 %v6671_v0  ;;  %v7084_v0 = vld [vmem:[#allocation3 + $0x4f0] sm:$0xf0] }
 0x180   :  { %2562 = vmatpush.bf16.msra.mxu2 %v6587_v9  ;;  %2617 = vmatpush.bf16.msrb.mxu0 %v6675_v8  ;;  %v7087_v27 = vor.u32 %v7968_v60, %v7084_v0  ;;  %v6922_v8 = vld [vmem:[#allocation3 + $0x360] sm:$0xf] }
 0x181   :  { %2645 = vmatpush.bf16.msrb.mxu1 %v6679_v33  ;;  %v7928_v33 = vld [vmem:[#allocation3 + $0x364] sm:$0xf]  ;;  %v6923_v55 = vor.u32 %v7938_v57, %v6922_v8  ;;  %v6764_v8 = vld [vmem:[#allocation3 + $0x270] sm:$0xf0]  ;;  %v7929_v57 = vld [vmem:[#allocation3 + $0x36c] sm:$0xf] }
 0x183   :  { %2590 = vmatpush.bf16.msra.mxu3 %v6591_v14  ;;  %v7979_v14 = vld [vmem:[#allocation3 + $0x4f4] sm:$0xf0] }
 0x184   :  { %2563 = vmatpush.bf16.msra.mxu2 %v6507_v54  ;;  %v7091_v36 = vor.u32 %v7979_v14, %v7090_v32  ;;  %v7092_v54 = vld [vmem:[#allocation3 + $0x4f8] sm:$0xf0]  ;;  %v7898_v32 = vld [vmem:[#allocation3 + $0x26c] sm:$0xf0]  ;;  %v7888_v14 = vld [vmem:[#allocation3 + $0x224] sm:$0xf] }
 0x187   :  { %2353 = vmatmul.bf16.gmra.mxu2 %v9396_v39 }
 0x18a   :  { %2380 = vmatmul.bf16.gmra.mxu3 %v9396_v39  ;;  %2407 = vmatmul.bf16.gmra.mxu0 %v9396_v39 }
 0x18b   :  { %2434 = vmatmul.bf16.gmra.mxu1 %v9396_v39 }
 0x197   :  { %2358 = vmatmul.bf16.gmra.mxu2 %v9406_v2 }
 0x19a   :  { %2385 = vmatmul.bf16.gmra.mxu3 %v9406_v2  ;;  %2412 = vmatmul.bf16.gmra.mxu0 %v9406_v2 }
 0x19b   :  { %2439 = vmatmul.bf16.gmra.mxu1 %v9406_v2 }
 0x1a7   :  { %v2291_v18 = vpop.f32.mrf.mxu0  ;;  %2452 = vmatmul.bf16.vlgmr.msrb.gmra.mxu2 %v9242_v31 }
 0x1a8   :  { %v2318_v45 = vpop.f32.mrf.mxu1  ;;  %v6508_v18 = vld [vmem:[#allocation3 + $0x80] sm:$0xf0]  ;;  %2668 = vmatpush.bf16.msrb.mxu2 %v7083_v20  ;;  %v7015_v20 = vor.u32 %v7949_v1, %v7012_v34 }
 0x1a9   :  { %v6594_v45 = vld [vmem:[#allocation3 + $0xd8] sm:$0xf]  ;;  %v6511_v61 = vor.u32 %v7826_v19, %v6508_v18  ;;  %v7969_v19 = vld [vmem:[#allocation3 + $0x4ac] sm:$0xf]  ;;  %v6927_v18 = vor.u32 %v7928_v33, %v6924_v6  ;;  %v6932_v33 = vld [vmem:[#allocation3 + $0x3b8] sm:$0xf0] }
 0x1aa   :  { %2480 = vmatmul.bf16.vlgmr.msrb.gmra.mxu3 %v9242_v31  ;;  %2508 = vmatmul.bf16.vlgmr.msra.gmra.mxu0 %v9242_v31  ;;  %v2237_v11 = vpop.f32.mrf.mxu2  ;;  %v6935_v6 = vor.u32 %v7929_v57, %v6932_v33  ;;  %v6690_v57 = vld [vmem:[#allocation3 + $0x188] sm:$0xf]  ;;  %v7879_v33 = vld [vmem:[#allocation3 + $0x1d4] sm:$0xf0] }
 0x1ab   :  { %2536 = vmatmul.bf16.vlgmr.msra.gmra.mxu1 %v9242_v31  ;;  %v6595_v11 = vor.u32 %v7857_v58, %v6594_v45  ;;  %2591 = vmatpush.bf16.msra.mxu3 %v6511_v61  ;;  %v7095_v45 = vor.u32 %v7969_v19, %v7092_v54 }
 0x1ac   :  { %2669 = vmatpush.bf16.msrb.mxu2 %v7003_v40 }
 0x1ad   :  { %v2264_v43 = vpop.f32.mrf.mxu3  ;;  %2618 = vmatpush.bf16.msrb.mxu0 %v6595_v11  ;;  %v7010_v11 = vld [vmem:[#allocation3 + $0x408] sm:$0xf] }
 0x1ae   :  { %v7847_v43 = vld [vmem:[#allocation3 + $0xdc] sm:$0xf] }
 0x1af   :  { %v9432_v10 = vpop.f32.mrf.mxu0  ;;  %v6599_v53 = vor.u32 %v7847_v43, %v6596_v47  ;;  %2695 = vmatpush.bf16.msrb.mxu3 %v7087_v27  ;;  %v7959_v43 = vld [vmem:[#allocation3 + $0x454] sm:$0xf0]  ;;  %v6842_v47 = vld [vmem:[#allocation3 + $0x2c0] sm:$0xf] }
 0x1b0   :  { %v9434_v4 = vpop.f32.mrf.mxu1  ;;  %2670 = vmatpush.bf16.msrb.mxu2 %v6923_v55  ;;  %v6843_v30 = vor.u32 %v7918_v37, %v6842_v47  ;;  %v6767_v55 = vor.u32 %v7888_v14, %v6764_v8  ;;  %v6684_v47 = vld [vmem:[#allocation3 + $0x1d0] sm:$0xf0] }
 0x1b1   :  { %2646 = vmatpush.bf16.msrb.mxu1 %v6599_v53  ;;  %2619 = vmatpush.bf16.msrb.mxu0 %v6515_v15  ;;  %v7011_v53 = vor.u32 %v7959_v43, %v7010_v11  ;;  %v7878_v11 = vld [vmem:[#allocation3 + $0x1cc] sm:$0xf0]  ;;  %v7868_v43 = vld [vmem:[#allocation3 + $0x184] sm:$0xf] }
 0x1b2   :  { %v9436_v17 = vpop.f32.mrf.mxu2 }
 0x1b3   :  { %2696 = vmatpush.bf16.msrb.mxu3 %v7007_v42  ;;  %v6762_v42 = vld [vmem:[#allocation3 + $0x220] sm:$0xf] }
 0x1b4   :  { %2671 = vmatpush.bf16.msrb.mxu2 %v6843_v30 }
 0x1b5   :  { %v9438_v3 = vpop.f32.mrf.mxu3  ;;  %2647 = vmatpush.bf16.msrb.mxu1 %v6519_v50  ;;  %2722 = vmatpush.bf16.msra.mxu0 %v7091_v36  ;;  %v6847_v50 = vor.u32 %v7908_v41, %v6844_v56  ;;  %v6763_v36 = vor.u32 %v7898_v32, %v6762_v42  ;;  %v6687_v41 = vor.u32 %v7868_v43, %v6684_v47  ;;  %v7909_v56 = vld [vmem:[#allocation3 + $0x2cc] sm:$0xf]  ;;  %v7858_v42 = vld [vmem:[#allocation3 + $0x12c] sm:$0xf0]  ;;  %v7848_v32 = vld [vmem:[#allocation3 + $0xe4] sm:$0xf] }
 0x1b6   :  { %v7838_v43 = vld [vmem:[#allocation3 + $0x8c] sm:$0xf0]  ;;  %v7828_v47 = vld [vmem:[#allocation3 + $0x44] sm:$0xf] }
 0x1b7   :  { %v9440_v26 = vpop.f32.mrf.mxu0  ;;  %2457 = vmatmul.bf16.gmra.mxu2 %v9272_v5  ;;  %2697 = vmatpush.bf16.msrb.mxu3 %v6927_v18  ;;  %v6850_v18 = vld [vmem:[#allocation3 + $0x2c8] sm:$0xf] }
 0x1b8   :  { %11463 = vst [vmem:[#allocation9_spill] sm:$0xff] %v9440_v26  ;;  %v9443_v13 = vpop.f32.mrf.mxu1  ;;  %2672 = vmatpush.bf16.msrb.mxu2 %v6763_v36  ;;  %v6604_v36 = vld [vmem:[#allocation3 + $0x130] sm:$0xf0]  ;;  %v9735_v26 = vld [vmem:[%s11339_s14 + $0x160] sm:$0xff] }
 0x1b9   :  { %11464 = vst [vmem:[#allocation10_spill] sm:$0xff] %v9443_v13  ;;  %2749 = vmatpush.bf16.msra.mxu1 %v7095_v45  ;;  %2723 = vmatpush.bf16.msra.mxu0 %v7011_v53  ;;  %v7919_v45 = vld [vmem:[#allocation3 + $0x314] sm:$0xf0]  ;;  %v6607_v8 = vor.u32 %v7848_v32, %v6604_v36  ;;  %v7829_v32 = vld [vmem:[#allocation3 + $0x4c] sm:$0xf] }
 0x1ba   :  { %2485 = vmatmul.bf16.gmra.mxu3 %v9272_v5  ;;  %2513 = vmatmul.bf16.gmra.mxu0 %v9272_v5  ;;  %v9447_v51 = vpop.f32.mrf.mxu2  ;;  %v6532_v36 = vld [vmem:[#allocation3 + $0x98] sm:$0xf0]  ;;  %v9713_v13 = vld [vmem:[%s11339_s14 + $0x168] sm:$0xff]  ;;  %11517 = vst [vmem:[#allocation63_spill] sm:$0xff] %v9735_v26 }
 0x1bb   :  { %11465 = vst [vmem:[#allocation11_spill] sm:$0xff] %v9447_v51  ;;  %2541 = vmatmul.bf16.gmra.mxu1 %v9272_v5  ;;  %2698 = vmatpush.bf16.msrb.mxu3 %v6847_v50  ;;  %v9687_v51 = vld [vmem:[%s11339_s14 + $0x78] sm:$0xff] }
 0x1bc   :  { %11509 = vst [vmem:[#allocation55_spill] sm:$0xff] %v9687_v51 }
 0x1bd   :  { %v9450_v44 = vpop.f32.mrf.mxu3  ;;  %2750 = vmatpush.bf16.msra.mxu1 %v7015_v20  ;;  %2724 = vmatpush.bf16.msra.mxu0 %v6931_v23  ;;  %v7899_v20 = vld [vmem:[#allocation3 + $0x274] sm:$0xf0]  ;;  %11513 = vst [vmem:[#allocation59_spill] sm:$0xff] %v9713_v13 }
 0x1be   :  { %11466 = vst [vmem:[#allocation12_spill] sm:$0xff] %v9450_v44 }
 0x1bf   :  { %v9452_v35 = vpop.f32.mrf.mxu0  ;;  %2699 = vmatpush.bf16.msrb.mxu3 %v6767_v55  ;;  %v7869_v55 = vld [vmem:[#allocation3 + $0x18c] sm:$0xf] }
 0x1c0   :  { %11467 = vst [vmem:[#allocation13_spill] sm:$0xff] %v9452_v35  ;;  %v9454_v25 = vpop.f32.mrf.mxu1  ;;  %v9668_v35 = vld [vmem:[%s11339_s14 + $0x1f8] sm:$0xff] }
 0x1c1   :  { %11468 = vst [vmem:[#allocation14_spill] sm:$0xff] %v9454_v25  ;;  %2751 = vmatpush.bf16.msra.mxu1 %v6935_v6  ;;  %v6691_v6 = vor.u32 %v7879_v33, %v6690_v57  ;;  %v6535_v57 = vor.u32 %v7829_v32, %v6532_v36  ;;  %v9663_v25 = vld [vmem:[%s11339_s14 + $0x178] sm:$0xff] }
 0x1c2   :  { %v9456_v38 = vpop.f32.mrf.mxu2  ;;  %11505 = vst [vmem:[#allocation51_spill] sm:$0xff] %v9663_v25 }
 0x1c3   :  { %11469 = vst [vmem:[#allocation15_spill] sm:$0xff] %v9456_v38  ;;  %2700 = vmatpush.bf16.msrb.mxu3 %v6687_v41  ;;  %v6524_v41 = vld [vmem:[#allocation3 + $0x90] sm:$0xf0] }
 0x1c4   :  { %11506 = vst [vmem:[#allocation52_spill] sm:$0xff] %v9668_v35 }
 0x1c5   :  { %v9458_v49 = vpop.f32.mrf.mxu3 }
 0x1c6   :  { %11470 = vst [vmem:[#allocation16_spill] sm:$0xff] %v9458_v49 }
 0x1c7   :  { %v9460_v22 = vpop.f32.mrf.mxu0  ;;  %2462 = vmatmul.bf16.gmra.mxu2 %v9396_v39  ;;  %2701 = vmatpush.bf16.msrb.mxu3 %v6607_v8 }
 0x1c8   :  { %11471 = vst [vmem:[#allocation17_spill] sm:$0xff] %v9460_v22  ;;  %v9463_v24 = vpop.f32.mrf.mxu1 }
 0x1c9   :  { %11472 = vst [vmem:[#allocation18_spill] sm:$0xff] %v9463_v24 }
 0x1ca   :  { %2490 = vmatmul.bf16.gmra.mxu3 %v9396_v39  ;;  %2518 = vmatmul.bf16.gmra.mxu0 %v9396_v39  ;;  %v9467_v7 = vpop.f32.mrf.mxu2 }
 0x1cb   :  { %11473 = vst [vmem:[#allocation19_spill] sm:$0xff] %v9467_v7  ;;  %2546 = vmatmul.bf16.gmra.mxu1 %v9396_v39 }
 0x1cd   :  { %v9470_v28 = vpop.f32.mrf.mxu3 }
 0x1ce   :  { %11474 = vst [vmem:[#allocation20_spill] sm:$0xff] %v9470_v28 }
 0x1cf   :  { %v9472_v52 = vpop.f32.mrf.mxu0 }
 0x1d0   :  { %11475 = vst [vmem:[#allocation21_spill] sm:$0xff] %v9472_v52  ;;  %v9474_v16 = vpop.f32.mrf.mxu1 }
 0x1d1   :  { %11476 = vst [vmem:[#allocation22_spill] sm:$0xff] %v9474_v16 }
 0x1d2   :  { %v9476_v29 = vpop.f32.mrf.mxu2 }
 0x1d3   :  { %11477 = vst [vmem:[#allocation23_spill] sm:$0xff] %v9476_v29 }
 0x1d5   :  { %v9478_v62 = vpop.f32.mrf.mxu3 }
 0x1d6   :  { %11478 = vst [vmem:[#allocation24_spill] sm:$0xff] %v9478_v62 }
 0x1d7   :  { %v9480_v63 = vpop.f32.mrf.mxu0  ;;  %2467 = vmatmul.bf16.gmra.mxu2 %v9406_v2 }
 0x1d8   :  { %11479 = vst [vmem:[#allocation25_spill] sm:$0xff] %v9480_v63  ;;  %v9483_v9 = vpop.f32.mrf.mxu1 }
 0x1d9   :  { %11480 = vst [vmem:[#allocation26_spill] sm:$0xff] %v9483_v9 }
 0x1da   :  { %2495 = vmatmul.bf16.gmra.mxu3 %v9406_v2  ;;  %2523 = vmatmul.bf16.gmra.mxu0 %v9406_v2  ;;  %v9487_v46 = vpop.f32.mrf.mxu2 }
 0x1db   :  { %11481 = vst [vmem:[#allocation27_spill] sm:$0xff] %v9487_v46  ;;  %2551 = vmatmul.bf16.gmra.mxu1 %v9406_v2 }
 0x1dd   :  { %v9490_v48 = vpop.f32.mrf.mxu3 }
 0x1de   :  { %11482 = vst [vmem:[#allocation28_spill] sm:$0xff] %v9490_v48 }
 0x1df   :  { %v2307_v58 = vpop.f32.mrf.mxu0 }
 0x1e0   :  { %v2334_v61 = vpop.f32.mrf.mxu1  ;;  %v6682_v58 = vld [vmem:[#allocation3 + $0x180] sm:$0xf] }
 0x1e1   :  { %v6851_v61 = vor.u32 %v7919_v45, %v6850_v18  ;;  %v6683_v37 = vor.u32 %v7878_v11, %v6682_v58  ;;  %v6692_v18 = vld [vmem:[#allocation3 + $0x1d8] sm:$0xf0]  ;;  %v6522_v11 = vld [vmem:[#allocation3 + $0x40] sm:$0xf] }
 0x1e2   :  { %v2253_v15 = vpop.f32.mrf.mxu2  ;;  %v6695_v58 = vor.u32 %v7869_v55, %v6692_v18 }
 0x1e3   :  { %v6852_v15 = vld [vmem:[#allocation3 + $0x318] sm:$0xf0]  ;;  %2725 = vmatpush.bf16.msra.mxu0 %v6851_v61  ;;  %2673 = vmatpush.bf16.msrb.mxu2 %v6683_v37  ;;  %v6523_v37 = vor.u32 %v7838_v43, %v6522_v11 }
 0x1e4   :  { %v6855_v50 = vor.u32 %v7909_v56, %v6852_v15  ;;  %v6610_v56 = vld [vmem:[#allocation3 + $0xe8] sm:$0xf]  ;;  %v7859_v15 = vld [vmem:[#allocation3 + $0x134] sm:$0xf0] }
 0x1e5   :  { %v2280_v60 = vpop.f32.mrf.mxu3 }
 0x1e6   :  { %2752 = vmatpush.bf16.msra.mxu1 %v6855_v50  ;;  %v6770_v60 = vld [vmem:[#allocation3 + $0x228] sm:$0xf] }
 0x1e7   :  { %v2399_v0 = vpop.f32.mrf.mxu0  ;;  %2564 = vmatmul.bf16.vlgmr.msra.gmra.mxu2 %v9242_v31 }
 0x1e8   :  { %v2426_v27 = vpop.f32.mrf.mxu1  ;;  %v6771_v0 = vor.u32 %v7899_v20, %v6770_v60  ;;  %v6527_v60 = vor.u32 %v7828_v47, %v6524_v41  ;;  %v6611_v20 = vor.u32 %v7859_v15, %v6610_v56 }
 0x1e9   :  { %v7889_v27 = vld [vmem:[#allocation3 + $0x22c] sm:$0xf] }
 0x1ea   :  { %2592 = vmatmul.bf16.vlgmr.msra.gmra.mxu3 %v9242_v31  ;;  %2620 = vmatmul.bf16.vlgmr.msrb.gmra.mxu0 %v9242_v31  ;;  %v2345_v40 = vpop.f32.mrf.mxu2  ;;  %v6775_v23 = vor.u32 %v7889_v27, %v6772_v59  ;;  %v6612_v27 = vld [vmem:[#allocation3 + $0x138] sm:$0xf0] }
 0x1eb   :  { %2648 = vmatmul.bf16.vlgmr.msrb.gmra.mxu1 %v9242_v31  ;;  %2726 = vmatpush.bf16.msra.mxu0 %v6771_v0  ;;  %v7849_v0 = vld [vmem:[#allocation3 + $0xec] sm:$0xf] }
 0x1ec   :  { %2753 = vmatpush.bf16.msra.mxu1 %v6775_v23  ;;  %v6615_v23 = vor.u32 %v7849_v0, %v6612_v27  ;;  %2702 = vmatpush.bf16.msrb.mxu3 %v6527_v60 }
 0x1ed   :  { %v2372_v12 = vpop.f32.mrf.mxu3 }
 0x1ee   :  { %v6602_v12 = vld [vmem:[#allocation3 + $0xe0] sm:$0xf] }
 0x1ef   :  { %v9496_v19 = vpop.f32.mrf.mxu0  ;;  %v6603_v14 = vor.u32 %v7858_v42, %v6602_v12  ;;  %2727 = vmatpush.bf16.msra.mxu0 %v6691_v6  ;;  %v6530_v12 = vld [vmem:[#allocation3 + $0x48] sm:$0xf]  ;;  %v7839_v42 = vld [vmem:[#allocation3 + $0x94] sm:$0xf0] }
 0x1f0   :  { %v9498_v54 = vpop.f32.mrf.mxu1  ;;  %2754 = vmatpush.bf16.msra.mxu1 %v6695_v58 }
 0x1f1   :  { %2674 = vmatpush.bf16.msrb.mxu2 %v6603_v14  ;;  %v6531_v14 = vor.u32 %v7839_v42, %v6530_v12 }
 0x1f2   :  { %v9500_v53 = vpop.f32.mrf.mxu2 }
 0x1f3   :  { %2728 = vmatpush.bf16.msra.mxu0 %v6611_v20 }
 0x1f4   :  { %2755 = vmatpush.bf16.msra.mxu1 %v6615_v23 }
 0x1f5   :  { %v9502_v30 = vpop.f32.mrf.mxu3  ;;  %2675 = vmatpush.bf16.msrb.mxu2 %v6523_v37 }
 0x1f7   :  { %v9504_v1 = vpop.f32.mrf.mxu0  ;;  %2569 = vmatmul.bf16.gmra.mxu2 %v9272_v5  ;;  %2729 = vmatpush.bf16.msra.mxu0 %v6531_v14 }
 0x1f8   :  { %v9507_v34 = vpop.f32.mrf.mxu1  ;;  %2756 = vmatpush.bf16.msra.mxu1 %v6535_v57 }
 0x1f9   :  { %3232 = vmatpush.msra.mxu2 %v9687_v51 }
 0x1fa   :  { %2597 = vmatmul.bf16.gmra.mxu3 %v9272_v5  ;;  %2625 = vmatmul.bf16.gmra.mxu0 %v9272_v5  ;;  %v9511_v21 = vpop.f32.mrf.mxu2 }
 0x1fb   :  { %2653 = vmatmul.bf16.gmra.mxu1 %v9272_v5  ;;  %3272 = vmatpush.msrb.mxu0 %v9663_v25  ;;  %v9697_v25 = vld [vmem:[%s11339_s14 + $0x70] sm:$0xff] }
 0x1fc   :  { %3292 = vmatpush.msrb.mxu1 %v9668_v35  ;;  %v9692_v35 = vld [vmem:[%s11339_s14 + $0xf8] sm:$0xff]  ;;  %11511 = vst [vmem:[#allocation57_spill] sm:$0xff] %v9697_v25  ;;  %3233 = vmatpush.msra.mxu2 %v9697_v25 }
 0x1fd   :  { %v9514_v40 = vpop.f32.mrf.mxu3  ;;  %11510 = vst [vmem:[#allocation56_spill] sm:$0xff] %v9692_v35  ;;  %3252 = vmatpush.msra.mxu3 %v9692_v35 }
 0x1ff   :  { %v9516_v45 = vpop.f32.mrf.mxu0 }
 0x200   :  { %v9518_v61 = vpop.f32.mrf.mxu1 }
 0x202   :  { %v9520_v50 = vpop.f32.mrf.mxu2 }
 0x205   :  { %v9522_v59 = vpop.f32.mrf.mxu3 }
 0x207   :  { %v9524_v8 = vpop.f32.mrf.mxu0  ;;  %2574 = vmatmul.bf16.gmra.mxu2 %v9396_v39 }
 0x208   :  { %v9527_v33 = vpop.f32.mrf.mxu1 }
 0x20a   :  { %2602 = vmatmul.bf16.gmra.mxu3 %v9396_v39  ;;  %2630 = vmatmul.bf16.gmra.mxu0 %v9396_v39  ;;  %v9531_v55 = vpop.f32.mrf.mxu2 }
 0x20b   :  { %2658 = vmatmul.bf16.gmra.mxu1 %v9396_v39 }
 0x20d   :  { %v9534_v6 = vpop.f32.mrf.mxu3 }
 0x20f   :  { %v9536_v18 = vpop.f32.mrf.mxu0 }
 0x210   :  { %v9538_v58 = vpop.f32.mrf.mxu1 }
 0x212   :  { %v9540_v11 = vpop.f32.mrf.mxu2 }
 0x215   :  { %v9542_v43 = vpop.f32.mrf.mxu3 }
 0x217   :  { %v9544_v47 = vpop.f32.mrf.mxu0  ;;  %2579 = vmatmul.bf16.gmra.mxu2 %v9406_v2 }
 0x218   :  { %v9547_v37 = vpop.f32.mrf.mxu1 }
 0x21a   :  { %2607 = vmatmul.bf16.gmra.mxu3 %v9406_v2  ;;  %2635 = vmatmul.bf16.gmra.mxu0 %v9406_v2  ;;  %v9551_v41 = vpop.f32.mrf.mxu2 }
 0x21b   :  { %2663 = vmatmul.bf16.gmra.mxu1 %v9406_v2 }
 0x21d   :  { %v9554_v56 = vpop.f32.mrf.mxu3 }
 0x21f   :  { %v2415_v15 = vpop.f32.mrf.mxu0 }
 0x220   :  { %v2442_v60 = vpop.f32.mrf.mxu1 }
 0x222   :  { %v2361_v20 = vpop.f32.mrf.mxu2 }
 0x225   :  { %v2388_v0 = vpop.f32.mrf.mxu3 }
 0x227   :  { %v9556_v27 = vpop.f32.mrf.mxu0  ;;  %2676 = vmatmul.bf16.vlgmr.msrb.gmra.mxu2 %v9242_v31 }
 0x228   :  { %v9559_v23 = vpop.f32.mrf.mxu1 }
 0x22a   :  { %2703 = vmatmul.bf16.vlgmr.msrb.gmra.mxu3 %v9242_v31  ;;  %2730 = vmatmul.bf16.vlgmr.msra.gmra.mxu0 %v9242_v31  ;;  %v9563_v12 = vpop.f32.mrf.mxu2 }
 0x22b   :  { %2757 = vmatmul.bf16.vlgmr.msra.gmra.mxu1 %v9242_v31 }
 0x22d   :  { %v9566_v42 = vpop.f32.mrf.mxu3 }
 0x22e   :  { %v9760_v25 = vadd.f32 %v9566_v42, %v9438_v3  ;;  %v9792_v42 = vld [vmem:[%s11339_s14 + $0xe8] sm:$0xff] }
 0x22f   :  { %v9568_v32 = vpop.f32.mrf.mxu0  ;;  %11528 = vst [vmem:[#allocation74_spill] sm:$0xff] %v9792_v42 }
 0x230   :  { %v9570_v14 = vpop.f32.mrf.mxu1  ;;  %11522 = vst [vmem:[#allocation68_spill] sm:$0xff] %v9760_v25 }
 0x232   :  { %v9572_v36 = vpop.f32.mrf.mxu2 }
 0x233   :  { %11483 = vst [vmem:[#allocation29_spill] sm:$0xff] %v9572_v36  ;;  %v9708_v36 = vld [vmem:[%s11339_s14 + $0xf0] sm:$0xff] }
 0x234   :  { %11512 = vst [vmem:[#allocation58_spill] sm:$0xff] %v9708_v36  ;;  %3253 = vmatpush.msra.mxu3 %v9708_v36 }
 0x235   :  { %v9574_v57 = vpop.f32.mrf.mxu3 }
 0x236   :  { %11484 = vst [vmem:[#allocation30_spill] sm:$0xff] %v9574_v57  ;;  %3254 = vmatpush.msra.mxu3 %v9792_v42  ;;  %v9829_v42 = vld [vmem:[%s11339_s14 + $0x60] sm:$0xff] }
 0x237   :  { %v9576_v15 = vpop.f32.mrf.mxu0  ;;  %2681 = vmatmul.bf16.gmra.mxu2 %v9272_v5 }
 0x238   :  { %11485 = vst [vmem:[#allocation31_spill] sm:$0xff] %v9576_v15  ;;  %v9579_v60 = vpop.f32.mrf.mxu1  ;;  %v9680_v15 = vld [vmem:[%s11339_s14 + $0x1f0] sm:$0xff] }
 0x239   :  { %11486 = vst [vmem:[#allocation32_spill] sm:$0xff] %v9579_v60  ;;  %v9675_v60 = vld [vmem:[%s11339_s14 + $0x170] sm:$0xff]  ;;  %3293 = vmatpush.msrb.mxu1 %v9680_v15 }
 0x23a   :  { %2708 = vmatmul.bf16.gmra.mxu3 %v9272_v5  ;;  %2735 = vmatmul.bf16.gmra.mxu0 %v9272_v5  ;;  %v9583_v31 = vpop.f32.mrf.mxu2  ;;  %11507 = vst [vmem:[#allocation53_spill] sm:$0xff] %v9675_v60 }
 0x23b   :  { %11487 = vst [vmem:[#allocation33_spill] sm:$0xff] %v9583_v31  ;;  %2762 = vmatmul.bf16.gmra.mxu1 %v9272_v5  ;;  %3273 = vmatpush.msrb.mxu0 %v9675_v60 }
 0x23c   :  { %11508 = vst [vmem:[#allocation54_spill] sm:$0xff] %v9680_v15  ;;  %v9718_v15 = vld [vmem:[%s11339_s14 + $0x1e8] sm:$0xff] }
 0x23d   :  { %v9586_v20 = vpop.f32.mrf.mxu3  ;;  %11514 = vst [vmem:[#allocation60_spill] sm:$0xff] %v9718_v15  ;;  %3274 = vmatpush.msrb.mxu0 %v9713_v13  ;;  %3294 = vmatpush.msrb.mxu1 %v9718_v15 }
 0x23e   :  { %11488 = vst [vmem:[#allocation34_spill] sm:$0xff] %v9586_v20 }
 0x23f   :  { %v9588_v0 = vpop.f32.mrf.mxu0  ;;  %3275 = vmatpush.msrb.mxu0 %v9735_v26 }
 0x240   :  { %11489 = vst [vmem:[#allocation35_spill] sm:$0xff] %v9588_v0  ;;  %v9590_v48 = vpop.f32.mrf.mxu1 }
 0x241   :  { %11490 = vst [vmem:[#allocation36_spill] sm:$0xff] %v9590_v48 }
 0x242   :  { %v9592_v46 = vpop.f32.mrf.mxu2 }
 0x243   :  { %11491 = vst [vmem:[#allocation37_spill] sm:$0xff] %v9592_v46 }
 0x245   :  { %v9594_v9 = vpop.f32.mrf.mxu3 }
 0x246   :  { %11492 = vst [vmem:[#allocation38_spill] sm:$0xff] %v9594_v9 }
 0x247   :  { %v9596_v63 = vpop.f32.mrf.mxu0  ;;  %2686 = vmatmul.bf16.gmra.mxu2 %v9396_v39 }
 0x248   :  { %11493 = vst [vmem:[#allocation39_spill] sm:$0xff] %v9596_v63  ;;  %v9599_v62 = vpop.f32.mrf.mxu1 }
 0x249   :  { %11494 = vst [vmem:[#allocation40_spill] sm:$0xff] %v9599_v62 }
 0x24a   :  { %2713 = vmatmul.bf16.gmra.mxu3 %v9396_v39  ;;  %2740 = vmatmul.bf16.gmra.mxu0 %v9396_v39  ;;  %v9603_v5 = vpop.f32.mrf.mxu2 }
 0x24b   :  { %11495 = vst [vmem:[#allocation41_spill] sm:$0xff] %v9603_v5  ;;  %2767 = vmatmul.bf16.gmra.mxu1 %v9396_v39 }
 0x24d   :  { %v9606_v29 = vpop.f32.mrf.mxu3 }
 0x24e   :  { %11496 = vst [vmem:[#allocation42_spill] sm:$0xff] %v9606_v29 }
 0x24f   :  { %v9608_v16 = vpop.f32.mrf.mxu0 }
 0x250   :  { %11497 = vst [vmem:[#allocation43_spill] sm:$0xff] %v9608_v16  ;;  %v9610_v52 = vpop.f32.mrf.mxu1 }
 0x251   :  { %11498 = vst [vmem:[#allocation44_spill] sm:$0xff] %v9610_v52 }
 0x252   :  { %v9612_v28 = vpop.f32.mrf.mxu2 }
 0x253   :  { %11499 = vst [vmem:[#allocation45_spill] sm:$0xff] %v9612_v28 }
 0x255   :  { %v9614_v63 = vpop.f32.mrf.mxu3 }
 0x256   :  { %11500 = vst [vmem:[#allocation46_spill] sm:$0xff] %v9614_v63 }
 0x257   :  { %v9616_v7 = vpop.f32.mrf.mxu0  ;;  %2691 = vmatmul.bf16.gmra.mxu2 %v9406_v2 }
 0x258   :  { %11501 = vst [vmem:[#allocation47_spill] sm:$0xff] %v9616_v7  ;;  %v9619_v62 = vpop.f32.mrf.mxu1 }
 0x259   :  { %11502 = vst [vmem:[#allocation48_spill] sm:$0xff] %v9619_v62 }
 0x25a   :  { %2718 = vmatmul.bf16.gmra.mxu3 %v9406_v2  ;;  %2745 = vmatmul.bf16.gmra.mxu0 %v9406_v2  ;;  %v9623_v39 = vpop.f32.mrf.mxu2 }
 0x25b   :  { %11503 = vst [vmem:[#allocation49_spill] sm:$0xff] %v9623_v39  ;;  %2772 = vmatmul.bf16.gmra.mxu1 %v9406_v2 }
 0x25d   :  { %v9626_v16 = vpop.f32.mrf.mxu3 }
 0x25e   :  { %11504 = vst [vmem:[#allocation50_spill] sm:$0xff] %v9626_v16 }
 0x25f   :  { %v2526_v52 = vpop.f32.mrf.mxu0 }
 0x260   :  { %v2554_v28 = vpop.f32.mrf.mxu1 }
 0x262   :  { %v2470_v29 = vpop.f32.mrf.mxu2 }
 0x265   :  { %v2498_v63 = vpop.f32.mrf.mxu3 }
 0x267   :  { %v2621_v5 = vpop.f32.mrf.mxu0 }
 0x268   :  { %v2649_v7 = vpop.f32.mrf.mxu1  ;;  %v9721_v60 = vadd.f32 %v2621_v5, %v9496_v19  ;;  %v9744_v19 = vadd.f32 %v9556_v27, %v9432_v10  ;;  %v9752_v5 = vadd.f32 %v9563_v12, %v9436_v17  ;;  %v9765_v10 = vld [vmem:[%s11339_s14 + $0x158] sm:$0xff]  ;;  %v9787_v12 = vld [vmem:[%s11339_s14 + $0x68] sm:$0xff] }
 0x269   :  { %v9724_v35 = vadd.f32 %v2649_v7, %v9498_v54  ;;  %v9740_v7 = vld [vmem:[%s11339_s14 + $0x1e0] sm:$0xff]  ;;  %v9748_v54 = vadd.f32 %v9559_v23, %v9434_v4  ;;  %11523 = vst [vmem:[#allocation69_spill] sm:$0xff] %v9765_v10  ;;  %v9770_v4 = vld [vmem:[%s11339_s14 + $0x1d8] sm:$0xff]  ;;  %3276 = vmatpush.msrb.mxu0 %v9765_v10  ;;  %3234 = vmatpush.msra.mxu2 %v9787_v12  ;;  %v9812_v10 = vld [vmem:[%s11339_s14 + $0x1d0] sm:$0xff] }
 0x26a   :  { %v2565_v9 = vpop.f32.mrf.mxu2  ;;  %11515 = vst [vmem:[#allocation61_spill] sm:$0xff] %v9721_v60  ;;  %3295 = vmatpush.msrb.mxu1 %v9740_v7  ;;  %v3042_v17 = vmul.f32 %v9721_v60, %v9721_v60  ;;  %v9818_v26 = vadd.f32 %v9721_v60, %v9744_v19 }
 0x26b   :  { %11516 = vst [vmem:[#allocation62_spill] sm:$0xff] %v9724_v35  ;;  %v3043_v27 = vmul.f32 %v9724_v35, %v9724_v35  ;;  %v9777_v23 = vadd.f32 %v2565_v9, %v9500_v53  ;;  %v9797_v9 = vld [vmem:[%s11339_s14 + $0x150] sm:$0xff]  ;;  %v3038_v53 = vmul.f32 %v9744_v19, %v9744_v19  ;;  %v9822_v15 = vadd.f32 %v9724_v35, %v9748_v54  ;;  %v9841_v35 = vld [vmem:[%s11339_s14 + $0x148] sm:$0xff] }
 0x26c   :  { %11518 = vst [vmem:[#allocation64_spill] sm:$0xff] %v9740_v7  ;;  %3296 = vmatpush.msrb.mxu1 %v9770_v4  ;;  %v3037_v7 = vmul.f32 %v9760_v25, %v9760_v25  ;;  %3277 = vmatpush.msrb.mxu0 %v9797_v9 }
 0x26d   :  { %v2593_v46 = vpop.f32.mrf.mxu3  ;;  %11519 = vst [vmem:[#allocation65_spill] sm:$0xff] %v9744_v19  ;;  %v3040_v19 = vmul.f32 %v9777_v23, %v9777_v23  ;;  %3235 = vmatpush.msra.mxu2 %v9829_v42 }
 0x26e   :  { %11520 = vst [vmem:[#allocation66_spill] sm:$0xff] %v9748_v54  ;;  %v9782_v3 = vadd.f32 %v2593_v46, %v9502_v30  ;;  %v3039_v46 = vmul.f32 %v9748_v54, %v9748_v54  ;;  %v3036_v30 = vmul.f32 %v9752_v5, %v9752_v5  ;;  %3297 = vmatpush.msrb.mxu1 %v9812_v10 }
 0x26f   :  { %v9628_v24 = vpop.f32.mrf.mxu0  ;;  %11521 = vst [vmem:[#allocation67_spill] sm:$0xff] %v9752_v5  ;;  %v9843_v54 = vadd.f32 %v3042_v17, %v3038_v53  ;;  %3278 = vmatpush.msrb.mxu0 %v9841_v35 }
 0x270   :  { %v9630_v62 = vpop.f32.mrf.mxu1  ;;  %11524 = vst [vmem:[#allocation70_spill] sm:$0xff] %v9770_v4  ;;  %v9845_v60 = vadd.f32 %v3043_v27, %v3039_v46  ;;  %v9860_v17 = vadd.f32 %v9628_v24, %v9504_v1  ;;  %v9871_v46 = vld [vmem:[%s11339_s14 + $0x58] sm:$0xff]  ;;  %v9883_v24 = vld [vmem:[%s11339_s14 + $0x140] sm:$0xff] }
 0x271   :  { %11525 = vst [vmem:[#allocation71_spill] sm:$0xff] %v9777_v23  ;;  %v9864_v27 = vadd.f32 %v9630_v62, %v9507_v34  ;;  %3236 = vmatpush.msra.mxu2 %v9871_v46  ;;  %3279 = vmatpush.msrb.mxu0 %v9883_v24 }
 0x272   :  { %v9632_v22 = vpop.f32.mrf.mxu2  ;;  %11526 = vst [vmem:[#allocation72_spill] sm:$0xff] %v9782_v3 }
 0x273   :  { %11527 = vst [vmem:[#allocation73_spill] sm:$0xff] %v9787_v12  ;;  %v9834_v12 = vld [vmem:[%s11339_s14 + $0xe0] sm:$0xff]  ;;  %v9887_v62 = vadd.f32 %v9632_v22, %v9511_v21  ;;  %v9908_v22 = vadd.f32 %v9777_v23, %v9752_v5 }
 0x274   :  { %11529 = vst [vmem:[#allocation75_spill] sm:$0xff] %v9797_v9  ;;  %3255 = vmatpush.msra.mxu3 %v9834_v12  ;;  %v3041_v9 = vmul.f32 %v9782_v3, %v9782_v3 }
 0x275   :  { %v9634_v48 = vpop.f32.mrf.mxu3  ;;  %11531 = vst [vmem:[#allocation77_spill] sm:$0xff] %v9812_v10  ;;  %v9854_v10 = vld [vmem:[%s11339_s14 + $0x1c8] sm:$0xff] }
 0x276   :  { %11533 = vst [vmem:[#allocation79_spill] sm:$0xff] %v9834_v12  ;;  %v9876_v12 = vld [vmem:[%s11339_s14 + $0xd8] sm:$0xff]  ;;  %3298 = vmatpush.msrb.mxu1 %v9854_v10  ;;  %v9891_v1 = vadd.f32 %v9634_v48, %v9514_v40  ;;  %v9923_v40 = vld [vmem:[%s11339_s14 + $0x50] sm:$0xff]  ;;  %v9952_v23 = vadd.f32 %v3041_v9, %v3037_v7  ;;  %v9981_v9 = vmul.f32 %v9887_v62, %v9887_v62 }
 0x277   :  { %v9636_v39 = vpop.f32.mrf.mxu0  ;;  %11534 = vst [vmem:[#allocation80_spill] sm:$0xff] %v9841_v35  ;;  %3256 = vmatpush.msra.mxu3 %v9876_v12  ;;  %3237 = vmatpush.msra.mxu2 %v9923_v40  ;;  %v9977_v7 = vld [vmem:[%s11339_s14 + $0x130] sm:$0xff] }
 0x278   :  { %v9638_v2 = vpop.f32.mrf.mxu1  ;;  %11535 = vst [vmem:[#allocation81_spill] sm:$0xff] %v9854_v10  ;;  %v9895_v34 = vadd.f32 %v9636_v39, %v9516_v45  ;;  %v9904_v10 = vld [vmem:[%s11339_s14 + $0x1c0] sm:$0xff]  ;;  %v9928_v45 = vld [vmem:[%s11339_s14 + $0xd0] sm:$0xff]  ;;  %v9939_v39 = vadd.f32 %v9782_v3, %v9760_v25  ;;  %v9985_v3 = vmul.f32 %v9891_v1, %v9891_v1 }
 0x279   :  { %11536 = vst [vmem:[#allocation82_spill] sm:$0xff] %v9860_v17  ;;  %v9912_v48 = vadd.f32 %v9638_v2, %v9518_v61  ;;  %3299 = vmatpush.msrb.mxu1 %v9904_v10  ;;  %v9933_v61 = vld [vmem:[%s11339_s14 + $0x138] sm:$0xff]  ;;  %3257 = vmatpush.msra.mxu3 %v9928_v45 }
 0x27a   :  { %v9640_v52 = vpop.f32.mrf.mxu2  ;;  %11537 = vst [vmem:[#allocation83_spill] sm:$0xff] %v9864_v27  ;;  %3280 = vmatpush.msrb.mxu0 %v9933_v61  ;;  %v9989_v25 = vmul.f32 %v9895_v34, %v9895_v34 }
 0x27b   :  { %11539 = vst [vmem:[#allocation85_spill] sm:$0xff] %v9887_v62  ;;  %v9916_v21 = vadd.f32 %v9640_v52, %v9520_v50  ;;  %v9935_v50 = vadd.f32 %v3040_v19, %v3036_v30  ;;  %v9950_v52 = vld [vmem:[%s11339_s14 + $0x1b8] sm:$0xff]  ;;  %v9956_v19 = vmul.f32 %v9860_v17, %v9860_v17  ;;  %v9960_v30 = vmul.f32 %v9864_v27, %v9864_v27 }
 0x27c   :  { %11540 = vst [vmem:[#allocation86_spill] sm:$0xff] %v9895_v34  ;;  %3300 = vmatpush.msrb.mxu1 %v9950_v52  ;;  %3281 = vmatpush.msrb.mxu0 %v9977_v7 }
 0x27d   :  { %v9642_v28 = vpop.f32.mrf.mxu3  ;;  %11542 = vst [vmem:[#allocation88_spill] sm:$0xff] %v9904_v10 }
 0x27e   :  { %11543 = vst [vmem:[#allocation89_spill] sm:$0xff] %v9912_v48  ;;  %v9943_v2 = vadd.f32 %v9642_v28, %v9522_v59  ;;  %v9967_v59 = vld [vmem:[%s11339_s14 + $0x48] sm:$0xff] }
 0x27f   :  { %v9644_v29 = vpop.f32.mrf.mxu0  ;;  %11544 = vst [vmem:[#allocation90_spill] sm:$0xff] %v9923_v40  ;;  %v9972_v28 = vld [vmem:[%s11339_s14 + $0xc8] sm:$0xff]  ;;  %3238 = vmatpush.msra.mxu2 %v9967_v59  ;;  %v10020_v40 = vld [vmem:[%s11339_s14 + $0xc0] sm:$0xff] }
 0x280   :  { %v9646_v63 = vpop.f32.mrf.mxu1  ;;  %11545 = vst [vmem:[#allocation91_spill] sm:$0xff] %v9928_v45  ;;  %3258 = vmatpush.msra.mxu3 %v9972_v28  ;;  %v10004_v45 = vmul.f32 %v9916_v21, %v9916_v21 }
 0x281   :  { %11546 = vst [vmem:[#allocation92_spill] sm:$0xff] %v9933_v61  ;;  %v10000_v61 = vmul.f32 %v9912_v48, %v9912_v48 }
 0x282   :  { %v9648_v16 = vpop.f32.mrf.mxu2  ;;  %11547 = vst [vmem:[#allocation93_spill] sm:$0xff] %v9950_v52  ;;  %v9996_v52 = vld [vmem:[%s11339_s14 + $0x1b0] sm:$0xff]  ;;  %3259 = vmatpush.msra.mxu3 %v10020_v40 }
 0x283   :  { %11548 = vst [vmem:[#allocation94_spill] sm:$0xff] %v9967_v59  ;;  %3301 = vmatpush.msrb.mxu1 %v9996_v52 }
 0x284   :  { %11549 = vst [vmem:[#allocation95_spill] sm:$0xff] %v9972_v28  ;;  %v10015_v28 = vld [vmem:[%s11339_s14 + $0x40] sm:$0xff] }
 0x285   :  { %v9650_v0 = vpop.f32.mrf.mxu3  ;;  %11550 = vst [vmem:[#allocation96_spill] sm:$0xff] %v9977_v7  ;;  %3239 = vmatpush.msra.mxu2 %v10015_v28  ;;  %v10044_v7 = vld [vmem:[%s11339_s14 + $0x1a8] sm:$0xff] }
 0x286   :  { %11551 = vst [vmem:[#allocation97_spill] sm:$0xff] %v9996_v52  ;;  %v10037_v52 = vadd.f32 %v9648_v16, %v9531_v55  ;;  %v10048_v10 = vadd.f32 %v9650_v0, %v9534_v6  ;;  %3302 = vmatpush.msrb.mxu1 %v10044_v7  ;;  %v10068_v6 = vld [vmem:[%s11339_s14 + $0xb8] sm:$0xff] }
 0x287   :  { %v9652_v49 = vpop.f32.mrf.mxu0  ;;  %11553 = vst [vmem:[#allocation99_spill] sm:$0xff] %v10068_v6  ;;  %3260 = vmatpush.msra.mxu3 %v10068_v6 }
 0x288   :  { %v9654_v38 = vpop.f32.mrf.mxu1 }
 0x289   :  { %v10056_v16 = vadd.f32 %v9654_v38, %v9538_v58  ;;  %v10073_v38 = vld [vmem:[%s11339_s14 + $0x120] sm:$0xff] }
 0x28a   :  { %v9656_v20 = vpop.f32.mrf.mxu2  ;;  %11554 = vst [vmem:[#allocation100_spill] sm:$0xff] %v10073_v38 }
 0x28d   :  { %v9658_v31 = vpop.f32.mrf.mxu3 }
 0x28f   :  { %v9682_v44 = vpop.f32.mrf.mxu0 }
 0x290   :  { %v9701_v57 = vpop.f32.mrf.mxu1  ;;  %v10085_v58 = vadd.f32 %v9682_v44, %v9544_v47  ;;  %v10111_v47 = vld [vmem:[%s11339_s14 + $0x30] sm:$0xff] }
 0x291   :  { %11559 = vst [vmem:[#allocation105_spill] sm:$0xff] %v10111_v47 }
 0x292   :  { %v9728_v51 = vpop.f32.mrf.mxu2  ;;  %11555 = vst [vmem:[#allocation101_spill] sm:$0xff] %v10085_v58 }
 0x293   :  { %v10104_v44 = vadd.f32 %v9728_v51, %v9551_v41  ;;  %v10129_v41 = vmul.f32 %v10037_v52, %v10037_v52 }
 0x295   :  { %v9754_v36 = vpop.f32.mrf.mxu3  ;;  %11558 = vst [vmem:[#allocation104_spill] sm:$0xff] %v10104_v44 }
 0x297   :  { %v9805_v4 = vpop.f32.mrf.mxu0 }
 0x298   :  { %11530 = vst [vmem:[#allocation76_spill] sm:$0xff] %v9805_v4  ;;  %v9824_v13 = vpop.f32.mrf.mxu1 }
 0x299   :  { %11532 = vst [vmem:[#allocation78_spill] sm:$0xff] %v9824_v13 }
 0x29a   :  { %v9866_v53 = vpop.f32.mrf.mxu2 }
 0x29b   :  { %11538 = vst [vmem:[#allocation84_spill] sm:$0xff] %v9866_v53 }
 0x29d   :  { %v9897_v35 = vpop.f32.mrf.mxu3 }
 0x29e   :  { %11541 = vst [vmem:[#allocation87_spill] sm:$0xff] %v9897_v35 }
 0x29f   :  { %v2638_v5 = vpop.f32.mrf.mxu0 }
 0x2a0   :  { %v10008_v5 = vadd.f32 %v9644_v29, %v9524_v8  ;;  %v2666_v59 = vpop.f32.mrf.mxu1  ;;  %v10025_v8 = vld [vmem:[%s11339_s14 + $0x128] sm:$0xff]  ;;  %v10029_v29 = vmul.f32 %v9943_v2, %v9943_v2 }
 0x2a1   :  { %v10033_v59 = vadd.f32 %v9646_v63, %v9527_v33  ;;  %v10052_v33 = vadd.f32 %v9652_v49, %v9536_v18  ;;  %3282 = vmatpush.msrb.mxu0 %v10025_v8  ;;  %v10063_v63 = vld [vmem:[%s11339_s14 + $0x38] sm:$0xff]  ;;  %v10077_v49 = vadd.f32 %v9656_v20, %v9540_v11  ;;  %v10081_v18 = vadd.f32 %v9658_v31, %v9542_v43  ;;  %v10116_v31 = vld [vmem:[%s11339_s14 + $0xb0] sm:$0xff] }
 0x2a2   :  { %v2582_v55 = vpop.f32.mrf.mxu2  ;;  %11552 = vst [vmem:[#allocation98_spill] sm:$0xff] %v10063_v63  ;;  %3240 = vmatpush.msra.mxu2 %v10063_v63  ;;  %v10096_v11 = vmul.f32 %v10008_v5, %v10008_v5  ;;  %v10100_v43 = vadd.f32 %v9701_v57, %v9547_v37  ;;  %v10121_v37 = vld [vmem:[%s11339_s14 + $0x118] sm:$0xff]  ;;  %v10133_v57 = vadd.f32 %v9754_v36, %v9554_v56  ;;  %v10159_v36 = vld [vmem:[%s11339_s14 + $0x28] sm:$0xff]  ;;  %v10188_v63 = vld [vmem:[%s11339_s14 + $0x190] sm:$0xff] }
 0x2a3   :  { %v10092_v55 = vld [vmem:[%s11339_s14 + $0x1a0] sm:$0xff]  ;;  %3283 = vmatpush.msrb.mxu0 %v10073_v38  ;;  %11560 = vst [vmem:[#allocation106_spill] sm:$0xff] %v10116_v31  ;;  %v10125_v51 = vmul.f32 %v10033_v59, %v10033_v59  ;;  %3261 = vmatpush.msra.mxu3 %v10116_v31  ;;  %v10140_v20 = vld [vmem:[%s11339_s14 + $0x198] sm:$0xff]  ;;  %v10152_v56 = vmul.f32 %v10056_v16, %v10056_v16  ;;  %v10164_v31 = vld [vmem:[%s11339_s14 + $0xa8] sm:$0xff] }
 0x2a4   :  { %11556 = vst [vmem:[#allocation102_spill] sm:$0xff] %v10092_v55  ;;  %3303 = vmatpush.msrb.mxu1 %v10092_v55  ;;  %3241 = vmatpush.msra.mxu2 %v10111_v47  ;;  %v10148_v55 = vmul.f32 %v10052_v33, %v10052_v33  ;;  %v10169_v47 = vld [vmem:[%s11339_s14 + $0x110] sm:$0xff]  ;;  %v10181_v38 = vmul.f32 %v10085_v58, %v10085_v58 }
 0x2a5   :  { %v2610_v0 = vpop.f32.mrf.mxu3  ;;  %11557 = vst [vmem:[#allocation103_spill] sm:$0xff] %v10100_v43  ;;  %3284 = vmatpush.msrb.mxu0 %v10121_v37  ;;  %3262 = vmatpush.msra.mxu3 %v10164_v31 }
 0x2a6   :  { %11561 = vst [vmem:[#allocation107_spill] sm:$0xff] %v10121_v37  ;;  %v10144_v0 = vmul.f32 %v10048_v10, %v10048_v10  ;;  %3304 = vmatpush.msrb.mxu1 %v10140_v20  ;;  %v10173_v37 = vmul.f32 %v10077_v49, %v10077_v49  ;;  %3242 = vmatpush.msra.mxu2 %v10159_v36 }
 0x2a7   :  { %11562 = vst [vmem:[#allocation108_spill] sm:$0xff] %v10133_v57  ;;  %v2731_v6 = vpop.f32.mrf.mxu0  ;;  %3285 = vmatpush.msrb.mxu0 %v10169_v47 }
 0x2a8   :  { %11563 = vst [vmem:[#allocation109_spill] sm:$0xff] %v10140_v20  ;;  %v10177_v20 = vmul.f32 %v10081_v18, %v10081_v18  ;;  %v2758_v58 = vpop.f32.mrf.mxu1  ;;  %3305 = vmatpush.msrb.mxu1 %v10188_v63 }
 0x2a9   :  { %11564 = vst [vmem:[#allocation110_spill] sm:$0xff] %v10164_v31  ;;  %v10204_v31 = vld [vmem:[%s11339_s14 + $0x20] sm:$0xff] }
 0x2aa   :  { %11565 = vst [vmem:[#allocation111_spill] sm:$0xff] %v10169_v47  ;;  %3243 = vmatpush.msra.mxu2 %v10204_v31  ;;  %v10230_v47 = vld [vmem:[%s11339_s14 + $0x188] sm:$0xff] }
 0x2ab   :  { %11566 = vst [vmem:[#allocation112_spill] sm:$0xff] %v10173_v37  ;;  %v10192_v37 = vmul.f32 %v10100_v43, %v10100_v43  ;;  %3306 = vmatpush.msrb.mxu1 %v10230_v47 }
 0x2ac   :  { %11567 = vst [vmem:[#allocation113_spill] sm:$0xff] %v10177_v20  ;;  %v10196_v20 = vmul.f32 %v10104_v44, %v10104_v44  ;;  %v10234_v44 = vmul.f32 %v9824_v13, %v9824_v13 }
 0x2ad   :  { %11568 = vst [vmem:[#allocation114_spill] sm:$0xff] %v10181_v38  ;;  %v2794_v38 = vadd.f32 %v2731_v6, %v9568_v32  ;;  %v10218_v32 = vmul.f32 %v10133_v57, %v10133_v57  ;;  %v10222_v6 = vmul.f32 %v9805_v4, %v9805_v4  ;;  %v2704_v13 = vpop.f32.mrf.mxu3 }
 0x2ae   :  { %11569 = vst [vmem:[#allocation115_spill] sm:$0xff] %v10188_v63  ;;  %v2795_v63 = vadd.f32 %v2758_v58, %v9570_v14  ;;  %v2677_v14 = vpop.f32.mrf.mxu2  ;;  %v10248_v58 = vld [vmem:[%s11339_s14 + $0x18] sm:$0xff] }
 0x2af   :  { %11570 = vst [vmem:[#allocation116_spill] sm:$0xff] %v10192_v37  ;;  %v10209_v37 = vld [vmem:[%s11339_s14 + $0xa0] sm:$0xff]  ;;  %3244 = vmatpush.msra.mxu2 %v10248_v58 }
 0x2b0   :  { %11571 = vst [vmem:[#allocation117_spill] sm:$0xff] %v10196_v20  ;;  %v10214_v20 = vld [vmem:[%s11339_s14 + $0x108] sm:$0xff]  ;;  %3263 = vmatpush.msra.mxu3 %v10209_v37 }
 0x2b1   :  { %11572 = vst [vmem:[#allocation118_spill] sm:$0xff] %v10204_v31  ;;  %3286 = vmatpush.msrb.mxu0 %v10214_v20 }
 0x2b2   :  { %11573 = vst [vmem:[#allocation119_spill] sm:$0xff] %v10209_v37  ;;  %v10273_v37 = vld [vmem:[%s11339_s14 + $0x180] sm:$0xff] }
 0x2b3   :  { %11574 = vst [vmem:[#allocation120_spill] sm:$0xff] %v10214_v20  ;;  %3307 = vmatpush.msrb.mxu1 %v10273_v37 }
 0x2b4   :  { %11575 = vst [vmem:[#allocation121_spill] sm:$0xff] %v10218_v32  ;;  %v10238_v32 = vmul.f32 %v9866_v53, %v9866_v53 }
 0x2b5   :  { %11576 = vst [vmem:[#allocation122_spill] sm:$0xff] %v10222_v6  ;;  %v11580_v6 = vld [vmem:[#allocation9_spill] sm:$0xff] }
 0x2b6   :  { %11577 = vst [vmem:[#allocation123_spill] sm:$0xff] %v10230_v47  ;;  %v10241_v4 = vadd.f32 %v2794_v38, %v11580_v6  ;;  %v10258_v38 = vld [vmem:[%s11339_s14 + $0x100] sm:$0xff]  ;;  %v10262_v6 = vmul.f32 %v9897_v35, %v9897_v35  ;;  %v11594_v35 = vld [vmem:[#allocation52_spill] sm:$0xff] }
 0x2b7   :  { %11578 = vst [vmem:[#allocation124_spill] sm:$0xff] %v10234_v44  ;;  %v10253_v44 = vld [vmem:[%s11339_s14 + $0x98] sm:$0xff]  ;;  %v11588_v47 = vld [vmem:[#allocation29_spill] sm:$0xff]  ;;  %3287 = vmatpush.msrb.mxu0 %v10258_v38  ;;  %3372 = vmatpush.msra.mxu1 %v11594_v35 }
 0x2b8   :  { %11579 = vst [vmem:[#allocation125_spill] sm:$0xff] %v10238_v32  ;;  %v11586_v32 = vld [vmem:[#allocation10_spill] sm:$0xff]  ;;  %v2792_v20 = vadd.f32 %v2677_v14, %v11588_v47  ;;  %3264 = vmatpush.msra.mxu3 %v10253_v44  ;;  %v2999_v31 = vadd.f32 %v9818_v26, %v10241_v4  ;;  %v10285_v47 = vld [vmem:[%s11339_s14 + $0x10] sm:$0xff] }
 0x2b9   :  { %11581 = vst [vmem:[#allocation9_spill] sm:$0xff] %v10241_v4  ;;  %v10265_v53 = vadd.f32 %v2795_v63, %v11586_v32  ;;  %v11590_v63 = vld [vmem:[#allocation30_spill] sm:$0xff]  ;;  %v10290_v14 = vld [vmem:[%s11339_s14 + $0x90] sm:$0xff]  ;;  %3245 = vmatpush.msra.mxu2 %v10285_v47 }
 0x2ba   :  { %11582 = vst [vmem:[#allocation126_spill] sm:$0xff] %v10248_v58  ;;  %v2793_v32 = vadd.f32 %v2704_v13, %v11590_v63  ;;  %v11591_v63 = vld [vmem:[#allocation11_spill] sm:$0xff]  ;;  %v3000_v57 = vadd.f32 %v2999_v31, %v9860_v17  ;;  %3265 = vmatpush.msra.mxu3 %v10290_v14  ;;  %v11600_v17 = vld [vmem:[#allocation54_spill] sm:$0xff] }
 0x2bb   :  { %11583 = vst [vmem:[#allocation127_spill] sm:$0xff] %v10253_v44  ;;  %v3018_v26 = vadd.f32 %v9822_v15, %v10265_v53  ;;  %v3047_v13 = vmul.f32 %v10265_v53, %v10265_v53  ;;  %v11595_v44 = vld [vmem:[#allocation12_spill] sm:$0xff]  ;;  %v10311_v15 = vld [vmem:[%s11339_s14 + $0x8] sm:$0xff]  ;;  %3373 = vmatpush.msra.mxu1 %v11600_v17 }
 0x2bc   :  { %11584 = vst [vmem:[#allocation128_spill] sm:$0xff] %v10258_v38  ;;  %v10303_v58 = vadd.f32 %v2793_v32, %v11595_v44  ;;  %v2733_v44 = vpop.f32.mrf.mxu0  ;;  %3246 = vmatpush.msra.mxu2 %v10311_v15 }
 0x2bd   :  { %11585 = vst [vmem:[#allocation129_spill] sm:$0xff] %v10262_v6  ;;  %v3046_v6 = vmul.f32 %v10241_v4, %v10241_v4  ;;  %v10297_v4 = vadd.f32 %v2792_v20, %v11591_v63  ;;  %v3019_v31 = vadd.f32 %v3018_v26, %v9864_v27  ;;  %v11598_v20 = vld [vmem:[#allocation53_spill] sm:$0xff] }
 0x2be   :  { %11587 = vst [vmem:[#allocation10_spill] sm:$0xff] %v10265_v53  ;;  %v2980_v32 = vadd.f32 %v9939_v39, %v10303_v58  ;;  %v2760_v53 = vpop.f32.mrf.mxu1  ;;  %v10335_v26 = vld [vmem:[%s11339_s14] sm:$0xff]  ;;  %v11601_v39 = vld [vmem:[#allocation32_spill] sm:$0xff] }
 0x2bf   :  { %11589 = vst [vmem:[#allocation29_spill] sm:$0xff] %v10273_v37  ;;  %v11593_v37 = vld [vmem:[#allocation51_spill] sm:$0xff]  ;;  %v3131_v38 = vadd.f32 %v9843_v54, %v3046_v6  ;;  %v2961_v35 = vadd.f32 %v9908_v22, %v10297_v4  ;;  %v3044_v54 = vmul.f32 %v10297_v4, %v10297_v4  ;;  %v10323_v6 = vld [vmem:[%s11339_s14 + $0x88] sm:$0xff]  ;;  %3247 = vmatpush.msra.mxu2 %v10335_v26 }
 0x2c0   :  { %11592 = vst [vmem:[#allocation30_spill] sm:$0xff] %v10297_v4  ;;  %3352 = vmatpush.msra.mxu0 %v11593_v37  ;;  %v3150_v37 = vadd.f32 %v9845_v60, %v3047_v13  ;;  %v3045_v60 = vmul.f32 %v10303_v58, %v10303_v58  ;;  %v11599_v22 = vld [vmem:[#allocation31_spill] sm:$0xff]  ;;  %v2815_v4 = vadd.f32 %v2760_v53, %v11601_v39 }
 0x2c1   :  { %11596 = vst [vmem:[#allocation11_spill] sm:$0xff] %v10303_v58  ;;  %v2814_v13 = vadd.f32 %v2733_v44, %v11599_v22  ;;  %v3132_v63 = vadd.f32 %v3131_v38, %v9956_v19  ;;  %v3093_v27 = vadd.f32 %v9935_v50, %v3044_v54  ;;  %v10345_v19 = vld [vmem:[%s11339_s14 + $0x80] sm:$0xff]  ;;  %v2981_v17 = vadd.f32 %v2980_v32, %v9891_v1  ;;  %v11603_v53 = vld [vmem:[#allocation59_spill] sm:$0xff] }
 0x2c2   :  { %11597 = vst [vmem:[#allocation51_spill] sm:$0xff] %v10311_v15  ;;  %3353 = vmatpush.msra.mxu0 %v11598_v20  ;;  %v2962_v20 = vadd.f32 %v2961_v35, %v9887_v62  ;;  %v3151_v58 = vadd.f32 %v3150_v37, %v9960_v30  ;;  %v3112_v38 = vadd.f32 %v9952_v23, %v3045_v60  ;;  %v11602_v44 = vld [vmem:[#allocation13_spill] sm:$0xff]  ;;  %v2679_v35 = vpop.f32.mrf.mxu2  ;;  %v11604_v30 = vld [vmem:[#allocation14_spill] sm:$0xff]  ;;  %v2706_v62 = vpop.f32.mrf.mxu3  ;;  %v11607_v15 = vld [vmem:[#allocation60_spill] sm:$0xff] }
 0x2c3   :  { %v10350_v22 = vadd.f32 %v2814_v13, %v11602_v44  ;;  %3266 = vmatpush.msra.mxu3 %v10323_v6  ;;  %v3094_v50 = vadd.f32 %v3093_v27, %v9981_v9  ;;  %v10356_v37 = vadd.f32 %v2815_v4, %v11604_v30  ;;  %v11606_v54 = vld [vmem:[#allocation33_spill] sm:$0xff]  ;;  %3374 = vmatpush.msra.mxu1 %v11607_v15  ;;  %v11608_v13 = vld [vmem:[#allocation34_spill] sm:$0xff]  ;;  %v11609_v9 = vld [vmem:[#allocation15_spill] sm:$0xff] }
 0x2c4   :  { %3354 = vmatpush.msra.mxu0 %v11603_v53  ;;  %v2812_v39 = vadd.f32 %v2679_v35, %v11606_v54  ;;  %v3113_v23 = vadd.f32 %v3112_v38, %v9985_v3  ;;  %v2813_v44 = vadd.f32 %v2706_v62, %v11608_v13  ;;  %v11610_v35 = vld [vmem:[#allocation55_spill] sm:$0xff]  ;;  %v11611_v3 = vld [vmem:[#allocation56_spill] sm:$0xff] }
 0x2c5   :  { %11605 = vst [vmem:[#allocation52_spill] sm:$0xff] %v10356_v37  ;;  %v3001_v32 = vadd.f32 %v3000_v57, %v10350_v22  ;;  %v3054_v60 = vmul.f32 %v10350_v22, %v10350_v22  ;;  %3267 = vmatpush.msra.mxu3 %v10345_v19  ;;  %v3020_v4 = vadd.f32 %v3019_v31, %v10356_v37  ;;  %v11612_v53 = vld [vmem:[#allocation16_spill] sm:$0xff]  ;;  %v11613_v62 = vld [vmem:[#allocation63_spill] sm:$0xff] }
 0x2c6   :  { %v3055_v27 = vmul.f32 %v10356_v37, %v10356_v37  ;;  %v10371_v15 = vadd.f32 %v2812_v39, %v11609_v9  ;;  %3312 = vmatpush.msrb.mxu2 %v11610_v35  ;;  %v10377_v30 = vadd.f32 %v2813_v44, %v11612_v53  ;;  %3355 = vmatpush.msra.mxu0 %v11613_v62  ;;  %v11614_v54 = vld [vmem:[#allocation64_spill] sm:$0xff]  ;;  %v2736_v35 = vpop.f32.mrf.mxu0  ;;  %v11616_v44 = vld [vmem:[#allocation35_spill] sm:$0xff]  ;;  %v2763_v62 = vpop.f32.mrf.mxu1 }
 0x2c7   :  { %3332 = vmatpush.msrb.mxu3 %v11611_v3  ;;  %v3002_v57 = vadd.f32 %v3001_v32, %v9895_v34  ;;  %v3133_v38 = vadd.f32 %v3132_v63, %v3054_v60  ;;  %3375 = vmatpush.msra.mxu1 %v11614_v54  ;;  %v3021_v31 = vadd.f32 %v3020_v4, %v9912_v48  ;;  %v11615_v3 = vld [vmem:[#allocation57_spill] sm:$0xff]  ;;  %v11617_v4 = vld [vmem:[#allocation58_spill] sm:$0xff] }
 0x2c8   :  { %v3152_v13 = vadd.f32 %v3151_v58, %v3055_v27  ;;  %v2963_v39 = vadd.f32 %v2962_v20, %v10371_v15  ;;  %v3052_v9 = vmul.f32 %v10371_v15, %v10371_v15  ;;  %3313 = vmatpush.msrb.mxu2 %v11615_v3  ;;  %v2982_v32 = vadd.f32 %v2981_v17, %v10377_v30  ;;  %v11618_v27 = vld [vmem:[#allocation36_spill] sm:$0xff]  ;;  %v11619_v3 = vld [vmem:[#allocation69_spill] sm:$0xff] }
 0x2c9   :  { %v3134_v63 = vadd.f32 %v3133_v38, %v9989_v25  ;;  %v3053_v60 = vmul.f32 %v10377_v30, %v10377_v30  ;;  %v2834_v53 = vadd.f32 %v2736_v35, %v11616_v44  ;;  %3333 = vmatpush.msrb.mxu3 %v11617_v4  ;;  %v2835_v54 = vadd.f32 %v2763_v62, %v11618_v27  ;;  %v11620_v38 = vld [vmem:[#allocation17_spill] sm:$0xff]  ;;  %v11621_v35 = vld [vmem:[#allocation70_spill] sm:$0xff] }
 0x2ca   :  { %v3153_v58 = vadd.f32 %v3152_v13, %v10000_v61  ;;  %v3095_v20 = vadd.f32 %v3094_v50, %v3052_v9  ;;  %v2964_v48 = vadd.f32 %v2963_v39, %v9916_v21  ;;  %3356 = vmatpush.msra.mxu0 %v11619_v3  ;;  %v2682_v37 = vpop.f32.mrf.mxu2  ;;  %v2983_v34 = vadd.f32 %v2982_v32, %v9943_v2  ;;  %v11622_v44 = vld [vmem:[#allocation73_spill] sm:$0xff]  ;;  %v11623_v4 = vld [vmem:[#allocation18_spill] sm:$0xff]  ;;  %v2709_v9 = vpop.f32.mrf.mxu3 }
 0x2cb   :  { %v3114_v25 = vadd.f32 %v3113_v23, %v3053_v60  ;;  %v10397_v17 = vadd.f32 %v2834_v53, %v11620_v38  ;;  %3376 = vmatpush.msra.mxu1 %v11621_v35  ;;  %3314 = vmatpush.msrb.mxu2 %v11622_v44  ;;  %v10403_v61 = vadd.f32 %v2835_v54, %v11623_v4  ;;  %v11624_v50 = vld [vmem:[#allocation37_spill] sm:$0xff]  ;;  %v11625_v62 = vld [vmem:[#allocation74_spill] sm:$0xff]  ;;  %v11626_v23 = vld [vmem:[#allocation75_spill] sm:$0xff] }
 0x2cc   :  { %v2832_v13 = vadd.f32 %v2682_v37, %v11624_v50  ;;  %v3096_v39 = vadd.f32 %v3095_v20, %v10004_v45  ;;  %3334 = vmatpush.msrb.mxu3 %v11625_v62  ;;  %3357 = vmatpush.msra.mxu0 %v11626_v23  ;;  %v11627_v53 = vld [vmem:[#allocation38_spill] sm:$0xff]  ;;  %v11628_v54 = vld [vmem:[#allocation77_spill] sm:$0xff]  ;;  %v11629_v20 = vld [vmem:[#allocation19_spill] sm:$0xff] }
 0x2cd   :  { %v3003_v60 = vadd.f32 %v3002_v57, %v10397_v17  ;;  %v3062_v32 = vmul.f32 %v10397_v17, %v10397_v17  ;;  %v2833_v27 = vadd.f32 %v2709_v9, %v11627_v53  ;;  %v3115_v3 = vadd.f32 %v3114_v25, %v10029_v29  ;;  %3377 = vmatpush.msra.mxu1 %v11628_v54  ;;  %v11630_v57 = vld [vmem:[#allocation79_spill] sm:$0xff]  ;;  %v11631_v44 = vld [vmem:[#allocation20_spill] sm:$0xff]  ;;  %v11633_v50 = vld [vmem:[#allocation81_spill] sm:$0xff] }
 0x2ce   :  { %v3022_v37 = vadd.f32 %v3021_v31, %v10403_v61  ;;  %v3063_v45 = vmul.f32 %v10403_v61, %v10403_v61  ;;  %v10419_v38 = vadd.f32 %v2832_v13, %v11629_v20  ;;  %3315 = vmatpush.msrb.mxu2 %v9829_v42  ;;  %3335 = vmatpush.msrb.mxu3 %v11630_v57  ;;  %v11632_v25 = vld [vmem:[#allocation80_spill] sm:$0xff]  ;;  %v2738_v62 = vpop.f32.mrf.mxu0  ;;  %v11636_v20 = vld [vmem:[#allocation21_spill] sm:$0xff] }
 0x2cf   :  { %v3135_v35 = vadd.f32 %v3134_v63, %v3062_v32  ;;  %v10424_v4 = vadd.f32 %v2833_v27, %v11631_v44  ;;  %v3004_v29 = vadd.f32 %v3003_v60, %v10008_v5  ;;  %3358 = vmatpush.msra.mxu0 %v11632_v25  ;;  %3378 = vmatpush.msra.mxu1 %v11633_v50  ;;  %v11634_v60 = vld [vmem:[#allocation39_spill] sm:$0xff]  ;;  %v11635_v54 = vld [vmem:[#allocation40_spill] sm:$0xff]  ;;  %v11640_v50 = vld [vmem:[#allocation41_spill] sm:$0xff] }
 0x2d0   :  { %v3154_v31 = vadd.f32 %v3153_v58, %v3063_v45  ;;  %v2965_v9 = vadd.f32 %v2964_v48, %v10419_v38  ;;  %v3060_v13 = vmul.f32 %v10419_v38, %v10419_v38  ;;  %v3023_v42 = vadd.f32 %v3022_v37, %v10033_v59  ;;  %3316 = vmatpush.msrb.mxu2 %v9871_v46  ;;  %v2765_v58 = vpop.f32.mrf.mxu1 }
 0x2d1   :  { %v2984_v63 = vadd.f32 %v2983_v34, %v10424_v4  ;;  %v3061_v23 = vmul.f32 %v10424_v4, %v10424_v4  ;;  %v2854_v32 = vadd.f32 %v2738_v62, %v11634_v60  ;;  %v3136_v53 = vadd.f32 %v3135_v35, %v10096_v11  ;;  %3336 = vmatpush.msrb.mxu3 %v9876_v12  ;;  %v11637_v11 = vld [vmem:[#allocation88_spill] sm:$0xff]  ;;  %v11638_v35 = vld [vmem:[#allocation90_spill] sm:$0xff] }
 0x2d2   :  { %v2966_v48 = vadd.f32 %v2965_v9, %v10037_v52  ;;  %v3097_v27 = vadd.f32 %v3096_v39, %v3060_v13  ;;  %v2855_v45 = vadd.f32 %v2765_v58, %v11635_v54  ;;  %v3155_v37 = vadd.f32 %v3154_v31, %v10125_v51  ;;  %3359 = vmatpush.msra.mxu0 %v9883_v24  ;;  %v2684_v44 = vpop.f32.mrf.mxu2  ;;  %v11639_v39 = vld [vmem:[#allocation22_spill] sm:$0xff]  ;;  %v2711_v31 = vpop.f32.mrf.mxu3  ;;  %v11641_v24 = vld [vmem:[#allocation91_spill] sm:$0xff]  ;;  %v11642_v9 = vld [vmem:[#allocation92_spill] sm:$0xff] }
 0x2d3   :  { %v2985_v46 = vadd.f32 %v2984_v63, %v10048_v10  ;;  %v3116_v34 = vadd.f32 %v3115_v3, %v3061_v23  ;;  %v10446_v57 = vadd.f32 %v2854_v32, %v11636_v20  ;;  %3379 = vmatpush.msra.mxu1 %v11637_v11  ;;  %3317 = vmatpush.msrb.mxu2 %v11638_v35  ;;  %v11643_v63 = vld [vmem:[#allocation42_spill] sm:$0xff]  ;;  %v11645_v58 = vld [vmem:[#allocation23_spill] sm:$0xff]  ;;  %v11650_v11 = vld [vmem:[#allocation97_spill] sm:$0xff] }
 0x2d4   :  { %v3098_v12 = vadd.f32 %v3097_v27, %v10129_v41  ;;  %v10452_v25 = vadd.f32 %v2855_v45, %v11639_v39  ;;  %v2852_v51 = vadd.f32 %v2684_v44, %v11640_v50  ;;  %3337 = vmatpush.msrb.mxu3 %v11641_v24  ;;  %3360 = vmatpush.msra.mxu0 %v11642_v9  ;;  %v11644_v41 = vld [vmem:[#allocation93_spill] sm:$0xff]  ;;  %v11646_v54 = vld [vmem:[#allocation94_spill] sm:$0xff]  ;;  %v11649_v44 = vld [vmem:[#allocation96_spill] sm:$0xff] }
 0x2d5   :  { %v3117_v3 = vadd.f32 %v3116_v34, %v10144_v0  ;;  %v3005_v13 = vadd.f32 %v3004_v29, %v10446_v57  ;;  %v3070_v62 = vmul.f32 %v10446_v57, %v10446_v57  ;;  %v2853_v23 = vadd.f32 %v2711_v31, %v11643_v63  ;;  %3380 = vmatpush.msra.mxu1 %v11644_v41  ;;  %v11647_v0 = vld [vmem:[#allocation95_spill] sm:$0xff]  ;;  %v11648_v34 = vld [vmem:[#allocation24_spill] sm:$0xff] }
 0x2d6   :  { %v3024_v60 = vadd.f32 %v3023_v42, %v10452_v25  ;;  %v3071_v32 = vmul.f32 %v10452_v25, %v10452_v25  ;;  %v10467_v27 = vadd.f32 %v2852_v51, %v11645_v58  ;;  %3318 = vmatpush.msrb.mxu2 %v11646_v54  ;;  %3338 = vmatpush.msrb.mxu3 %v11647_v0  ;;  %v2741_v51 = vpop.f32.mrf.mxu0  ;;  %v11651_v9 = vld [vmem:[#allocation43_spill] sm:$0xff]  ;;  %v11652_v63 = vld [vmem:[#allocation44_spill] sm:$0xff]  ;;  %v11654_v58 = vld [vmem:[#allocation98_spill] sm:$0xff] }
 0x2d7   :  { %v3006_v29 = vadd.f32 %v3005_v13, %v10052_v33  ;;  %v3137_v45 = vadd.f32 %v3136_v53, %v3070_v62  ;;  %v10473_v20 = vadd.f32 %v2853_v23, %v11648_v34  ;;  %3361 = vmatpush.msra.mxu0 %v11649_v44  ;;  %3381 = vmatpush.msra.mxu1 %v11650_v11  ;;  %v11657_v0 = vld [vmem:[#allocation112_spill] sm:$0xff] }
 0x2d8   :  { %v3025_v42 = vadd.f32 %v3024_v60, %v10056_v16  ;;  %v3156_v35 = vadd.f32 %v3155_v37, %v3071_v32  ;;  %v2967_v39 = vadd.f32 %v2966_v48, %v10467_v27  ;;  %v3068_v50 = vmul.f32 %v10467_v27, %v10467_v27  ;;  %3319 = vmatpush.msrb.mxu2 %v10015_v28  ;;  %v2768_v62 = vpop.f32.mrf.mxu1 }
 0x2d9   :  { %v3138_v53 = vadd.f32 %v3137_v45, %v10148_v55  ;;  %v2986_v31 = vadd.f32 %v2985_v46, %v10473_v20  ;;  %v3069_v24 = vmul.f32 %v10473_v20, %v10473_v20  ;;  %v2874_v13 = vadd.f32 %v2741_v51, %v11651_v9  ;;  %3339 = vmatpush.msrb.mxu3 %v10020_v40  ;;  %v11653_v55 = vld [vmem:[#allocation25_spill] sm:$0xff]  ;;  %v11655_v40 = vld [vmem:[#allocation26_spill] sm:$0xff]  ;;  %v11663_v9 = vld [vmem:[#allocation27_spill] sm:$0xff] }
 0x2da   :  { %v3157_v48 = vadd.f32 %v3156_v35, %v10152_v56  ;;  %v3099_v37 = vadd.f32 %v3098_v12, %v3068_v50  ;;  %v2875_v23 = vadd.f32 %v2768_v62, %v11652_v63  ;;  %v2968_v41 = vadd.f32 %v2967_v39, %v10077_v49  ;;  %3362 = vmatpush.msra.mxu0 %v10025_v8  ;;  %v2687_v60 = vpop.f32.mrf.mxu2  ;;  %v11656_v12 = vld [vmem:[#allocation45_spill] sm:$0xff]  ;;  %v2714_v34 = vpop.f32.mrf.mxu3  ;;  %v11658_v8 = vld [vmem:[#allocation99_spill] sm:$0xff]  ;;  %v11662_v51 = vld [vmem:[#allocation102_spill] sm:$0xff] }
 0x2db   :  { %v3118_v28 = vadd.f32 %v3117_v3, %v3069_v24  ;;  %v10493_v46 = vadd.f32 %v2874_v13, %v11653_v55  ;;  %v2987_v32 = vadd.f32 %v2986_v31, %v10081_v18  ;;  %3382 = vmatpush.msra.mxu1 %v10044_v7  ;;  %3320 = vmatpush.msrb.mxu2 %v11654_v58  ;;  %v11659_v3 = vld [vmem:[#allocation100_spill] sm:$0xff]  ;;  %v11660_v7 = vld [vmem:[#allocation46_spill] sm:$0xff]  ;;  %v11661_v39 = vld [vmem:[#allocation113_spill] sm:$0xff] }
 0x2dc   :  { %v10499_v56 = vadd.f32 %v2875_v23, %v11655_v40  ;;  %v2872_v54 = vadd.f32 %v2687_v60, %v11656_v12  ;;  %v3100_v45 = vadd.f32 %v3099_v37, %v11657_v0  ;;  %3340 = vmatpush.msrb.mxu3 %v11658_v8  ;;  %3363 = vmatpush.msra.mxu0 %v11659_v3  ;;  %v11664_v62 = vld [vmem:[#allocation105_spill] sm:$0xff]  ;;  %v11666_v63 = vld [vmem:[#allocation28_spill] sm:$0xff]  ;;  %v11668_v60 = vld [vmem:[#allocation107_spill] sm:$0xff] }
 0x2dd   :  { %v3007_v44 = vadd.f32 %v3006_v29, %v10493_v46  ;;  %v3078_v11 = vmul.f32 %v10493_v46, %v10493_v46  ;;  %v2873_v35 = vadd.f32 %v2714_v34, %v11660_v7  ;;  %v3119_v50 = vadd.f32 %v3118_v28, %v11661_v39  ;;  %3383 = vmatpush.msra.mxu1 %v11662_v51  ;;  %v11665_v29 = vld [vmem:[#allocation106_spill] sm:$0xff]  ;;  %v11667_v55 = vld [vmem:[#allocation101_spill] sm:$0xff]  ;;  %v11670_v8 = vld [vmem:[#allocation47_spill] sm:$0xff] }
 0x2de   :  { %v3026_v31 = vadd.f32 %v3025_v42, %v10499_v56  ;;  %v3079_v24 = vmul.f32 %v10499_v56, %v10499_v56  ;;  %v10515_v13 = vadd.f32 %v2872_v54, %v11663_v9  ;;  %3321 = vmatpush.msrb.mxu2 %v11664_v62  ;;  %3341 = vmatpush.msrb.mxu3 %v11665_v29  ;;  %v11669_v58 = vld [vmem:[#allocation109_spill] sm:$0xff]  ;;  %v2743_v54 = vpop.f32.mrf.mxu0  ;;  %v11676_v51 = vld [vmem:[#allocation116_spill] sm:$0xff] }
 0x2df   :  { %v3139_v37 = vadd.f32 %v3138_v53, %v3078_v11  ;;  %v10520_v23 = vadd.f32 %v2873_v35, %v11666_v63  ;;  %v3008_v28 = vadd.f32 %v3007_v44, %v11667_v55  ;;  %3364 = vmatpush.msra.mxu0 %v11668_v60  ;;  %3384 = vmatpush.msra.mxu1 %v11669_v58  ;;  %v11672_v44 = vld [vmem:[#allocation114_spill] sm:$0xff]  ;;  %v11674_v35 = vld [vmem:[#allocation48_spill] sm:$0xff]  ;;  %v11680_v58 = vld [vmem:[#allocation115_spill] sm:$0xff] }
 0x2e0   :  { %v3158_v42 = vadd.f32 %v3157_v48, %v3079_v24  ;;  %v2969_v40 = vadd.f32 %v2968_v41, %v10515_v13  ;;  %v3076_v12 = vmul.f32 %v10515_v13, %v10515_v13  ;;  %v3027_v0 = vadd.f32 %v3026_v31, %v10100_v43  ;;  %3322 = vmatpush.msrb.mxu2 %v10159_v36  ;;  %v2770_v11 = vpop.f32.mrf.mxu1  ;;  %v11673_v41 = vld [vmem:[#allocation110_spill] sm:$0xff]  ;;  %v11677_v36 = vld [vmem:[#allocation104_spill] sm:$0xff] }
 0x2e1   :  { %v2988_v53 = vadd.f32 %v2987_v32, %v10520_v23  ;;  %v3077_v34 = vmul.f32 %v10520_v23, %v10520_v23  ;;  %v10534_v3 = vadd.f32 %v2743_v54, %v11670_v8  ;;  %v3140_v48 = vadd.f32 %v3139_v37, %v11672_v44  ;;  %3342 = vmatpush.msrb.mxu3 %v11673_v41  ;;  %v11678_v32 = vld [vmem:[#allocation111_spill] sm:$0xff]  ;;  %v11679_v63 = vld [vmem:[#allocation108_spill] sm:$0xff]  ;;  %v11683_v54 = vld [vmem:[#allocation117_spill] sm:$0xff] }
 0x2e2   :  { %v3101_v7 = vadd.f32 %v3100_v45, %v3076_v12  ;;  %v10539_v39 = vadd.f32 %v2770_v11, %v11674_v35  ;;  %v3159_v31 = vadd.f32 %v3158_v42, %v11676_v51  ;;  %v2970_v24 = vadd.f32 %v2969_v40, %v11677_v36  ;;  %3365 = vmatpush.msra.mxu0 %v11678_v32  ;;  %v2689_v37 = vpop.f32.mrf.mxu2  ;;  %v11681_v12 = vld [vmem:[#allocation49_spill] sm:$0xff]  ;;  %v11685_v8 = vld [vmem:[#allocation76_spill] sm:$0xff]  ;;  %v11686_v41 = vld [vmem:[#allocation50_spill] sm:$0xff] }
 0x2e3   :  { %11671 = vst [vmem:[#allocation12_spill] sm:$0xff] %v10534_v3  ;;  %v3120_v9 = vadd.f32 %v3119_v50, %v3077_v34  ;;  %v3009_v62 = vadd.f32 %v3008_v28, %v10534_v3  ;;  %v3086_v29 = vmul.f32 %v10534_v3, %v10534_v3  ;;  %v2989_v60 = vadd.f32 %v2988_v53, %v11679_v63  ;;  %v2716_v34 = vpop.f32.mrf.mxu3  ;;  %v11684_v28 = vld [vmem:[#allocation118_spill] sm:$0xff]  ;;  %v11688_v35 = vld [vmem:[#allocation121_spill] sm:$0xff] }
 0x2e4   :  { %11675 = vst [vmem:[#allocation53_spill] sm:$0xff] %v10539_v39  ;;  %3385 = vmatpush.msra.mxu1 %v11680_v58  ;;  %v3028_v45 = vadd.f32 %v3027_v0, %v10539_v39  ;;  %v3087_v42 = vmul.f32 %v10539_v39, %v10539_v39  ;;  %v10553_v40 = vadd.f32 %v2689_v37, %v11681_v12  ;;  %v11689_v0 = vld [vmem:[#allocation119_spill] sm:$0xff]  ;;  %v11690_v32 = vld [vmem:[#allocation78_spill] sm:$0xff]  ;;  %v11691_v12 = vld [vmem:[#allocation120_spill] sm:$0xff] }
 0x2e5   :  { %v3102_v50 = vadd.f32 %v3101_v7, %v11683_v54  ;;  %3323 = vmatpush.msrb.mxu2 %v11684_v28  ;;  %v3010_v44 = vadd.f32 %v3009_v62, %v11685_v8  ;;  %v3141_v11 = vadd.f32 %v3140_v48, %v3086_v29  ;;  %v10559_v53 = vadd.f32 %v2716_v34, %v11686_v41  ;;  %v11692_v62 = vld [vmem:[#allocation122_spill] sm:$0xff]  ;;  %v11693_v34 = vld [vmem:[#allocation123_spill] sm:$0xff] }
 0x2e6   :  { %11682 = vst [vmem:[#allocation31_spill] sm:$0xff] %v10553_v40  ;;  %v3121_v51 = vadd.f32 %v3120_v9, %v11688_v35  ;;  %3343 = vmatpush.msrb.mxu3 %v11689_v0  ;;  %v3029_v58 = vadd.f32 %v3028_v45, %v11690_v32  ;;  %v3160_v39 = vadd.f32 %v3159_v31, %v3087_v42  ;;  %v11694_v28 = vld [vmem:[#allocation126_spill] sm:$0xff]  ;;  %v11695_v45 = vld [vmem:[#allocation124_spill] sm:$0xff]  ;;  %v2746_v0 = vpop.f32.mrf.mxu0 }
 0x2e7   :  { %11687 = vst [vmem:[#allocation54_spill] sm:$0xff] %v10559_v53  ;;  %v2971_v37 = vadd.f32 %v2970_v24, %v10553_v40  ;;  %v3084_v7 = vmul.f32 %v10553_v40, %v10553_v40  ;;  %3366 = vmatpush.msra.mxu0 %v11691_v12  ;;  %v3011_v54 = vrot.slane %v3010_v44, 4  ;;  %v3142_v48 = vadd.f32 %v3141_v11, %v11692_v62  ;;  %v11696_v42 = vld [vmem:[#allocation84_spill] sm:$0xff]  ;;  %v11697_v12 = vld [vmem:[#allocation127_spill] sm:$0xff]  ;;  %v8125_v43 = vld [vmem:[#allocation5 + $0x48c] sm:$0xf] }
 0x2e8   :  { %v2990_v29 = vadd.f32 %v2989_v60, %v10559_v53  ;;  %v3085_v9 = vmul.f32 %v10559_v53, %v10559_v53  ;;  %3386 = vmatpush.msra.mxu1 %v11693_v34  ;;  %3324 = vmatpush.msrb.mxu2 %v11694_v28  ;;  %v3030_v31 = vrot.slane %v3029_v58, 4  ;;  %v3161_v24 = vadd.f32 %v3160_v39, %v11695_v45  ;;  %v11698_v32 = vld [vmem:[#allocation128_spill] sm:$0xff]  ;;  %v11699_v62 = vld [vmem:[#allocation87_spill] sm:$0xff]  ;;  %v2773_v53 = vpop.f32.mrf.mxu1  ;;  %v11700_v34 = vld [vmem:[#allocation29_spill] sm:$0xff] }
 0x2e9   :  { %v2972_v41 = vadd.f32 %v2971_v37, %v11696_v42  ;;  %v3103_v35 = vadd.f32 %v3102_v50, %v3084_v7  ;;  %3344 = vmatpush.msrb.mxu3 %v11697_v12  ;;  %3367 = vmatpush.msra.mxu0 %v11698_v32  ;;  %v3012_v11 = vadd.f32 %v3011_v54, %v3010_v44  ;;  %v3143_v60 = vrot.slane %v3142_v48, 4  ;;  %v11701_v37 = vld [vmem:[#allocation125_spill] sm:$0xff] }
 0x2ea   :  { %v2991_v8 = vadd.f32 %v2990_v29, %v11699_v62  ;;  %v3122_v3 = vadd.f32 %v3121_v51, %v3085_v9  ;;  %3387 = vmatpush.msra.mxu1 %v11700_v34  ;;  %3325 = vmatpush.msrb.mxu2 %v10285_v47  ;;  %v3031_v28 = vadd.f32 %v3030_v31, %v3029_v58  ;;  %v3162_v39 = vrot.slane %v3161_v24, 4  ;;  %v11702_v44 = vld [vmem:[#allocation129_spill] sm:$0xff]  ;;  %v2692_v12 = vpop.f32.mrf.mxu2  ;;  %v11703_v29 = vld [vmem:[#allocation51_spill] sm:$0xff] }
 0x2eb   :  { %v2973_v45 = vrot.slane %v2972_v41, 4  ;;  %v3104_v50 = vadd.f32 %v3103_v35, %v11701_v37  ;;  %3345 = vmatpush.msrb.mxu3 %v10290_v14  ;;  %v3013_v7 = vrot.slane %v3012_v11, 2  ;;  %v3144_v0 = vadd.f32 %v3143_v60, %v3142_v48  ;;  %v2719_v47 = vpop.f32.mrf.mxu3 }
 0x2ec   :  { %v2992_v32 = vrot.slane %v2991_v8, 4  ;;  %v3123_v54 = vadd.f32 %v3122_v3, %v11702_v44  ;;  %3326 = vmatpush.msrb.mxu2 %v11703_v29  ;;  %v3032_v53 = vrot.slane %v3031_v28, 2  ;;  %v3163_v51 = vadd.f32 %v3162_v39, %v3161_v24 }
 0x2ed   :  { %v2974_v9 = vadd.f32 %v2973_v45, %v2972_v41  ;;  %v3105_v34 = vrot.slane %v3104_v50, 4  ;;  %3346 = vmatpush.msrb.mxu3 %v10323_v6  ;;  %v3014_v58 = vadd.f32 %v3013_v7, %v3012_v11  ;;  %v3145_v31 = vrot.slane %v3144_v0, 2 }
 0x2ee   :  { %v2993_v35 = vadd.f32 %v2992_v32, %v2991_v8  ;;  %v3124_v37 = vrot.slane %v3123_v54, 4  ;;  %3327 = vmatpush.msrb.mxu2 %v10335_v26  ;;  %v3033_v14 = vadd.f32 %v3032_v53, %v3031_v28  ;;  %v3164_v48 = vrot.slane %v3163_v51, 2  ;;  %v2747_v29 = vpop.f32.mrf.mxu0 }
 0x2ef   :  { %v2975_v60 = vrot.slane %v2974_v9, 2  ;;  %v3106_v3 = vadd.f32 %v3105_v34, %v3104_v50  ;;  %3347 = vmatpush.msrb.mxu3 %v10345_v19  ;;  %v3015_v44 = vrot.slane %v3014_v58, 1  ;;  %v3146_v6 = vadd.f32 %v3145_v31, %v3144_v0  ;;  %v3417_v29 = vld [vmem:[%s11340_s15 + $0x48] sm:$0xff] }
 0x2f0   :  { %v2994_v12 = vrot.slane %v2993_v35, 2  ;;  %v3125_v24 = vadd.f32 %v3124_v37, %v3123_v54  ;;  %v3034_v41 = vrot.slane %v3033_v14, 1  ;;  %v2774_v8 = vpop.f32.mrf.mxu1  ;;  %v3165_v47 = vadd.f32 %v3164_v48, %v3163_v51  ;;  %v3420_v48 = vld [vmem:[%s11340_s15 + $0x60] sm:$0xff] }
 0x2f1   :  { %v2976_v39 = vadd.f32 %v2975_v60, %v2974_v9  ;;  %v3107_v45 = vrot.slane %v3106_v3, 2  ;;  %v3016_v32 = vadd.f32 %v3015_v44, %v3014_v58  ;;  %v3147_v37 = vrot.slane %v3146_v6, 1  ;;  %v3416_v44 = vld [vmem:[%s11340_s15 + $0x40] sm:$0xff]  ;;  %v3419_v8 = vld [vmem:[%s11340_s15 + $0x58] sm:$0xff] }
 0x2f2   :  { %v2995_v11 = vadd.f32 %v2994_v12, %v2993_v35  ;;  %v3126_v7 = vrot.slane %v3125_v24, 2  ;;  %v3035_v26 = vadd.f32 %v3034_v41, %v3033_v14  ;;  %v2693_v53 = vpop.f32.mrf.mxu2  ;;  %v3166_v60 = vrot.slane %v3165_v47, 1  ;;  %v3412_v12 = vld [vmem:[%s11340_s15 + $0x20] sm:$0xff] }
 0x2f3   :  { %v2977_v28 = vrot.slane %v2976_v39, 1  ;;  %3288 = vmatmul.f32.vlgmr.msrb.gmra.mxu0 %v3016_v32  ;;  %v2720_v19 = vpop.f32.mrf.mxu3  ;;  %v3108_v62 = vadd.f32 %v3107_v45, %v3106_v3  ;;  %v3148_v31 = vadd.f32 %v3147_v37, %v3146_v6  ;;  %v3422_v3 = vld [vmem:[%s11340_s15 + $0x70] sm:$0xff]  ;;  %v3408_v41 = vld [vmem:[%s11340_s15] sm:$0xff]  ;;  %v3421_v45 = vld [vmem:[%s11340_s15 + $0x68] sm:$0xff] }
 0x2f4   :  { %v2996_v50 = vrot.slane %v2995_v11, 1  ;;  %3308 = vmatmul.f32.vlgmr.msrb.gmra.mxu1 %v3035_v26  ;;  %v3127_v9 = vadd.f32 %v3126_v7, %v3125_v24  ;;  %v3167_v58 = vadd.f32 %v3166_v60, %v3165_v47  ;;  %3563 = vmatpush.msrb.mxu0 %v3422_v3  ;;  %v3414_v24 = vld [vmem:[%s11340_s15 + $0x30] sm:$0xff]  ;;  %v3413_v6 = vld [vmem:[%s11340_s15 + $0x28] sm:$0xff]  ;;  %v3423_v7 = vld [vmem:[%s11340_s15 + $0x78] sm:$0xff] }
 0x2f5   :  { %v2978_v34 = vadd.f32 %v2977_v28, %v2976_v39  ;;  %v3109_v0 = vrot.slane %v3108_v62, 1  ;;  %v3410_v39 = vld [vmem:[%s11340_s15 + $0x10] sm:$0xff]  ;;  %3583 = vmatpush.msrb.mxu1 %v3423_v7  ;;  %v3415_v32 = vld [vmem:[%s11340_s15 + $0x38] sm:$0xff] }
 0x2f6   :  { %v2997_v54 = vadd.f32 %v2996_v50, %v2995_v11  ;;  %v3128_v35 = vrot.slane %v3127_v9, 1  ;;  %v3409_v11 = vld [vmem:[%s11340_s15 + $0x8] sm:$0xff]  ;;  %v3411_v47 = vld [vmem:[%s11340_s15 + $0x18] sm:$0xff] }
 0x2f7   :  { %3248 = vmatmul.f32.vlgmr.msra.gmra.mxu2 %v2978_v34  ;;  %v3110_v51 = vadd.f32 %v3109_v0, %v3108_v62  ;;  %v3418_v62 = vld [vmem:[%s11340_s15 + $0x50] sm:$0xff]  ;;  %3584 = vmatpush.msrb.mxu1 %v3419_v8 }
 0x2f8   :  { %3268 = vmatmul.f32.vlgmr.msra.gmra.mxu3 %v2997_v54  ;;  %v3129_v14 = vadd.f32 %v3128_v35, %v3127_v9  ;;  %3440 = vmatpush.msra.mxu2 %v3420_v48 }
 0x2f9   :  { %3480 = vmatpush.msra.mxu3 %v3422_v3  ;;  %3564 = vmatpush.msrb.mxu0 %v3418_v62 }
 0x2fa   :  { %3441 = vmatpush.msra.mxu2 %v3416_v44  ;;  %3585 = vmatpush.msrb.mxu1 %v3415_v32 }
 0x2fb   :  { %3368 = vmatmul.f32.vlgmr.msra.gmra.mxu0 %v3148_v31  ;;  %3481 = vmatpush.msra.mxu3 %v3418_v62 }
 0x2fc   :  { %3388 = vmatmul.f32.vlgmr.msra.gmra.mxu1 %v3167_v58  ;;  %3442 = vmatpush.msra.mxu2 %v3412_v12 }
 0x2fd   :  { %3482 = vmatpush.msra.mxu3 %v3414_v24  ;;  %3565 = vmatpush.msrb.mxu0 %v3414_v24 }
 0x2fe   :  { %3443 = vmatpush.msra.mxu2 %v3408_v41  ;;  %3586 = vmatpush.msrb.mxu1 %v3411_v47 }
 0x2ff   :  { %3328 = vmatmul.f32.vlgmr.msrb.gmra.mxu2 %v3110_v51  ;;  %3483 = vmatpush.msra.mxu3 %v3410_v39 }
 0x300   :  { %3348 = vmatmul.f32.vlgmr.msrb.gmra.mxu3 %v3129_v14  ;;  %3566 = vmatpush.msrb.mxu0 %v3410_v39 }
 0x301   :  { %3523 = vmatpush.msrb.mxu3 %v3420_v48  ;;  %3460 = vmatpush.msrb.mxu2 %v3421_v45 }
 0x303   :  { %3524 = vmatpush.msrb.mxu3 %v3416_v44  ;;  %3461 = vmatpush.msrb.mxu2 %v3417_v29 }
 0x305   :  { %3525 = vmatpush.msrb.mxu3 %v3412_v12  ;;  %3462 = vmatpush.msrb.mxu2 %v3413_v6 }
 0x307   :  { %3526 = vmatpush.msrb.mxu3 %v3408_v41  ;;  %3463 = vmatpush.msrb.mxu2 %v3409_v11 }
 0x370   :  { %v3289_v28 = vpop.f32.mrf.mxu0 }
 0x371   :  { %v3309_v19 = vpop.f32.mrf.mxu1 }
 0x378   :  { %v3369_v31 = vpop.f32.mrf.mxu0 }
 0x379   :  { %v3389_v58 = vpop.f32.mrf.mxu1 }
 0x37a   :  { %v3249_v26 = vpop.f32.mrf.mxu2 }
 0x37b   :  { %v3269_v53 = vpop.f32.mrf.mxu3 }
 0x37c   :  { %v3270_v50 = vadd.f32 %v3269_v53, %v3249_v26  ;;  %v7566_v26 = vld [vmem:[#allocation5 + $0x398] sm:$0xf] }
 0x37e   :  { %v3290_v34 = vadd.f32 %v3289_v28, %v3270_v50  ;;  %v8097_v28 = vld [vmem:[#allocation5 + $0x3a8] sm:$0xf0] }
 0x37f   :  { %v7567_v50 = vor.u32 %v8097_v28, %v7566_v26  ;;  %v8002_v26 = vld [vmem:[#allocation5 + $0xb0] sm:$0xf0]  ;;  %v7346_v28 = vld [vmem:[#allocation5 + $0x1e0] sm:$0xf] }
 0x380   :  { %v3310_v54 = vadd.f32 %v3309_v19, %v3290_v34  ;;  %v7726_v19 = vld [vmem:[#allocation5 + $0x4d8] sm:$0xf]  ;;  %v8137_v34 = vld [vmem:[#allocation5 + $0x4e8] sm:$0xf0] }
 0x381   :  { %5055 = vmatpush.bf16.msra.mxu0 %v7567_v50  ;;  %v8042_v50 = vld [vmem:[#allocation5 + $0x1f0] sm:$0xf0] }
 0x382   :  { %v3392_v37 = vmul.f32 0.0012755102, %v3310_v54  ;;  %v3329_v9 = vpop.f32.mrf.mxu2  ;;  %v7226_v54 = vld [vmem:[#allocation5 + $0xf0] sm:$0xf] }
 0x383   :  { %v3349_v60 = vpop.f32.mrf.mxu3 }
 0x384   :  { %v3350_v0 = vadd.f32 %v3349_v60, %v3329_v9  ;;  %7096 = vmatmul.msk.f32.vlgmr.msra.gmra.mxu2 %vm3424_vm15, %v3392_v37  ;;  %7098 = vmatmul.msk.f32.vlgmr.msra.gmra.mxu3 %vm3424_vm15, %v3392_v37  ;;  %v3394_v48 = vmul.f32 %v3392_v37, %v3392_v37  ;;  %v8012_v9 = vld [vmem:[#allocation5 + $0x100] sm:$0xf0]  ;;  %v7386_v60 = vld [vmem:[#allocation5 + $0x230] sm:$0xf] }
 0x385   :  { %3500 = vmatpush.msra.mxu2 %v3423_v7 }
 0x386   :  { %v3370_v35 = vadd.f32 %v3369_v31, %v3350_v0  ;;  %v8052_v0 = vld [vmem:[#allocation5 + $0x240] sm:$0xf0]  ;;  %v7227_v31 = vor.u32 %v8012_v9, %v7226_v54  ;;  %v8082_v54 = vld [vmem:[#allocation5 + $0x330] sm:$0xf0] }
 0x387   :  { %3501 = vmatpush.msra.mxu2 %v3419_v8 }
 0x388   :  { %v3390_v51 = vadd.f32 %v3389_v58, %v3370_v35  ;;  %v7387_v35 = vor.u32 %v8052_v0, %v7386_v60  ;;  %v7546_v58 = vld [vmem:[#allocation5 + $0x370] sm:$0xf]  ;;  %v8122_v0 = vld [vmem:[#allocation5 + $0x470] sm:$0xf0] }
 0x389   :  { %3502 = vmatpush.msra.mxu2 %v3415_v32 }
 0x38a   :  { %v3393_v14 = vmul.f32 0.0012755102, %v3390_v51  ;;  %v8092_v51 = vld [vmem:[#allocation5 + $0x380] sm:$0xf0] }
 0x38b   :  { %3503 = vmatpush.msra.mxu2 %v3411_v47  ;;  %v8057_v47 = vld [vmem:[#allocation5 + $0x268] sm:$0xf0] }
 0x38c   :  { %v3395_v3 = vsub.f32 %v3393_v14, %v3394_v48  ;;  %7097 = vmatmul.msk.f32.vlgmr.msrb.gmra.mxu2 %vm3424_vm15, %v3392_v37  ;;  %v7706_v14 = vld [vmem:[#allocation5 + $0x4b0] sm:$0xf]  ;;  %v7547_v48 = vor.u32 %v8092_v51, %v7546_v58  ;;  %v7997_v58 = vld [vmem:[#allocation5 + $0x88] sm:$0xf0] }
 0x38d   :  { %3543 = vmatpush.msrb.mxu2 %v3421_v45  ;;  %v7246_v45 = vld [vmem:[#allocation5 + $0x118] sm:$0xf] }
 0x38e   :  { %v3396_v44 = vmax.f32 %v3395_v3, 0.0  ;;  %v8132_v3 = vld [vmem:[#allocation5 + $0x4c0] sm:$0xf0]  ;;  %5056 = vmatpush.bf16.msra.mxu0 %v7547_v48  ;;  %v8037_v48 = vld [vmem:[#allocation5 + $0x1c8] sm:$0xf0] }
 0x38f   :  { %3544 = vmatpush.msrb.mxu2 %v3417_v29  ;;  %v8017_v29 = vld [vmem:[#allocation5 + $0x128] sm:$0xf0] }
 0x390   :  { %v3397_v62 = vadd.f32 1e-05, %v3396_v44  ;;  %v7707_v44 = vor.u32 %v8132_v3, %v7706_v14  ;;  %v7326_v14 = vld [vmem:[#allocation5 + $0x1b8] sm:$0xf] }
 0x391   :  { %3545 = vmatpush.msrb.mxu2 %v3413_v6  ;;  %v7406_v6 = vld [vmem:[#allocation5 + $0x258] sm:$0xf] }
 0x392   :  { %8175 = vrsqrt.f32 %v3397_v62  ;;  %vm3404_vm2 = vweird.f32 %v3397_v62  ;;  %v7407_v53 = vor.u32 %v8057_v47, %v7406_v6  ;;  %v8127_v6 = vld [vmem:[#allocation5 + $0x498] sm:$0xf0]  ;;  %v7186_v47 = vld [vmem:[#allocation5 + $0xa0] sm:$0xf]  ;;  %v7486_v3 = vld [vmem:[#allocation5 + $0x2f8] sm:$0xf] }
 0x393   :  { %3546 = vmatpush.msrb.mxu2 %v3409_v11  ;;  %v7247_v11 = vor.u32 %v8017_v29, %v7246_v45  ;;  %v7686_v29 = vld [vmem:[#allocation5 + $0x488] sm:$0xf] }
 0x394   :  { %7099 = vmatmul.msk.f32.vlgmr.msra.gmra.mxu2 %vm3424_vm15, %v3392_v37  ;;  %v7727_v37 = vor.u32 %v8137_v34, %v7726_v19  ;;  %v7506_v19 = vld [vmem:[#allocation5 + $0x320] sm:$0xf]  ;;  %v7347_v34 = vor.u32 %v8042_v50, %v7346_v28  ;;  %v7626_v28 = vld [vmem:[#allocation5 + $0x410] sm:$0xf]  ;;  %v7126_v50 = vld [vmem:[#allocation5 + $0x28] sm:$0xf] }
 0x395   :  { %4969 = vmatpush.bf16.msra.mxu3 %v7247_v11  ;;  %5012 = vmatpush.bf16.msra.mxu2 %v7407_v53  ;;  %v7687_v11 = vor.u32 %v8127_v6, %v7686_v29  ;;  %v7187_v53 = vor.u32 %v8002_v26, %v7186_v47  ;;  %v7507_v60 = vor.u32 %v8082_v54, %v7506_v19  ;;  %v8032_v29 = vld [vmem:[#allocation5 + $0x1a0] sm:$0xf0]  ;;  %v7466_v6 = vld [vmem:[#allocation5 + $0x2d0] sm:$0xf]  ;;  %v7286_v54 = vld [vmem:[#allocation5 + $0x168] sm:$0xf] }
 0x396   :  { %5098 = vmatpush.bf16.msra.mxu1 %v7727_v37  ;;  %v7666_v37 = vld [vmem:[#allocation5 + $0x460] sm:$0xf] }
 0x398   :  { %v8176_v12 = vpop.eup %8175 }
 0x399   :  { %v3399_v24 = vmul.f32 %v8176_v12, %v3397_v62  ;;  %vm3405_vm0 = vweird.f32 %v8176_v12  ;;  %4970 = vmatpush.bf16.msra.mxu3 %v7227_v31  ;;  %5013 = vmatpush.bf16.msra.mxu2 %v7387_v35  ;;  %v7206_v62 = vld [vmem:[#allocation5 + $0xc8] sm:$0xf]  ;;  %v7667_v31 = vor.u32 %v8122_v0, %v7666_v37  ;;  %v7166_v35 = vld [vmem:[#allocation5 + $0x78] sm:$0xf]  ;;  %v8027_v37 = vld [vmem:[#allocation5 + $0x178] sm:$0xf0] }
 0x39a   :  { %vm3406_vm3 = vmor %vm3404_vm2, %vm3405_vm0  ;;  %5099 = vmatpush.bf16.msra.mxu1 %v7707_v44  ;;  %v7167_v51 = vor.u32 %v7997_v58, %v7166_v35  ;;  %v7327_v44 = vor.u32 %v8037_v48, %v7326_v14  ;;  %v7287_v0 = vor.u32 %v8027_v37, %v7286_v54  ;;  %v8067_v35 = vld [vmem:[#allocation5 + $0x2b8] sm:$0xf0]  ;;  %v7606_v58 = vld [vmem:[#allocation5 + $0x3e8] sm:$0xf] }
 0x39b   :  { %v3400_v41 = vmul.f32 %v8176_v12, %v3399_v24  ;;  %v7366_v24 = vld [vmem:[#allocation5 + $0x208] sm:$0xf]  ;;  %v8107_v48 = vld [vmem:[#allocation5 + $0x3f8] sm:$0xf0]  ;;  %v7408_v37 = vld [vmem:[#allocation5 + $0x26c] sm:$0xf0] }
 0x39d   :  { %v3401_v39 = vmul.f32 0.5, %v3400_v41 }
 0x39e   :  { %5100 = vmatpush.bf16.msra.mxu1 %v7687_v11  ;;  %v8072_v11 = vld [vmem:[#allocation5 + $0x2e0] sm:$0xf0] }
 0x39f   :  { %v3402_v7 = vsub.f32 1.5, %v3401_v39  ;;  %v8047_v39 = vld [vmem:[#allocation5 + $0x218] sm:$0xf0]  ;;  %v7467_v26 = vor.u32 %v8072_v11, %v7466_v6  ;;  %v3591_v11 = vld [vmem:[%s11336_s11] sm:$0xf] }
 0x3a1   :  { %v3403_v8 = vmul.f32 %v8176_v12, %v3402_v7  ;;  %v7526_v7 = vld [vmem:[#allocation5 + $0x348] sm:$0xf] }
 0x3a2   :  { %5101 = vmatpush.bf16.msra.mxu1 %v7667_v31  ;;  %v7446_v31 = vld [vmem:[#allocation5 + $0x2a8] sm:$0xf] }
 0x3a3   :  { %v3407_v32 = vsel %vm3406_vm3, %v8176_v12, %v3403_v8  ;;  %v8007_v12 = vld [vmem:[#allocation5 + $0xd8] sm:$0xf0]  ;;  %v7447_v14 = vor.u32 %v8067_v35, %v7446_v31 }
 0x3a4   :  { %7100 = vmatmul.msk.f32.vlgmr.msrb.gmra.mxu3 %vm3424_vm15, %v3407_v32  ;;  %7101 = vmatmul.msk.f32.vlgmr.msrb.gmra.mxu2 %vm3424_vm15, %v3407_v32  ;;  %v7207_v41 = vor.u32 %v8007_v12, %v7206_v62  ;;  %v8087_v8 = vld [vmem:[#allocation5 + $0x358] sm:$0xf0]  ;;  %v8077_v62 = vld [vmem:[#allocation5 + $0x308] sm:$0xf0]  ;;  %v7646_v12 = vld [vmem:[#allocation5 + $0x438] sm:$0xf] }
 0x3a5   :  { %7102 = vmatmul.msk.f32.vlgmr.msrb.gmra.mxu0 %vm3424_vm15, %v3407_v32  ;;  %7103 = vmatmul.msk.f32.vlgmr.msrb.gmra.mxu1 %vm3424_vm15, %v3407_v32  ;;  %v7367_v32 = vor.u32 %v8047_v39, %v7366_v24  ;;  %v7527_v45 = vor.u32 %v8087_v8, %v7526_v7  ;;  %v8117_v24 = vld [vmem:[#allocation5 + $0x448] sm:$0xf0]  ;;  %v7146_v7 = vld [vmem:[#allocation5 + $0x50] sm:$0xf]  ;;  %v7992_v8 = vld [vmem:[#allocation5 + $0x60] sm:$0xf0] }
 0x3a6   :  { %4971 = vmatpush.bf16.msra.mxu3 %v7207_v41  ;;  %v7487_v41 = vor.u32 %v8077_v62, %v7486_v3  ;;  %v7647_v39 = vor.u32 %v8117_v24, %v7646_v12  ;;  %v7106_v3 = vld [vmem:[#allocation5] sm:$0xf]  ;;  %v7607_v62 = vor.u32 %v8107_v48, %v7606_v58  ;;  %v8022_v24 = vld [vmem:[#allocation5 + $0x150] sm:$0xf0]  ;;  %v8135_v48 = vld [vmem:[#allocation5 + $0x4dc] sm:$0xf] }
 0x3a7   :  { %5014 = vmatpush.bf16.msra.mxu2 %v7367_v32  ;;  %5057 = vmatpush.bf16.msra.mxu0 %v7527_v45  ;;  %v7306_v32 = vld [vmem:[#allocation5 + $0x190] sm:$0xf]  ;;  %v7147_v45 = vor.u32 %v7992_v8, %v7146_v7  ;;  %v7266_v12 = vld [vmem:[#allocation5 + $0x140] sm:$0xf]  ;;  %v8062_v7 = vld [vmem:[#allocation5 + $0x290] sm:$0xf0] }
 0x3a8   :  { %5102 = vmatpush.bf16.msra.mxu1 %v7647_v39  ;;  %v7307_v47 = vor.u32 %v8032_v29, %v7306_v32  ;;  %v7586_v8 = vld [vmem:[#allocation5 + $0x3c0] sm:$0xf]  ;;  %v8102_v32 = vld [vmem:[#allocation5 + $0x3d0] sm:$0xf0] }
 0x3a9   :  { %v7587_v6 = vor.u32 %v8102_v32, %v7586_v8  ;;  %v3593_v8 = vperm.slane %v3591_v11, 0  ;;  %v3594_v32 = vperm.slane %v3591_v11, 1 }
 0x3aa   :  { %4972 = vmatpush.bf16.msra.mxu3 %v7187_v53  ;;  %v8112_v53 = vld [vmem:[#allocation5 + $0x420] sm:$0xf0] }
 0x3ab   :  { %5015 = vmatpush.bf16.msra.mxu2 %v7347_v34  ;;  %5058 = vmatpush.bf16.msra.mxu0 %v7507_v60  ;;  %v7627_v19 = vor.u32 %v8112_v53, %v7626_v28  ;;  %v7987_v34 = vld [vmem:[#allocation5 + $0x38] sm:$0xf0]  ;;  %v3595_v28 = vperm.slane %v3591_v11, 2  ;;  %v3596_v53 = vperm.slane %v3591_v11, 3 }
 0x3ac   :  { %v7127_v60 = vor.u32 %v7987_v34, %v7126_v50  ;;  %v8015_v50 = vld [vmem:[#allocation5 + $0x11c] sm:$0xf] }
 0x3ad   :  { %5103 = vmatpush.bf16.msra.mxu1 %v7627_v19  ;;  %v7248_v19 = vld [vmem:[#allocation5 + $0x12c] sm:$0xf0]  ;;  %v8055_v34 = vld [vmem:[#allocation5 + $0x25c] sm:$0xf] }
 0x3ae   :  { %4973 = vmatpush.bf16.msra.mxu3 %v7167_v51  ;;  %v7251_v54 = vor.u32 %v8015_v50, %v7248_v19  ;;  %v7411_v58 = vor.u32 %v8055_v34, %v7408_v37 }
 0x3af   :  { %5016 = vmatpush.bf16.msra.mxu2 %v7327_v44  ;;  %5059 = vmatpush.bf16.msra.mxu0 %v7487_v41  ;;  %v7982_v44 = vld [vmem:[#allocation5 + $0x10] sm:$0xf0]  ;;  %v7426_v41 = vld [vmem:[#allocation5 + $0x280] sm:$0xf] }
 0x3b0   :  { %v7107_v39 = vor.u32 %v7982_v44, %v7106_v3  ;;  %v7427_v29 = vor.u32 %v8062_v7, %v7426_v41  ;;  %v7728_v3 = vld [vmem:[#allocation5 + $0x4ec] sm:$0xf0]  ;;  %v8010_v44 = vld [vmem:[#allocation5 + $0xf4] sm:$0xf]  ;;  %v7228_v41 = vld [vmem:[#allocation5 + $0x104] sm:$0xf0] }
 0x3b1   :  { %5104 = vmatpush.bf16.msra.mxu1 %v7607_v62  ;;  %v7388_v7 = vld [vmem:[#allocation5 + $0x244] sm:$0xf0] }
 0x3b2   :  { %4974 = vmatpush.bf16.msra.mxu3 %v7147_v45  ;;  %v7267_v45 = vor.u32 %v8022_v24, %v7266_v12  ;;  %v7731_v24 = vor.u32 %v8135_v48, %v7728_v3  ;;  %v11704_v3 = vld [vmem:[#allocation65_spill] sm:$0xff] }
 0x3b3   :  { %5017 = vmatpush.bf16.msra.mxu2 %v7307_v47  ;;  %5060 = vmatpush.bf16.msra.mxu0 %v7467_v26 }
 0x3b5   :  { %5105 = vmatpush.bf16.msra.mxu1 %v7587_v6 }
 0x3b6   :  { %4975 = vmatpush.bf16.msra.mxu3 %v7127_v60  ;;  %v8095_v60 = vld [vmem:[#allocation5 + $0x39c] sm:$0xf] }
 0x3b7   :  { %5018 = vmatpush.bf16.msra.mxu2 %v7287_v0  ;;  %5061 = vmatpush.bf16.msra.mxu0 %v7447_v14  ;;  %v7568_v0 = vld [vmem:[#allocation5 + $0x3ac] sm:$0xf0] }
 0x3b8   :  { %v7571_v14 = vor.u32 %v8095_v60, %v7568_v0 }
 0x3b9   :  { %5270 = vmatpush.bf16.msrb.mxu1 %v7731_v24  ;;  %v11706_v24 = vld [vmem:[#allocation61_spill] sm:$0xff] }
 0x3ba   :  { %4976 = vmatpush.bf16.msra.mxu3 %v7107_v39  ;;  %v8050_v39 = vld [vmem:[#allocation5 + $0x234] sm:$0xf] }
 0x3bb   :  { %5019 = vmatpush.bf16.msra.mxu2 %v7267_v45  ;;  %5062 = vmatpush.bf16.msra.mxu0 %v7427_v29  ;;  %v7231_v45 = vor.u32 %v8010_v44, %v7228_v41  ;;  %v7391_v29 = vor.u32 %v8050_v39, %v7388_v7  ;;  %v11707_v39 = vld [vmem:[#allocation66_spill] sm:$0xff] }
 0x3be   :  { %5141 = vmatpush.bf16.msrb.mxu3 %v7251_v54 }
 0x3bf   :  { %5184 = vmatpush.bf16.msrb.mxu2 %v7411_v58  ;;  %5227 = vmatpush.bf16.msrb.mxu0 %v7571_v14 }
 0x3c2   :  { %5142 = vmatpush.bf16.msrb.mxu3 %v7231_v45  ;;  %v8130_v45 = vld [vmem:[#allocation5 + $0x4b4] sm:$0xf] }
 0x3c3   :  { %5185 = vmatpush.bf16.msrb.mxu2 %v7391_v29  ;;  %v11708_v29 = vld [vmem:[#allocation71_spill] sm:$0xff] }
 0x407   :  { %v10644_v9 = vpop.f32.mrf.mxu2  ;;  %v3485_v47 = vpop.f32.mrf.mxu3 }
 0x40f   :  { %v10646_v51 = vpop.f32.mrf.mxu2 }
 0x417   :  { %v3505_v26 = vpop.f32.mrf.mxu2 }
 0x422   :  { %v3568_v31 = vpop.f32.mrf.mxu0  ;;  %v3588_v35 = vpop.f32.mrf.mxu1 }
 0x423   :  { %v3603_v62 = vmul.f32 %v3595_v28, %v3568_v31  ;;  %v3604_v12 = vmul.f32 %v3596_v53, %v3588_v35  ;;  %v3605_v35 = vld [vmem:[%s11337_s12] sm:$0xf] }
 0x425   :  { %v3608_v6 = vmul.f32 %v3603_v62, %v3485_v47  ;;  %v3609_v50 = vmul.f32 %v3604_v12, %v3505_v26  ;;  %v10652_v0 = vperm.slane %v3603_v62, 0  ;;  %v10654_v11 = vperm.slane %v3604_v12, 0  ;;  %v11705_v12 = vld [vmem:[#allocation67_spill] sm:$0xff] }
 0x427   :  { %v3528_v19 = vpop.f32.mrf.mxu3  ;;  %v3548_v34 = vpop.f32.mrf.mxu2  ;;  %v3615_v53 = vrot.slane %v3608_v6, 6  ;;  %v3616_v54 = vrot.slane %v3609_v50, 5  ;;  %v3630_v44 = vmul.f32 %v10652_v0, %v11704_v3  ;;  %v3634_v41 = vmul.f32 %v10652_v0, %v11706_v24  ;;  %v11709_v50 = vld [vmem:[#allocation68_spill] sm:$0xff]  ;;  %v11712_v3 = vld [vmem:[#allocation30_spill] sm:$0xff] }
 0x428   :  { %v3601_v37 = vmul.f32 %v3593_v8, %v3528_v19  ;;  %v3602_v28 = vmul.f32 %v3594_v32, %v3548_v34  ;;  %v3631_v7 = vmul.f32 %v10654_v11, %v11707_v39  ;;  %v8090_v8 = vld [vmem:[#allocation5 + $0x374] sm:$0xf]  ;;  %v7548_v32 = vld [vmem:[#allocation5 + $0x384] sm:$0xf0]  ;;  %v11710_v34 = vld [vmem:[#allocation72_spill] sm:$0xff] }
 0x429   :  { %v3620_v14 = vsel %vm3619_vm4, %v3615_v53, %v3616_v54  ;;  %v7708_v53 = vld [vmem:[#allocation5 + $0x4c4] sm:$0xf0]  ;;  %v8005_v54 = vld [vmem:[#allocation5 + $0xcc] sm:$0xf] }
 0x42a   :  { %v3607_v60 = vmul.f32 %v3602_v28, %v10646_v51  ;;  %v3606_v31 = vmul.f32 %v3601_v37, %v10644_v9  ;;  %v10657_v47 = vperm.slane %v3601_v37, 0  ;;  %v10662_v58 = vperm.slane %v3602_v28, 0 }
 0x42b   :  { %v7551_v28 = vor.u32 %v8090_v8, %v7548_v32  ;;  %v7711_v24 = vor.u32 %v8130_v45, %v7708_v53 }
 0x42c   :  { %v3614_v26 = vrot.slane %v3607_v60, 7  ;;  %v3628_v9 = vmul.f32 %v10657_v47, %v11705_v12  ;;  %v3632_v6 = vmul.f32 %v10657_v47, %v11708_v29  ;;  %v3629_v19 = vmul.f32 %v10662_v58, %v11709_v50  ;;  %v7208_v60 = vld [vmem:[#allocation5 + $0xdc] sm:$0xf0] }
 0x42d   :  { %v3633_v37 = vmul.f32 %v10662_v58, %v11710_v34  ;;  %v3636_v12 = vmul.f32 %v10657_v47, %v11712_v3  ;;  %5228 = vmatpush.bf16.msrb.mxu0 %v7551_v28  ;;  %v7211_v39 = vor.u32 %v8005_v54, %v7208_v60  ;;  %5271 = vmatpush.bf16.msrb.mxu1 %v7711_v24 }
 0x42e   :  { %v3618_v48 = vsel %vm3617_vm5, %v3606_v31, %v3614_v26 }
 0x42f   :  { %v3621_v51 = vsel %vm846_vm1, %v3618_v48, %v3620_v14  ;;  %v11711_v48 = vld [vmem:[#allocation62_spill] sm:$0xff]  ;;  %5143 = vmatpush.bf16.msrb.mxu3 %v7211_v39  ;;  %v11715_v39 = vld [vmem:[#allocation85_spill] sm:$0xff] }
 0x430   :  { %v3623_v62 = vsub.f32 %v3605_v35, %v3621_v51  ;;  %v3635_v51 = vmul.f32 %v10654_v11, %v11711_v48 }
 0x432   :  { %v10679_v31 = vperm.slane %v3623_v62, 0  ;;  %v10681_v26 = vperm.slane %v3623_v62, 1  ;;  %v10683_v35 = vperm.slane %v3623_v62, 2  ;;  %v10685_v14 = vperm.slane %v3623_v62, 3 }
 0x434   :  { %v3693_v8 = vadd.f32 %v10679_v31, %v3628_v9  ;;  %v3697_v32 = vadd.f32 %v10679_v31, %v3632_v6  ;;  %v3694_v29 = vadd.f32 %v10681_v26, %v3629_v19  ;;  %v3698_v50 = vadd.f32 %v10681_v26, %v3633_v37 }
 0x435   :  { %v3695_v62 = vadd.f32 %v10683_v35, %v3630_v44  ;;  %v3699_v34 = vadd.f32 %v10683_v35, %v3634_v41  ;;  %v3696_v48 = vadd.f32 %v10685_v14, %v3631_v7  ;;  %v3700_v42 = vadd.f32 %v10685_v14, %v3635_v51 }
 0x436   :  { %vm3749_vm1 = vcmp.ge.f32.partialorder %v3693_v8, 0.0  ;;  %vm3753_vm6 = vcmp.ge.f32.partialorder %v3697_v32, 0.0  ;;  %v3805_v45 = vmul.f32 0.2, %v3693_v8  ;;  %v3809_v28 = vmul.f32 0.2, %v3697_v32 }
 0x437   :  { %vm3750_vm7 = vcmp.ge.f32.partialorder %v3694_v29, 0.0  ;;  %vm3754_vm8 = vcmp.ge.f32.partialorder %v3698_v50, 0.0  ;;  %v3806_v9 = vmul.f32 0.2, %v3694_v29  ;;  %v3810_v6 = vmul.f32 0.2, %v3698_v50 }
 0x438   :  { %v3861_v19 = vsel %vm3749_vm1, %v3693_v8, %v3805_v45  ;;  %v3865_v37 = vsel %vm3753_vm6, %v3697_v32, %v3809_v28  ;;  %vm3751_vm9 = vcmp.ge.f32.partialorder %v3695_v62, 0.0  ;;  %vm3755_vm10 = vcmp.ge.f32.partialorder %v3699_v34, 0.0 }
 0x439   :  { %v10699_v44 = vpack.c.bf16 %v3865_v37, %v3861_v19  ;;  %v3862_v41 = vsel %vm3750_vm7, %v3694_v29, %v3806_v9  ;;  %v3866_v7 = vsel %vm3754_vm8, %v3698_v50, %v3810_v6  ;;  %v3807_v53 = vmul.f32 0.2, %v3695_v62  ;;  %v11716_v50 = vld [vmem:[#allocation11_spill] sm:$0xff] }
 0x43a   :  { %v10701_v54 = vpack.c.bf16 %v3866_v7, %v3862_v41  ;;  %v3811_v60 = vmul.f32 0.2, %v3699_v34  ;;  %vm3752_vm11 = vcmp.ge.f32.partialorder %v3696_v48, 0.0  ;;  %vm3756_vm12 = vcmp.ge.f32.partialorder %v3700_v42, 0.0 }
 0x43b   :  { %11713 = vst [vmem:[#allocation32_spill] sm:$0xff] %v10699_v44  ;;  %4977 = vmatmul.bf16.vlgmr.msra.gmra.mxu3 %v10699_v44  ;;  %v3863_v51 = vsel %vm3751_vm9, %v3695_v62, %v3807_v53  ;;  %v3808_v3 = vmul.f32 0.2, %v3696_v48  ;;  %v3812_v24 = vmul.f32 0.2, %v3700_v42  ;;  %v3640_v8 = vmul.f32 %v10657_v47, %v11715_v39 }
 0x43c   :  { %11714 = vst [vmem:[#allocation13_spill] sm:$0xff] %v10701_v54  ;;  %5020 = vmatmul.bf16.vlgmr.msra.gmra.mxu2 %v10701_v54  ;;  %v3867_v32 = vsel %vm3755_vm10, %v3699_v34, %v3811_v60  ;;  %v3701_v29 = vadd.f32 %v10679_v31, %v3636_v12  ;;  %v3637_v45 = vmul.f32 %v10662_v58, %v11716_v50  ;;  %v11719_v12 = vld [vmem:[#allocation9_spill] sm:$0xff]  ;;  %v11722_v60 = vld [vmem:[#allocation83_spill] sm:$0xff] }
 0x43d   :  { %v3641_v28 = vmul.f32 %v10662_v58, %v9891_v1  ;;  %v10712_v9 = vpack.c.bf16 %v3867_v32, %v3863_v51  ;;  %v3864_v6 = vsel %vm3752_vm11, %v3696_v48, %v3808_v3  ;;  %v3868_v62 = vsel %vm3756_vm12, %v3700_v42, %v3812_v24  ;;  %v11720_v1 = vld [vmem:[#allocation82_spill] sm:$0xff]  ;;  %v7368_v24 = vld [vmem:[#allocation5 + $0x21c] sm:$0xf0] }
 0x43e   :  { %v3705_v19 = vadd.f32 %v10679_v31, %v3640_v8  ;;  %v10715_v37 = vpack.c.bf16 %v3868_v62, %v3864_v6  ;;  %v3702_v41 = vadd.f32 %v10681_v26, %v3637_v45  ;;  %v3638_v7 = vmul.f32 %v10652_v0, %v11719_v12  ;;  %v11721_v48 = vld [vmem:[#allocation10_spill] sm:$0xff] }
 0x43f   :  { %11717 = vst [vmem:[#allocation59_spill] sm:$0xff] %v10712_v9  ;;  %v3706_v34 = vadd.f32 %v10681_v26, %v3641_v28  ;;  %5063 = vmatmul.bf16.vlgmr.msra.gmra.mxu0 %v10712_v9  ;;  %v3642_v53 = vmul.f32 %v10652_v0, %v11720_v1  ;;  %v3639_v42 = vmul.f32 %v10654_v11, %v11721_v48  ;;  %v8045_v3 = vld [vmem:[#allocation5 + $0x20c] sm:$0xf]  ;;  %vm3757_vm13 = vcmp.ge.f32.partialorder %v3701_v29, 0.0 }
 0x440   :  { %11718 = vst [vmem:[#allocation14_spill] sm:$0xff] %v10715_v37  ;;  %5106 = vmatmul.bf16.vlgmr.msra.gmra.mxu1 %v10715_v37  ;;  %v3643_v51 = vmul.f32 %v10654_v11, %v11722_v60  ;;  %vm3761_vm14 = vcmp.ge.f32.partialorder %v3705_v19, 0.0  ;;  %v3813_v39 = vmul.f32 0.2, %v3701_v29  ;;  %v3817_v8 = vmul.f32 0.2, %v3705_v19 }
 0x441   :  { %v3814_v32 = vmul.f32 0.2, %v3702_v41  ;;  %v3818_v50 = vmul.f32 0.2, %v3706_v34  ;;  %v3703_v45 = vadd.f32 %v10683_v35, %v3638_v7  ;;  %v3707_v28 = vadd.f32 %v10683_v35, %v3642_v53  ;;  %v8085_v53 = vld [vmem:[#allocation5 + $0x34c] sm:$0xf] }
 0x442   :  { %vm3758_vm15 = vcmp.ge.f32.partialorder %v3702_v41, 0.0  ;;  %vm3762_vm0 = vcmp.ge.f32.partialorder %v3706_v34, 0.0  ;;  %v3704_v6 = vadd.f32 %v10685_v14, %v3639_v42  ;;  %v3708_v62 = vadd.f32 %v10685_v14, %v3643_v51  ;;  %v7528_v42 = vld [vmem:[#allocation5 + $0x35c] sm:$0xf0] }
 0x443   :  { %v7371_v12 = vor.u32 %v8045_v3, %v7368_v24  ;;  %v3869_v1 = vsel %vm3757_vm13, %v3701_v29, %v3813_v39  ;;  %v3873_v48 = vsel %vm3761_vm14, %v3705_v19, %v3817_v8  ;;  %v3870_v60 = vsel %vm3758_vm15, %v3702_v41, %v3814_v32  ;;  %v7688_v51 = vld [vmem:[#allocation5 + $0x49c] sm:$0xf0]  ;;  %v8000_v32 = vld [vmem:[#allocation5 + $0xa4] sm:$0xf] }
 0x444   :  { %v3874_v37 = vsel %vm3762_vm0, %v3706_v34, %v3818_v50  ;;  %v3815_v9 = vmul.f32 0.2, %v3703_v45  ;;  %v3819_v54 = vmul.f32 0.2, %v3707_v28  ;;  %vm3759_vm2 = vcmp.ge.f32.partialorder %v3703_v45, 0.0 }
 0x445   :  { %5186 = vmatpush.bf16.msrb.mxu2 %v7371_v12  ;;  %vm3763_vm3 = vcmp.ge.f32.partialorder %v3707_v28, 0.0  ;;  %v3816_v44 = vmul.f32 0.2, %v3704_v6  ;;  %v3820_v7 = vmul.f32 0.2, %v3708_v62  ;;  %vm3760_vm4 = vcmp.ge.f32.partialorder %v3704_v6, 0.0 }
 0x446   :  { %vm3764_vm5 = vcmp.ge.f32.partialorder %v3708_v62, 0.0  ;;  %v10733_v40 = vpack.c.bf16 %v3873_v48, %v3869_v1  ;;  %v10735_v3 = vpack.c.bf16 %v3874_v37, %v3870_v60  ;;  %v3871_v29 = vsel %vm3759_vm2, %v3703_v45, %v3815_v9  ;;  %v7188_v50 = vld [vmem:[#allocation5 + $0xb4] sm:$0xf0]  ;;  %v8040_v45 = vld [vmem:[#allocation5 + $0x1e4] sm:$0xf] }
 0x447   :  { %v3875_v19 = vsel %vm3763_vm3, %v3707_v28, %v3819_v54  ;;  %v3644_v41 = vmul.f32 %v10657_v47, %v10371_v15  ;;  %v3872_v34 = vsel %vm3760_vm4, %v3704_v6, %v3816_v44  ;;  %v3876_v24 = vsel %vm3764_vm5, %v3708_v62, %v3820_v7  ;;  %v7348_v44 = vld [vmem:[#allocation5 + $0x1f4] sm:$0xf0] }
 0x448   :  { %v3648_v39 = vmul.f32 %v10657_v47, %v9916_v21  ;;  %v3645_v8 = vmul.f32 %v10662_v58, %v10377_v30  ;;  %v3649_v54 = vmul.f32 %v10662_v58, %v9943_v2  ;;  %v7531_v9 = vor.u32 %v8085_v53, %v7528_v42  ;;  %v11725_v2 = vld [vmem:[#allocation86_spill] sm:$0xff]  ;;  %v11727_v53 = vld [vmem:[#allocation89_spill] sm:$0xff] }
 0x449   :  { %v3709_v37 = vadd.f32 %v10679_v31, %v3644_v41  ;;  %v7691_v15 = vor.u32 %v8125_v43, %v7688_v51  ;;  %v10748_v28 = vpack.c.bf16 %v3875_v19, %v3871_v29  ;;  %v3646_v30 = vmul.f32 %v10652_v0, %v10350_v22  ;;  %v11726_v22 = vld [vmem:[#allocation52_spill] sm:$0xff] }
 0x44a   :  { %v3713_v21 = vadd.f32 %v10679_v31, %v3648_v39  ;;  %v10753_v6 = vpack.c.bf16 %v3876_v24, %v3872_v34  ;;  %v3710_v62 = vadd.f32 %v10681_v26, %v3645_v8  ;;  %v3714_v12 = vadd.f32 %v10681_v26, %v3649_v54  ;;  %5229 = vmatpush.bf16.msrb.mxu0 %v7531_v9  ;;  %v8080_v54 = vld [vmem:[#allocation5 + $0x324] sm:$0xf]  ;;  %v7508_v9 = vld [vmem:[#allocation5 + $0x334] sm:$0xf0] }
 0x44b   :  { %4981 = vmatmul.bf16.gmra.mxu3 %v10733_v40  ;;  %11723 = vst [vmem:[#allocation33_spill] sm:$0xff] %v10748_v28  ;;  %5272 = vmatpush.bf16.msrb.mxu1 %v7691_v15  ;;  %v3650_v43 = vmul.f32 %v10652_v0, %v11725_v2  ;;  %v3711_v1 = vadd.f32 %v10683_v35, %v3646_v30  ;;  %vm3765_vm1 = vcmp.ge.f32.partialorder %v3709_v37, 0.0  ;;  %v3821_v51 = vmul.f32 0.2, %v3709_v37  ;;  %v8120_v15 = vld [vmem:[#allocation5 + $0x464] sm:$0xf] }
 0x44c   :  { %5024 = vmatmul.bf16.gmra.mxu2 %v10735_v3  ;;  %11724 = vst [vmem:[#allocation60_spill] sm:$0xff] %v10753_v6  ;;  %v7191_v48 = vor.u32 %v8000_v32, %v7188_v50  ;;  %v7351_v60 = vor.u32 %v8040_v45, %v7348_v44  ;;  %v3647_v7 = vmul.f32 %v10654_v11, %v11726_v22  ;;  %vm3769_vm6 = vcmp.ge.f32.partialorder %v3713_v21, 0.0  ;;  %v7668_v2 = vld [vmem:[#allocation5 + $0x474] sm:$0xf0] }
 0x44d   :  { %v3651_v42 = vmul.f32 %v10654_v11, %v11727_v53  ;;  %v3825_v29 = vmul.f32 0.2, %v3713_v21  ;;  %v3715_v19 = vadd.f32 %v10683_v35, %v3650_v43  ;;  %vm3766_vm7 = vcmp.ge.f32.partialorder %v3710_v62, 0.0  ;;  %v7995_v43 = vld [vmem:[#allocation5 + $0x7c] sm:$0xf] }
 0x44e   :  { %5144 = vmatpush.bf16.msrb.mxu3 %v7191_v48  ;;  %5187 = vmatpush.bf16.msrb.mxu2 %v7351_v60  ;;  %vm3770_vm8 = vcmp.ge.f32.partialorder %v3714_v12, 0.0  ;;  %v3822_v41 = vmul.f32 0.2, %v3710_v62  ;;  %v3826_v34 = vmul.f32 0.2, %v3714_v12  ;;  %vm3767_vm9 = vcmp.ge.f32.partialorder %v3711_v1, 0.0 }
 0x44f   :  { %5067 = vmatmul.bf16.gmra.mxu0 %v10748_v28  ;;  %v3823_v24 = vmul.f32 0.2, %v3711_v1  ;;  %v3712_v39 = vadd.f32 %v10685_v14, %v3647_v7  ;;  %v3716_v8 = vadd.f32 %v10685_v14, %v3651_v42  ;;  %v3652_v32 = vmul.f32 %v10657_v47, %v10419_v38  ;;  %v7168_v48 = vld [vmem:[#allocation5 + $0x8c] sm:$0xf0] }
 0x450   :  { %5110 = vmatmul.bf16.gmra.mxu1 %v10753_v6  ;;  %v3877_v50 = vsel %vm3765_vm1, %v3709_v37, %v3821_v51  ;;  %v3656_v45 = vmul.f32 %v10657_v47, %v10037_v52  ;;  %v3653_v44 = vmul.f32 %v10662_v58, %v10424_v4  ;;  %v3657_v30 = vmul.f32 %v10662_v58, %v10048_v10  ;;  %v8035_v37 = vld [vmem:[#allocation5 + $0x1bc] sm:$0xf]  ;;  %v7328_v53 = vld [vmem:[#allocation5 + $0x1cc] sm:$0xf0] }
 0x451   :  { %v3881_v60 = vsel %vm3769_vm6, %v3713_v21, %v3825_v29  ;;  %v3878_v38 = vsel %vm3766_vm7, %v3710_v62, %v3822_v41  ;;  %v3882_v22 = vsel %vm3770_vm8, %v3714_v12, %v3826_v34  ;;  %v3827_v7 = vmul.f32 0.2, %v3715_v19 }
 0x452   :  { %vm3771_vm10 = vcmp.ge.f32.partialorder %v3715_v19, 0.0  ;;  %v3824_v52 = vmul.f32 0.2, %v3712_v39  ;;  %v3828_v42 = vmul.f32 0.2, %v3716_v8  ;;  %v7511_v51 = vor.u32 %v8080_v54, %v7508_v9 }
 0x453   :  { %vm3768_vm11 = vcmp.ge.f32.partialorder %v3712_v39, 0.0  ;;  %vm3772_vm12 = vcmp.ge.f32.partialorder %v3716_v8, 0.0  ;;  %v7671_v4 = vor.u32 %v8120_v15, %v7668_v2  ;;  %v7171_v10 = vor.u32 %v7995_v43, %v7168_v48  ;;  %v8115_v48 = vld [vmem:[#allocation5 + $0x43c] sm:$0xf] }
 0x454   :  { %v10781_v6 = vpack.c.bf16 %v3881_v60, %v3877_v50  ;;  %v10783_v28 = vpack.c.bf16 %v3882_v22, %v3878_v38  ;;  %v3879_v21 = vsel %vm3767_vm9, %v3711_v1, %v3823_v24  ;;  %5230 = vmatpush.bf16.msrb.mxu0 %v7511_v51  ;;  %v7331_v62 = vor.u32 %v8035_v37, %v7328_v53  ;;  %v7648_v60 = vld [vmem:[#allocation5 + $0x44c] sm:$0xf0]  ;;  %v7148_v53 = vld [vmem:[#allocation5 + $0x64] sm:$0xf0] }
 0x455   :  { %v3883_v12 = vsel %vm3771_vm10, %v3715_v19, %v3827_v7  ;;  %v3717_v29 = vadd.f32 %v10679_v31, %v3652_v32  ;;  %v3721_v41 = vadd.f32 %v10679_v31, %v3656_v45  ;;  %5273 = vmatpush.bf16.msrb.mxu1 %v7671_v4  ;;  %5145 = vmatpush.bf16.msrb.mxu3 %v7171_v10  ;;  %v7990_v7 = vld [vmem:[#allocation5 + $0x54] sm:$0xf] }
 0x456   :  { %v3880_v34 = vsel %vm3768_vm11, %v3712_v39, %v3824_v52  ;;  %v3884_v54 = vsel %vm3772_vm12, %v3716_v8, %v3828_v42  ;;  %v3718_v9 = vadd.f32 %v10681_v26, %v3653_v44  ;;  %5188 = vmatpush.bf16.msrb.mxu2 %v7331_v62  ;;  %v10791_v15 = vpack.c.bf16 %v3883_v12, %v3879_v21  ;;  %v8075_v44 = vld [vmem:[#allocation5 + $0x2fc] sm:$0xf]  ;;  %v8030_v52 = vld [vmem:[#allocation5 + $0x194] sm:$0xf]  ;;  %v7308_v42 = vld [vmem:[#allocation5 + $0x1a4] sm:$0xf0] }
 0x457   :  { %v3722_v1 = vadd.f32 %v10681_v26, %v3657_v30  ;;  %v10794_v19 = vpack.c.bf16 %v3884_v54, %v3880_v34  ;;  %vm3773_vm13 = vcmp.ge.f32.partialorder %v3717_v29, 0.0  ;;  %vm3777_vm14 = vcmp.ge.f32.partialorder %v3721_v41, 0.0  ;;  %v7488_v30 = vld [vmem:[#allocation5 + $0x30c] sm:$0xf0]  ;;  %v8070_v10 = vld [vmem:[#allocation5 + $0x2d4] sm:$0xf] }
 0x458   :  { %v3829_v24 = vmul.f32 0.2, %v3717_v29  ;;  %v3833_v32 = vmul.f32 0.2, %v3721_v41  ;;  %vm3774_vm15 = vcmp.ge.f32.partialorder %v3718_v9, 0.0  ;;  %v3654_v8 = vmul.f32 %v10652_v0, %v10397_v17 }
 0x459   :  { %v3830_v39 = vmul.f32 0.2, %v3718_v9  ;;  %v3658_v50 = vmul.f32 %v10652_v0, %v10008_v5  ;;  %v3655_v45 = vmul.f32 %v10654_v11, %v10403_v61  ;;  %v3834_v2 = vmul.f32 0.2, %v3722_v1  ;;  %v7468_v34 = vld [vmem:[#allocation5 + $0x2e4] sm:$0xf0] }
 0x45a   :  { %v3659_v43 = vmul.f32 %v10654_v11, %v10033_v59  ;;  %vm3778_vm0 = vcmp.ge.f32.partialorder %v3722_v1, 0.0  ;;  %v3719_v38 = vadd.f32 %v10683_v35, %v3654_v8  ;;  %v7491_v37 = vor.u32 %v8075_v44, %v7488_v30 }
 0x45b   :  { %4986 = vmatmul.bf16.gmra.mxu3 %v10781_v6  ;;  %v3723_v22 = vadd.f32 %v10683_v35, %v3658_v50  ;;  %v3720_v17 = vadd.f32 %v10685_v14, %v3655_v45  ;;  %v7651_v61 = vor.u32 %v8115_v48, %v7648_v60  ;;  %v3885_v51 = vsel %vm3773_vm13, %v3717_v29, %v3829_v24 }
 0x45c   :  { %5029 = vmatmul.bf16.gmra.mxu2 %v10783_v28  ;;  %v3724_v5 = vadd.f32 %v10685_v14, %v3659_v43  ;;  %v3889_v59 = vsel %vm3777_vm14, %v3721_v41, %v3833_v32  ;;  %v7151_v4 = vor.u32 %v7990_v7, %v7148_v53  ;;  %v3886_v21 = vsel %vm3774_vm15, %v3718_v9, %v3830_v39  ;;  %v7628_v53 = vld [vmem:[#allocation5 + $0x424] sm:$0xf0] }
 0x45d   :  { %v3890_v62 = vsel %vm3778_vm0, %v3722_v1, %v3834_v2  ;;  %5231 = vmatpush.bf16.msrb.mxu0 %v7491_v37  ;;  %5274 = vmatpush.bf16.msrb.mxu1 %v7651_v61  ;;  %v7311_v12 = vor.u32 %v8030_v52, %v7308_v42  ;;  %v3831_v54 = vmul.f32 0.2, %v3719_v38  ;;  %v3835_v8 = vmul.f32 0.2, %v3723_v22  ;;  %v8110_v61 = vld [vmem:[#allocation5 + $0x414] sm:$0xf] }
 0x45e   :  { %v3832_v50 = vmul.f32 0.2, %v3720_v17  ;;  %5146 = vmatpush.bf16.msrb.mxu3 %v7151_v4  ;;  %v7471_v45 = vor.u32 %v8070_v10, %v7468_v34  ;;  %vm3775_vm2 = vcmp.ge.f32.partialorder %v3719_v38, 0.0  ;;  %vm3779_vm3 = vcmp.ge.f32.partialorder %v3723_v22, 0.0  ;;  %v7448_v34 = vld [vmem:[#allocation5 + $0x2bc] sm:$0xf0] }
 0x45f   :  { %5072 = vmatmul.bf16.gmra.mxu0 %v10791_v15  ;;  %vm3776_vm4 = vcmp.ge.f32.partialorder %v3720_v17, 0.0  ;;  %v3836_v29 = vmul.f32 0.2, %v3724_v5  ;;  %5189 = vmatpush.bf16.msrb.mxu2 %v7311_v12  ;;  %vm3780_vm5 = vcmp.ge.f32.partialorder %v3724_v5, 0.0  ;;  %v10814_v41 = vpack.c.bf16 %v3889_v59, %v3885_v51  ;;  %v7128_v51 = vld [vmem:[#allocation5 + $0x3c] sm:$0xf0] }
 0x460   :  { %5115 = vmatmul.bf16.gmra.mxu1 %v10794_v19  ;;  %v3660_v9 = vmul.f32 %v10657_v47, %v10467_v27  ;;  %v10818_v1 = vpack.c.bf16 %v3890_v62, %v3886_v21  ;;  %v3887_v24 = vsel %vm3775_vm2, %v3719_v38, %v3831_v54  ;;  %v3891_v32 = vsel %vm3779_vm3, %v3723_v22, %v3835_v8  ;;  %v8025_v21 = vld [vmem:[#allocation5 + $0x16c] sm:$0xf] }
 0x461   :  { %5232 = vmatpush.bf16.msrb.mxu0 %v7471_v45  ;;  %v3888_v39 = vsel %vm3776_vm4, %v3720_v17, %v3832_v50  ;;  %v3892_v44 = vsel %vm3780_vm5, %v3724_v5, %v3836_v29  ;;  %v3664_v30 = vmul.f32 %v10657_v47, %v10077_v49  ;;  %v3661_v43 = vmul.f32 %v10662_v58, %v10473_v20  ;;  %v8065_v12 = vld [vmem:[#allocation5 + $0x2ac] sm:$0xf]  ;;  %v7608_v45 = vld [vmem:[#allocation5 + $0x3fc] sm:$0xf0] }
 0x462   :  { %v3725_v2 = vadd.f32 %v10679_v31, %v3660_v9  ;;  %v3665_v27 = vmul.f32 %v10662_v58, %v10081_v18  ;;  %v10829_v48 = vpack.c.bf16 %v3891_v32, %v3887_v24  ;;  %v10833_v22 = vpack.c.bf16 %v3892_v44, %v3888_v39  ;;  %v8105_v50 = vld [vmem:[#allocation5 + $0x3ec] sm:$0xf] }
 0x463   :  { %v3729_v60 = vadd.f32 %v10679_v31, %v3664_v30  ;;  %v3726_v38 = vadd.f32 %v10681_v26, %v3661_v43  ;;  %v3662_v17 = vmul.f32 %v10652_v0, %v10446_v57  ;;  %v3666_v18 = vmul.f32 %v10652_v0, %v10052_v33  ;;  %v7985_v57 = vld [vmem:[#allocation5 + $0x2c] sm:$0xf] }
 0x464   :  { %v3730_v49 = vadd.f32 %v10681_v26, %v3665_v27  ;;  %vm3781_vm1 = vcmp.ge.f32.partialorder %v3725_v2, 0.0  ;;  %v3837_v20 = vmul.f32 0.2, %v3725_v2  ;;  %v3663_v5 = vmul.f32 %v10654_v11, %v10452_v25 }
 0x465   :  { %v3727_v7 = vadd.f32 %v10683_v35, %v3662_v17  ;;  %v3667_v37 = vmul.f32 %v10654_v11, %v10056_v16  ;;  %vm3785_vm6 = vcmp.ge.f32.partialorder %v3729_v60, 0.0  ;;  %v3841_v52 = vmul.f32 0.2, %v3729_v60  ;;  %v7288_v16 = vld [vmem:[#allocation5 + $0x17c] sm:$0xf0] }
 0x466   :  { %vm3782_vm7 = vcmp.ge.f32.partialorder %v3726_v38, 0.0  ;;  %v7631_v42 = vor.u32 %v8110_v61, %v7628_v53  ;;  %v3838_v59 = vmul.f32 0.2, %v3726_v38  ;;  %v3842_v4 = vmul.f32 0.2, %v3730_v49 }
 0x467   :  { %v3731_v33 = vadd.f32 %v10683_v35, %v3666_v18  ;;  %v7131_v10 = vor.u32 %v7985_v57, %v7128_v51  ;;  %v3728_v62 = vadd.f32 %v10685_v14, %v3663_v5  ;;  %v3732_v25 = vadd.f32 %v10685_v14, %v3667_v37 }
 0x468   :  { %5275 = vmatpush.bf16.msrb.mxu1 %v7631_v42  ;;  %vm3786_vm8 = vcmp.ge.f32.partialorder %v3730_v49, 0.0  ;;  %v7291_v54 = vor.u32 %v8025_v21, %v7288_v16  ;;  %v7451_v8 = vor.u32 %v8065_v12, %v7448_v34  ;;  %v3893_v29 = vsel %vm3781_vm1, %v3725_v2, %v3837_v20  ;;  %v7268_v12 = vld [vmem:[#allocation5 + $0x154] sm:$0xf0]  ;;  %v8060_v34 = vld [vmem:[#allocation5 + $0x284] sm:$0xf] }
 0x469   :  { %5147 = vmatpush.bf16.msrb.mxu3 %v7131_v10  ;;  %v3897_v9 = vsel %vm3785_vm6, %v3729_v60, %v3841_v52  ;;  %v7611_v24 = vor.u32 %v8105_v50, %v7608_v45  ;;  %v3894_v32 = vsel %vm3782_vm7, %v3726_v38, %v3838_v59  ;;  %vm3783_vm9 = vcmp.ge.f32.partialorder %v3727_v7, 0.0 }
 0x46a   :  { %v3839_v39 = vmul.f32 0.2, %v3727_v7  ;;  %v3843_v44 = vmul.f32 0.2, %v3731_v33  ;;  %5190 = vmatpush.bf16.msrb.mxu2 %v7291_v54  ;;  %5233 = vmatpush.bf16.msrb.mxu0 %v7451_v8  ;;  %v3898_v30 = vsel %vm3786_vm8, %v3730_v49, %v3842_v4  ;;  %vm3787_vm10 = vcmp.ge.f32.partialorder %v3731_v33, 0.0 }
 0x46b   :  { %4991 = vmatmul.bf16.gmra.mxu3 %v10814_v41  ;;  %v3840_v43 = vmul.f32 0.2, %v3728_v62  ;;  %v3844_v27 = vmul.f32 0.2, %v3732_v25  ;;  %vm3784_vm11 = vcmp.ge.f32.partialorder %v3728_v62, 0.0  ;;  %vm3788_vm12 = vcmp.ge.f32.partialorder %v3732_v25, 0.0 }
 0x46c   :  { %5034 = vmatmul.bf16.gmra.mxu2 %v10818_v1  ;;  %5276 = vmatpush.bf16.msrb.mxu1 %v7611_v24  ;;  %v3668_v2 = vmul.f32 %v10657_v47, %v10515_v13  ;;  %v10855_v17 = vpack.c.bf16 %v3897_v9, %v3893_v29  ;;  %v3672_v60 = vmul.f32 %v10657_v47, %v11677_v36  ;;  %v7980_v4 = vld [vmem:[#allocation5 + $0x4] sm:$0xf]  ;;  %v7428_v54 = vld [vmem:[#allocation5 + $0x294] sm:$0xf0] }
 0x46d   :  { %v3669_v38 = vmul.f32 %v10662_v58, %v10520_v23  ;;  %v10861_v20 = vpack.c.bf16 %v3898_v30, %v3894_v32  ;;  %v3895_v49 = vsel %vm3783_vm9, %v3727_v7, %v3839_v39  ;;  %v3899_v18 = vsel %vm3787_vm10, %v3731_v33, %v3843_v44  ;;  %v7108_v33 = vld [vmem:[#allocation5 + $0x14] sm:$0xf0]  ;;  %v8100_v29 = vld [vmem:[#allocation5 + $0x3c4] sm:$0xf] }
 0x46e   :  { %v3733_v5 = vadd.f32 %v10679_v31, %v3668_v2  ;;  %v3896_v37 = vsel %vm3784_vm11, %v3728_v62, %v3840_v43  ;;  %v3900_v61 = vsel %vm3788_vm12, %v3732_v25, %v3844_v27  ;;  %v3737_v13 = vadd.f32 %v10679_v31, %v3672_v60  ;;  %v11728_v62 = vld [vmem:[#allocation103_spill] sm:$0xff]  ;;  %v7588_v9 = vld [vmem:[#allocation5 + $0x3d4] sm:$0xf0] }
 0x46f   :  { %5077 = vmatmul.bf16.gmra.mxu0 %v10829_v48  ;;  %v3734_v53 = vadd.f32 %v10681_v26, %v3669_v38  ;;  %v3673_v23 = vmul.f32 %v10662_v58, %v11679_v63  ;;  %v10871_v36 = vpack.c.bf16 %v3899_v18, %v3895_v49  ;;  %v3670_v7 = vmul.f32 %v10652_v0, %v10493_v46  ;;  %v8020_v46 = vld [vmem:[#allocation5 + $0x144] sm:$0xf]  ;;  %v11729_v49 = vld [vmem:[#allocation31_spill] sm:$0xff] }
 0x470   :  { %5120 = vmatmul.bf16.gmra.mxu1 %v10833_v22  ;;  %v10875_v57 = vpack.c.bf16 %v3900_v61, %v3896_v37  ;;  %vm3789_vm13 = vcmp.ge.f32.partialorder %v3733_v5, 0.0  ;;  %v3845_v52 = vmul.f32 0.2, %v3733_v5  ;;  %vm3793_vm14 = vcmp.ge.f32.partialorder %v3737_v13, 0.0  ;;  %v11730_v37 = vld [vmem:[#allocation84_spill] sm:$0xff] }
 0x471   :  { %v3738_v42 = vadd.f32 %v10681_v26, %v3673_v23  ;;  %v3849_v51 = vmul.f32 0.2, %v3737_v13  ;;  %vm3790_vm15 = vcmp.ge.f32.partialorder %v3734_v53, 0.0  ;;  %v3846_v59 = vmul.f32 0.2, %v3734_v53 }
 0x472   :  { %v3674_v63 = vmul.f32 %v10652_v0, %v11667_v55  ;;  %v3735_v10 = vadd.f32 %v10683_v35, %v3670_v7  ;;  %v3671_v21 = vmul.f32 %v10654_v11, %v10499_v56  ;;  %v3675_v25 = vmul.f32 %v10654_v11, %v11728_v62  ;;  %v11732_v7 = vld [vmem:[#allocation87_spill] sm:$0xff] }
 0x473   :  { %v7111_v16 = vor.u32 %v7980_v4, %v7108_v33  ;;  %v3850_v8 = vmul.f32 0.2, %v3738_v42  ;;  %v7271_v45 = vor.u32 %v8020_v46, %v7268_v12  ;;  %v7431_v55 = vor.u32 %v8060_v34, %v7428_v54  ;;  %v11734_v12 = vld [vmem:[#allocation76_spill] sm:$0xff]  ;;  %v7254_v54 = vld [vmem:[#allocation5 + $0x120] sm:$0xf] }
 0x474   :  { %v3739_v50 = vadd.f32 %v10683_v35, %v3674_v63  ;;  %vm3794_vm0 = vcmp.ge.f32.partialorder %v3738_v42, 0.0  ;;  %v3736_v24 = vadd.f32 %v10685_v14, %v3671_v21  ;;  %v3740_v32 = vadd.f32 %v10685_v14, %v3675_v25 }
 0x475   :  { %5148 = vmatpush.bf16.msrb.mxu3 %v7111_v16  ;;  %v7591_v56 = vor.u32 %v8100_v29, %v7588_v9  ;;  %5191 = vmatpush.bf16.msrb.mxu2 %v7271_v45  ;;  %v3901_v39 = vsel %vm3789_vm13, %v3733_v5, %v3845_v52  ;;  %v3905_v44 = vsel %vm3793_vm14, %v3737_v13, %v3849_v51  ;;  %v3847_v27 = vmul.f32 0.2, %v3735_v10  ;;  %v11733_v16 = vld [vmem:[#allocation12_spill] sm:$0xff]  ;;  %v11735_v45 = vld [vmem:[#allocation53_spill] sm:$0xff]  ;;  %v11736_v29 = vld [vmem:[#allocation78_spill] sm:$0xff] }
 0x476   :  { %5234 = vmatpush.bf16.msrb.mxu0 %v7431_v55  ;;  %v3902_v30 = vsel %vm3790_vm15, %v3734_v53, %v3846_v59  ;;  %v3906_v43 = vsel %vm3794_vm0, %v3738_v42, %v3850_v8  ;;  %v3851_v2 = vmul.f32 0.2, %v3739_v50  ;;  %vm3791_vm2 = vcmp.ge.f32.partialorder %v3735_v10, 0.0  ;;  %v11731_v53 = vld [vmem:[#allocation54_spill] sm:$0xff]  ;;  %v8018_v8 = vld [vmem:[#allocation5 + $0x130] sm:$0xf0] }
 0x477   :  { %5277 = vmatpush.bf16.msrb.mxu1 %v7591_v56  ;;  %vm3795_vm3 = vcmp.ge.f32.partialorder %v3739_v50, 0.0  ;;  %v3848_v60 = vmul.f32 0.2, %v3736_v24  ;;  %v3852_v38 = vmul.f32 0.2, %v3740_v32  ;;  %vm3792_vm4 = vcmp.ge.f32.partialorder %v3736_v24, 0.0 }
 0x478   :  { %vm3796_vm5 = vcmp.ge.f32.partialorder %v3740_v32, 0.0  ;;  %v3676_v18 = vmul.f32 %v10657_v47, %v11729_v49  ;;  %v3680_v5 = vmul.f32 %v10657_v47, %v11730_v37  ;;  %v10897_v61 = vpack.c.bf16 %v3905_v44, %v3901_v39  ;;  %v7574_v56 = vld [vmem:[#allocation5 + $0x3a0] sm:$0xf]  ;;  %v8098_v39 = vld [vmem:[#allocation5 + $0x3b0] sm:$0xf0] }
 0x479   :  { %v10899_v13 = vpack.c.bf16 %v3906_v43, %v3902_v30  ;;  %v3677_v23 = vmul.f32 %v10662_v58, %v11731_v53  ;;  %v3681_v52 = vmul.f32 %v10662_v58, %v11732_v7  ;;  %v3903_v42 = vsel %vm3791_vm2, %v3735_v10, %v3847_v27 }
 0x47a   :  { %v3907_v51 = vsel %vm3795_vm3, %v3739_v50, %v3851_v2  ;;  %v3741_v59 = vadd.f32 %v10679_v31, %v3676_v18  ;;  %v3745_v63 = vadd.f32 %v10679_v31, %v3680_v5  ;;  %v3904_v4 = vsel %vm3792_vm4, %v3736_v24, %v3848_v60  ;;  %v7414_v50 = vld [vmem:[#allocation5 + $0x260] sm:$0xf]  ;;  %v8138_v2 = vld [vmem:[#allocation5 + $0x4f0] sm:$0xf0] }
 0x47b   :  { %4996 = vmatmul.bf16.gmra.mxu3 %v10855_v17  ;;  %v3908_v47 = vsel %vm3796_vm5, %v3740_v32, %v3852_v38  ;;  %v3742_v33 = vadd.f32 %v10681_v26, %v3677_v23  ;;  %v3746_v46 = vadd.f32 %v10681_v26, %v3681_v52  ;;  %v10911_v21 = vpack.c.bf16 %v3907_v51, %v3903_v42  ;;  %v8058_v32 = vld [vmem:[#allocation5 + $0x270] sm:$0xf0] }
 0x47c   :  { %5039 = vmatmul.bf16.gmra.mxu2 %v10861_v20  ;;  %v10913_v62 = vpack.c.bf16 %v3908_v47, %v3904_v4  ;;  %vm3797_vm1 = vcmp.ge.f32.partialorder %v3741_v59, 0.0  ;;  %v3853_v58 = vmul.f32 0.2, %v3741_v59  ;;  %v3857_v10 = vmul.f32 0.2, %v3745_v63 }
 0x47d   :  { %vm3801_vm6 = vcmp.ge.f32.partialorder %v3745_v63, 0.0  ;;  %vm3798_vm7 = vcmp.ge.f32.partialorder %v3742_v33, 0.0  ;;  %v3854_v31 = vmul.f32 0.2, %v3742_v33  ;;  %v3858_v25 = vmul.f32 0.2, %v3746_v46 }
 0x47e   :  { %v3678_v26 = vmul.f32 %v10652_v0, %v11733_v16  ;;  %v3682_v34 = vmul.f32 %v10652_v0, %v11734_v12  ;;  %v3679_v55 = vmul.f32 %v10654_v11, %v11735_v45  ;;  %v3683_v9 = vmul.f32 %v10654_v11, %v11736_v29  ;;  %v7734_v0 = vld [vmem:[#allocation5 + $0x4e0] sm:$0xf]  ;;  %v7234_v47 = vld [vmem:[#allocation5 + $0xf8] sm:$0xf]  ;;  %v8008_v29 = vld [vmem:[#allocation5 + $0xe0] sm:$0xf0] }
 0x47f   :  { %5082 = vmatmul.bf16.gmra.mxu0 %v10871_v36  ;;  %v7255_v24 = vor.u32 %v8018_v8, %v7254_v54  ;;  %v7415_v43 = vor.u32 %v8058_v32, %v7414_v50  ;;  %v7575_v27 = vor.u32 %v8098_v39, %v7574_v56  ;;  %vm3802_vm8 = vcmp.ge.f32.partialorder %v3746_v46, 0.0  ;;  %v7554_v16 = vld [vmem:[#allocation5 + $0x378] sm:$0xf]  ;;  %v8133_v54 = vld [vmem:[#allocation5 + $0x4c8] sm:$0xf0]  ;;  %v11738_v45 = vld [vmem:[#allocation13_spill] sm:$0xff] }
 0x480   :  { %5125 = vmatmul.bf16.gmra.mxu1 %v10875_v57  ;;  %v3743_v44 = vadd.f32 %v10683_v35, %v3678_v26  ;;  %v3747_v30 = vadd.f32 %v10683_v35, %v3682_v34  ;;  %v3744_v60 = vadd.f32 %v10685_v14, %v3679_v55  ;;  %v3748_v38 = vadd.f32 %v10685_v14, %v3683_v9  ;;  %v8093_v26 = vld [vmem:[#allocation5 + $0x388] sm:$0xf0]  ;;  %v7714_v12 = vld [vmem:[#allocation5 + $0x4b8] sm:$0xf]  ;;  %v7214_v55 = vld [vmem:[#allocation5 + $0xd0] sm:$0xf] }
 0x481   :  { %5313 = vmatpush.bf16.msra.mxu3 %v7255_v24  ;;  %v7735_v49 = vor.u32 %v8138_v2, %v7734_v0  ;;  %5357 = vmatpush.bf16.msra.mxu2 %v7415_v43  ;;  %v3909_v11 = vsel %vm3797_vm1, %v3741_v59, %v3853_v58  ;;  %v3913_v18 = vsel %vm3801_vm6, %v3745_v63, %v3857_v10  ;;  %v11737_v50 = vld [vmem:[#allocation32_spill] sm:$0xff]  ;;  %v7374_v9 = vld [vmem:[#allocation5 + $0x210] sm:$0xf]  ;;  %v8048_v32 = vld [vmem:[#allocation5 + $0x220] sm:$0xf0] }
 0x482   :  { %5401 = vmatpush.bf16.msra.mxu0 %v7575_v27  ;;  %v3910_v35 = vsel %vm3798_vm7, %v3742_v33, %v3854_v31  ;;  %v3914_v37 = vsel %vm3802_vm8, %v3746_v46, %v3858_v25  ;;  %v3855_v5 = vmul.f32 0.2, %v3743_v44  ;;  %v3859_v53 = vmul.f32 0.2, %v3747_v30  ;;  %v8013_v33 = vld [vmem:[#allocation5 + $0x108] sm:$0xf0] }
 0x483   :  { %5445 = vmatpush.bf16.msra.mxu1 %v7735_v49  ;;  %vm3799_vm9 = vcmp.ge.f32.partialorder %v3743_v44, 0.0  ;;  %vm3803_vm10 = vcmp.ge.f32.partialorder %v3747_v30, 0.0  ;;  %v3856_v23 = vmul.f32 0.2, %v3744_v60  ;;  %v3860_v7 = vmul.f32 0.2, %v3748_v38 }
 0x484   :  { %vm3800_vm11 = vcmp.ge.f32.partialorder %v3744_v60, 0.0  ;;  %vm3804_vm12 = vcmp.ge.f32.partialorder %v3748_v38, 0.0  ;;  %v10932_v14 = vpack.c.bf16 %v3913_v18, %v3909_v11  ;;  %v10934_v52 = vpack.c.bf16 %v3914_v37, %v3910_v35  ;;  %v7394_v46 = vld [vmem:[#allocation5 + $0x238] sm:$0xf]  ;;  %v8053_v31 = vld [vmem:[#allocation5 + $0x248] sm:$0xf0] }
 0x485   :  { %v3911_v42 = vsel %vm3799_vm9, %v3743_v44, %v3855_v5  ;;  %v3915_v51 = vsel %vm3803_vm10, %v3747_v30, %v3859_v53  ;;  %v3912_v59 = vsel %vm3800_vm11, %v3744_v60, %v3856_v23  ;;  %v3916_v63 = vsel %vm3804_vm12, %v3748_v38, %v3860_v7  ;;  %v11739_v39 = vld [vmem:[#allocation59_spill] sm:$0xff]  ;;  %v11740_v44 = vld [vmem:[#allocation14_spill] sm:$0xff]  ;;  %v8088_v43 = vld [vmem:[#allocation5 + $0x360] sm:$0xf0] }
 0x486   :  { %v10938_v4 = vpack.c.bf16 %v3915_v51, %v3911_v42  ;;  %v10940_v58 = vpack.c.bf16 %v3916_v63, %v3912_v59  ;;  %v7235_v10 = vor.u32 %v8013_v33, %v7234_v47  ;;  %v7395_v25 = vor.u32 %v8053_v31, %v7394_v46  ;;  %v7534_v30 = vld [vmem:[#allocation5 + $0x350] sm:$0xf]  ;;  %v8128_v2 = vld [vmem:[#allocation5 + $0x4a0] sm:$0xf0]  ;;  %v7194_v60 = vld [vmem:[#allocation5 + $0xa8] sm:$0xf] }
 0x487   :  { %v7555_v34 = vor.u32 %v8093_v26, %v7554_v16  ;;  %v7715_v8 = vor.u32 %v8133_v54, %v7714_v12  ;;  %v7215_v24 = vor.u32 %v8008_v29, %v7214_v55  ;;  %v7375_v56 = vor.u32 %v8048_v32, %v7374_v9  ;;  %v7694_v0 = vld [vmem:[#allocation5 + $0x490] sm:$0xf]  ;;  %v8003_v49 = vld [vmem:[#allocation5 + $0xb8] sm:$0xf0]  ;;  %v7354_v11 = vld [vmem:[#allocation5 + $0x1e8] sm:$0xf] }
 0x488   :  { %5314 = vmatpush.bf16.msra.mxu3 %v7235_v10  ;;  %5358 = vmatpush.bf16.msra.mxu2 %v7395_v25  ;;  %v7535_v27 = vor.u32 %v8088_v43, %v7534_v30  ;;  %v7695_v38 = vor.u32 %v8128_v2, %v7694_v0  ;;  %v8043_v18 = vld [vmem:[#allocation5 + $0x1f8] sm:$0xf0]  ;;  %v7195_v35 = vor.u32 %v8003_v49, %v7194_v60  ;;  %v11741_v7 = vld [vmem:[#allocation33_spill] sm:$0xff]  ;;  %v7514_v59 = vld [vmem:[#allocation5 + $0x328] sm:$0xf] }
 0x489   :  { %5402 = vmatpush.bf16.msra.mxu0 %v7555_v34  ;;  %5446 = vmatpush.bf16.msra.mxu1 %v7715_v8  ;;  %v7355_v37 = vor.u32 %v8043_v18, %v7354_v11  ;;  %v11742_v51 = vld [vmem:[#allocation60_spill] sm:$0xff]  ;;  %v7674_v46 = vld [vmem:[#allocation5 + $0x468] sm:$0xf]  ;;  %v7174_v16 = vld [vmem:[#allocation5 + $0x80] sm:$0xf] }
 0x48a   :  { %v8083_v63 = vld [vmem:[#allocation5 + $0x338] sm:$0xf0]  ;;  %v7998_v26 = vld [vmem:[#allocation5 + $0x90] sm:$0xf0]  ;;  %v7334_v12 = vld [vmem:[#allocation5 + $0x1c0] sm:$0xf] }
 0x48b   :  { %5001 = vmatmul.bf16.gmra.mxu3 %v10897_v61  ;;  %v7515_v47 = vor.u32 %v8083_v63, %v7514_v59  ;;  %v8123_v10 = vld [vmem:[#allocation5 + $0x478] sm:$0xf0]  ;;  %v7175_v54 = vor.u32 %v7998_v26, %v7174_v16  ;;  %v8038_v8 = vld [vmem:[#allocation5 + $0x1d0] sm:$0xf0]  ;;  %v7494_v2 = vld [vmem:[#allocation5 + $0x300] sm:$0xf] }
 0x48c   :  { %5044 = vmatmul.bf16.gmra.mxu2 %v10899_v13  ;;  %5315 = vmatpush.bf16.msra.mxu3 %v7215_v24  ;;  %v7675_v25 = vor.u32 %v8123_v10, %v7674_v46  ;;  %v7335_v29 = vor.u32 %v8038_v8, %v7334_v12  ;;  %v8078_v60 = vld [vmem:[#allocation5 + $0x310] sm:$0xf0]  ;;  %v7314_v59 = vld [vmem:[#allocation5 + $0x198] sm:$0xf] }
 0x48d   :  { %5359 = vmatpush.bf16.msra.mxu2 %v7375_v56  ;;  %5403 = vmatpush.bf16.msra.mxu0 %v7535_v27  ;;  %v7495_v49 = vor.u32 %v8078_v60, %v7494_v2  ;;  %v8118_v11 = vld [vmem:[#allocation5 + $0x450] sm:$0xf0]  ;;  %v7134_v2 = vld [vmem:[#allocation5 + $0x30] sm:$0xf]  ;;  %v7988_v60 = vld [vmem:[#allocation5 + $0x40] sm:$0xf0] }
 0x48e   :  { %5447 = vmatpush.bf16.msra.mxu1 %v7695_v38  ;;  %v7654_v38 = vld [vmem:[#allocation5 + $0x440] sm:$0xf] }
 0x48f   :  { %5087 = vmatmul.bf16.gmra.mxu0 %v10911_v21 }
 0x490   :  { %5130 = vmatmul.bf16.gmra.mxu1 %v10913_v62  ;;  %5316 = vmatpush.bf16.msra.mxu3 %v7195_v35  ;;  %v7655_v35 = vor.u32 %v8118_v11, %v7654_v38  ;;  %v7294_v38 = vld [vmem:[#allocation5 + $0x170] sm:$0xf]  ;;  %v7135_v11 = vor.u32 %v7988_v60, %v7134_v2  ;;  %v7434_v60 = vld [vmem:[#allocation5 + $0x288] sm:$0xf] }
 0x491   :  { %5360 = vmatpush.bf16.msra.mxu2 %v7355_v37  ;;  %5404 = vmatpush.bf16.msra.mxu0 %v7515_v47 }
 0x492   :  { %5448 = vmatpush.bf16.msra.mxu1 %v7675_v25 }
 0x494   :  { %5317 = vmatpush.bf16.msra.mxu3 %v7175_v54  ;;  %v8073_v54 = vld [vmem:[#allocation5 + $0x2e8] sm:$0xf0] }
 0x495   :  { %5361 = vmatpush.bf16.msra.mxu2 %v7335_v29  ;;  %5405 = vmatpush.bf16.msra.mxu0 %v7495_v49 }
 0x496   :  { %5449 = vmatpush.bf16.msra.mxu1 %v7655_v35 }
 0x49b   :  { %5006 = vmatmul.bf16.gmra.mxu3 %v10932_v14 }
 0x49c   :  { %5049 = vmatmul.bf16.gmra.mxu2 %v10934_v52 }
 0x49f   :  { %5092 = vmatmul.bf16.gmra.mxu0 %v10938_v4 }
 0x4a0   :  { %5135 = vmatmul.bf16.gmra.mxu1 %v10940_v58 }
 0x4ab   :  { %5149 = vmatmul.bf16.vlgmr.msrb.gmra.mxu3 %v11737_v50 }
 0x4ac   :  { %5192 = vmatmul.bf16.vlgmr.msrb.gmra.mxu2 %v11738_v45 }
 0x4af   :  { %5235 = vmatmul.bf16.vlgmr.msrb.gmra.mxu0 %v11739_v39 }
 0x4b0   :  { %5278 = vmatmul.bf16.vlgmr.msrb.gmra.mxu1 %v11740_v44 }
 0x4bb   :  { %5153 = vmatmul.bf16.gmra.mxu3 %v10733_v40 }
 0x4bc   :  { %v5064_v5 = vpop.f32.mrf.mxu0  ;;  %5196 = vmatmul.bf16.gmra.mxu2 %v10735_v3 }
 0x4bd   :  { %v5107_v53 = vpop.f32.mrf.mxu1 }
 0x4be   :  { %v4978_v23 = vpop.f32.mrf.mxu3 }
 0x4bf   :  { %5239 = vmatmul.bf16.gmra.mxu0 %v11741_v7  ;;  %v5021_v42 = vpop.f32.mrf.mxu2  ;;  %v7154_v23 = vld [vmem:[#allocation5 + $0x58] sm:$0xf] }
 0x4c0   :  { %5282 = vmatmul.bf16.gmra.mxu1 %v11742_v51  ;;  %v7993_v42 = vld [vmem:[#allocation5 + $0x68] sm:$0xf0] }
 0x4c1   :  { %v7155_v47 = vor.u32 %v7993_v42, %v7154_v23 }
 0x4c3   :  { %5318 = vmatpush.bf16.msra.mxu3 %v7155_v47  ;;  %v7454_v47 = vld [vmem:[#allocation5 + $0x2b0] sm:$0xf] }
 0x4c4   :  { %v5065_v33 = vpop.f32.mrf.mxu0 }
 0x4c5   :  { %v5108_v31 = vpop.f32.mrf.mxu1 }
 0x4c6   :  { %v4979_v34 = vpop.f32.mrf.mxu3 }
 0x4c7   :  { %v5022_v55 = vpop.f32.mrf.mxu2  ;;  %5319 = vmatpush.bf16.msra.mxu3 %v7135_v11 }
 0x4c8   :  { %v5023_v9 = vadd.f32 %v5022_v55, %v4979_v34  ;;  %v7474_v34 = vld [vmem:[#allocation5 + $0x2d8] sm:$0xf] }
 0x4c9   :  { %v7475_v55 = vor.u32 %v8073_v54, %v7474_v34 }
 0x4ca   :  { %v5066_v24 = vadd.f32 %v5065_v33, %v5023_v9  ;;  %v8033_v33 = vld [vmem:[#allocation5 + $0x1a8] sm:$0xf0] }
 0x4cb   :  { %5158 = vmatmul.bf16.gmra.mxu3 %v10781_v6  ;;  %v7315_v10 = vor.u32 %v8033_v33, %v7314_v59  ;;  %5406 = vmatpush.bf16.msra.mxu0 %v7475_v55  ;;  %v8068_v33 = vld [vmem:[#allocation5 + $0x2c0] sm:$0xf0]  ;;  %v7983_v55 = vld [vmem:[#allocation5 + $0x18] sm:$0xf0] }
 0x4cc   :  { %v10953_v32 = vadd.f32 %v5108_v31, %v5066_v24  ;;  %v5068_v56 = vpop.f32.mrf.mxu0  ;;  %5201 = vmatmul.bf16.gmra.mxu2 %v10783_v28  ;;  %v7634_v24 = vld [vmem:[#allocation5 + $0x418] sm:$0xf] }
 0x4cd   :  { %v5111_v30 = vpop.f32.mrf.mxu1  ;;  %5362 = vmatpush.bf16.msra.mxu2 %v7315_v10  ;;  %v7455_v10 = vor.u32 %v8068_v33, %v7454_v47 }
 0x4ce   :  { %v4982_v43 = vpop.f32.mrf.mxu3 }
 0x4cf   :  { %5244 = vmatmul.bf16.gmra.mxu0 %v10791_v15  ;;  %v5025_v27 = vpop.f32.mrf.mxu2 }
 0x4d0   :  { %5287 = vmatmul.bf16.gmra.mxu1 %v10794_v19  ;;  %v5026_v0 = vadd.f32 %v5025_v27, %v4982_v43  ;;  %5407 = vmatpush.bf16.msra.mxu0 %v7455_v10 }
 0x4d2   :  { %v5069_v18 = vadd.f32 %v5068_v56, %v5026_v0  ;;  %v8113_v56 = vld [vmem:[#allocation5 + $0x428] sm:$0xf0] }
 0x4d4   :  { %v10958_v37 = vadd.f32 %v5111_v30, %v5069_v18  ;;  %v5070_v5 = vpop.f32.mrf.mxu0  ;;  %v7635_v30 = vor.u32 %v8113_v56, %v7634_v24  ;;  %v8028_v18 = vld [vmem:[#allocation5 + $0x180] sm:$0xf0]  ;;  %v8023_v24 = vld [vmem:[#allocation5 + $0x158] sm:$0xf0] }
 0x4d5   :  { %v5113_v53 = vpop.f32.mrf.mxu1 }
 0x4d6   :  { %11743 = vst [vmem:[#allocation34_spill] sm:$0xff] %v10958_v37  ;;  %v4984_v63 = vpop.f32.mrf.mxu3  ;;  %5450 = vmatpush.bf16.msra.mxu1 %v7635_v30  ;;  %v8049_v37 = vld [vmem:[#allocation5 + $0x228] sm:$0xf0] }
 0x4d7   :  { %v5027_v46 = vpop.f32.mrf.mxu2 }
 0x4d8   :  { %v5028_v31 = vadd.f32 %v5027_v46, %v4984_v63 }
 0x4da   :  { %v5071_v25 = vadd.f32 %v5070_v5, %v5028_v31  ;;  %v7295_v5 = vor.u32 %v8028_v18, %v7294_v38  ;;  %v7614_v31 = vld [vmem:[#allocation5 + $0x3f0] sm:$0xf]  ;;  %v8063_v38 = vld [vmem:[#allocation5 + $0x298] sm:$0xf0] }
 0x4db   :  { %5163 = vmatmul.bf16.gmra.mxu3 %v10814_v41  ;;  %v7435_v11 = vor.u32 %v8063_v38, %v7434_v60  ;;  %v7736_v38 = vld [vmem:[#allocation5 + $0x4f4] sm:$0xf0] }
 0x4dc   :  { %v10961_v16 = vadd.f32 %v5113_v53, %v5071_v25  ;;  %v5073_v26 = vpop.f32.mrf.mxu0  ;;  %5206 = vmatmul.bf16.gmra.mxu2 %v10818_v1  ;;  %v8108_v25 = vld [vmem:[#allocation5 + $0x400] sm:$0xf0] }
 0x4dd   :  { %v5116_v12 = vpop.f32.mrf.mxu1  ;;  %5363 = vmatpush.bf16.msra.mxu2 %v7295_v5  ;;  %5408 = vmatpush.bf16.msra.mxu0 %v7435_v11 }
 0x4de   :  { %11744 = vst [vmem:[#allocation15_spill] sm:$0xff] %v10961_v16  ;;  %v4987_v8 = vpop.f32.mrf.mxu3  ;;  %v7382_v16 = vld [vmem:[#allocation5 + $0x218] sm:$0xf] }
 0x4df   :  { %5249 = vmatmul.bf16.gmra.mxu0 %v10829_v48  ;;  %v5030_v29 = vpop.f32.mrf.mxu2 }
 0x4e0   :  { %5292 = vmatmul.bf16.gmra.mxu1 %v10833_v22  ;;  %v5031_v9 = vadd.f32 %v5030_v29, %v4987_v8  ;;  %v7114_v8 = vld [vmem:[#allocation5 + $0x8] sm:$0xf] }
 0x4e1   :  { %v7274_v29 = vld [vmem:[#allocation5 + $0x148] sm:$0xf] }
 0x4e2   :  { %v5074_v43 = vadd.f32 %v5073_v26, %v5031_v9  ;;  %v7115_v9 = vor.u32 %v7983_v55, %v7114_v8  ;;  %v7275_v30 = vor.u32 %v8023_v24, %v7274_v29 }
 0x4e4   :  { %v10966_v27 = vadd.f32 %v5116_v12, %v5074_v43  ;;  %v5075_v0 = vpop.f32.mrf.mxu0  ;;  %v7615_v12 = vor.u32 %v8108_v25, %v7614_v31  ;;  %5320 = vmatpush.bf16.msra.mxu3 %v7115_v9  ;;  %5364 = vmatpush.bf16.msra.mxu2 %v7275_v30  ;;  %v8016_v25 = vld [vmem:[#allocation5 + $0x124] sm:$0xf]  ;;  %v7576_v30 = vld [vmem:[#allocation5 + $0x3b4] sm:$0xf0] }
 0x4e5   :  { %v5118_v49 = vpop.f32.mrf.mxu1 }
 0x4e6   :  { %11745 = vst [vmem:[#allocation55_spill] sm:$0xff] %v10966_v27  ;;  %v4989_v35 = vpop.f32.mrf.mxu3  ;;  %5451 = vmatpush.bf16.msra.mxu1 %v7615_v12  ;;  %v8056_v12 = vld [vmem:[#allocation5 + $0x264] sm:$0xf] }
 0x4e7   :  { %v5032_v53 = vpop.f32.mrf.mxu2 }
 0x4e8   :  { %v5033_v23 = vadd.f32 %v5032_v53, %v4989_v35 }
 0x4ea   :  { %v5076_v42 = vadd.f32 %v5075_v0, %v5033_v23 }
 0x4eb   :  { %5168 = vmatmul.bf16.gmra.mxu3 %v10855_v17 }
 0x4ec   :  { %v10969_v59 = vadd.f32 %v5118_v49, %v5076_v42  ;;  %v5078_v63 = vpop.f32.mrf.mxu0  ;;  %5211 = vmatmul.bf16.gmra.mxu2 %v10861_v20  ;;  %v7594_v42 = vld [vmem:[#allocation5 + $0x3c8] sm:$0xf] }
 0x4ed   :  { %v5121_v46 = vpop.f32.mrf.mxu1 }
 0x4ee   :  { %11746 = vst [vmem:[#allocation56_spill] sm:$0xff] %v10969_v59  ;;  %v4992_v26 = vpop.f32.mrf.mxu3 }
 0x4ef   :  { %5254 = vmatmul.bf16.gmra.mxu0 %v10871_v36  ;;  %v5035_v34 = vpop.f32.mrf.mxu2 }
 0x4f0   :  { %5297 = vmatmul.bf16.gmra.mxu1 %v10875_v57  ;;  %v5036_v54 = vadd.f32 %v5035_v34, %v4992_v26  ;;  %v7256_v26 = vld [vmem:[#allocation5 + $0x134] sm:$0xf0] }
 0x4f1   :  { %v7259_v34 = vor.u32 %v8016_v25, %v7256_v26 }
 0x4f2   :  { %v5079_v56 = vadd.f32 %v5078_v63, %v5036_v54  ;;  %v8103_v63 = vld [vmem:[#allocation5 + $0x3d8] sm:$0xf0]  ;;  %v7416_v54 = vld [vmem:[#allocation5 + $0x274] sm:$0xf0] }
 0x4f3   :  { %v7595_v33 = vor.u32 %v8103_v63, %v7594_v42  ;;  %v7419_v55 = vor.u32 %v8056_v12, %v7416_v54  ;;  %5489 = vmatpush.bf16.msrb.mxu3 %v7259_v34  ;;  %v8011_v63 = vld [vmem:[#allocation5 + $0xfc] sm:$0xf] }
 0x4f4   :  { %v10974_v43 = vadd.f32 %v5121_v46, %v5079_v56  ;;  %v5080_v0 = vpop.f32.mrf.mxu0  ;;  %v8096_v56 = vld [vmem:[#allocation5 + $0x3a4] sm:$0xf] }
 0x4f5   :  { %v5123_v2 = vpop.f32.mrf.mxu1  ;;  %5452 = vmatpush.bf16.msra.mxu1 %v7595_v33  ;;  %5533 = vmatpush.bf16.msrb.mxu2 %v7419_v55  ;;  %v7579_v60 = vor.u32 %v8096_v56, %v7576_v30  ;;  %v8051_v33 = vld [vmem:[#allocation5 + $0x23c] sm:$0xf] }
 0x4f6   :  { %11747 = vst [vmem:[#allocation16_spill] sm:$0xff] %v10974_v43  ;;  %v4994_v49 = vpop.f32.mrf.mxu3  ;;  %v8131_v56 = vld [vmem:[#allocation5 + $0x4bc] sm:$0xf] }
 0x4f7   :  { %v5037_v18 = vpop.f32.mrf.mxu2  ;;  %5577 = vmatpush.bf16.msrb.mxu0 %v7579_v60 }
 0x4f8   :  { %v5038_v35 = vadd.f32 %v5037_v18, %v4994_v49 }
 0x4fa   :  { %v5081_v5 = vadd.f32 %v5080_v0, %v5038_v35  ;;  %v8136_v0 = vld [vmem:[#allocation5 + $0x4e4] sm:$0xf] }
 0x4fb   :  { %5173 = vmatmul.bf16.gmra.mxu3 %v10897_v61  ;;  %v7739_v11 = vor.u32 %v8136_v0, %v7736_v38 }
 0x4fc   :  { %v10977_v53 = vadd.f32 %v5123_v2, %v5081_v5  ;;  %v5083_v23 = vpop.f32.mrf.mxu0  ;;  %5216 = vmatmul.bf16.gmra.mxu2 %v10899_v13 }
 0x4fd   :  { %v5126_v47 = vpop.f32.mrf.mxu1  ;;  %5621 = vmatpush.bf16.msrb.mxu1 %v7739_v11 }
 0x4fe   :  { %11748 = vst [vmem:[#allocation63_spill] sm:$0xff] %v10977_v53  ;;  %v4997_v46 = vpop.f32.mrf.mxu3 }
 0x4ff   :  { %5259 = vmatmul.bf16.gmra.mxu0 %v10911_v21  ;;  %v5040_v10 = vpop.f32.mrf.mxu2 }
 0x500   :  { %5302 = vmatmul.bf16.gmra.mxu1 %v10913_v62  ;;  %v5041_v31 = vadd.f32 %v5040_v10, %v4997_v46 }
 0x502   :  { %v5084_v8 = vadd.f32 %v5083_v23, %v5041_v31  ;;  %v7396_v31 = vld [vmem:[#allocation5 + $0x24c] sm:$0xf0] }
 0x503   :  { %v7399_v26 = vor.u32 %v8051_v33, %v7396_v31 }
 0x504   :  { %v10982_v29 = vadd.f32 %v5126_v47, %v5084_v8  ;;  %v5085_v9 = vpop.f32.mrf.mxu0  ;;  %v7236_v47 = vld [vmem:[#allocation5 + $0x10c] sm:$0xf0] }
 0x505   :  { %v5128_v24 = vpop.f32.mrf.mxu1  ;;  %v7239_v10 = vor.u32 %v8011_v63, %v7236_v47  ;;  %5534 = vmatpush.bf16.msrb.mxu2 %v7399_v26  ;;  %v8046_v63 = vld [vmem:[#allocation5 + $0x214] sm:$0xf] }
 0x506   :  { %11749 = vst [vmem:[#allocation64_spill] sm:$0xff] %v10982_v29  ;;  %v4999_v2 = vpop.f32.mrf.mxu3 }
 0x507   :  { %v5042_v49 = vpop.f32.mrf.mxu2  ;;  %5490 = vmatpush.bf16.msrb.mxu3 %v7239_v10 }
 0x508   :  { %v5043_v18 = vadd.f32 %v5042_v49, %v4999_v2  ;;  %v7716_v2 = vld [vmem:[#allocation5 + $0x4cc] sm:$0xf0] }
 0x509   :  { %v7719_v38 = vor.u32 %v8131_v56, %v7716_v2  ;;  %v8001_v2 = vld [vmem:[#allocation5 + $0xac] sm:$0xf] }
 0x50a   :  { %v5086_v35 = vadd.f32 %v5085_v9, %v5043_v18  ;;  %v8091_v9 = vld [vmem:[#allocation5 + $0x37c] sm:$0xf] }
 0x50b   :  { %5178 = vmatmul.bf16.gmra.mxu3 %v10932_v14  ;;  %5622 = vmatpush.bf16.msrb.mxu1 %v7719_v38 }
 0x50c   :  { %v10985_v5 = vadd.f32 %v5128_v24, %v5086_v35  ;;  %v5088_v23 = vpop.f32.mrf.mxu0  ;;  %5221 = vmatmul.bf16.gmra.mxu2 %v10934_v52  ;;  %v7556_v24 = vld [vmem:[#allocation5 + $0x38c] sm:$0xf0] }
 0x50d   :  { %v5131_v42 = vpop.f32.mrf.mxu1  ;;  %v7559_v0 = vor.u32 %v8091_v9, %v7556_v24  ;;  %v7536_v9 = vld [vmem:[#allocation5 + $0x364] sm:$0xf0] }
 0x50e   :  { %11750 = vst [vmem:[#allocation57_spill] sm:$0xff] %v10985_v5  ;;  %v5002_v46 = vpop.f32.mrf.mxu3  ;;  %v8139_v5 = vld [vmem:[#allocation5 + $0x4f8] sm:$0xf0] }
 0x50f   :  { %5264 = vmatmul.bf16.gmra.mxu0 %v10938_v4  ;;  %v5045_v25 = vpop.f32.mrf.mxu2 }
 0x510   :  { %5307 = vmatmul.bf16.gmra.mxu1 %v10940_v58  ;;  %v5046_v12 = vadd.f32 %v5045_v25, %v5002_v46  ;;  %5578 = vmatpush.bf16.msrb.mxu0 %v7559_v0  ;;  %v7376_v46 = vld [vmem:[#allocation5 + $0x224] sm:$0xf0] }
 0x511   :  { %v7379_v31 = vor.u32 %v8046_v63, %v7376_v46  ;;  %v7696_v0 = vld [vmem:[#allocation5 + $0x4a4] sm:$0xf0] }
 0x512   :  { %v5089_v34 = vadd.f32 %v5088_v23, %v5046_v12  ;;  %v8006_v23 = vld [vmem:[#allocation5 + $0xd4] sm:$0xf] }
 0x513   :  { %5535 = vmatpush.bf16.msrb.mxu2 %v7379_v31 }
 0x514   :  { %v10990_v54 = vadd.f32 %v5131_v42, %v5089_v34  ;;  %v5090_v8 = vpop.f32.mrf.mxu0  ;;  %v7216_v42 = vld [vmem:[#allocation5 + $0xe4] sm:$0xf0] }
 0x515   :  { %v5133_v55 = vpop.f32.mrf.mxu1  ;;  %v7219_v33 = vor.u32 %v8006_v23, %v7216_v42  ;;  %v7356_v23 = vld [vmem:[#allocation5 + $0x1fc] sm:$0xf0] }
 0x516   :  { %11751 = vst [vmem:[#allocation35_spill] sm:$0xff] %v10990_v54  ;;  %v5004_v30 = vpop.f32.mrf.mxu3 }
 0x517   :  { %v5047_v60 = vpop.f32.mrf.mxu2  ;;  %5491 = vmatpush.bf16.msrb.mxu3 %v7219_v33 }
 0x518   :  { %v5048_v49 = vadd.f32 %v5047_v60, %v5004_v30  ;;  %v8126_v30 = vld [vmem:[#allocation5 + $0x494] sm:$0xf] }
 0x519   :  { %v7699_v38 = vor.u32 %v8126_v30, %v7696_v0  ;;  %v7676_v30 = vld [vmem:[#allocation5 + $0x47c] sm:$0xf0] }
 0x51a   :  { %v5091_v11 = vadd.f32 %v5090_v8, %v5048_v49  ;;  %v7196_v49 = vld [vmem:[#allocation5 + $0xbc] sm:$0xf0] }
 0x51b   :  { %5321 = vmatmul.bf16.vlgmr.msra.gmra.mxu3 %v11737_v50  ;;  %v7199_v63 = vor.u32 %v8001_v2, %v7196_v49  ;;  %5623 = vmatpush.bf16.msrb.mxu1 %v7699_v38  ;;  %v7996_v2 = vld [vmem:[#allocation5 + $0x84] sm:$0xf] }
 0x51c   :  { %v10993_v18 = vadd.f32 %v5133_v55, %v5091_v11  ;;  %v5093_v35 = vpop.f32.mrf.mxu0  ;;  %5365 = vmatmul.bf16.vlgmr.msra.gmra.mxu2 %v11738_v45  ;;  %v8086_v55 = vld [vmem:[#allocation5 + $0x354] sm:$0xf]  ;;  %v8041_v11 = vld [vmem:[#allocation5 + $0x1ec] sm:$0xf]  ;;  %v8036_v38 = vld [vmem:[#allocation5 + $0x1c4] sm:$0xf] }
 0x51d   :  { %v5136_v47 = vpop.f32.mrf.mxu1  ;;  %v7539_v56 = vor.u32 %v8086_v55, %v7536_v9  ;;  %v7359_v33 = vor.u32 %v8041_v11, %v7356_v23  ;;  %5492 = vmatpush.bf16.msrb.mxu3 %v7199_v63  ;;  %v7516_v55 = vld [vmem:[#allocation5 + $0x33c] sm:$0xf0]  ;;  %v7336_v23 = vld [vmem:[#allocation5 + $0x1d4] sm:$0xf0] }
 0x51e   :  { %11752 = vst [vmem:[#allocation58_spill] sm:$0xff] %v10993_v18  ;;  %v5007_v10 = vpop.f32.mrf.mxu3  ;;  %v7339_v63 = vor.u32 %v8036_v38, %v7336_v23  ;;  %v8031_v23 = vld [vmem:[#allocation5 + $0x19c] sm:$0xf] }
 0x51f   :  { %5409 = vmatmul.bf16.vlgmr.msra.gmra.mxu0 %v11739_v39  ;;  %v5050_v25 = vpop.f32.mrf.mxu2  ;;  %5536 = vmatpush.bf16.msrb.mxu2 %v7359_v33 }
 0x520   :  { %5453 = vmatmul.bf16.vlgmr.msra.gmra.mxu1 %v11740_v44  ;;  %v5051_v26 = vadd.f32 %v5050_v25, %v5007_v10  ;;  %5579 = vmatpush.bf16.msrb.mxu0 %v7539_v56 }
 0x522   :  { %v5094_v12 = vadd.f32 %v5093_v35, %v5051_v26 }
 0x523   :  { %5537 = vmatpush.bf16.msrb.mxu2 %v7339_v63 }
 0x524   :  { %v10998_v34 = vadd.f32 %v5136_v47, %v5094_v12  ;;  %v5095_v8 = vpop.f32.mrf.mxu0  ;;  %v8081_v12 = vld [vmem:[#allocation5 + $0x32c] sm:$0xf] }
 0x525   :  { %v5138_v24 = vpop.f32.mrf.mxu1  ;;  %v7519_v9 = vor.u32 %v8081_v12, %v7516_v55  ;;  %v8076_v55 = vld [vmem:[#allocation5 + $0x304] sm:$0xf] }
 0x526   :  { %11753 = vst [vmem:[#allocation36_spill] sm:$0xff] %v10998_v34  ;;  %v5009_v60 = vpop.f32.mrf.mxu3 }
 0x527   :  { %v5052_v42 = vpop.f32.mrf.mxu2  ;;  %5580 = vmatpush.bf16.msrb.mxu0 %v7519_v9  ;;  %v7496_v9 = vld [vmem:[#allocation5 + $0x314] sm:$0xf0] }
 0x528   :  { %v5053_v35 = vadd.f32 %v5052_v42, %v5009_v60  ;;  %v7176_v60 = vld [vmem:[#allocation5 + $0x94] sm:$0xf0] }
 0x529   :  { %v7179_v11 = vor.u32 %v7996_v2, %v7176_v60 }
 0x52a   :  { %v5096_v47 = vadd.f32 %v5095_v8, %v5053_v35  ;;  %v8121_v8 = vld [vmem:[#allocation5 + $0x46c] sm:$0xf] }
 0x52b   :  { %5326 = vmatmul.bf16.gmra.mxu3 %v10733_v40 }
 0x52c   :  { %v11001_v46 = vadd.f32 %v5138_v24, %v5096_v47  ;;  %v5236_v10 = vpop.f32.mrf.mxu0  ;;  %5370 = vmatmul.bf16.gmra.mxu2 %v10735_v3  ;;  %v7679_v24 = vor.u32 %v8121_v8, %v7676_v30  ;;  %5493 = vmatpush.bf16.msrb.mxu3 %v7179_v11  ;;  %v8116_v8 = vld [vmem:[#allocation5 + $0x444] sm:$0xf]  ;;  %v7499_v30 = vor.u32 %v8076_v55, %v7496_v9  ;;  %v7156_v11 = vld [vmem:[#allocation5 + $0x6c] sm:$0xf0]  ;;  %v8071_v9 = vld [vmem:[#allocation5 + $0x2dc] sm:$0xf] }
 0x52d   :  { %v5279_v31 = vpop.f32.mrf.mxu1 }
 0x52e   :  { %11754 = vst [vmem:[#allocation69_spill] sm:$0xff] %v11001_v46  ;;  %v5150_v25 = vpop.f32.mrf.mxu3  ;;  %5624 = vmatpush.bf16.msrb.mxu1 %v7679_v24  ;;  %5581 = vmatpush.bf16.msrb.mxu0 %v7499_v30 }
 0x52f   :  { %5414 = vmatmul.bf16.gmra.mxu0 %v11741_v7  ;;  %v5193_v26 = vpop.f32.mrf.mxu2 }
 0x530   :  { %5458 = vmatmul.bf16.gmra.mxu1 %v11742_v51 }
 0x534   :  { %v5237_v56 = vpop.f32.mrf.mxu0 }
 0x535   :  { %v5280_v0 = vpop.f32.mrf.mxu1 }
 0x536   :  { %v5151_v49 = vpop.f32.mrf.mxu3 }
 0x537   :  { %v5194_v42 = vpop.f32.mrf.mxu2 }
 0x538   :  { %v5195_v33 = vadd.f32 %v5194_v42, %v5151_v49  ;;  %v7991_v49 = vld [vmem:[#allocation5 + $0x5c] sm:$0xf] }
 0x539   :  { %v7159_v63 = vor.u32 %v7991_v49, %v7156_v11  ;;  %v7636_v49 = vld [vmem:[#allocation5 + $0x42c] sm:$0xf0] }
 0x53a   :  { %v5238_v35 = vadd.f32 %v5237_v56, %v5195_v33  ;;  %v7656_v56 = vld [vmem:[#allocation5 + $0x454] sm:$0xf0]  ;;  %v7316_v33 = vld [vmem:[#allocation5 + $0x1ac] sm:$0xf0] }
 0x53b   :  { %5331 = vmatmul.bf16.gmra.mxu3 %v10781_v6  ;;  %v7659_v2 = vor.u32 %v8116_v8, %v7656_v56  ;;  %v7476_v8 = vld [vmem:[#allocation5 + $0x2ec] sm:$0xf0] }
 0x53c   :  { %v11007_v47 = vadd.f32 %v5280_v0, %v5238_v35  ;;  %v5240_v10 = vpop.f32.mrf.mxu0  ;;  %5375 = vmatmul.bf16.gmra.mxu2 %v10783_v28  ;;  %5494 = vmatpush.bf16.msrb.mxu3 %v7159_v63  ;;  %v7479_v56 = vor.u32 %v8071_v9, %v7476_v8  ;;  %v7986_v63 = vld [vmem:[#allocation5 + $0x34] sm:$0xf] }
 0x53d   :  { %v5283_v31 = vpop.f32.mrf.mxu1  ;;  %5625 = vmatpush.bf16.msrb.mxu1 %v7659_v2 }
 0x53e   :  { %v5154_v25 = vpop.f32.mrf.mxu3  ;;  %5582 = vmatpush.bf16.msrb.mxu0 %v7479_v56 }
 0x53f   :  { %5419 = vmatmul.bf16.gmra.mxu0 %v10791_v15  ;;  %v5197_v26 = vpop.f32.mrf.mxu2 }
 0x540   :  { %5463 = vmatmul.bf16.gmra.mxu1 %v10794_v19  ;;  %v5198_v12 = vadd.f32 %v5197_v26, %v5154_v25  ;;  %v7319_v25 = vor.u32 %v8031_v23, %v7316_v33  ;;  %v7136_v33 = vld [vmem:[#allocation5 + $0x44] sm:$0xf0] }
 0x542   :  { %v5241_v24 = vadd.f32 %v5240_v10, %v5198_v12  ;;  %5538 = vmatpush.bf16.msrb.mxu2 %v7319_v25 }
 0x544   :  { %v11012_v0 = vadd.f32 %v5283_v31, %v5241_v24  ;;  %v5242_v60 = vpop.f32.mrf.mxu0 }
 0x545   :  { %v5285_v38 = vpop.f32.mrf.mxu1 }
 0x546   :  { %v5156_v42 = vpop.f32.mrf.mxu3 }
 0x547   :  { %v5199_v35 = vpop.f32.mrf.mxu2 }
 0x548   :  { %v5200_v26 = vadd.f32 %v5199_v35, %v5156_v42  ;;  %v8026_v35 = vld [vmem:[#allocation5 + $0x174] sm:$0xf] }
 0x54a   :  { %v5243_v55 = vadd.f32 %v5242_v60, %v5200_v26  ;;  %v8111_v60 = vld [vmem:[#allocation5 + $0x41c] sm:$0xf]  ;;  %v7139_v26 = vor.u32 %v7986_v63, %v7136_v33 }
 0x54b   :  { %5336 = vmatmul.bf16.gmra.mxu3 %v10814_v41  ;;  %v7639_v11 = vor.u32 %v8111_v60, %v7636_v49 }
 0x54c   :  { %v11015_v10 = vadd.f32 %v5285_v38, %v5243_v55  ;;  %v5245_v31 = vpop.f32.mrf.mxu0  ;;  %5380 = vmatmul.bf16.gmra.mxu2 %v10818_v1  ;;  %v7296_v55 = vld [vmem:[#allocation5 + $0x184] sm:$0xf0]  ;;  %5495 = vmatpush.bf16.msrb.mxu3 %v7139_v26  ;;  %v8021_v26 = vld [vmem:[#allocation5 + $0x14c] sm:$0xf] }
 0x54d   :  { %v5288_v12 = vpop.f32.mrf.mxu1  ;;  %5626 = vmatpush.bf16.msrb.mxu1 %v7639_v11  ;;  %v7299_v8 = vor.u32 %v8026_v35, %v7296_v55  ;;  %v8106_v11 = vld [vmem:[#allocation5 + $0x3f4] sm:$0xf]  ;;  %v7981_v35 = vld [vmem:[#allocation5 + $0xc] sm:$0xf] }
 0x54e   :  { %v5159_v30 = vpop.f32.mrf.mxu3 }
 0x54f   :  { %5424 = vmatmul.bf16.gmra.mxu0 %v10829_v48  ;;  %v5202_v24 = vpop.f32.mrf.mxu2  ;;  %5539 = vmatpush.bf16.msrb.mxu2 %v7299_v8 }
 0x550   :  { %5468 = vmatmul.bf16.gmra.mxu1 %v10833_v22  ;;  %v5203_v2 = vadd.f32 %v5202_v24, %v5159_v30  ;;  %v8066_v24 = vld [vmem:[#allocation5 + $0x2b4] sm:$0xf] }
 0x552   :  { %v5246_v38 = vadd.f32 %v5245_v31, %v5203_v2  ;;  %v7456_v2 = vld [vmem:[#allocation5 + $0x2c4] sm:$0xf0] }
 0x553   :  { %v7459_v49 = vor.u32 %v8066_v24, %v7456_v2 }
 0x554   :  { %v11020_v23 = vadd.f32 %v5288_v12, %v5246_v38  ;;  %v5247_v42 = vpop.f32.mrf.mxu0  ;;  %v7616_v38 = vld [vmem:[#allocation5 + $0x404] sm:$0xf0] }
 0x555   :  { %v5290_v25 = vpop.f32.mrf.mxu1  ;;  %v7619_v33 = vor.u32 %v8106_v11, %v7616_v38  ;;  %5583 = vmatpush.bf16.msrb.mxu0 %v7459_v49  ;;  %v8061_v11 = vld [vmem:[#allocation5 + $0x28c] sm:$0xf]  ;;  %v7436_v38 = vld [vmem:[#allocation5 + $0x29c] sm:$0xf0] }
 0x556   :  { %v5161_v9 = vpop.f32.mrf.mxu3  ;;  %v7439_v18 = vor.u32 %v8061_v11, %v7436_v38 }
 0x557   :  { %v5204_v46 = vpop.f32.mrf.mxu2  ;;  %5627 = vmatpush.bf16.msrb.mxu1 %v7619_v33 }
 0x558   :  { %v5205_v30 = vadd.f32 %v5204_v46, %v5161_v9  ;;  %v7276_v9 = vld [vmem:[#allocation5 + $0x15c] sm:$0xf0] }
 0x559   :  { %5584 = vmatpush.bf16.msrb.mxu0 %v7439_v18 }
 0x55a   :  { %v5248_v56 = vadd.f32 %v5247_v42, %v5205_v30  ;;  %v7279_v30 = vor.u32 %v8021_v26, %v7276_v9  ;;  %v8019_v9 = vld [vmem:[#allocation5 + $0x138] sm:$0xf0] }
 0x55b   :  { %5341 = vmatmul.bf16.gmra.mxu3 %v10855_v17 }
 0x55c   :  { %v11023_v31 = vadd.f32 %v5290_v25, %v5248_v56  ;;  %v5250_v12 = vpop.f32.mrf.mxu0  ;;  %5385 = vmatmul.bf16.gmra.mxu2 %v10861_v20  ;;  %v7116_v25 = vld [vmem:[#allocation5 + $0x1c] sm:$0xf0] }
 0x55d   :  { %v5293_v60 = vpop.f32.mrf.mxu1  ;;  %v7119_v55 = vor.u32 %v7981_v35, %v7116_v25  ;;  %5540 = vmatpush.bf16.msrb.mxu2 %v7279_v30 }
 0x55e   :  { %v5164_v63 = vpop.f32.mrf.mxu3 }
 0x55f   :  { %5429 = vmatmul.bf16.gmra.mxu0 %v10871_v36  ;;  %v5207_v46 = vpop.f32.mrf.mxu2  ;;  %5496 = vmatpush.bf16.msrb.mxu3 %v7119_v55 }
 0x560   :  { %5473 = vmatmul.bf16.gmra.mxu1 %v10875_v57  ;;  %v5208_v42 = vadd.f32 %v5207_v46, %v5164_v63 }
 0x562   :  { %v5251_v8 = vadd.f32 %v5250_v12, %v5208_v42  ;;  %v7596_v42 = vld [vmem:[#allocation5 + $0x3dc] sm:$0xf0] }
 0x564   :  { %v11028_v56 = vadd.f32 %v5293_v60, %v5251_v8  ;;  %v5252_v24 = vpop.f32.mrf.mxu0  ;;  %v8101_v60 = vld [vmem:[#allocation5 + $0x3cc] sm:$0xf]  ;;  %v7422_v8 = vld [vmem:[#allocation5 + $0x268] sm:$0xf] }
 0x565   :  { %v5295_v2 = vpop.f32.mrf.mxu1  ;;  %v7599_v25 = vor.u32 %v8101_v60, %v7596_v42  ;;  %v8099_v60 = vld [vmem:[#allocation5 + $0x3b8] sm:$0xf0]  ;;  %v7742_v42 = vld [vmem:[#allocation5 + $0x4e8] sm:$0xf] }
 0x566   :  { %v5166_v34 = vpop.f32.mrf.mxu3 }
 0x567   :  { %v5209_v63 = vpop.f32.mrf.mxu2  ;;  %5628 = vmatpush.bf16.msrb.mxu1 %v7599_v25 }
 0x568   :  { %v5210_v49 = vadd.f32 %v5209_v63, %v5166_v34  ;;  %v7262_v34 = vld [vmem:[#allocation5 + $0x128] sm:$0xf] }
 0x569   :  { %v7263_v30 = vor.u32 %v8019_v9, %v7262_v34  ;;  %v7242_v9 = vld [vmem:[#allocation5 + $0x100] sm:$0xf] }
 0x56a   :  { %v5253_v46 = vadd.f32 %v5252_v24, %v5210_v49  ;;  %v8059_v24 = vld [vmem:[#allocation5 + $0x278] sm:$0xf0] }
 0x56b   :  { %5346 = vmatmul.bf16.gmra.mxu3 %v10897_v61  ;;  %v7423_v11 = vor.u32 %v8059_v24, %v7422_v8  ;;  %v8014_v8 = vld [vmem:[#allocation5 + $0x110] sm:$0xf0] }
 0x56c   :  { %v11031_v33 = vadd.f32 %v5295_v2, %v5253_v46  ;;  %v5255_v12 = vpop.f32.mrf.mxu0  ;;  %5390 = vmatmul.bf16.gmra.mxu2 %v10899_v13  ;;  %5665 = vmatpush.bf16.msra.mxu3 %v7263_v30  ;;  %v7582_v46 = vld [vmem:[#allocation5 + $0x3a8] sm:$0xf]  ;;  %v7402_v30 = vld [vmem:[#allocation5 + $0x240] sm:$0xf] }
 0x56d   :  { %v5298_v35 = vpop.f32.mrf.mxu1  ;;  %5708 = vmatpush.bf16.msra.mxu2 %v7423_v11  ;;  %v7583_v54 = vor.u32 %v8099_v60, %v7582_v46  ;;  %v8054_v11 = vld [vmem:[#allocation5 + $0x250] sm:$0xf0] }
 0x56e   :  { %v5169_v26 = vpop.f32.mrf.mxu3 }
 0x56f   :  { %5434 = vmatmul.bf16.gmra.mxu0 %v10911_v21  ;;  %v5212_v55 = vpop.f32.mrf.mxu2 }
 0x570   :  { %5478 = vmatmul.bf16.gmra.mxu1 %v10913_v62  ;;  %v5213_v18 = vadd.f32 %v5212_v55, %v5169_v26  ;;  %v7743_v55 = vor.u32 %v8139_v5, %v7742_v42  ;;  %5751 = vmatpush.bf16.msra.mxu0 %v7583_v54  ;;  %v7403_v54 = vor.u32 %v8054_v11, %v7402_v30 }
 0x572   :  { %v5256_v2 = vadd.f32 %v5255_v12, %v5213_v18  ;;  %5794 = vmatpush.bf16.msra.mxu1 %v7743_v55  ;;  %5709 = vmatpush.bf16.msra.mxu2 %v7403_v54 }
 0x574   :  { %v11036_v38 = vadd.f32 %v5298_v35, %v5256_v2  ;;  %v5257_v63 = vpop.f32.mrf.mxu0  ;;  %v7243_v2 = vor.u32 %v8014_v8, %v7242_v9 }
 0x575   :  { %v5300_v49 = vpop.f32.mrf.mxu1 }
 0x576   :  { %v5171_v25 = vpop.f32.mrf.mxu3  ;;  %5666 = vmatpush.bf16.msra.mxu3 %v7243_v2 }
 0x577   :  { %v5214_v26 = vpop.f32.mrf.mxu2 }
 0x578   :  { %v5215_v29 = vadd.f32 %v5214_v26, %v5171_v25 }
 0x57a   :  { %v5258_v34 = vadd.f32 %v5257_v63, %v5215_v29 }
 0x57b   :  { %5351 = vmatmul.bf16.gmra.mxu3 %v10932_v14 }
 0x57c   :  { %v11039_v12 = vadd.f32 %v5300_v49, %v5258_v34  ;;  %v5260_v35 = vpop.f32.mrf.mxu0  ;;  %5395 = vmatmul.bf16.gmra.mxu2 %v10934_v52 }
 0x57d   :  { %v5303_v18 = vpop.f32.mrf.mxu1 }
 0x57e   :  { %v5174_v24 = vpop.f32.mrf.mxu3 }
 0x57f   :  { %5439 = vmatmul.bf16.gmra.mxu0 %v10938_v4  ;;  %v5217_v5 = vpop.f32.mrf.mxu2 }
 0x580   :  { %5483 = vmatmul.bf16.gmra.mxu1 %v10940_v58  ;;  %v5218_v29 = vadd.f32 %v5217_v5, %v5174_v24 }
 0x582   :  { %v5261_v63 = vadd.f32 %v5260_v35, %v5218_v29 }
 0x584   :  { %v11044_v49 = vadd.f32 %v5303_v18, %v5261_v63  ;;  %v5262_v46 = vpop.f32.mrf.mxu0 }
 0x585   :  { %v5305_v60 = vpop.f32.mrf.mxu1 }
 0x586   :  { %11755 = vst [vmem:[#allocation17_spill] sm:$0xff] %v11044_v49  ;;  %v5176_v42 = vpop.f32.mrf.mxu3  ;;  %v7682_v49 = vld [vmem:[#allocation5 + $0x470] sm:$0xf] }
 0x587   :  { %v5219_v25 = vpop.f32.mrf.mxu2 }
 0x588   :  { %v5220_v26 = vadd.f32 %v5219_v25, %v5176_v42 }
 0x58a   :  { %v5263_v55 = vadd.f32 %v5262_v46, %v5220_v26 }
 0x58b   :  { %5497 = vmatmul.bf16.vlgmr.msrb.gmra.mxu3 %v11737_v50 }
 0x58c   :  { %v11047_v34 = vadd.f32 %v5305_v60, %v5263_v55  ;;  %v5265_v9 = vpop.f32.mrf.mxu0  ;;  %5541 = vmatmul.bf16.vlgmr.msrb.gmra.mxu2 %v11738_v45 }
 0x58d   :  { %v5308_v8 = vpop.f32.mrf.mxu1 }
 0x58e   :  { %11756 = vst [vmem:[#allocation70_spill] sm:$0xff] %v11047_v34  ;;  %v5179_v30 = vpop.f32.mrf.mxu3 }
 0x58f   :  { %5585 = vmatmul.bf16.vlgmr.msrb.gmra.mxu0 %v11739_v39  ;;  %v5222_v35 = vpop.f32.mrf.mxu2 }
 0x590   :  { %5629 = vmatmul.bf16.vlgmr.msrb.gmra.mxu1 %v11740_v44  ;;  %v5223_v18 = vadd.f32 %v5222_v35, %v5179_v30 }
 0x592   :  { %v5266_v24 = vadd.f32 %v5265_v9, %v5223_v18  ;;  %v7562_v18 = vld [vmem:[#allocation5 + $0x380] sm:$0xf] }
 0x594   :  { %v11052_v2 = vadd.f32 %v5308_v8, %v5266_v24  ;;  %v5267_v11 = vpop.f32.mrf.mxu0  ;;  %v8094_v24 = vld [vmem:[#allocation5 + $0x390] sm:$0xf0] }
 0x595   :  { %v5310_v5 = vpop.f32.mrf.mxu1 }
 0x596   :  { %11757 = vst [vmem:[#allocation73_spill] sm:$0xff] %v11052_v2  ;;  %v5181_v54 = vpop.f32.mrf.mxu3 }
 0x597   :  { %v5224_v29 = vpop.f32.mrf.mxu2 }
 0x598   :  { %v5225_v63 = vadd.f32 %v5224_v29, %v5181_v54  ;;  %v8134_v29 = vld [vmem:[#allocation5 + $0x4d0] sm:$0xf0] }
 0x59a   :  { %v5268_v46 = vadd.f32 %v5267_v11, %v5225_v63  ;;  %v7722_v11 = vld [vmem:[#allocation5 + $0x4c0] sm:$0xf]  ;;  %v7222_v63 = vld [vmem:[#allocation5 + $0xd8] sm:$0xf] }
 0x59b   :  { %5502 = vmatmul.bf16.gmra.mxu3 %v10733_v40  ;;  %v7723_v43 = vor.u32 %v8134_v29, %v7722_v11  ;;  %v8004_v11 = vld [vmem:[#allocation5 + $0xc0] sm:$0xf0]  ;;  %v7362_v29 = vld [vmem:[#allocation5 + $0x1f0] sm:$0xf] }
 0x59c   :  { %v11055_v60 = vadd.f32 %v5310_v5, %v5268_v46  ;;  %v5410_v42 = vpop.f32.mrf.mxu0  ;;  %5546 = vmatmul.bf16.gmra.mxu2 %v10735_v3  ;;  %v7563_v5 = vor.u32 %v8094_v24, %v7562_v18  ;;  %v8009_v46 = vld [vmem:[#allocation5 + $0xe8] sm:$0xf0] }
 0x59d   :  { %v5454_v25 = vpop.f32.mrf.mxu1  ;;  %v7223_v27 = vor.u32 %v8009_v46, %v7222_v63  ;;  %5795 = vmatpush.bf16.msra.mxu1 %v7723_v43  ;;  %v8044_v63 = vld [vmem:[#allocation5 + $0x200] sm:$0xf0] }
 0x59e   :  { %11758 = vst [vmem:[#allocation18_spill] sm:$0xff] %v11055_v60  ;;  %v5322_v26 = vpop.f32.mrf.mxu3  ;;  %5752 = vmatpush.bf16.msra.mxu0 %v7563_v5  ;;  %v7363_v34 = vor.u32 %v8044_v63, %v7362_v29  ;;  %v8124_v43 = vld [vmem:[#allocation5 + $0x480] sm:$0xf0]  ;;  %v7662_v29 = vld [vmem:[#allocation5 + $0x448] sm:$0xf] }
 0x59f   :  { %5590 = vmatmul.bf16.gmra.mxu0 %v11741_v7  ;;  %v5366_v55 = vpop.f32.mrf.mxu2  ;;  %5667 = vmatpush.bf16.msra.mxu3 %v7223_v27 }
 0x5a0   :  { %5634 = vmatmul.bf16.gmra.mxu1 %v11742_v51  ;;  %v5367_v9 = vadd.f32 %v5366_v55, %v5322_v26  ;;  %v7542_v26 = vld [vmem:[#allocation5 + $0x358] sm:$0xf]  ;;  %v8089_v55 = vld [vmem:[#allocation5 + $0x368] sm:$0xf0] }
 0x5a1   :  { %v7543_v60 = vor.u32 %v8089_v55, %v7542_v26  ;;  %v7999_v55 = vld [vmem:[#allocation5 + $0x98] sm:$0xf0] }
 0x5a2   :  { %v5411_v8 = vadd.f32 %v5410_v42, %v5367_v9  ;;  %v7702_v9 = vld [vmem:[#allocation5 + $0x498] sm:$0xf] }
 0x5a3   :  { %5753 = vmatpush.bf16.msra.mxu0 %v7543_v60 }
 0x5a4   :  { %v5455_v30 = vadd.f32 %v5454_v25, %v5411_v8  ;;  %v5412_v35 = vpop.f32.mrf.mxu0  ;;  %v7383_v25 = vor.u32 %v8049_v37, %v7382_v16  ;;  %v8129_v8 = vld [vmem:[#allocation5 + $0x4a8] sm:$0xf0]  ;;  %v7522_v37 = vld [vmem:[#allocation5 + $0x330] sm:$0xf]  ;;  %v8084_v16 = vld [vmem:[#allocation5 + $0x340] sm:$0xf0] }
 0x5a5   :  { %v5456_v54 = vpop.f32.mrf.mxu1 }
 0x5a6   :  { %v11061_v53 = vadd.f32 %v5455_v30, %v10953_v32  ;;  %v5324_v59 = vpop.f32.mrf.mxu3  ;;  %v7202_v32 = vld [vmem:[#allocation5 + $0xb0] sm:$0xf]  ;;  %5710 = vmatpush.bf16.msra.mxu2 %v7383_v25  ;;  %v7703_v30 = vor.u32 %v8129_v8, %v7702_v9  ;;  %v7523_v25 = vor.u32 %v8084_v16, %v7522_v37  ;;  %v7683_v8 = vor.u32 %v8124_v43, %v7682_v49 }
 0x5a7   :  { %v5368_v42 = vpop.f32.mrf.mxu2  ;;  %v7203_v5 = vor.u32 %v8004_v11, %v7202_v32  ;;  %v8079_v11 = vld [vmem:[#allocation5 + $0x318] sm:$0xf0] }
 0x5a8   :  { %v5838_v18 = vand.u32 2147483647, %v11061_v53  ;;  %v5369_v24 = vadd.f32 %v5368_v42, %v5324_v59  ;;  %v7182_v59 = vld [vmem:[#allocation5 + $0x88] sm:$0xf]  ;;  %5796 = vmatpush.bf16.msra.mxu1 %v7703_v30  ;;  %5754 = vmatpush.bf16.msra.mxu0 %v7523_v25  ;;  %v7994_v25 = vld [vmem:[#allocation5 + $0x70] sm:$0xf0] }
 0x5a9   :  { %5668 = vmatpush.bf16.msra.mxu3 %v7203_v5  ;;  %v7502_v30 = vld [vmem:[#allocation5 + $0x308] sm:$0xf]  ;;  %vm5842_vm13 = vcmp.ge.f32.partialorder %v11061_v53, 0.0 }
 0x5aa   :  { %v5839_v46 = vsub.f32 0.0, %v5838_v18  ;;  %v5413_v2 = vadd.f32 %v5412_v35, %v5369_v24  ;;  %v7342_v35 = vld [vmem:[#allocation5 + $0x1c8] sm:$0xf]  ;;  %5711 = vmatpush.bf16.msra.mxu2 %v7363_v34  ;;  %v7183_v18 = vor.u32 %v7999_v55, %v7182_v59  ;;  %v8039_v24 = vld [vmem:[#allocation5 + $0x1d8] sm:$0xf0]  ;;  %v7503_v63 = vor.u32 %v8079_v11, %v7502_v30 }
 0x5ab   :  { %5507 = vmatmul.bf16.gmra.mxu3 %v10781_v6  ;;  %v7343_v32 = vor.u32 %v8039_v24, %v7342_v35  ;;  %v8119_v34 = vld [vmem:[#allocation5 + $0x458] sm:$0xf0]  ;;  %v7322_v24 = vld [vmem:[#allocation5 + $0x1a0] sm:$0xf] }
 0x5ac   :  { %v5840_v27 = vmul.f32 1.442695, %v5839_v46  ;;  %v11065_v26 = vadd.f32 %v5456_v54, %v5413_v2  ;;  %v5415_v42 = vpop.f32.mrf.mxu0  ;;  %5551 = vmatmul.bf16.gmra.mxu2 %v10783_v28  ;;  %5797 = vmatpush.bf16.msra.mxu1 %v7683_v8  ;;  %v7663_v46 = vor.u32 %v8119_v34, %v7662_v29  ;;  %v8034_v8 = vld [vmem:[#allocation5 + $0x1b0] sm:$0xf0]  ;;  %v7482_v29 = vld [vmem:[#allocation5 + $0x2e0] sm:$0xf] }
 0x5ad   :  { %v5459_v9 = vpop.f32.mrf.mxu1  ;;  %5669 = vmatpush.bf16.msra.mxu3 %v7183_v18  ;;  %5755 = vmatpush.bf16.msra.mxu0 %v7503_v63  ;;  %v8074_v63 = vld [vmem:[#allocation5 + $0x2f0] sm:$0xf0] }
 0x5ae   :  { %8177 = vpow2.f32 %v5840_v27  ;;  %v5327_v60 = vpop.f32.mrf.mxu3  ;;  %5712 = vmatpush.bf16.msra.mxu2 %v7343_v32  ;;  %v7162_v27 = vld [vmem:[#allocation5 + $0x60] sm:$0xf] }
 0x5af   :  { %5595 = vmatmul.bf16.gmra.mxu0 %v10791_v15  ;;  %v5371_v2 = vpop.f32.mrf.mxu2  ;;  %v7163_v35 = vor.u32 %v7994_v25, %v7162_v27  ;;  %v8114_v27 = vld [vmem:[#allocation5 + $0x430] sm:$0xf0] }
 0x5b0   :  { %5639 = vmatmul.bf16.gmra.mxu1 %v10794_v19  ;;  %v5372_v54 = vadd.f32 %v5371_v2, %v5327_v60  ;;  %v7323_v60 = vor.u32 %v8034_v8, %v7322_v24  ;;  %v7142_v8 = vld [vmem:[#allocation5 + $0x38] sm:$0xf] }
 0x5b1   :  { %5798 = vmatpush.bf16.msra.mxu1 %v7663_v46  ;;  %5670 = vmatpush.bf16.msra.mxu3 %v7163_v35  ;;  %v7483_v46 = vor.u32 %v8074_v63, %v7482_v29 }
 0x5b2   :  { %v5416_v49 = vadd.f32 %v5415_v42, %v5372_v54  ;;  %5713 = vmatpush.bf16.msra.mxu2 %v7323_v60  ;;  %v7302_v60 = vld [vmem:[#allocation5 + $0x178] sm:$0xf] }
 0x5b3   :  { %5756 = vmatpush.bf16.msra.mxu0 %v7483_v46  ;;  %v7462_v46 = vld [vmem:[#allocation5 + $0x2b8] sm:$0xf] }
 0x5b4   :  { %v8178_v5 = vpop.eup %8177  ;;  %v11070_v37 = vadd.f32 %v5459_v9, %v5416_v49  ;;  %v5417_v16 = vpop.f32.mrf.mxu0 }
 0x5b5   :  { %v5844_v43 = vadd.f32 1.0, %v8178_v5  ;;  %v5461_v59 = vpop.f32.mrf.mxu1  ;;  %v5843_v30 = vsel %vm5842_vm13, 1.0, %v8178_v5 }
 0x5b6   :  { %v5329_v55 = vpop.f32.mrf.mxu3 }
 0x5b7   :  { %8179 = vrcp.f32 %v5844_v43  ;;  %v5373_v18 = vpop.f32.mrf.mxu2 }
 0x5b8   :  { %v5374_v42 = vadd.f32 %v5373_v18, %v5329_v55  ;;  %v7989_v18 = vld [vmem:[#allocation5 + $0x48] sm:$0xf0] }
 0x5ba   :  { %v5418_v32 = vadd.f32 %v5417_v16, %v5374_v42 }
 0x5bb   :  { %5512 = vmatmul.bf16.gmra.mxu3 %v10814_v41 }
 0x5bc   :  { %v11074_v9 = vadd.f32 %v5461_v59, %v5418_v32  ;;  %v5420_v2 = vpop.f32.mrf.mxu0  ;;  %5556 = vmatmul.bf16.gmra.mxu2 %v10818_v1  ;;  %v7642_v59 = vld [vmem:[#allocation5 + $0x420] sm:$0xf]  ;;  %v7143_v32 = vor.u32 %v7989_v18, %v7142_v8  ;;  %v7122_v8 = vld [vmem:[#allocation5 + $0x10] sm:$0xf]  ;;  %v7984_v18 = vld [vmem:[#allocation5 + $0x20] sm:$0xf0] }
 0x5bd   :  { %v8180_v54 = vpop.eup %8179  ;;  %v5464_v11 = vpop.f32.mrf.mxu1  ;;  %v7643_v25 = vor.u32 %v8114_v27, %v7642_v59  ;;  %v7622_v59 = vld [vmem:[#allocation5 + $0x3f8] sm:$0xf]  ;;  %v8109_v27 = vld [vmem:[#allocation5 + $0x408] sm:$0xf0] }
 0x5be   :  { %v5846_v34 = vmul.f32 %v8180_v54, %v5843_v30  ;;  %v5332_v49 = vpop.f32.mrf.mxu3  ;;  %v8029_v54 = vld [vmem:[#allocation5 + $0x188] sm:$0xf0]  ;;  %5671 = vmatpush.bf16.msra.mxu3 %v7143_v32  ;;  %v8024_v32 = vld [vmem:[#allocation5 + $0x160] sm:$0xf0] }
 0x5bf   :  { %5600 = vmatmul.bf16.gmra.mxu0 %v10829_v48  ;;  %v5376_v16 = vpop.f32.mrf.mxu2  ;;  %5799 = vmatpush.bf16.msra.mxu1 %v7643_v25  ;;  %v7303_v29 = vor.u32 %v8029_v54, %v7302_v60  ;;  %v7282_v60 = vld [vmem:[#allocation5 + $0x150] sm:$0xf] }
 0x5c0   :  { %v5847_v43 = vmax.f32 %v5846_v34, 0.0  ;;  %5644 = vmatmul.bf16.gmra.mxu1 %v10833_v22  ;;  %v5377_v53 = vadd.f32 %v5376_v16, %v5332_v49  ;;  %v8069_v16 = vld [vmem:[#allocation5 + $0x2c8] sm:$0xf0] }
 0x5c1   :  { %5714 = vmatpush.bf16.msra.mxu2 %v7303_v29 }
 0x5c2   :  { %v5848_v55 = vmin.f32 %v5847_v43, 1.0  ;;  %v5421_v35 = vadd.f32 %v5420_v2, %v5377_v53  ;;  %v7463_v53 = vor.u32 %v8069_v16, %v7462_v46  ;;  %v8064_v46 = vld [vmem:[#allocation5 + $0x2a0] sm:$0xf0] }
 0x5c4   :  { %5849 = vst [vmem:[%s11341_s16] sm:$0xff] %v5848_v55  ;;  %v11082_v5 = vadd.f32 %v5464_v11, %v5421_v35  ;;  %v5422_v24 = vpop.f32.mrf.mxu0  ;;  %v7623_v55 = vor.u32 %v8109_v27, %v7622_v59  ;;  %5757 = vmatpush.bf16.msra.mxu0 %v7463_v53 }
 0x5c5   :  { %v5466_v42 = vpop.f32.mrf.mxu1 }
 0x5c6   :  { %v5334_v30 = vpop.f32.mrf.mxu3  ;;  %5800 = vmatpush.bf16.msra.mxu1 %v7623_v55 }
 0x5c7   :  { %v5378_v63 = vpop.f32.mrf.mxu2 }
 0x5c8   :  { %v5379_v34 = vadd.f32 %v5378_v63, %v5334_v30  ;;  %v7283_v30 = vor.u32 %v8024_v32, %v7282_v60 }
 0x5ca   :  { %v5423_v2 = vadd.f32 %v5422_v24, %v5379_v34  ;;  %5715 = vmatpush.bf16.msra.mxu2 %v7283_v30 }
 0x5cb   :  { %5517 = vmatmul.bf16.gmra.mxu3 %v10855_v17 }
 0x5cc   :  { %v11085_v49 = vadd.f32 %v5466_v42, %v5423_v2  ;;  %v5425_v11 = vpop.f32.mrf.mxu0  ;;  %5561 = vmatmul.bf16.gmra.mxu2 %v10861_v20  ;;  %v7123_v42 = vor.u32 %v7984_v18, %v7122_v8  ;;  %v7442_v2 = vld [vmem:[#allocation5 + $0x290] sm:$0xf] }
 0x5cd   :  { %v5469_v43 = vpop.f32.mrf.mxu1  ;;  %v7443_v59 = vor.u32 %v8064_v46, %v7442_v2 }
 0x5ce   :  { %v5337_v25 = vpop.f32.mrf.mxu3  ;;  %5672 = vmatpush.bf16.msra.mxu3 %v7123_v42 }
 0x5cf   :  { %5605 = vmatmul.bf16.gmra.mxu0 %v10871_v36  ;;  %v5381_v35 = vpop.f32.mrf.mxu2 }
 0x5d0   :  { %5649 = vmatmul.bf16.gmra.mxu1 %v10875_v57  ;;  %v5382_v24 = vadd.f32 %v5381_v35, %v5337_v25  ;;  %5758 = vmatpush.bf16.msra.mxu0 %v7443_v59  ;;  %v8104_v35 = vld [vmem:[#allocation5 + $0x3e0] sm:$0xf0] }
 0x5d2   :  { %v5426_v54 = vadd.f32 %v5425_v11, %v5382_v24 }
 0x5d4   :  { %v11090_v29 = vadd.f32 %v5469_v43, %v5426_v54  ;;  %v5427_v63 = vpop.f32.mrf.mxu0  ;;  %v7602_v43 = vld [vmem:[#allocation5 + $0x3d0] sm:$0xf] }
 0x5d5   :  { %v5471_v34 = vpop.f32.mrf.mxu1  ;;  %v7603_v8 = vor.u32 %v8104_v35, %v7602_v43 }
 0x5d6   :  { %v5339_v16 = vpop.f32.mrf.mxu3 }
 0x5d7   :  { %v5383_v27 = vpop.f32.mrf.mxu2  ;;  %5801 = vmatpush.bf16.msra.mxu1 %v7603_v8 }
 0x5d8   :  { %v5384_v53 = vadd.f32 %v5383_v27, %v5339_v16 }
 0x5da   :  { %v5428_v25 = vadd.f32 %v5427_v63, %v5384_v53 }
 0x5db   :  { %5522 = vmatmul.bf16.gmra.mxu3 %v10897_v61 }
 0x5dc   :  { %v11093_v55 = vadd.f32 %v5471_v34, %v5428_v25  ;;  %v5430_v11 = vpop.f32.mrf.mxu0  ;;  %5566 = vmatmul.bf16.gmra.mxu2 %v10899_v13 }
 0x5dd   :  { %v5474_v24 = vpop.f32.mrf.mxu1 }
 0x5de   :  { %v5342_v18 = vpop.f32.mrf.mxu3 }
 0x5df   :  { %5610 = vmatmul.bf16.gmra.mxu0 %v10911_v21  ;;  %v5386_v60 = vpop.f32.mrf.mxu2 }
 0x5e0   :  { %5654 = vmatmul.bf16.gmra.mxu1 %v10913_v62  ;;  %v5387_v42 = vadd.f32 %v5386_v60, %v5342_v18 }
 0x5e2   :  { %v5431_v32 = vadd.f32 %v5430_v11, %v5387_v42 }
 0x5e4   :  { %v11098_v54 = vadd.f32 %v5474_v24, %v5431_v32  ;;  %v5432_v30 = vpop.f32.mrf.mxu0 }
 0x5e5   :  { %v5476_v63 = vpop.f32.mrf.mxu1 }
 0x5e6   :  { %v5344_v34 = vpop.f32.mrf.mxu3 }
 0x5e7   :  { %v5388_v2 = vpop.f32.mrf.mxu2 }
 0x5e8   :  { %v5389_v46 = vadd.f32 %v5388_v2, %v5344_v34 }
 0x5ea   :  { %v5433_v16 = vadd.f32 %v5432_v30, %v5389_v46 }
 0x5eb   :  { %5527 = vmatmul.bf16.gmra.mxu3 %v10932_v14 }
 0x5ec   :  { %v11101_v59 = vadd.f32 %v5476_v63, %v5433_v16  ;;  %v5435_v27 = vpop.f32.mrf.mxu0  ;;  %5571 = vmatmul.bf16.gmra.mxu2 %v10934_v52 }
 0x5ed   :  { %v5479_v53 = vpop.f32.mrf.mxu1 }
 0x5ee   :  { %v5347_v25 = vpop.f32.mrf.mxu3 }
 0x5ef   :  { %5615 = vmatmul.bf16.gmra.mxu0 %v10938_v4  ;;  %v5391_v11 = vpop.f32.mrf.mxu2 }
 0x5f0   :  { %5659 = vmatmul.bf16.gmra.mxu1 %v10940_v58  ;;  %v5392_v43 = vadd.f32 %v5391_v11, %v5347_v25 }
 0x5f2   :  { %v5436_v35 = vadd.f32 %v5435_v27, %v5392_v43 }
 0x5f4   :  { %v11106_v24 = vadd.f32 %v5479_v53, %v5436_v35  ;;  %v5437_v8 = vpop.f32.mrf.mxu0 }
 0x5f5   :  { %v5481_v18 = vpop.f32.mrf.mxu1 }
 0x5f6   :  { %v5349_v60 = vpop.f32.mrf.mxu3 }
 0x5f7   :  { %v5393_v42 = vpop.f32.mrf.mxu2 }
 0x5f8   :  { %v5394_v32 = vadd.f32 %v5393_v42, %v5349_v60 }
 0x5fa   :  { %v5438_v30 = vadd.f32 %v5437_v8, %v5394_v32 }
 0x5fb   :  { %5673 = vmatmul.bf16.vlgmr.msra.gmra.mxu3 %v11737_v50 }
 0x5fc   :  { %v11109_v63 = vadd.f32 %v5481_v18, %v5438_v30  ;;  %v5440_v34 = vpop.f32.mrf.mxu0  ;;  %5716 = vmatmul.bf16.vlgmr.msra.gmra.mxu2 %v11738_v45 }
 0x5fd   :  { %v5484_v2 = vpop.f32.mrf.mxu1 }
 0x5fe   :  { %v5352_v46 = vpop.f32.mrf.mxu3 }
 0x5ff   :  { %5759 = vmatmul.bf16.vlgmr.msra.gmra.mxu0 %v11739_v39  ;;  %v5396_v16 = vpop.f32.mrf.mxu2 }
 0x600   :  { %5802 = vmatmul.bf16.vlgmr.msra.gmra.mxu1 %v11740_v44  ;;  %v5397_v27 = vadd.f32 %v5396_v16, %v5352_v46 }
 0x602   :  { %v5441_v53 = vadd.f32 %v5440_v34, %v5397_v27 }
 0x604   :  { %v11114_v25 = vadd.f32 %v5484_v2, %v5441_v53  ;;  %v5442_v11 = vpop.f32.mrf.mxu0 }
 0x605   :  { %v5486_v43 = vpop.f32.mrf.mxu1 }
 0x606   :  { %v5354_v35 = vpop.f32.mrf.mxu3 }
 0x607   :  { %v5398_v50 = vpop.f32.mrf.mxu2 }
 0x608   :  { %v5399_v8 = vadd.f32 %v5398_v50, %v5354_v35 }
 0x60a   :  { %v5443_v18 = vadd.f32 %v5442_v11, %v5399_v8 }
 0x60b   :  { %5678 = vmatmul.bf16.gmra.mxu3 %v10733_v40 }
 0x60c   :  { %v11117_v45 = vadd.f32 %v5486_v43, %v5443_v18  ;;  %v5586_v60 = vpop.f32.mrf.mxu0  ;;  %5721 = vmatmul.bf16.gmra.mxu2 %v10735_v3 }
 0x60d   :  { %v5630_v39 = vpop.f32.mrf.mxu1 }
 0x60e   :  { %v5498_v42 = vpop.f32.mrf.mxu3 }
 0x60f   :  { %5764 = vmatmul.bf16.gmra.mxu0 %v11741_v7  ;;  %v5542_v44 = vpop.f32.mrf.mxu2 }
 0x610   :  { %5807 = vmatmul.bf16.gmra.mxu1 %v11742_v51  ;;  %v5543_v32 = vadd.f32 %v5542_v44, %v5498_v42 }
 0x612   :  { %v5587_v30 = vadd.f32 %v5586_v60, %v5543_v32 }
 0x614   :  { %v5631_v34 = vadd.f32 %v5630_v39, %v5587_v30  ;;  %v5588_v2 = vpop.f32.mrf.mxu0 }
 0x615   :  { %v5632_v46 = vpop.f32.mrf.mxu1 }
 0x616   :  { %v5850_v16 = vadd.f32 %v5631_v34, %v11007_v47  ;;  %v5500_v40 = vpop.f32.mrf.mxu3 }
 0x617   :  { %v5544_v27 = vpop.f32.mrf.mxu2 }
 0x618   :  { %v5851_v53 = vand.u32 2147483647, %v5850_v16  ;;  %v5545_v11 = vadd.f32 %v5544_v27, %v5500_v40  ;;  %vm5855_vm14 = vcmp.ge.f32.partialorder %v5850_v16, 0.0 }
 0x61a   :  { %v5852_v43 = vsub.f32 0.0, %v5851_v53  ;;  %v5589_v3 = vadd.f32 %v5588_v2, %v5545_v11 }
 0x61b   :  { %5683 = vmatmul.bf16.gmra.mxu3 %v10781_v6 }
 0x61c   :  { %v5853_v35 = vmul.f32 1.442695, %v5852_v43  ;;  %v5633_v7 = vadd.f32 %v5632_v46, %v5589_v3  ;;  %v5591_v50 = vpop.f32.mrf.mxu0  ;;  %5726 = vmatmul.bf16.gmra.mxu2 %v10783_v28 }
 0x61d   :  { %v5635_v51 = vpop.f32.mrf.mxu1 }
 0x61e   :  { %8181 = vpow2.f32 %v5853_v35  ;;  %v5879_v8 = vadd.f32 %v5633_v7, %v11012_v0  ;;  %v5503_v18 = vpop.f32.mrf.mxu3 }
 0x61f   :  { %5769 = vmatmul.bf16.gmra.mxu0 %v10791_v15  ;;  %v5547_v47 = vpop.f32.mrf.mxu2 }
 0x620   :  { %v5880_v60 = vand.u32 2147483647, %v5879_v8  ;;  %5812 = vmatmul.bf16.gmra.mxu1 %v10794_v19  ;;  %v5548_v39 = vadd.f32 %v5547_v47, %v5503_v18  ;;  %vm5884_vm15 = vcmp.ge.f32.partialorder %v5879_v8, 0.0 }
 0x622   :  { %v5881_v42 = vsub.f32 0.0, %v5880_v60  ;;  %v5592_v44 = vadd.f32 %v5591_v50, %v5548_v39 }
 0x624   :  { %v8182_v6 = vpop.eup %8181  ;;  %v5882_v32 = vmul.f32 1.442695, %v5881_v42  ;;  %v5636_v30 = vadd.f32 %v5635_v51, %v5592_v44  ;;  %v5593_v34 = vpop.f32.mrf.mxu0 }
 0x625   :  { %v5857_v2 = vadd.f32 1.0, %v8182_v6  ;;  %v5637_v28 = vpop.f32.mrf.mxu1 }
 0x626   :  { %8183 = vpow2.f32 %v5882_v32  ;;  %v11129_v46 = vadd.f32 %v5636_v30, %v11015_v10  ;;  %v5505_v0 = vpop.f32.mrf.mxu3  ;;  %v5856_v10 = vsel %vm5855_vm14, 1.0, %v8182_v6 }
 0x627   :  { %8185 = vrcp.f32 %v5857_v2  ;;  %v5549_v15 = vpop.f32.mrf.mxu2 }
 0x628   :  { %v5909_v40 = vand.u32 2147483647, %v11129_v46  ;;  %v5550_v27 = vadd.f32 %v5549_v15, %v5505_v0  ;;  %vm5913_vm0 = vcmp.ge.f32.partialorder %v11129_v46, 0.0 }
 0x62a   :  { %v5910_v19 = vsub.f32 0.0, %v5909_v40  ;;  %v5594_v53 = vadd.f32 %v5593_v34, %v5550_v27 }
 0x62b   :  { %5688 = vmatmul.bf16.gmra.mxu3 %v10814_v41 }
 0x62c   :  { %v8184_v11 = vpop.eup %8183  ;;  %v5911_v43 = vmul.f32 1.442695, %v5910_v19  ;;  %v5638_v3 = vadd.f32 %v5637_v28, %v5594_v53  ;;  %v5596_v35 = vpop.f32.mrf.mxu0  ;;  %5731 = vmatmul.bf16.gmra.mxu2 %v10818_v1 }
 0x62d   :  { %v8186_v7 = vpop.eup %8185  ;;  %v5886_v50 = vadd.f32 1.0, %v8184_v11  ;;  %v5640_v51 = vpop.f32.mrf.mxu1  ;;  %v5885_v2 = vsel %vm5884_vm15, 1.0, %v8184_v11 }
 0x62e   :  { %v5859_v18 = vmul.f32 %v8186_v7, %v5856_v10  ;;  %8187 = vpow2.f32 %v5911_v43  ;;  %v11135_v47 = vadd.f32 %v5638_v3, %v11020_v23  ;;  %v5508_v60 = vpop.f32.mrf.mxu3 }
 0x62f   :  { %8189 = vrcp.f32 %v5886_v50  ;;  %5774 = vmatmul.bf16.gmra.mxu0 %v10829_v48  ;;  %v5552_v41 = vpop.f32.mrf.mxu2 }
 0x630   :  { %v5860_v16 = vmax.f32 %v5859_v18, 0.0  ;;  %v5938_v39 = vand.u32 2147483647, %v11135_v47  ;;  %5817 = vmatmul.bf16.gmra.mxu1 %v10833_v22  ;;  %v5553_v1 = vadd.f32 %v5552_v41, %v5508_v60  ;;  %vm5942_vm2 = vcmp.ge.f32.partialorder %v11135_v47, 0.0 }
 0x632   :  { %v5861_v42 = vmin.f32 %v5860_v16, 1.0  ;;  %v5939_v44 = vsub.f32 0.0, %v5938_v39  ;;  %v5597_v6 = vadd.f32 %v5596_v35, %v5553_v1 }
 0x634   :  { %v8188_v32 = vpop.eup %8187  ;;  %7744 = vst [vmem:[%s11341_s16 + $0x8] sm:$0xff] %v5861_v42  ;;  %v5940_v23 = vmul.f32 1.442695, %v5939_v44  ;;  %v5641_v30 = vadd.f32 %v5640_v51, %v5597_v6  ;;  %v5598_v34 = vpop.f32.mrf.mxu0 }
 0x635   :  { %v8190_v48 = vpop.eup %8189  ;;  %v5915_v28 = vadd.f32 1.0, %v8188_v32  ;;  %v5642_v0 = vpop.f32.mrf.mxu1  ;;  %v5914_v51 = vsel %vm5913_vm0, 1.0, %v8188_v32 }
 0x636   :  { %v5888_v15 = vmul.f32 %v8190_v48, %v5885_v2  ;;  %8191 = vpow2.f32 %v5940_v23  ;;  %v11144_v22 = vadd.f32 %v5641_v30, %v11023_v31  ;;  %v5510_v40 = vpop.f32.mrf.mxu3 }
 0x637   :  { %8193 = vrcp.f32 %v5915_v28  ;;  %v5554_v27 = vpop.f32.mrf.mxu2 }
 0x638   :  { %v5889_v19 = vmax.f32 %v5888_v15, 0.0  ;;  %v5967_v53 = vand.u32 2147483647, %v11144_v22  ;;  %v5555_v43 = vadd.f32 %v5554_v27, %v5510_v40  ;;  %vm5971_vm3 = vcmp.ge.f32.partialorder %v11144_v22, 0.0 }
 0x63a   :  { %v5890_v8 = vmin.f32 %v5889_v19, 1.0  ;;  %v5968_v3 = vsub.f32 0.0, %v5967_v53  ;;  %v5599_v35 = vadd.f32 %v5598_v34, %v5555_v43 }
 0x63b   :  { %5693 = vmatmul.bf16.gmra.mxu3 %v10855_v17 }
 0x63c   :  { %v8192_v11 = vpop.eup %8191  ;;  %7746 = vst [vmem:[%s11341_s16 + $0x18] sm:$0xff] %v5890_v8  ;;  %v5969_v31 = vmul.f32 1.442695, %v5968_v3  ;;  %v5643_v7 = vadd.f32 %v5642_v0, %v5599_v35  ;;  %v5601_v10 = vpop.f32.mrf.mxu0  ;;  %5736 = vmatmul.bf16.gmra.mxu2 %v10861_v20 }
 0x63d   :  { %v8194_v50 = vpop.eup %8193  ;;  %v5944_v18 = vadd.f32 1.0, %v8192_v11  ;;  %v5645_v60 = vpop.f32.mrf.mxu1  ;;  %v5943_v34 = vsel %vm5942_vm2, 1.0, %v8192_v11 }
 0x63e   :  { %v5917_v41 = vmul.f32 %v8194_v50, %v5914_v51  ;;  %8195 = vpow2.f32 %v5969_v31  ;;  %v11154_v17 = vadd.f32 %v5643_v7, %v11028_v56  ;;  %v5513_v16 = vpop.f32.mrf.mxu3 }
 0x63f   :  { %8197 = vrcp.f32 %v5944_v18  ;;  %5779 = vmatmul.bf16.gmra.mxu0 %v10871_v36  ;;  %v5557_v39 = vpop.f32.mrf.mxu2 }
 0x640   :  { %v5918_v46 = vmax.f32 %v5917_v41, 0.0  ;;  %v5996_v1 = vand.u32 2147483647, %v11154_v17  ;;  %5822 = vmatmul.bf16.gmra.mxu1 %v10875_v57  ;;  %v5558_v20 = vadd.f32 %v5557_v39, %v5513_v16  ;;  %vm6000_vm4 = vcmp.ge.f32.partialorder %v11154_v17, 0.0 }
 0x642   :  { %v5919_v42 = vmin.f32 %v5918_v46, 1.0  ;;  %v5997_v44 = vsub.f32 0.0, %v5996_v1  ;;  %v5602_v6 = vadd.f32 %v5601_v10, %v5558_v20 }
 0x644   :  { %v8196_v32 = vpop.eup %8195  ;;  %7748 = vst [vmem:[%s11341_s16 + $0x28] sm:$0xff] %v5919_v42  ;;  %v5998_v56 = vmul.f32 1.442695, %v5997_v44  ;;  %v5646_v23 = vadd.f32 %v5645_v60, %v5602_v6  ;;  %v5603_v36 = vpop.f32.mrf.mxu0 }
 0x645   :  { %v8198_v30 = vpop.eup %8197  ;;  %v5973_v48 = vadd.f32 1.0, %v8196_v32  ;;  %v5647_v2 = vpop.f32.mrf.mxu1  ;;  %v5972_v31 = vsel %vm5971_vm3, 1.0, %v8196_v32 }
 0x646   :  { %v5946_v28 = vmul.f32 %v8198_v30, %v5943_v34  ;;  %8199 = vpow2.f32 %v5998_v56  ;;  %v11164_v57 = vadd.f32 %v5646_v23, %v11031_v33  ;;  %v5515_v0 = vpop.f32.mrf.mxu3 }
 0x647   :  { %8201 = vrcp.f32 %v5973_v48  ;;  %v5559_v15 = vpop.f32.mrf.mxu2 }
 0x648   :  { %v5947_v40 = vmax.f32 %v5946_v28, 0.0  ;;  %v6025_v27 = vand.u32 2147483647, %v11164_v57  ;;  %v5560_v19 = vadd.f32 %v5559_v15, %v5515_v0  ;;  %vm6029_vm5 = vcmp.ge.f32.partialorder %v11164_v57, 0.0 }
 0x64a   :  { %v5948_v47 = vmin.f32 %v5947_v40, 1.0  ;;  %v6026_v53 = vsub.f32 0.0, %v6025_v27  ;;  %v5604_v43 = vadd.f32 %v5603_v36, %v5560_v19 }
 0x64b   :  { %5698 = vmatmul.bf16.gmra.mxu3 %v10897_v61 }
 0x64c   :  { %v8200_v8 = vpop.eup %8199  ;;  %7750 = vst [vmem:[%s11341_s16 + $0x38] sm:$0xff] %v5948_v47  ;;  %v6027_v33 = vmul.f32 1.442695, %v6026_v53  ;;  %v5648_v3 = vadd.f32 %v5647_v2, %v5604_v43  ;;  %v5606_v35 = vpop.f32.mrf.mxu0  ;;  %5741 = vmatmul.bf16.gmra.mxu2 %v10899_v13  ;;  %v11759_v43 = vld [vmem:[#allocation17_spill] sm:$0xff] }
 0x64d   :  { %v8202_v11 = vpop.eup %8201  ;;  %v6002_v7 = vadd.f32 1.0, %v8200_v8  ;;  %v5650_v10 = vpop.f32.mrf.mxu1  ;;  %v6001_v42 = vsel %vm6000_vm4, 1.0, %v8200_v8 }
 0x64e   :  { %v5975_v50 = vmul.f32 %v8202_v11, %v5972_v31  ;;  %8203 = vpow2.f32 %v6027_v33  ;;  %v11174_v61 = vadd.f32 %v5648_v3, %v11036_v38  ;;  %v5518_v51 = vpop.f32.mrf.mxu3 }
 0x64f   :  { %8205 = vrcp.f32 %v6002_v7  ;;  %5784 = vmatmul.bf16.gmra.mxu0 %v10911_v21  ;;  %v5562_v18 = vpop.f32.mrf.mxu2 }
 0x650   :  { %v5976_v22 = vmax.f32 %v5975_v50, 0.0  ;;  %v6054_v60 = vand.u32 2147483647, %v11174_v61  ;;  %5827 = vmatmul.bf16.gmra.mxu1 %v10913_v62  ;;  %v5563_v13 = vadd.f32 %v5562_v18, %v5518_v51  ;;  %vm6058_vm1 = vcmp.ge.f32.partialorder %v11174_v61, 0.0 }
 0x652   :  { %v5977_v41 = vmin.f32 %v5976_v22, 1.0  ;;  %v6055_v16 = vsub.f32 0.0, %v6054_v60  ;;  %v5607_v39 = vadd.f32 %v5606_v35, %v5563_v13 }
 0x654   :  { %v8204_v46 = vpop.eup %8203  ;;  %7752 = vst [vmem:[%s11341_s16 + $0x48] sm:$0xff] %v5977_v41  ;;  %v6056_v38 = vmul.f32 1.442695, %v6055_v16  ;;  %v5651_v1 = vadd.f32 %v5650_v10, %v5607_v39  ;;  %v5608_v21 = vpop.f32.mrf.mxu0 }
 0x655   :  { %v8206_v20 = vpop.eup %8205  ;;  %v6031_v44 = vadd.f32 1.0, %v8204_v46  ;;  %v5652_v6 = vpop.f32.mrf.mxu1  ;;  %v6030_v27 = vsel %vm6029_vm5, 1.0, %v8204_v46 }
 0x656   :  { %v6004_v32 = vmul.f32 %v8206_v20, %v6001_v42  ;;  %8207 = vpow2.f32 %v6056_v38  ;;  %v11184_v62 = vadd.f32 %v5651_v1, %v11039_v12  ;;  %v5520_v56 = vpop.f32.mrf.mxu3 }
 0x657   :  { %8209 = vrcp.f32 %v6031_v44  ;;  %v5564_v23 = vpop.f32.mrf.mxu2 }
 0x658   :  { %v6005_v36 = vmax.f32 %v6004_v32, 0.0  ;;  %v6083_v30 = vand.u32 2147483647, %v11184_v62  ;;  %v5565_v34 = vadd.f32 %v5564_v23, %v5520_v56  ;;  %vm6087_vm6 = vcmp.ge.f32.partialorder %v11184_v62, 0.0 }
 0x65a   :  { %v6006_v17 = vmin.f32 %v6005_v36, 1.0  ;;  %v6084_v48 = vsub.f32 0.0, %v6083_v30  ;;  %v5609_v2 = vadd.f32 %v5608_v21, %v5565_v34 }
 0x65b   :  { %5703 = vmatmul.bf16.gmra.mxu3 %v10932_v14 }
 0x65c   :  { %v8208_v28 = vpop.eup %8207  ;;  %7754 = vst [vmem:[%s11341_s16 + $0x58] sm:$0xff] %v6006_v17  ;;  %v6085_v12 = vmul.f32 1.442695, %v6084_v48  ;;  %v5653_v0 = vadd.f32 %v5652_v6, %v5609_v2  ;;  %v5611_v15 = vpop.f32.mrf.mxu0  ;;  %5746 = vmatmul.bf16.gmra.mxu2 %v10934_v52  ;;  %v11761_v17 = vld [vmem:[#allocation73_spill] sm:$0xff] }
 0x65d   :  { %v8210_v40 = vpop.eup %8209  ;;  %v6060_v19 = vadd.f32 1.0, %v8208_v28  ;;  %v5655_v47 = vpop.f32.mrf.mxu1  ;;  %v6059_v18 = vsel %vm6058_vm1, 1.0, %v8208_v28 }
 0x65e   :  { %v6033_v53 = vmul.f32 %v8210_v40, %v6030_v27  ;;  %8211 = vpow2.f32 %v6085_v12  ;;  %v11194_v14 = vadd.f32 %v5653_v0, %v11759_v43  ;;  %v5523_v8 = vpop.f32.mrf.mxu3 }
 0x65f   :  { %8213 = vrcp.f32 %v6060_v19  ;;  %5789 = vmatmul.bf16.gmra.mxu0 %v10938_v4  ;;  %v5567_v33 = vpop.f32.mrf.mxu2 }
 0x660   :  { %v6034_v57 = vmax.f32 %v6033_v53, 0.0  ;;  %v6112_v3 = vand.u32 2147483647, %v11194_v14  ;;  %5832 = vmatmul.bf16.gmra.mxu1 %v10940_v58  ;;  %v5568_v52 = vadd.f32 %v5567_v33, %v5523_v8  ;;  %v11760_v58 = vld [vmem:[#allocation70_spill] sm:$0xff]  ;;  %vm6116_vm7 = vcmp.ge.f32.partialorder %v11194_v14, 0.0 }
 0x662   :  { %v6035_v35 = vmin.f32 %v6034_v57, 1.0  ;;  %v6113_v11 = vsub.f32 0.0, %v6112_v3  ;;  %v5612_v31 = vadd.f32 %v5611_v15, %v5568_v52 }
 0x664   :  { %v8212_v7 = vpop.eup %8211  ;;  %7756 = vst [vmem:[%s11341_s16 + $0x68] sm:$0xff] %v6035_v35  ;;  %v6114_v10 = vmul.f32 1.442695, %v6113_v11  ;;  %v5656_v50 = vadd.f32 %v5655_v47, %v5612_v31  ;;  %v5613_v4 = vpop.f32.mrf.mxu0  ;;  %v11762_v35 = vld [vmem:[#allocation18_spill] sm:$0xff] }
 0x665   :  { %v8214_v51 = vpop.eup %8213  ;;  %v6089_v22 = vadd.f32 1.0, %v8212_v7  ;;  %v5657_v60 = vpop.f32.mrf.mxu1  ;;  %v6088_v23 = vsel %vm6087_vm6, 1.0, %v8212_v7 }
 0x666   :  { %v6062_v13 = vmul.f32 %v8214_v51, %v6059_v18  ;;  %8215 = vpow2.f32 %v6114_v10  ;;  %v6140_v41 = vadd.f32 %v5656_v50, %v11760_v58  ;;  %v5525_v16 = vpop.f32.mrf.mxu3 }
 0x667   :  { %8217 = vrcp.f32 %v6089_v22  ;;  %v5569_v39 = vpop.f32.mrf.mxu2 }
 0x668   :  { %v6063_v46 = vmax.f32 %v6062_v13, 0.0  ;;  %v6141_v38 = vand.u32 2147483647, %v6140_v41  ;;  %v5570_v1 = vadd.f32 %v5569_v39, %v5525_v16  ;;  %vm6145_vm8 = vcmp.ge.f32.partialorder %v6140_v41, 0.0 }
 0x66a   :  { %v6064_v21 = vmin.f32 %v6063_v46, 1.0  ;;  %v6142_v20 = vsub.f32 0.0, %v6141_v38  ;;  %v5614_v61 = vadd.f32 %v5613_v4, %v5570_v1 }
 0x66c   :  { %v8216_v42 = vpop.eup %8215  ;;  %7758 = vst [vmem:[%s11341_s16 + $0x78] sm:$0xff] %v6064_v21  ;;  %v6143_v44 = vmul.f32 1.442695, %v6142_v20  ;;  %v5658_v6 = vadd.f32 %v5657_v60, %v5614_v61  ;;  %v5616_v32 = vpop.f32.mrf.mxu0 }
 0x66d   :  { %v8218_v56 = vpop.eup %8217  ;;  %v6118_v36 = vadd.f32 1.0, %v8216_v42  ;;  %v5660_v30 = vpop.f32.mrf.mxu1  ;;  %v6117_v33 = vsel %vm6116_vm7, 1.0, %v8216_v42 }
 0x66e   :  { %v6091_v34 = vmul.f32 %v8218_v56, %v6088_v23  ;;  %8219 = vpow2.f32 %v6143_v44  ;;  %v6169_v48 = vadd.f32 %v5658_v6, %v11761_v17  ;;  %v5528_v2 = vpop.f32.mrf.mxu3 }
 0x66f   :  { %8221 = vrcp.f32 %v6118_v36  ;;  %v5572_v28 = vpop.f32.mrf.mxu2 }
 0x670   :  { %v6092_v12 = vmax.f32 %v6091_v34, 0.0  ;;  %v6170_v0 = vand.u32 2147483647, %v6169_v48  ;;  %v5573_v15 = vadd.f32 %v5572_v28, %v5528_v2  ;;  %vm6174_vm9 = vcmp.ge.f32.partialorder %v6169_v48, 0.0 }
 0x672   :  { %v6093_v40 = vmin.f32 %v6092_v12, 1.0  ;;  %v6171_v27 = vsub.f32 0.0, %v6170_v0  ;;  %v5617_v62 = vadd.f32 %v5616_v32, %v5573_v15 }
 0x674   :  { %v8220_v19 = vpop.eup %8219  ;;  %7760 = vst [vmem:[%s11341_s16 + $0x88] sm:$0xff] %v6093_v40  ;;  %v6172_v47 = vmul.f32 1.442695, %v6171_v27  ;;  %v5661_v53 = vadd.f32 %v5660_v30, %v5617_v62  ;;  %v5618_v43 = vpop.f32.mrf.mxu0  ;;  %v11763_v62 = vld [vmem:[#allocation34_spill] sm:$0xff] }
 0x675   :  { %v8222_v8 = vpop.eup %8221  ;;  %v6147_v57 = vadd.f32 1.0, %v8220_v19  ;;  %v5662_v3 = vpop.f32.mrf.mxu1  ;;  %v6146_v39 = vsel %vm6145_vm8, 1.0, %v8220_v19 }
 0x676   :  { %v6120_v52 = vmul.f32 %v8222_v8, %v6117_v33  ;;  %8223 = vpow2.f32 %v6172_v47  ;;  %v6198_v11 = vadd.f32 %v5661_v53, %v11762_v35  ;;  %v5530_v31 = vpop.f32.mrf.mxu3 }
 0x677   :  { %8225 = vrcp.f32 %v6147_v57  ;;  %v5574_v7 = vpop.f32.mrf.mxu2 }
 0x678   :  { %v6121_v10 = vmax.f32 %v6120_v52, 0.0  ;;  %v6199_v50 = vand.u32 2147483647, %v6198_v11  ;;  %v5575_v4 = vadd.f32 %v5574_v7, %v5530_v31  ;;  %vm6203_vm10 = vcmp.ge.f32.partialorder %v6198_v11, 0.0 }
 0x67a   :  { %v6122_v51 = vmin.f32 %v6121_v10, 1.0  ;;  %v6200_v18 = vsub.f32 0.0, %v6199_v50  ;;  %v5619_v14 = vadd.f32 %v5618_v43, %v5575_v4 }
 0x67c   :  { %v8224_v22 = vpop.eup %8223  ;;  %7762 = vst [vmem:[%s11341_s16 + $0x98] sm:$0xff] %v6122_v51  ;;  %v6201_v60 = vmul.f32 1.442695, %v6200_v18  ;;  %v11217_v13 = vadd.f32 %v5662_v3, %v5619_v14  ;;  %v5760_v58 = vpop.f32.mrf.mxu0  ;;  %v11764_v14 = vld [vmem:[#allocation15_spill] sm:$0xff] }
 0x67d   :  { %v8226_v16 = vpop.eup %8225  ;;  %v6176_v46 = vadd.f32 1.0, %v8224_v22  ;;  %v5803_v38 = vpop.f32.mrf.mxu1  ;;  %v6175_v34 = vsel %vm6174_vm9, 1.0, %v8224_v22 }
 0x67e   :  { %v6149_v1 = vmul.f32 %v8226_v16, %v6146_v39  ;;  %8227 = vpow2.f32 %v6201_v60  ;;  %v6226_v21 = vand.u32 2147483647, %v11217_v13  ;;  %v5674_v20 = vpop.f32.mrf.mxu3  ;;  %vm6230_vm11 = vcmp.ge.f32.partialorder %v11217_v13, 0.0 }
 0x67f   :  { %8229 = vrcp.f32 %v6176_v46  ;;  %v5717_v61 = vpop.f32.mrf.mxu2 }
 0x680   :  { %v6150_v42 = vmax.f32 %v6149_v1, 0.0  ;;  %v6227_v44 = vsub.f32 0.0, %v6226_v21  ;;  %v5718_v6 = vadd.f32 %v5717_v61, %v5674_v20 }
 0x682   :  { %v6151_v32 = vmin.f32 %v6150_v42, 1.0  ;;  %v6228_v41 = vmul.f32 1.442695, %v6227_v44  ;;  %v5761_v56 = vadd.f32 %v5760_v58, %v5718_v6 }
 0x684   :  { %v8228_v23 = vpop.eup %8227  ;;  %7764 = vst [vmem:[%s11341_s16 + $0xa8] sm:$0xff] %v6151_v32  ;;  %8231 = vpow2.f32 %v6228_v41  ;;  %v5804_v36 = vadd.f32 %v5803_v38, %v5761_v56  ;;  %v5762_v12 = vpop.f32.mrf.mxu0 }
 0x685   :  { %v8230_v30 = vpop.eup %8229  ;;  %v6205_v17 = vadd.f32 1.0, %v8228_v23  ;;  %v5805_v0 = vpop.f32.mrf.mxu1  ;;  %v6204_v52 = vsel %vm6203_vm10, 1.0, %v8228_v23  ;;  %v11765_v23 = vld [vmem:[#allocation55_spill] sm:$0xff] }
 0x686   :  { %v6178_v2 = vmul.f32 %v8230_v30, %v6175_v34  ;;  %v5864_v28 = vadd.f32 %v5804_v36, %v11065_v26  ;;  %v5676_v15 = vpop.f32.mrf.mxu3 }
 0x687   :  { %8233 = vrcp.f32 %v6205_v17  ;;  %v5719_v40 = vpop.f32.mrf.mxu2 }
 0x688   :  { %v6179_v27 = vmax.f32 %v6178_v2, 0.0  ;;  %v5865_v19 = vadd.f32 %v5864_v28, %v11763_v62  ;;  %v5720_v47 = vadd.f32 %v5719_v40, %v5676_v15 }
 0x68a   :  { %v8232_v53 = vpop.eup %8231  ;;  %v6180_v43 = vmin.f32 %v6179_v27, 1.0  ;;  %v5866_v48 = vand.u32 2147483647, %v5865_v19  ;;  %v5763_v8 = vadd.f32 %v5762_v12, %v5720_v47  ;;  %vm5870_vm12 = vcmp.ge.f32.partialorder %v5865_v19, 0.0 }
 0x68b   :  { %v6232_v33 = vadd.f32 1.0, %v8232_v53  ;;  %v6231_v46 = vsel %vm6230_vm11, 1.0, %v8232_v53 }
 0x68c   :  { %7766 = vst [vmem:[%s11341_s16 + $0xb8] sm:$0xff] %v6180_v43  ;;  %v5867_v26 = vsub.f32 0.0, %v5866_v48  ;;  %v5806_v57 = vadd.f32 %v5805_v0, %v5763_v8  ;;  %v5765_v10 = vpop.f32.mrf.mxu0  ;;  %v11766_v8 = vld [vmem:[#allocation56_spill] sm:$0xff] }
 0x68d   :  { %v8234_v3 = vpop.eup %8233  ;;  %8235 = vrcp.f32 %v6232_v33  ;;  %v5808_v50 = vpop.f32.mrf.mxu1 }
 0x68e   :  { %v6207_v35 = vmul.f32 %v8234_v3, %v6204_v52  ;;  %v5868_v31 = vmul.f32 1.442695, %v5867_v26  ;;  %v5893_v7 = vadd.f32 %v5806_v57, %v11070_v37  ;;  %v5679_v4 = vpop.f32.mrf.mxu3 }
 0x68f   :  { %v5722_v51 = vpop.f32.mrf.mxu2 }
 0x690   :  { %v6208_v18 = vmax.f32 %v6207_v35, 0.0  ;;  %8237 = vpow2.f32 %v5868_v31  ;;  %v5894_v22 = vadd.f32 %v5893_v7, %v11764_v14  ;;  %v5723_v60 = vadd.f32 %v5722_v51, %v5679_v4 }
 0x692   :  { %v6209_v58 = vmin.f32 %v6208_v18, 1.0  ;;  %v5895_v11 = vand.u32 2147483647, %v5894_v22  ;;  %v5766_v16 = vadd.f32 %v5765_v10, %v5723_v60  ;;  %vm5899_vm13 = vcmp.ge.f32.partialorder %v5894_v22, 0.0 }
 0x693   :  { %v8236_v39 = vpop.eup %8235 }
 0x694   :  { %7768 = vst [vmem:[%s11341_s16 + $0xc8] sm:$0xff] %v6209_v58  ;;  %v6234_v37 = vmul.f32 %v8236_v39, %v6231_v46  ;;  %v5896_v38 = vsub.f32 0.0, %v5895_v11  ;;  %v5809_v1 = vadd.f32 %v5808_v50, %v5766_v16  ;;  %v5767_v44 = vpop.f32.mrf.mxu0  ;;  %v11767_v16 = vld [vmem:[#allocation16_spill] sm:$0xff] }
 0x695   :  { %v5810_v6 = vpop.f32.mrf.mxu1 }
 0x696   :  { %v8238_v21 = vpop.eup %8237  ;;  %v6235_v20 = vmax.f32 %v6234_v37, 0.0  ;;  %v5897_v61 = vmul.f32 1.442695, %v5896_v38  ;;  %v5922_v42 = vadd.f32 %v5809_v1, %v11074_v9  ;;  %v5681_v13 = vpop.f32.mrf.mxu3 }
 0x697   :  { %v5872_v32 = vadd.f32 1.0, %v8238_v21  ;;  %v5724_v41 = vpop.f32.mrf.mxu2  ;;  %v5871_v62 = vsel %vm5870_vm12, 1.0, %v8238_v21 }
 0x698   :  { %v6236_v56 = vmin.f32 %v6235_v20, 1.0  ;;  %8239 = vpow2.f32 %v5897_v61  ;;  %v5923_v36 = vadd.f32 %v5922_v42, %v11765_v23  ;;  %v5725_v30 = vadd.f32 %v5724_v41, %v5681_v13 }
 0x699   :  { %8241 = vrcp.f32 %v5872_v32 }
 0x69a   :  { %7770 = vst [vmem:[%s11341_s16 + $0xd8] sm:$0xff] %v6236_v56  ;;  %v5924_v34 = vand.u32 2147483647, %v5923_v36  ;;  %v5768_v17 = vadd.f32 %v5767_v44, %v5725_v30  ;;  %vm5928_vm14 = vcmp.ge.f32.partialorder %v5923_v36, 0.0 }
 0x69c   :  { %v5925_v2 = vsub.f32 0.0, %v5924_v34  ;;  %v5811_v28 = vadd.f32 %v5810_v6, %v5768_v17  ;;  %v5770_v15 = vpop.f32.mrf.mxu0  ;;  %v11768_v34 = vld [vmem:[#allocation63_spill] sm:$0xff] }
 0x69d   :  { %v5813_v40 = vpop.f32.mrf.mxu1 }
 0x69e   :  { %v8240_v9 = vpop.eup %8239  ;;  %v5926_v12 = vmul.f32 1.442695, %v5925_v2  ;;  %v5951_v0 = vadd.f32 %v5811_v28, %v11082_v5  ;;  %v5684_v53 = vpop.f32.mrf.mxu3 }
 0x69f   :  { %v8242_v27 = vpop.eup %8241  ;;  %v5901_v47 = vadd.f32 1.0, %v8240_v9  ;;  %v5727_v43 = vpop.f32.mrf.mxu2  ;;  %v5900_v18 = vsel %vm5899_vm13, 1.0, %v8240_v9 }
 0x6a0   :  { %v5874_v48 = vmul.f32 %v8242_v27, %v5871_v62  ;;  %8243 = vpow2.f32 %v5926_v12  ;;  %v11241_v33 = vadd.f32 %v5951_v0, %v11766_v8  ;;  %v5728_v26 = vadd.f32 %v5727_v43, %v5684_v53 }
 0x6a1   :  { %8245 = vrcp.f32 %v5901_v47 }
 0x6a2   :  { %v5875_v57 = vmax.f32 %v5874_v48, 0.0  ;;  %v5953_v19 = vand.u32 2147483647, %v11241_v33  ;;  %v5771_v3 = vadd.f32 %v5770_v15, %v5728_v26  ;;  %vm5957_vm15 = vcmp.ge.f32.partialorder %v11241_v33, 0.0 }
 0x6a4   :  { %v5876_v52 = vmin.f32 %v5875_v57, 1.0  ;;  %v5954_v5 = vsub.f32 0.0, %v5953_v19  ;;  %v5814_v35 = vadd.f32 %v5813_v40, %v5771_v3  ;;  %v5772_v50 = vpop.f32.mrf.mxu0  ;;  %v11769_v19 = vld [vmem:[#allocation64_spill] sm:$0xff] }
 0x6a5   :  { %v5815_v4 = vpop.f32.mrf.mxu1 }
 0x6a6   :  { %v8244_v31 = vpop.eup %8243  ;;  %7745 = vst [vmem:[%s11341_s16 + $0x10] sm:$0xff] %v5876_v52  ;;  %v5955_v7 = vmul.f32 1.442695, %v5954_v5  ;;  %v5980_v10 = vadd.f32 %v5814_v35, %v11085_v49  ;;  %v5686_v60 = vpop.f32.mrf.mxu3 }
 0x6a7   :  { %v8246_v51 = vpop.eup %8245  ;;  %v5930_v14 = vadd.f32 1.0, %v8244_v31  ;;  %v5729_v58 = vpop.f32.mrf.mxu2  ;;  %v5929_v13 = vsel %vm5928_vm14, 1.0, %v8244_v31 }
 0x6a8   :  { %v5903_v11 = vmul.f32 %v8246_v51, %v5900_v18  ;;  %8247 = vpow2.f32 %v5955_v7  ;;  %v11249_v39 = vadd.f32 %v5980_v10, %v11767_v16  ;;  %v5730_v46 = vadd.f32 %v5729_v58, %v5686_v60 }
 0x6a9   :  { %8249 = vrcp.f32 %v5930_v14 }
 0x6aa   :  { %v5904_v37 = vmax.f32 %v5903_v11, 0.0  ;;  %v5982_v22 = vand.u32 2147483647, %v11249_v39  ;;  %v5773_v38 = vadd.f32 %v5772_v50, %v5730_v46  ;;  %vm5986_vm0 = vcmp.ge.f32.partialorder %v11249_v39, 0.0 }
 0x6ac   :  { %v5905_v1 = vmin.f32 %v5904_v37, 1.0  ;;  %v5983_v49 = vsub.f32 0.0, %v5982_v22  ;;  %v5816_v21 = vadd.f32 %v5815_v4, %v5773_v38  ;;  %v5775_v44 = vpop.f32.mrf.mxu0  ;;  %v11770_v37 = vld [vmem:[#allocation57_spill] sm:$0xff] }
 0x6ad   :  { %v5818_v6 = vpop.f32.mrf.mxu1 }
 0x6ae   :  { %v8248_v20 = vpop.eup %8247  ;;  %7747 = vst [vmem:[%s11341_s16 + $0x20] sm:$0xff] %v5905_v1  ;;  %v5984_v61 = vmul.f32 1.442695, %v5983_v49  ;;  %v6009_v42 = vadd.f32 %v5816_v21, %v11090_v29  ;;  %v5689_v56 = vpop.f32.mrf.mxu3 }
 0x6af   :  { %v8250_v32 = vpop.eup %8249  ;;  %v5959_v41 = vadd.f32 1.0, %v8248_v20  ;;  %v5732_v23 = vpop.f32.mrf.mxu2  ;;  %v5958_v43 = vsel %vm5957_vm15, 1.0, %v8248_v20 }
 0x6b0   :  { %v5932_v30 = vmul.f32 %v8250_v32, %v5929_v13  ;;  %8251 = vpow2.f32 %v5984_v61  ;;  %v11257_v17 = vadd.f32 %v6009_v42, %v11768_v34  ;;  %v5733_v2 = vadd.f32 %v5732_v23, %v5689_v56 }
 0x6b1   :  { %8253 = vrcp.f32 %v5959_v41 }
 0x6b2   :  { %v5933_v28 = vmax.f32 %v5932_v30, 0.0  ;;  %v6011_v36 = vand.u32 2147483647, %v11257_v17  ;;  %v5776_v9 = vadd.f32 %v5775_v44, %v5733_v2  ;;  %vm6015_vm2 = vcmp.ge.f32.partialorder %v11257_v17, 0.0  ;;  %v11771_v2 = vld [vmem:[#allocation35_spill] sm:$0xff] }
 0x6b4   :  { %v5934_v12 = vmin.f32 %v5933_v28, 1.0  ;;  %v6012_v29 = vsub.f32 0.0, %v6011_v36  ;;  %v5819_v0 = vadd.f32 %v5818_v6, %v5776_v9  ;;  %v5777_v62 = vpop.f32.mrf.mxu0 }
 0x6b5   :  { %v5820_v47 = vpop.f32.mrf.mxu1 }
 0x6b6   :  { %v8252_v15 = vpop.eup %8251  ;;  %7749 = vst [vmem:[%s11341_s16 + $0x30] sm:$0xff] %v5934_v12  ;;  %v6013_v40 = vmul.f32 1.442695, %v6012_v29  ;;  %v6038_v27 = vadd.f32 %v5819_v0, %v11093_v55  ;;  %v5691_v8 = vpop.f32.mrf.mxu3 }
 0x6b7   :  { %v8254_v53 = vpop.eup %8253  ;;  %v5988_v48 = vadd.f32 1.0, %v8252_v15  ;;  %v5734_v26 = vpop.f32.mrf.mxu2  ;;  %v5987_v60 = vsel %vm5986_vm0, 1.0, %v8252_v15 }
 0x6b8   :  { %v5961_v57 = vmul.f32 %v8254_v53, %v5958_v43  ;;  %8255 = vpow2.f32 %v6013_v40  ;;  %v11266_v3 = vadd.f32 %v6038_v27, %v11769_v19  ;;  %v5735_v52 = vadd.f32 %v5734_v26, %v5691_v8  ;;  %v11772_v19 = vld [vmem:[#allocation58_spill] sm:$0xff] }
 0x6b9   :  { %8257 = vrcp.f32 %v5988_v48 }
 0x6ba   :  { %v5962_v5 = vmax.f32 %v5961_v57, 0.0  ;;  %v6040_v33 = vand.u32 2147483647, %v11266_v3  ;;  %v5778_v35 = vadd.f32 %v5777_v62, %v5735_v52  ;;  %vm6044_vm3 = vcmp.ge.f32.partialorder %v11266_v3, 0.0 }
 0x6bc   :  { %v5963_v31 = vmin.f32 %v5962_v5, 1.0  ;;  %v6041_v55 = vsub.f32 0.0, %v6040_v33  ;;  %v5821_v7 = vadd.f32 %v5820_v47, %v5778_v35  ;;  %v5780_v51 = vpop.f32.mrf.mxu0 }
 0x6bd   :  { %v5823_v18 = vpop.f32.mrf.mxu1 }
 0x6be   :  { %v8256_v10 = vpop.eup %8255  ;;  %7751 = vst [vmem:[%s11341_s16 + $0x40] sm:$0xff] %v5963_v31  ;;  %v6042_v50 = vmul.f32 1.442695, %v6041_v55  ;;  %v6067_v4 = vadd.f32 %v5821_v7, %v11098_v54  ;;  %v5694_v11 = vpop.f32.mrf.mxu3 }
 0x6bf   :  { %v8258_v14 = vpop.eup %8257  ;;  %v6017_v58 = vadd.f32 1.0, %v8256_v10  ;;  %v5737_v16 = vpop.f32.mrf.mxu2  ;;  %v6016_v41 = vsel %vm6015_vm2, 1.0, %v8256_v10 }
 0x6c0   :  { %v5990_v46 = vmul.f32 %v8258_v14, %v5987_v60  ;;  %8259 = vpow2.f32 %v6042_v50  ;;  %v11275_v22 = vadd.f32 %v6067_v4, %v11770_v37  ;;  %v5738_v38 = vadd.f32 %v5737_v16, %v5694_v11 }
 0x6c1   :  { %8261 = vrcp.f32 %v6017_v58 }
 0x6c2   :  { %v5991_v1 = vmax.f32 %v5990_v46, 0.0  ;;  %v6069_v39 = vand.u32 2147483647, %v11275_v22  ;;  %v5781_v49 = vadd.f32 %v5780_v51, %v5738_v38  ;;  %vm6073_vm4 = vcmp.ge.f32.partialorder %v11275_v22, 0.0  ;;  %v11773_v46 = vld [vmem:[#allocation36_spill] sm:$0xff] }
 0x6c4   :  { %v5992_v21 = vmin.f32 %v5991_v1, 1.0  ;;  %v6070_v54 = vsub.f32 0.0, %v6069_v39  ;;  %v5824_v20 = vadd.f32 %v5823_v18, %v5781_v49  ;;  %v5782_v6 = vpop.f32.mrf.mxu0 }
 0x6c5   :  { %v5825_v32 = vpop.f32.mrf.mxu1 }
 0x6c6   :  { %v8260_v61 = vpop.eup %8259  ;;  %7753 = vst [vmem:[%s11341_s16 + $0x50] sm:$0xff] %v5992_v21  ;;  %v6071_v42 = vmul.f32 1.442695, %v6070_v54  ;;  %v6096_v44 = vadd.f32 %v5824_v20, %v11101_v59  ;;  %v5696_v23 = vpop.f32.mrf.mxu3 }
 0x6c7   :  { %v8262_v13 = vpop.eup %8261  ;;  %v6046_v56 = vadd.f32 1.0, %v8260_v61  ;;  %v5739_v30 = vpop.f32.mrf.mxu2  ;;  %v6045_v43 = vsel %vm6044_vm3, 1.0, %v8260_v61 }
 0x6c8   :  { %v6019_v34 = vmul.f32 %v8262_v13, %v6016_v41  ;;  %8263 = vpow2.f32 %v6071_v42  ;;  %v11284_v28 = vadd.f32 %v6096_v44, %v11771_v2  ;;  %v5740_v36 = vadd.f32 %v5739_v30, %v5696_v23  ;;  %v11774_v30 = vld [vmem:[#allocation69_spill] sm:$0xff] }
 0x6c9   :  { %8265 = vrcp.f32 %v6046_v56 }
 0x6ca   :  { %v6020_v9 = vmax.f32 %v6019_v34, 0.0  ;;  %v6098_v17 = vand.u32 2147483647, %v11284_v28  ;;  %v5783_v12 = vadd.f32 %v5782_v6, %v5740_v36  ;;  %vm6102_vm5 = vcmp.ge.f32.partialorder %v11284_v28, 0.0 }
 0x6cc   :  { %v6021_v29 = vmin.f32 %v6020_v9, 1.0  ;;  %v6099_v59 = vsub.f32 0.0, %v6098_v17  ;;  %v5826_v0 = vadd.f32 %v5825_v32, %v5783_v12  ;;  %v5785_v62 = vpop.f32.mrf.mxu0 }
 0x6cd   :  { %v5828_v47 = vpop.f32.mrf.mxu1 }
 0x6ce   :  { %v8264_v15 = vpop.eup %8263  ;;  %7755 = vst [vmem:[%s11341_s16 + $0x60] sm:$0xff] %v6021_v29  ;;  %v6100_v40 = vmul.f32 1.442695, %v6099_v59  ;;  %v6125_v27 = vadd.f32 %v5826_v0, %v11106_v24  ;;  %v5699_v8 = vpop.f32.mrf.mxu3 }
 0x6cf   :  { %v8266_v53 = vpop.eup %8265  ;;  %v6075_v48 = vadd.f32 1.0, %v8264_v15  ;;  %v5742_v26 = vpop.f32.mrf.mxu2  ;;  %v6074_v14 = vsel %vm6073_vm4, 1.0, %v8264_v15 }
 0x6d0   :  { %v6048_v57 = vmul.f32 %v8266_v53, %v6045_v43  ;;  %8267 = vpow2.f32 %v6100_v40  ;;  %v11293_v52 = vadd.f32 %v6125_v27, %v11772_v19  ;;  %v5743_v5 = vadd.f32 %v5742_v26, %v5699_v8 }
 0x6d1   :  { %8269 = vrcp.f32 %v6075_v48 }
 0x6d2   :  { %v6049_v33 = vmax.f32 %v6048_v57, 0.0  ;;  %v6127_v3 = vand.u32 2147483647, %v11293_v52  ;;  %v5786_v35 = vadd.f32 %v5785_v62, %v5743_v5  ;;  %vm6131_vm1 = vcmp.ge.f32.partialorder %v11293_v52, 0.0 }
 0x6d4   :  { %v6050_v31 = vmin.f32 %v6049_v33, 1.0  ;;  %v6128_v24 = vsub.f32 0.0, %v6127_v3  ;;  %v5829_v55 = vadd.f32 %v5828_v47, %v5786_v35  ;;  %v5787_v4 = vpop.f32.mrf.mxu0 }
 0x6d5   :  { %v5830_v51 = vpop.f32.mrf.mxu1 }
 0x6d6   :  { %v8268_v7 = vpop.eup %8267  ;;  %7757 = vst [vmem:[%s11341_s16 + $0x70] sm:$0xff] %v6050_v31  ;;  %v6129_v10 = vmul.f32 1.442695, %v6128_v24  ;;  %v6154_v50 = vadd.f32 %v5829_v55, %v11109_v63  ;;  %v5701_v58 = vpop.f32.mrf.mxu3 }
 0x6d7   :  { %v8270_v18 = vpop.eup %8269  ;;  %v6104_v60 = vadd.f32 1.0, %v8268_v7  ;;  %v5744_v11 = vpop.f32.mrf.mxu2  ;;  %v6103_v32 = vsel %vm6102_vm5, 1.0, %v8268_v7 }
 0x6d8   :  { %v6077_v16 = vmul.f32 %v8270_v18, %v6074_v14  ;;  %8271 = vpow2.f32 %v6129_v10  ;;  %v6155_v37 = vadd.f32 %v6154_v50, %v11773_v46  ;;  %v5745_v38 = vadd.f32 %v5744_v11, %v5701_v58 }
 0x6d9   :  { %8273 = vrcp.f32 %v6104_v60 }
 0x6da   :  { %v6078_v1 = vmax.f32 %v6077_v16, 0.0  ;;  %v6156_v39 = vand.u32 2147483647, %v6155_v37  ;;  %v5788_v49 = vadd.f32 %v5787_v4, %v5745_v38  ;;  %vm6160_vm6 = vcmp.ge.f32.partialorder %v6155_v37, 0.0 }
 0x6dc   :  { %v6079_v22 = vmin.f32 %v6078_v1, 1.0  ;;  %v6157_v21 = vsub.f32 0.0, %v6156_v39  ;;  %v5831_v54 = vadd.f32 %v5830_v51, %v5788_v49  ;;  %v5790_v42 = vpop.f32.mrf.mxu0 }
 0x6dd   :  { %v5833_v44 = vpop.f32.mrf.mxu1 }
 0x6de   :  { %v8272_v63 = vpop.eup %8271  ;;  %7759 = vst [vmem:[%s11341_s16 + $0x80] sm:$0xff] %v6079_v22  ;;  %v6158_v20 = vmul.f32 1.442695, %v6157_v21  ;;  %v6183_v61 = vadd.f32 %v5831_v54, %v11114_v25  ;;  %v5704_v41 = vpop.f32.mrf.mxu3 }
 0x6df   :  { %v8274_v6 = vpop.eup %8273  ;;  %v6133_v13 = vadd.f32 1.0, %v8272_v63  ;;  %v5747_v56 = vpop.f32.mrf.mxu2  ;;  %v6132_v62 = vsel %vm6131_vm1, 1.0, %v8272_v63 }
 0x6e0   :  { %v6106_v23 = vmul.f32 %v8274_v6, %v6103_v32  ;;  %8275 = vpow2.f32 %v6158_v20  ;;  %v6184_v34 = vadd.f32 %v6183_v61, %v11774_v30  ;;  %v5748_v2 = vadd.f32 %v5747_v56, %v5704_v41 }
 0x6e1   :  { %8277 = vrcp.f32 %v6133_v13 }
 0x6e2   :  { %v6107_v36 = vmax.f32 %v6106_v23, 0.0  ;;  %v6185_v9 = vand.u32 2147483647, %v6184_v34  ;;  %v5791_v17 = vadd.f32 %v5790_v42, %v5748_v2  ;;  %vm6189_vm7 = vcmp.ge.f32.partialorder %v6184_v34, 0.0 }
 0x6e4   :  { %v6108_v28 = vmin.f32 %v6107_v36, 1.0  ;;  %v6186_v12 = vsub.f32 0.0, %v6185_v9  ;;  %v5834_v29 = vadd.f32 %v5833_v44, %v5791_v17  ;;  %v5792_v15 = vpop.f32.mrf.mxu0 }
 0x6e5   :  { %v5835_v40 = vpop.f32.mrf.mxu1 }
 0x6e6   :  { %v8276_v25 = vpop.eup %8275  ;;  %7761 = vst [vmem:[%s11341_s16 + $0x90] sm:$0xff] %v6108_v28  ;;  %v6187_v59 = vmul.f32 1.442695, %v6186_v12  ;;  %v6212_v0 = vadd.f32 %v5834_v29, %v11117_v45  ;;  %v5706_v53 = vpop.f32.mrf.mxu3 }
 0x6e7   :  { %v8278_v27 = vpop.eup %8277  ;;  %v6162_v47 = vadd.f32 1.0, %v8276_v25  ;;  %v5749_v43 = vpop.f32.mrf.mxu2  ;;  %v6161_v52 = vsel %vm6160_vm6, 1.0, %v8276_v25 }
 0x6e8   :  { %v6135_v48 = vmul.f32 %v8278_v27, %v6132_v62  ;;  %8279 = vpow2.f32 %v6187_v59  ;;  %v6213_v8 = vand.u32 2147483647, %v6212_v0  ;;  %vm6217_vm8 = vcmp.ge.f32.partialorder %v6212_v0, 0.0 }
 0x6e9   :  { %8281 = vrcp.f32 %v6162_v47 }
 0x6ea   :  { %v6136_v26 = vmax.f32 %v6135_v48, 0.0  ;;  %v6214_v57 = vsub.f32 0.0, %v6213_v8 }
 0x6ec   :  { %v6137_v19 = vmin.f32 %v6136_v26, 1.0  ;;  %v6215_v5 = vmul.f32 1.442695, %v6214_v57 }
 0x6ee   :  { %v8280_v33 = vpop.eup %8279  ;;  %7763 = vst [vmem:[%s11341_s16 + $0xa0] sm:$0xff] %v6137_v19  ;;  %8283 = vpow2.f32 %v6215_v5 }
 0x6ef   :  { %v8282_v45 = vpop.eup %8281  ;;  %v6191_v3 = vadd.f32 1.0, %v8280_v33  ;;  %v6190_v50 = vsel %vm6189_vm7, 1.0, %v8280_v33 }
 0x6f0   :  { %v6164_v35 = vmul.f32 %v8282_v45, %v6161_v52 }
 0x6f1   :  { %8285 = vrcp.f32 %v6191_v3 }
 0x6f2   :  { %v6165_v31 = vmax.f32 %v6164_v35, 0.0 }
 0x6f4   :  { %v8284_v24 = vpop.eup %8283  ;;  %v6166_v55 = vmin.f32 %v6165_v31, 1.0 }
 0x6f5   :  { %v6219_v7 = vadd.f32 1.0, %v8284_v24  ;;  %v6218_v60 = vsel %vm6217_vm8, 1.0, %v8284_v24 }
 0x6f6   :  { %7765 = vst [vmem:[%s11341_s16 + $0xb0] sm:$0xff] %v6166_v55 }
 0x6f7   :  { %v8286_v10 = vpop.eup %8285  ;;  %8287 = vrcp.f32 %v6219_v7 }
 0x6f8   :  { %v6193_v4 = vmul.f32 %v8286_v10, %v6190_v50 }
 0x6fa   :  { %v6194_v51 = vmax.f32 %v6193_v4, 0.0 }
 0x6fc   :  { %v6195_v18 = vmin.f32 %v6194_v51, 1.0 }
 0x6fd   :  { %v8288_v14 = vpop.eup %8287 }
 0x6fe   :  { %7767 = vst [vmem:[%s11341_s16 + $0xc0] sm:$0xff] %v6195_v18  ;;  %v6221_v58 = vmul.f32 %v8288_v14, %v6218_v60 }
 0x700   :  { %v6222_v11 = vmax.f32 %v6221_v58, 0.0 }
 0x702   :  { %v6223_v16 = vmin.f32 %v6222_v11, 1.0 }
 0x704   :  { %7769 = vst [vmem:[%s11341_s16 + $0xd0] sm:$0xff] %v6223_v16 }
 0x705   :  { %6243 = vsyncpa [#allocation4], 1 }
 0x706   :  { %6244 = vsyncpa [#allocation6], 1 }

</bundles_post_ra>
